<compile_context>
chip_gen: v7x
topology: tpu7x:2x2x1
jax: 0.10.0
libtpu: 0.0.40
codegen_flags: <defaults>
</compile_context>

<pallas_src>
import functools

import jax
import jax.numpy as jnp
from jax.experimental import pallas as pl
from jax.experimental.pallas import tpu as pltpu


VMEM_LIMIT_BYTES = 32 * 1024 * 1024   # > what the fused FC needs (~20 MiB),
                                      # < v7x's 64 MiB physical VMEM.


def _round_up(x, m):
    return ((x + m - 1) // m) * m


# ----------------------------- Pallas kernels -----------------------------

def _matmul_bias_kernel(x_ref, w_ref, b_ref, o_ref, *, relu):
    # One (TILE_M, K) activation block against the resident (K, N) weight.
    x = x_ref[...].astype(jnp.float32)
    acc = jnp.dot(x, w_ref[...], preferred_element_type=jnp.float32)
    acc = acc + b_ref[...]
    if relu:
        acc = jnp.maximum(acc, 0.0)
    o_ref[...] = acc.astype(o_ref.dtype)


def matmul_bias(x, w, b, *, relu=False, tile_m=512):
    """(M, K) @ (K, N) + b (+ ReLU), M-tiled grid, weight/bias VMEM-resident."""
    M, K = x.shape
    N = w.shape[1]
    tm = min(tile_m, _round_up(M, 8))          # multiple of 8, <= tile_m
    grid = (pl.cdiv(M, tm),)                   # partial last block handled by Pallas
    return pl.pallas_call(
        functools.partial(_matmul_bias_kernel, relu=relu),
        out_shape=jax.ShapeDtypeStruct((M, N), jnp.float32),
        grid=grid,
        in_specs=[
            pl.BlockSpec((tm, K), lambda i: (i, 0)),   # streamed activations
            pl.BlockSpec((K, N), lambda i: (0, 0)),    # resident weight
            pl.BlockSpec((1, N), lambda i: (0, 0)),    # resident bias
        ],
        out_specs=pl.BlockSpec((tm, N), lambda i: (i, 0)),
        compiler_params=pltpu.CompilerParams(
            dimension_semantics=("parallel",),          # megacore on v7x
            vmem_limit_bytes=VMEM_LIMIT_BYTES,
        ),
    )(x, w, b.reshape(1, N))


def _fc_head_kernel(x_ref, w1_ref, b1_ref, w2_ref, b2_ref, o_ref):
    # hidden = relu(x @ W1 + b1); logits = hidden @ W2 + b2.  Fully fused:
    # the 512-wide hidden never leaves VMEM.
    h = jnp.dot(x_ref[...], w1_ref[...], preferred_element_type=jnp.float32)
    h = jnp.maximum(h + b1_ref[...], 0.0)
    o = jnp.dot(h, w2_ref[...], preferred_element_type=jnp.float32) + b2_ref[...]
    o_ref[...] = o.astype(o_ref.dtype)


def fc_head(x, w1, b1, w2, b2, *, tile_b=256):
    """Fused Linear(3136,512)+ReLU+head(512,A), gridded over batch rows."""
    B, K = x.shape
    H = w1.shape[1]
    A = w2.shape[1]
    tb = min(tile_b, _round_up(B, 8))
    grid = (pl.cdiv(B, tb),)
    return pl.pallas_call(
        _fc_head_kernel,
        out_shape=jax.ShapeDtypeStruct((B, A), jnp.float32),
        grid=grid,
        in_specs=[
            pl.BlockSpec((tb, K), lambda i: (i, 0)),   # streamed batch rows
            pl.BlockSpec((K, H), lambda i: (0, 0)),    # resident fc weight (6.4 MB)
            pl.BlockSpec((1, H), lambda i: (0, 0)),
            pl.BlockSpec((H, A), lambda i: (0, 0)),    # resident head weight
            pl.BlockSpec((1, A), lambda i: (0, 0)),
        ],
        out_specs=pl.BlockSpec((tb, A), lambda i: (i, 0)),
        compiler_params=pltpu.CompilerParams(
            dimension_semantics=("parallel",),
            vmem_limit_bytes=VMEM_LIMIT_BYTES,
        ),
    )(x, w1, b1.reshape(1, H), w2, b2.reshape(1, A))


# ----------------------------- XLA glue (data movement only) ----------------

def im2col_nhwc(x, k, s):
    """NHWC (B,H,W,C) -> (B*OH*OW, k*k*C) patches; feature order (ky, kx, c).

    Only strided slices + one concat + reshape: no transposes, the channel
    (lane) axis stays innermost throughout.
    """
    B, H, W, C = x.shape
    OH = (H - k) // s + 1
    OW = (W - k) // s + 1
    cols = []
    for ky in range(k):
        for kx in range(k):
            cols.append(x[:, ky:ky + s * (OH - 1) + 1:s,
                             kx:kx + s * (OW - 1) + 1:s, :])
    p = jnp.stack(cols, axis=3)                       # (B, OH, OW, k*k, C)
    return p.reshape(B * OH * OW, k * k * C), OH, OW


def conv2d_relu_nhwc(x, w, b, k, s, tile_m=512):
    """Conv2d(kernel=k, stride=s, padding=0) + ReLU on NHWC input.

    x: (B, H, W, C); w: (k*k*C, out_c) with rows in (ky, kx, c) order;
    b: (out_c,).  Returns NHWC (B, OH, OW, out_c) — no transpose needed.
    """
    B = x.shape[0]
    patches, OH, OW = im2col_nhwc(x, k, s)
    y = matmul_bias(patches, w, b, relu=True, tile_m=tile_m)   # (B*OH*OW, out_c)
    return y.reshape(B, OH, OW, -1)


# ----------------------------- forward pass -----------------------------

def convdqn_forward(params, x):
    """x: (B, C, H, W) uint8 (or float) frames, PyTorch NCHW interface.

    The reference `x.float() / 255` is realised as: a single fused
    NCHW->NHWC transpose + cast of the small input, with the 1/255 scale
    folded into conv1_w at init (exact, since the conv is linear).
    """
    x = jnp.transpose(x, (0, 2, 3, 1)).astype(jnp.float32)                  # (B,84,84,C)
    x = conv2d_relu_nhwc(x, params["conv1_w"], params["conv1_b"], k=8, s=4)  # (B,20,20,32)
    x = conv2d_relu_nhwc(x, params["conv2_w"], params["conv2_b"], k=4, s=2)  # (B, 9, 9,64)
    x = conv2d_relu_nhwc(x, params["conv3_w"], params["conv3_b"], k=3, s=1)  # (B, 7, 7,64)
    B = x.shape[0]
    x = x.reshape(B, -1)          # flatten in (h, w, c) order; fc_w rows match
    return fc_head(x, params["fc_w"], params["fc_b"],
                   params["head_w"], params["head_b"])   # (B, num_actions)


# ----------------------------- parameter init -----------------------------

def init_params(key, num_channels, num_actions):
    """PyTorch-style default init U(-1/sqrt(fan_in), +1/sqrt(fan_in)).

    Layout conventions (pure relabelling of our own random init; to load real
    PyTorch weights, permute conv weights (out,in,kh,kw)->(kh,kw,in)->rows and
    fc rows from (c,h,w) to (h,w,c), and divide conv1_w by 255):
      * conv*_w : (k*k*in_c, out_c), rows in (ky, kx, c) order (NHWC im2col).
      * conv1_w additionally carries the folded 1/255 input scaling.
      * fc_w    : (64*7*7, 512), rows in (h, w, c) order (NHWC flatten).
    """
    ks = jax.random.split(key, 10)

    def u(k_, shape, fan_in):
        bound = 1.0 / float(fan_in) ** 0.5
        return jax.random.uniform(k_, shape, jnp.float32, -bound, bound)

    c1_fan = num_channels * 8 * 8
    c2_fan = 32 * 4 * 4
    c3_fan = 64 * 3 * 3
    fc_fan = 64 * 7 * 7
    return {
        "conv1_w": u(ks[0], (c1_fan, 32), c1_fan) * (1.0 / 255.0),
        "conv1_b": u(ks[1], (32,), c1_fan),
        "conv2_w": u(ks[2], (c2_fan, 64), c2_fan),
        "conv2_b": u(ks[3], (64,), c2_fan),
        "conv3_w": u(ks[4], (c3_fan, 64), c3_fan),
        "conv3_b": u(ks[5], (64,), c3_fan),
        "fc_w": u(ks[6], (fc_fan, 512), fc_fan),
        "fc_b": u(ks[7], (512,), fc_fan),
        "head_w": u(ks[8], (512, num_actions), 512),
        "head_b": u(ks[9], (num_actions,), 512),
    }


if __name__ == "__main__":
    num_channels = 4
    num_actions = 6
    key = jax.random.PRNGKey(0)
    kp, kx = jax.random.split(key)
    params = init_params(kp, num_channels, num_actions)

    # 84x84 Atari-style uint8 frames: the only spatial size consistent with
    # the module's Linear(64 * 7 * 7, 512) after the three valid convolutions.
    x = jax.random.randint(kx, (2, num_channels, 84, 84), 0, 256,
                           jnp.int32).astype(jnp.uint8)

    fwd = jax.jit(convdqn_forward)
    out = jax.block_until_ready(fwd(params, x))
    assert out.shape == (2, num_actions), out.shape
    assert bool(jnp.all(jnp.isfinite(out)))
    print("KERNEL_OK")
</pallas_src>

<mosaic_0001>
module attributes {stable_mosaic.version = 11 : i64} {
  func.func @_matmul_bias_kernel(%arg0: i32, %arg1: memref<512x256xf32, #tpu.memory_space<vmem>>, %arg2: memref<256x32xf32, #tpu.memory_space<vmem>>, %arg3: memref<1x32xf32, #tpu.memory_space<vmem>>, %arg4: memref<512x32xf32, #tpu.memory_space<vmem>>) attributes {dimension_semantics = [#tpu.dimension_semantics<parallel>], iteration_bounds = array<i64: 2>, scalar_prefetch = 0 : i64, scratch_operands = 0 : i64, tpu.core_type = #tpu.core_type<tc>, window_params = [{transform_indices = @transform_0, window_bounds = array<i64: 512, 256>}, {pipeline_mode = #tpu.pipeline_mode<synchronous>, transform_indices = @transform_1, window_bounds = array<i64: 256, 32>}, {pipeline_mode = #tpu.pipeline_mode<synchronous>, transform_indices = @transform_2, window_bounds = array<i64: 1, 32>}, {transform_indices = @transform_3, window_bounds = array<i64: 512, 32>}]} {
    %c0 = arith.constant 0 : index
    %c0_0 = arith.constant 0 : index
    %0 = vector.load %arg1[%c0, %c0_0] : memref<512x256xf32, #tpu.memory_space<vmem>>, vector<512x256xf32>
    %c0_1 = arith.constant 0 : index
    %c0_2 = arith.constant 0 : index
    %1 = vector.load %arg2[%c0_1, %c0_2] : memref<256x32xf32, #tpu.memory_space<vmem>>, vector<256x32xf32>
    %cst = arith.constant dense<0.000000e+00> : vector<512x32xf32>
    %2 = tpu.matmul %0, %1, %cst {dimension_numbers = #tpu.dot_dimension_numbers<[1], [0], [0], [1], [0, 0, 1, 1], [], []>} : vector<512x256xf32>, vector<256x32xf32>, vector<512x32xf32> -> vector<512x32xf32>
    %c0_3 = arith.constant 0 : index
    %c0_4 = arith.constant 0 : index
    %3 = vector.load %arg3[%c0_3, %c0_4] : memref<1x32xf32, #tpu.memory_space<vmem>>, vector<1x32xf32>
    %4 = vector.broadcast %3 : vector<1x32xf32> to vector<512x32xf32>
    %5 = arith.addf %2, %4 : vector<512x32xf32>
    %cst_5 = arith.constant 0.000000e+00 : f32
    %6 = vector.broadcast %cst_5 : f32 to vector<512x32xf32>
    %7 = arith.maximumf %5, %6 : vector<512x32xf32>
    %c0_6 = arith.constant 0 : index
    %c0_7 = arith.constant 0 : index
    %8 = vector.load %arg4[%c0_6, %c0_7] : memref<512x32xf32, #tpu.memory_space<vmem>>, vector<512x32xf32>
    tpu.vector_store %arg4[%c0_6, %c0_7], %7 {strides = array<i32>} : memref<512x32xf32, #tpu.memory_space<vmem>>, vector<512x32xf32>,
    return
  }
  func.func @transform_0(%arg0: i32) -> (i32, i32) {
    %c0_i32 = arith.constant 0 : i32
    %c0_i32_0 = arith.constant 0 : i32
    return %arg0, %c0_i32 : i32, i32
  }
  func.func @transform_1(%arg0: i32) -> (i32, i32) {
    %c0_i32 = arith.constant 0 : i32
    %c0_i32_0 = arith.constant 0 : i32
    %c0_i32_1 = arith.constant 0 : i32
    return %c0_i32, %c0_i32_0 : i32, i32
  }
  func.func @transform_2(%arg0: i32) -> (i32, i32) {
    %c0_i32 = arith.constant 0 : i32
    %c0_i32_0 = arith.constant 0 : i32
    %c0_i32_1 = arith.constant 0 : i32
    return %c0_i32, %c0_i32_0 : i32, i32
  }
  func.func @transform_3(%arg0: i32) -> (i32, i32) {
    %c0_i32 = arith.constant 0 : i32
    %c0_i32_0 = arith.constant 0 : i32
    return %arg0, %c0_i32 : i32, i32
  }
}

module attributes {stable_mosaic.version = 11 : i64} {
  func.func @_matmul_bias_kernel(%arg0: i32, %arg1: memref<168x512xf32, #tpu.memory_space<vmem>>, %arg2: memref<512x64xf32, #tpu.memory_space<vmem>>, %arg3: memref<1x64xf32, #tpu.memory_space<vmem>>, %arg4: memref<168x64xf32, #tpu.memory_space<vmem>>) attributes {dimension_semantics = [#tpu.dimension_semantics<parallel>], iteration_bounds = array<i64: 1>, scalar_prefetch = 0 : i64, scratch_operands = 0 : i64, tpu.core_type = #tpu.core_type<tc>, window_params = [{transform_indices = @transform_0, window_bounds = array<i64: 168, 512>}, {pipeline_mode = #tpu.pipeline_mode<synchronous>, transform_indices = @transform_1, window_bounds = array<i64: 512, 64>}, {pipeline_mode = #tpu.pipeline_mode<synchronous>, transform_indices = @transform_2, window_bounds = array<i64: 1, 64>}, {transform_indices = @transform_3, window_bounds = array<i64: 168, 64>}]} {
    %c0 = arith.constant 0 : index
    %c0_0 = arith.constant 0 : index
    %0 = vector.load %arg1[%c0, %c0_0] : memref<168x512xf32, #tpu.memory_space<vmem>>, vector<168x512xf32>
    %c0_1 = arith.constant 0 : index
    %c0_2 = arith.constant 0 : index
    %1 = vector.load %arg2[%c0_1, %c0_2] : memref<512x64xf32, #tpu.memory_space<vmem>>, vector<512x64xf32>
    %cst = arith.constant dense<0.000000e+00> : vector<168x64xf32>
    %2 = tpu.matmul %0, %1, %cst {dimension_numbers = #tpu.dot_dimension_numbers<[1], [0], [0], [1], [0, 0, 1, 1], [], []>} : vector<168x512xf32>, vector<512x64xf32>, vector<168x64xf32> -> vector<168x64xf32>
    %c0_3 = arith.constant 0 : index
    %c0_4 = arith.constant 0 : index
    %3 = vector.load %arg3[%c0_3, %c0_4] : memref<1x64xf32, #tpu.memory_space<vmem>>, vector<1x64xf32>
    %4 = vector.broadcast %3 : vector<1x64xf32> to vector<168x64xf32>
    %5 = arith.addf %2, %4 : vector<168x64xf32>
    %cst_5 = arith.constant 0.000000e+00 : f32
    %6 = vector.broadcast %cst_5 : f32 to vector<168x64xf32>
    %7 = arith.maximumf %5, %6 : vector<168x64xf32>
    %c0_6 = arith.constant 0 : index
    %c0_7 = arith.constant 0 : index
    %8 = vector.load %arg4[%c0_6, %c0_7] : memref<168x64xf32, #tpu.memory_space<vmem>>, vector<168x64xf32>
    tpu.vector_store %arg4[%c0_6, %c0_7], %7 {strides = array<i32>} : memref<168x64xf32, #tpu.memory_space<vmem>>, vector<168x64xf32>,
    return
  }
  func.func @transform_0(%arg0: i32) -> (i32, i32) {
    %c0_i32 = arith.constant 0 : i32
    %c0_i32_0 = arith.constant 0 : i32
    return %arg0, %c0_i32 : i32, i32
  }
  func.func @transform_1(%arg0: i32) -> (i32, i32) {
    %c0_i32 = arith.constant 0 : i32
    %c0_i32_0 = arith.constant 0 : i32
    %c0_i32_1 = arith.constant 0 : i32
    return %c0_i32, %c0_i32_0 : i32, i32
  }
  func.func @transform_2(%arg0: i32) -> (i32, i32) {
    %c0_i32 = arith.constant 0 : i32
    %c0_i32_0 = arith.constant 0 : i32
    %c0_i32_1 = arith.constant 0 : i32
    return %c0_i32, %c0_i32_0 : i32, i32
  }
  func.func @transform_3(%arg0: i32) -> (i32, i32) {
    %c0_i32 = arith.constant 0 : i32
    %c0_i32_0 = arith.constant 0 : i32
    return %arg0, %c0_i32 : i32, i32
  }
}

module attributes {stable_mosaic.version = 11 : i64} {
  func.func @_matmul_bias_kernel(%arg0: i32, %arg1: memref<104x576xf32, #tpu.memory_space<vmem>>, %arg2: memref<576x64xf32, #tpu.memory_space<vmem>>, %arg3: memref<1x64xf32, #tpu.memory_space<vmem>>, %arg4: memref<104x64xf32, #tpu.memory_space<vmem>>) attributes {dimension_semantics = [#tpu.dimension_semantics<parallel>], iteration_bounds = array<i64: 1>, scalar_prefetch = 0 : i64, scratch_operands = 0 : i64, tpu.core_type = #tpu.core_type<tc>, window_params = [{transform_indices = @transform_0, window_bounds = array<i64: 104, 576>}, {pipeline_mode = #tpu.pipeline_mode<synchronous>, transform_indices = @transform_1, window_bounds = array<i64: 576, 64>}, {pipeline_mode = #tpu.pipeline_mode<synchronous>, transform_indices = @transform_2, window_bounds = array<i64: 1, 64>}, {transform_indices = @transform_3, window_bounds = array<i64: 104, 64>}]} {
    %c0 = arith.constant 0 : index
    %c0_0 = arith.constant 0 : index
    %0 = vector.load %arg1[%c0, %c0_0] : memref<104x576xf32, #tpu.memory_space<vmem>>, vector<104x576xf32>
    %c0_1 = arith.constant 0 : index
    %c0_2 = arith.constant 0 : index
    %1 = vector.load %arg2[%c0_1, %c0_2] : memref<576x64xf32, #tpu.memory_space<vmem>>, vector<576x64xf32>
    %cst = arith.constant dense<0.000000e+00> : vector<104x64xf32>
    %2 = tpu.matmul %0, %1, %cst {dimension_numbers = #tpu.dot_dimension_numbers<[1], [0], [0], [1], [0, 0, 1, 1], [], []>} : vector<104x576xf32>, vector<576x64xf32>, vector<104x64xf32> -> vector<104x64xf32>
    %c0_3 = arith.constant 0 : index
    %c0_4 = arith.constant 0 : index
    %3 = vector.load %arg3[%c0_3, %c0_4] : memref<1x64xf32, #tpu.memory_space<vmem>>, vector<1x64xf32>
    %4 = vector.broadcast %3 : vector<1x64xf32> to vector<104x64xf32>
    %5 = arith.addf %2, %4 : vector<104x64xf32>
    %cst_5 = arith.constant 0.000000e+00 : f32
    %6 = vector.broadcast %cst_5 : f32 to vector<104x64xf32>
    %7 = arith.maximumf %5, %6 : vector<104x64xf32>
    %c0_6 = arith.constant 0 : index
    %c0_7 = arith.constant 0 : index
    %8 = vector.load %arg4[%c0_6, %c0_7] : memref<104x64xf32, #tpu.memory_space<vmem>>, vector<104x64xf32>
    tpu.vector_store %arg4[%c0_6, %c0_7], %7 {strides = array<i32>} : memref<104x64xf32, #tpu.memory_space<vmem>>, vector<104x64xf32>,
    return
  }
  func.func @transform_0(%arg0: i32) -> (i32, i32) {
    %c0_i32 = arith.constant 0 : i32
    %c0_i32_0 = arith.constant 0 : i32
    return %arg0, %c0_i32 : i32, i32
  }
  func.func @transform_1(%arg0: i32) -> (i32, i32) {
    %c0_i32 = arith.constant 0 : i32
    %c0_i32_0 = arith.constant 0 : i32
    %c0_i32_1 = arith.constant 0 : i32
    return %c0_i32, %c0_i32_0 : i32, i32
  }
  func.func @transform_2(%arg0: i32) -> (i32, i32) {
    %c0_i32 = arith.constant 0 : i32
    %c0_i32_0 = arith.constant 0 : i32
    %c0_i32_1 = arith.constant 0 : i32
    return %c0_i32, %c0_i32_0 : i32, i32
  }
  func.func @transform_3(%arg0: i32) -> (i32, i32) {
    %c0_i32 = arith.constant 0 : i32
    %c0_i32_0 = arith.constant 0 : i32
    return %arg0, %c0_i32 : i32, i32
  }
}

module attributes {stable_mosaic.version = 11 : i64} {
  func.func @_fc_head_kernel(%arg0: i32, %arg1: memref<8x3136xf32, #tpu.memory_space<vmem>>, %arg2: memref<3136x512xf32, #tpu.memory_space<vmem>>, %arg3: memref<1x512xf32, #tpu.memory_space<vmem>>, %arg4: memref<512x6xf32, #tpu.memory_space<vmem>>, %arg5: memref<1x6xf32, #tpu.memory_space<vmem>>, %arg6: memref<8x6xf32, #tpu.memory_space<vmem>>) attributes {dimension_semantics = [#tpu.dimension_semantics<parallel>], iteration_bounds = array<i64: 1>, scalar_prefetch = 0 : i64, scratch_operands = 0 : i64, tpu.core_type = #tpu.core_type<tc>, window_params = [{transform_indices = @transform_0, window_bounds = array<i64: 8, 3136>}, {pipeline_mode = #tpu.pipeline_mode<synchronous>, transform_indices = @transform_1, window_bounds = array<i64: 3136, 512>}, {pipeline_mode = #tpu.pipeline_mode<synchronous>, transform_indices = @transform_2, window_bounds = array<i64: 1, 512>}, {pipeline_mode = #tpu.pipeline_mode<synchronous>, transform_indices = @transform_3, window_bounds = array<i64: 512, 6>}, {pipeline_mode = #tpu.pipeline_mode<synchronous>, transform_indices = @transform_4, window_bounds = array<i64: 1, 6>}, {transform_indices = @transform_5, window_bounds = array<i64: 8, 6>}]} {
    %c0 = arith.constant 0 : index
    %c0_0 = arith.constant 0 : index
    %0 = vector.load %arg1[%c0, %c0_0] : memref<8x3136xf32, #tpu.memory_space<vmem>>, vector<8x3136xf32>
    %c0_1 = arith.constant 0 : index
    %c0_2 = arith.constant 0 : index
    %1 = vector.load %arg2[%c0_1, %c0_2] : memref<3136x512xf32, #tpu.memory_space<vmem>>, vector<3136x512xf32>
    %cst = arith.constant dense<0.000000e+00> : vector<8x512xf32>
    %2 = tpu.matmul %0, %1, %cst {dimension_numbers = #tpu.dot_dimension_numbers<[1], [0], [0], [1], [0, 0, 1, 1], [], []>} : vector<8x3136xf32>, vector<3136x512xf32>, vector<8x512xf32> -> vector<8x512xf32>
    %c0_3 = arith.constant 0 : index
    %c0_4 = arith.constant 0 : index
    %3 = vector.load %arg3[%c0_3, %c0_4] : memref<1x512xf32, #tpu.memory_space<vmem>>, vector<1x512xf32>
    %4 = vector.broadcast %3 : vector<1x512xf32> to vector<8x512xf32>
    %5 = arith.addf %2, %4 : vector<8x512xf32>
    %cst_5 = arith.constant 0.000000e+00 : f32
    %6 = vector.broadcast %cst_5 : f32 to vector<8x512xf32>
    %7 = arith.maximumf %5, %6 : vector<8x512xf32>
    %c0_6 = arith.constant 0 : index
    %c0_7 = arith.constant 0 : index
    %8 = vector.load %arg4[%c0_6, %c0_7] : memref<512x6xf32, #tpu.memory_space<vmem>>, vector<512x6xf32>
    %cst_8 = arith.constant dense<0.000000e+00> : vector<8x6xf32>
    %9 = tpu.matmul %7, %8, %cst_8 {dimension_numbers = #tpu.dot_dimension_numbers<[1], [0], [0], [1], [0, 0, 1, 1], [], []>} : vector<8x512xf32>, vector<512x6xf32>, vector<8x6xf32> -> vector<8x6xf32>
    %c0_9 = arith.constant 0 : index
    %c0_10 = arith.constant 0 : index
    %10 = vector.load %arg5[%c0_9, %c0_10] : memref<1x6xf32, #tpu.memory_space<vmem>>, vector<1x6xf32>
    %11 = vector.broadcast %10 : vector<1x6xf32> to vector<8x6xf32>
    %12 = arith.addf %9, %11 : vector<8x6xf32>
    %c0_11 = arith.constant 0 : index
    %c0_12 = arith.constant 0 : index
    %13 = vector.load %arg6[%c0_11, %c0_12] : memref<8x6xf32, #tpu.memory_space<vmem>>, vector<8x6xf32>
    tpu.vector_store %arg6[%c0_11, %c0_12], %12 {strides = array<i32>} : memref<8x6xf32, #tpu.memory_space<vmem>>, vector<8x6xf32>,
    return
  }
  func.func @transform_0(%arg0: i32) -> (i32, i32) {
    %c0_i32 = arith.constant 0 : i32
    %c0_i32_0 = arith.constant 0 : i32
    return %arg0, %c0_i32 : i32, i32
  }
  func.func @transform_1(%arg0: i32) -> (i32, i32) {
    %c0_i32 = arith.constant 0 : i32
    %c0_i32_0 = arith.constant 0 : i32
    %c0_i32_1 = arith.constant 0 : i32
    return %c0_i32, %c0_i32_0 : i32, i32
  }
  func.func @transform_2(%arg0: i32) -> (i32, i32) {
    %c0_i32 = arith.constant 0 : i32
    %c0_i32_0 = arith.constant 0 : i32
    %c0_i32_1 = arith.constant 0 : i32
    return %c0_i32, %c0_i32_0 : i32, i32
  }
  func.func @transform_3(%arg0: i32) -> (i32, i32) {
    %c0_i32 = arith.constant 0 : i32
    %c0_i32_0 = arith.constant 0 : i32
    %c0_i32_1 = arith.constant 0 : i32
    return %c0_i32, %c0_i32_0 : i32, i32
  }
  func.func @transform_4(%arg0: i32) -> (i32, i32) {
    %c0_i32 = arith.constant 0 : i32
    %c0_i32_0 = arith.constant 0 : i32
    %c0_i32_1 = arith.constant 0 : i32
    return %c0_i32, %c0_i32_0 : i32, i32
  }
  func.func @transform_5(%arg0: i32) -> (i32, i32) {
    %c0_i32 = arith.constant 0 : i32
    %c0_i32_0 = arith.constant 0 : i32
    return %arg0, %c0_i32 : i32, i32
  }
}

</mosaic_0001>

<bundles_post_ra>
// kernel: convdqn_forward.4
= control target key start
LH: loop header
LB: loop body
LE: loop exit
PB: predicated region body
PF: predicated region fallthrough
CT: control target
= control target key end

     0   :  { %s1656_s12 = smov 0   ;;  %s1658_s13 = smov 0   ;;  %s2357_s0 = inlined_call_operand.vmem [shape: f32[800,256], index: 0, kind: input, shape index: {}]   ;;  %s2358_s1 = inlined_call_operand.vmem [shape: f32[256,32], index: 1, kind: input, shape index: {}]   ;;  %s2359_s2 = inlined_call_operand.vmem [shape: f32[1,32], index: 2, kind: input, shape index: {}]   ;;  %s2360_s3 = inlined_call_operand.vmem [shape: f32[800,32], index: 3, kind: output, shape index: {}]  }
   0x1   :  { %s1660_s14 = smov 0  }
   0x2 LB: > { %s1669_s15 = sadd.s32 4294967295, %s1601_s14   ;;  %s1671_s16 = sadd.s32 1, %s1601_s14   ;;  %s1601_s14 = sphi %s1660_s14, %s2369_s14   ;;  %s1597_s13 = sphi %s1658_s13, %s2368_s13   ;;  %s1593_s12 = sphi %s1656_s12, %s2367_s12  }
   0x3   : > { %s85_s17 = ssub.s32 %s1601_s14, %s1671_s16  ;;  %s88_s18 = sadd.s32 1, %s1597_s13 }
   0x4   : > { %p86_p0 = scmp.eq.s32.totalorder %s85_s17, 0  ;;  %p98_p1 = scmp.ne.s32.totalorder %s1597_s13, %s1593_s12 }
   0x5   : > { %p99_p2 = scmp.eq.s32.totalorder %s1669_s15, 1  ;;  %p1351_p3 = scmp.ge.s32.totalorder %s1601_s14, 1 }
   0x6   : > { %s1679_s19 = scalar_select %p86_p0, %s1597_s13, %s88_s18  }
   0x7   : > { %p1681_p4 = por %p99_p2, %p98_p1  ;;  %p149_p5 = scmp.lt.s32.totalorder %s1601_s14, 3 }
   0x9   : > { %p150_p6 = pnand %p1351_p3, %p149_p5 }
   0xa   : > { %v328_v0 = vld [vmem:[%s2358_s1] sm:$0xff] (!%p150_p6)  ;;  %v329_v1 = vld [vmem:[%s2358_s1 + $0x8] sm:$0xff] (!%p150_p6)  ;;  %v330_v2 = vld [vmem:[%s2358_s1 + $0x10] sm:$0xff] (!%p150_p6)  ;;  %s1695_s27 = sshll.u32 (!%p150_p6), %s1669_s15, 6  ;;  %v1635_v3 = vmov (!%p150_p6), 0.0|0.0   ;;  %s175_s6 = sand.u32 (!%p150_p6), 1, %s1593_s12  }
   0xb   : > { %153 = sbr.rel (%p150_p6) target bundleno = 489 (0x1e9), region = 32  ;;  %1378 = vmatprep.subr.bf16.mxu0 (!%p150_p6), %v1635_v3  ;;  %1426 = vmatprep.subr.bf16.mxu1 (!%p150_p6), %v1635_v3  ;;  %v1379_v4 = vpack.c.bf16 (!%p150_p6), %v329_v1, %v328_v0  ;;  %v331_v5 = vld [vmem:[%s2358_s1 + $0x18] sm:$0xff] (!%p150_p6)  ;;  %p184_p7 = scmp.lt.s32.totalorder (!%p150_p6), %s1695_s27, 99  ;;  %v332_v7 = vld [vmem:[%s2358_s1 + $0x20] sm:$0xff] (!%p150_p6)  ;;  %v333_v8 = vld [vmem:[%s2358_s1 + $0x28] sm:$0xff] (!%p150_p6)  ;;  %vm816_vm0 = vcmask (!%p150_p6), 261120  }
   0xc   : > { %v1382_v6 = vpack.c.bf16 (!%p150_p6), %v331_v5, %v330_v2  ;;  %v1385_v9 = vpack.c.bf16 (!%p150_p6), %v333_v8, %v332_v7  ;;  %v334_v10 = vld [vmem:[%s2358_s1 + $0x30] sm:$0xff] (!%p150_p6)  ;;  %v335_v11 = vld [vmem:[%s2358_s1 + $0x38] sm:$0xff] (!%p150_p6)  ;;  %v336_v15 = vld [vmem:[%s2358_s1 + $0x40] sm:$0xff] (!%p150_p6)  ;;  %s1352_s9 = sshll.u32 (!%p150_p6), %s175_s6, 9 }
   0xd   : > { %1380 = vmatpush1.bf16.msra.mxu0 (!%p150_p6), %v1379_v4  ;;  %1442 = vmatpush1.bf16.msra.mxu1 (!%p150_p6), %v1379_v4  ;;  %v1388_v13 = vpack.c.bf16 (!%p150_p6), %v335_v11, %v334_v10  ;;  %v337_v16 = vld [vmem:[%s2358_s1 + $0x48] sm:$0xff] (!%p150_p6)  ;;  %v338_v18 = vld [vmem:[%s2358_s1 + $0x50] sm:$0xff] (!%p150_p6)  ;;  %v339_v19 = vld [vmem:[%s2358_s1 + $0x58] sm:$0xff] (!%p150_p6)  ;;  %s1959_s12 = scalar_lea.vmem (!%p150_p6), [#allocation2], %s1352_s9  }
   0xe   : > { %1381 = vmatprep.subr.bf16.mxu0 (!%p150_p6), %v1635_v3  ;;  %1427 = vmatprep.subr.bf16.mxu1 (!%p150_p6), %v1635_v3  ;;  %v1391_v17 = vpack.c.bf16 (!%p150_p6), %v337_v16, %v336_v15  ;;  %v1394_v20 = vpack.c.bf16 (!%p150_p6), %v339_v19, %v338_v18  ;;  %v340_v21 = vld [vmem:[%s2358_s1 + $0x60] sm:$0xff] (!%p150_p6)  ;;  %v341_v22 = vld [vmem:[%s2358_s1 + $0x68] sm:$0xff] (!%p150_p6)  ;;  %v342_v24 = vld [vmem:[%s2358_s1 + $0x70] sm:$0xff] (!%p150_p6) }
   0xf   : > { %v1397_v23 = vpack.c.bf16 (!%p150_p6), %v341_v22, %v340_v21  ;;  %v343_v25 = vld [vmem:[%s2358_s1 + $0x78] sm:$0xff] (!%p150_p6)  ;;  %v344_v27 = vld [vmem:[%s2358_s1 + $0x80] sm:$0xff] (!%p150_p6)  ;;  %v345_v28 = vld [vmem:[%s2358_s1 + $0x88] sm:$0xff] (!%p150_p6) }
  0x10   : > { %v1400_v26 = vpack.c.bf16 (!%p150_p6), %v343_v25, %v342_v24  ;;  %v1403_v29 = vpack.c.bf16 (!%p150_p6), %v345_v28, %v344_v27  ;;  %v346_v30 = vld [vmem:[%s2358_s1 + $0x90] sm:$0xff] (!%p150_p6)  ;;  %v347_v31 = vld [vmem:[%s2358_s1 + $0x98] sm:$0xff] (!%p150_p6)  ;;  %v348_v33 = vld [vmem:[%s2358_s1 + $0xa0] sm:$0xff] (!%p150_p6) }
  0x11   : > { %1383 = vmatpush1.bf16.msra.mxu0 (!%p150_p6), %v1382_v6  ;;  %1443 = vmatpush1.bf16.msra.mxu1 (!%p150_p6), %v1382_v6  ;;  %v1406_v32 = vpack.c.bf16 (!%p150_p6), %v347_v31, %v346_v30  ;;  %v349_v34 = vld [vmem:[%s2358_s1 + $0xa8] sm:$0xff] (!%p150_p6)  ;;  %v350_v36 = vld [vmem:[%s2358_s1 + $0xb0] sm:$0xff] (!%p150_p6)  ;;  %v351_v37 = vld [vmem:[%s2358_s1 + $0xb8] sm:$0xff] (!%p150_p6) }
  0x12   : > { %s185_s30 = scalar_select %p184_p7, %s1695_s27, 99  ;;  %1384 = vmatprep.subr.bf16.mxu0 %v1635_v3  ;;  %1428 = vmatprep.subr.bf16.mxu1 %v1635_v3  ;;  %v1409_v35 = vpack.c.bf16 %v349_v34, %v348_v33  ;;  %v1412_v38 = vpack.c.bf16 %v351_v37, %v350_v36  ;;  %v352_v39 = vld [vmem:[%s2358_s1 + $0xc0] sm:$0xff]  ;;  %v353_v40 = vld [vmem:[%s2358_s1 + $0xc8] sm:$0xff]  ;;  %v354_v42 = vld [vmem:[%s2358_s1 + $0xd0] sm:$0xff] }
  0x13   : > { %v1415_v41 = vpack.c.bf16 %v353_v40, %v352_v39  ;;  %v355_v43 = vld [vmem:[%s2358_s1 + $0xd8] sm:$0xff]  ;;  %v356_v45 = vld [vmem:[%s2358_s1 + $0xe0] sm:$0xff]  ;;  %v357_v46 = vld [vmem:[%s2358_s1 + $0xe8] sm:$0xff]  ;;  %s1375_s10 = sshll.u32 (%p1681_p4), %s1669_s15, 9 }
  0x14   : > { %s1374_s8 = sshll.u32 %s185_s30, 4  ;;  %v1418_v44 = vpack.c.bf16 %v355_v43, %v354_v42  ;;  %v1421_v47 = vpack.c.bf16 %v357_v46, %v356_v45  ;;  %v358_v48 = vld [vmem:[%s2358_s1 + $0xf0] sm:$0xff]  ;;  %v359_v49 = vld [vmem:[%s2358_s1 + $0xf8] sm:$0xff]  ;;  %s2158_s18 = scalar_lea.vmem (%p1681_p4), %s2360_s3, %s1375_s10  }
  0x15   : > { %s1715_s11 = scalar_lea.vmem %s2357_s0, %s1374_s8  ;;  %1386 = vmatpush1.bf16.msra.mxu0 %v1385_v9  ;;  %1444 = vmatpush1.bf16.msra.mxu1 %v1385_v9  ;;  %v1424_v50 = vpack.c.bf16 %v359_v49, %v358_v48 }
  0x16   : > { %v201_v12 = vld [vmem:[%s1715_s11 + $0x8] sm:$0xff]  ;;  %1387 = vmatprep.subr.bf16.mxu0 %v1635_v3  ;;  %1429 = vmatprep.subr.bf16.mxu1 %v1635_v3  ;;  %v200_v51 = vld [vmem:[%s1715_s11] sm:$0xff]  ;;  %v203_v53 = vld [vmem:[%s1715_s11 + $0x18] sm:$0xff] }
  0x17   : > { %v265_v14 = vld [vmem:[%s1715_s11 + $0x208] sm:$0xff]  ;;  %431 = vmatprep.mubr.f32.mxu0 %v201_v12  ;;  %v264_v52 = vld [vmem:[%s1715_s11 + $0x200] sm:$0xff]  ;;  %v267_v54 = vld [vmem:[%s1715_s11 + $0x218] sm:$0xff] }
  0x18   : > { %591 = vmatprep.mubr.f32.mxu1 %v265_v14  ;;  %v202_v55 = vld [vmem:[%s1715_s11 + $0x10] sm:$0xff]  ;;  %v205_v57 = vld [vmem:[%s1715_s11 + $0x28] sm:$0xff]  ;;  %v204_v59 = vld [vmem:[%s1715_s11 + $0x20] sm:$0xff] }
  0x19   : > { %1389 = vmatpush1.bf16.msra.mxu0 %v1388_v13  ;;  %1445 = vmatpush1.bf16.msra.mxu1 %v1388_v13  ;;  %v266_v56 = vld [vmem:[%s1715_s11 + $0x210] sm:$0xff]  ;;  %v269_v58 = vld [vmem:[%s1715_s11 + $0x228] sm:$0xff]  ;;  %v268_v60 = vld [vmem:[%s1715_s11 + $0x220] sm:$0xff] }
  0x1a   : > { %1390 = vmatprep.subr.bf16.mxu0 %v1635_v3  ;;  %1430 = vmatprep.subr.bf16.mxu1 %v1635_v3  ;;  %v207_v61 = vld [vmem:[%s1715_s11 + $0x38] sm:$0xff]  ;;  %v206_v63 = vld [vmem:[%s1715_s11 + $0x30] sm:$0xff]  ;;  %v209_v1 = vld [vmem:[%s1715_s11 + $0x48] sm:$0xff] }
  0x1b   : > { %v271_v62 = vld [vmem:[%s1715_s11 + $0x238] sm:$0xff]  ;;  %v270_v0 = vld [vmem:[%s1715_s11 + $0x230] sm:$0xff]  ;;  %v273_v2 = vld [vmem:[%s1715_s11 + $0x248] sm:$0xff] }
  0x1c   : > { %v272_v4 = vld [vmem:[%s1715_s11 + $0x240] sm:$0xff]  ;;  %v211_v5 = vld [vmem:[%s1715_s11 + $0x58] sm:$0xff]  ;;  %v210_v7 = vld [vmem:[%s1715_s11 + $0x50] sm:$0xff] }
  0x1d   : > { %1392 = vmatpush1.bf16.msra.mxu0 %v1391_v17  ;;  %1446 = vmatpush1.bf16.msra.mxu1 %v1391_v17  ;;  %v275_v6 = vld [vmem:[%s1715_s11 + $0x258] sm:$0xff]  ;;  %v274_v8 = vld [vmem:[%s1715_s11 + $0x250] sm:$0xff]  ;;  %v213_v9 = vld [vmem:[%s1715_s11 + $0x68] sm:$0xff] }
  0x1e   : > { %1393 = vmatprep.subr.bf16.mxu0 %v1635_v3  ;;  %1431 = vmatprep.subr.bf16.mxu1 %v1635_v3  ;;  %v277_v10 = vld [vmem:[%s1715_s11 + $0x268] sm:$0xff]  ;;  %v212_v11 = vld [vmem:[%s1715_s11 + $0x60] sm:$0xff]  ;;  %v215_v13 = vld [vmem:[%s1715_s11 + $0x78] sm:$0xff] }
  0x1f   : > { %v276_v12 = vld [vmem:[%s1715_s11 + $0x260] sm:$0xff]  ;;  %v279_v14 = vld [vmem:[%s1715_s11 + $0x278] sm:$0xff]  ;;  %v214_v15 = vld [vmem:[%s1715_s11 + $0x70] sm:$0xff] }
  0x20   : > { %v278_v16 = vld [vmem:[%s1715_s11 + $0x270] sm:$0xff]  ;;  %v217_v17 = vld [vmem:[%s1715_s11 + $0x88] sm:$0xff]  ;;  %v216_v19 = vld [vmem:[%s1715_s11 + $0x80] sm:$0xff] }
  0x21   : > { %1395 = vmatpush1.bf16.msra.mxu0 %v1394_v20  ;;  %1447 = vmatpush1.bf16.msra.mxu1 %v1394_v20  ;;  %v281_v18 = vld [vmem:[%s1715_s11 + $0x288] sm:$0xff]  ;;  %v280_v20 = vld [vmem:[%s1715_s11 + $0x280] sm:$0xff]  ;;  %v219_v21 = vld [vmem:[%s1715_s11 + $0x98] sm:$0xff] }
  0x22   : > { %1396 = vmatprep.subr.bf16.mxu0 %v1635_v3  ;;  %1432 = vmatprep.subr.bf16.mxu1 %v1635_v3  ;;  %v283_v22 = vld [vmem:[%s1715_s11 + $0x298] sm:$0xff]  ;;  %v282_v24 = vld [vmem:[%s1715_s11 + $0x290] sm:$0xff]  ;;  %v221_v25 = vld [vmem:[%s1715_s11 + $0xa8] sm:$0xff] }
  0x23   : > { %v220_v27 = vld [vmem:[%s1715_s11 + $0xa0] sm:$0xff]  ;;  %v287_v30 = vld [vmem:[%s1715_s11 + $0x2b8] sm:$0xff]  ;;  %v222_v31 = vld [vmem:[%s1715_s11 + $0xb0] sm:$0xff] }
  0x24   : > { %v284_v28 = vld [vmem:[%s1715_s11 + $0x2a0] sm:$0xff]  ;;  %v225_v33 = vld [vmem:[%s1715_s11 + $0xc8] sm:$0xff]  ;;  %v227_v37 = vld [vmem:[%s1715_s11 + $0xd8] sm:$0xff] }
  0x25   : > { %1398 = vmatpush1.bf16.msra.mxu0 %v1397_v23  ;;  %1448 = vmatpush1.bf16.msra.mxu1 %v1397_v23  ;;  %v218_v23 = vld [vmem:[%s1715_s11 + $0x90] sm:$0xff]  ;;  %v289_v34 = vld [vmem:[%s1715_s11 + $0x2c8] sm:$0xff]  ;;  %v288_v36 = vld [vmem:[%s1715_s11 + $0x2c0] sm:$0xff] }
  0x26   : > { %1399 = vmatprep.subr.bf16.mxu0 %v1635_v3  ;;  %1433 = vmatprep.subr.bf16.mxu1 %v1635_v3  ;;  %v226_v39 = vld [vmem:[%s1715_s11 + $0xd0] sm:$0xff]  ;;  %v293_v42 = vld [vmem:[%s1715_s11 + $0x2e8] sm:$0xff]  ;;  %v228_v43 = vld [vmem:[%s1715_s11 + $0xe0] sm:$0xff] }
  0x27   : > { %v290_v40 = vld [vmem:[%s1715_s11 + $0x2d0] sm:$0xff]  ;;  %v231_v45 = vld [vmem:[%s1715_s11 + $0xf8] sm:$0xff]  ;;  %v233_v49 = vld [vmem:[%s1715_s11 + $0x108] sm:$0xff] }
  0x28   : > { %v295_v46 = vld [vmem:[%s1715_s11 + $0x2f8] sm:$0xff]  ;;  %v294_v48 = vld [vmem:[%s1715_s11 + $0x2f0] sm:$0xff] }
  0x29   : > { %1401 = vmatpush1.bf16.msra.mxu0 %v1400_v26  ;;  %1449 = vmatpush1.bf16.msra.mxu1 %v1400_v26  ;;  %v285_v26 = vld [vmem:[%s1715_s11 + $0x2a8] sm:$0xff] }
  0x2a   : > { %1402 = vmatprep.subr.bf16.mxu0 %v1635_v3  ;;  %1434 = vmatprep.subr.bf16.mxu1 %v1635_v3 }
  0x2d   : > { %1404 = vmatpush1.bf16.msra.mxu0 %v1403_v29  ;;  %1450 = vmatpush1.bf16.msra.mxu1 %v1403_v29  ;;  %v223_v29 = vld [vmem:[%s1715_s11 + $0xb8] sm:$0xff] }
  0x2e   : > { %1405 = vmatprep.subr.bf16.mxu0 %v1635_v3  ;;  %1435 = vmatprep.subr.bf16.mxu1 %v1635_v3 }
  0x31   : > { %1407 = vmatpush1.bf16.msra.mxu0 %v1406_v32  ;;  %1451 = vmatpush1.bf16.msra.mxu1 %v1406_v32  ;;  %v286_v32 = vld [vmem:[%s1715_s11 + $0x2b0] sm:$0xff] }
  0x32   : > { %1408 = vmatprep.subr.bf16.mxu0 %v1635_v3  ;;  %1436 = vmatprep.subr.bf16.mxu1 %v1635_v3 }
  0x35   : > { %1410 = vmatpush1.bf16.msra.mxu0 %v1409_v35  ;;  %1452 = vmatpush1.bf16.msra.mxu1 %v1409_v35  ;;  %v224_v35 = vld [vmem:[%s1715_s11 + $0xc0] sm:$0xff] }
  0x36   : > { %1411 = vmatprep.subr.bf16.mxu0 %v1635_v3  ;;  %1437 = vmatprep.subr.bf16.mxu1 %v1635_v3 }
  0x39   : > { %1413 = vmatpush1.bf16.msra.mxu0 %v1412_v38  ;;  %1453 = vmatpush1.bf16.msra.mxu1 %v1412_v38  ;;  %v291_v38 = vld [vmem:[%s1715_s11 + $0x2d8] sm:$0xff] }
  0x3a   : > { %1414 = vmatprep.subr.bf16.mxu0 %v1635_v3  ;;  %1438 = vmatprep.subr.bf16.mxu1 %v1635_v3 }
  0x3d   : > { %1416 = vmatpush1.bf16.msra.mxu0 %v1415_v41  ;;  %1454 = vmatpush1.bf16.msra.mxu1 %v1415_v41  ;;  %v229_v41 = vld [vmem:[%s1715_s11 + $0xe8] sm:$0xff] }
  0x3e   : > { %1417 = vmatprep.subr.bf16.mxu0 %v1635_v3  ;;  %1439 = vmatprep.subr.bf16.mxu1 %v1635_v3 }
  0x41   : > { %1419 = vmatpush1.bf16.msra.mxu0 %v1418_v44  ;;  %1455 = vmatpush1.bf16.msra.mxu1 %v1418_v44  ;;  %v292_v44 = vld [vmem:[%s1715_s11 + $0x2e0] sm:$0xff] }
  0x42   : > { %1420 = vmatprep.subr.bf16.mxu0 %v1635_v3  ;;  %1440 = vmatprep.subr.bf16.mxu1 %v1635_v3 }
  0x45   : > { %1422 = vmatpush1.bf16.msra.mxu0 %v1421_v47  ;;  %1456 = vmatpush1.bf16.msra.mxu1 %v1421_v47  ;;  %v230_v47 = vld [vmem:[%s1715_s11 + $0xf0] sm:$0xff] }
  0x46   : > { %1423 = vmatprep.subr.bf16.mxu0 %v1635_v3  ;;  %1441 = vmatprep.subr.bf16.mxu1 %v1635_v3  ;;  %v208_v3 = vld [vmem:[%s1715_s11 + $0x40] sm:$0xff] }
  0x49   : > { %1425 = vmatpush1.bf16.msra.mxu0 %v1424_v50  ;;  %1457 = vmatpush1.bf16.msra.mxu1 %v1424_v50  ;;  %v297_v50 = vld [vmem:[%s1715_s11 + $0x308] sm:$0xff] }
  0x4c   : > { %432 = vmatmul.mubr.f32.vlgmr.msra.gmra.mrb[0].mxu0 %v200_v51  ;;  %592 = vmatmul.mubr.f32.vlgmr.msra.gmra.mrb[0].mxu1 %v264_v52  ;;  %v232_v51 = vld [vmem:[%s1715_s11 + $0x100] sm:$0xff] }
  0x4d   : > { %436 = vmatprep.mubr.f32.mxu0 %v203_v53  ;;  %596 = vmatprep.mubr.f32.mxu1 %v267_v54  ;;  %v296_v52 = vld [vmem:[%s1715_s11 + $0x300] sm:$0xff]  ;;  %v235_v53 = vld [vmem:[%s1715_s11 + $0x118] sm:$0xff] }
  0x4e   : > { %v299_v54 = vld [vmem:[%s1715_s11 + $0x318] sm:$0xff] }
  0x50   : > { %437 = vmatmul.mubr.f32.gmra.mrb[2].mxu0 %v202_v55  ;;  %597 = vmatmul.mubr.f32.gmra.mrb[2].mxu1 %v266_v56  ;;  %v234_v55 = vld [vmem:[%s1715_s11 + $0x110] sm:$0xff] }
  0x51   : > { %441 = vmatprep.mubr.f32.mxu0 %v205_v57  ;;  %601 = vmatprep.mubr.f32.mxu1 %v269_v58  ;;  %v298_v56 = vld [vmem:[%s1715_s11 + $0x310] sm:$0xff]  ;;  %v237_v57 = vld [vmem:[%s1715_s11 + $0x128] sm:$0xff] }
  0x52   : > { %v301_v58 = vld [vmem:[%s1715_s11 + $0x328] sm:$0xff] }
  0x54   : > { %442 = vmatmul.mubr.f32.gmra.mrb[4].mxu0 %v204_v59  ;;  %602 = vmatmul.mubr.f32.gmra.mrb[4].mxu1 %v268_v60  ;;  %v236_v59 = vld [vmem:[%s1715_s11 + $0x120] sm:$0xff] }
  0x55   : > { %446 = vmatprep.mubr.f32.mxu0 %v207_v61  ;;  %606 = vmatprep.mubr.f32.mxu1 %v271_v62  ;;  %v300_v60 = vld [vmem:[%s1715_s11 + $0x320] sm:$0xff]  ;;  %v239_v61 = vld [vmem:[%s1715_s11 + $0x138] sm:$0xff] }
  0x56   : > { %v303_v62 = vld [vmem:[%s1715_s11 + $0x338] sm:$0xff] }
  0x58   : > { %447 = vmatmul.mubr.f32.gmra.mrb[6].mxu0 %v206_v63  ;;  %607 = vmatmul.mubr.f32.gmra.mrb[6].mxu1 %v270_v0  ;;  %v238_v63 = vld [vmem:[%s1715_s11 + $0x130] sm:$0xff] }
  0x59   : > { %451 = vmatprep.mubr.f32.mxu0 %v209_v1  ;;  %611 = vmatprep.mubr.f32.mxu1 %v273_v2  ;;  %v302_v0 = vld [vmem:[%s1715_s11 + $0x330] sm:$0xff]  ;;  %v241_v1 = vld [vmem:[%s1715_s11 + $0x148] sm:$0xff] }
  0x5a   : > { %v305_v2 = vld [vmem:[%s1715_s11 + $0x348] sm:$0xff] }
  0x5c   : > { %452 = vmatmul.mubr.f32.gmra.mrb[8].mxu0 %v208_v3  ;;  %612 = vmatmul.mubr.f32.gmra.mrb[8].mxu1 %v272_v4  ;;  %v240_v3 = vld [vmem:[%s1715_s11 + $0x140] sm:$0xff] }
  0x5d   : > { %456 = vmatprep.mubr.f32.mxu0 %v211_v5  ;;  %616 = vmatprep.mubr.f32.mxu1 %v275_v6  ;;  %v304_v4 = vld [vmem:[%s1715_s11 + $0x340] sm:$0xff]  ;;  %v243_v5 = vld [vmem:[%s1715_s11 + $0x158] sm:$0xff] }
  0x5e   : > { %v307_v6 = vld [vmem:[%s1715_s11 + $0x358] sm:$0xff] }
  0x60   : > { %457 = vmatmul.mubr.f32.gmra.mrb[10].mxu0 %v210_v7  ;;  %617 = vmatmul.mubr.f32.gmra.mrb[10].mxu1 %v274_v8  ;;  %v242_v7 = vld [vmem:[%s1715_s11 + $0x150] sm:$0xff] }
  0x61   : > { %461 = vmatprep.mubr.f32.mxu0 %v213_v9  ;;  %621 = vmatprep.mubr.f32.mxu1 %v277_v10  ;;  %v306_v8 = vld [vmem:[%s1715_s11 + $0x350] sm:$0xff]  ;;  %v245_v9 = vld [vmem:[%s1715_s11 + $0x168] sm:$0xff] }
  0x62   : > { %v309_v10 = vld [vmem:[%s1715_s11 + $0x368] sm:$0xff] }
  0x64   : > { %462 = vmatmul.mubr.f32.gmra.mrb[12].mxu0 %v212_v11  ;;  %622 = vmatmul.mubr.f32.gmra.mrb[12].mxu1 %v276_v12  ;;  %v244_v11 = vld [vmem:[%s1715_s11 + $0x160] sm:$0xff] }
  0x65   : > { %466 = vmatprep.mubr.f32.mxu0 %v215_v13  ;;  %626 = vmatprep.mubr.f32.mxu1 %v279_v14  ;;  %v308_v12 = vld [vmem:[%s1715_s11 + $0x360] sm:$0xff]  ;;  %v247_v13 = vld [vmem:[%s1715_s11 + $0x178] sm:$0xff] }
  0x66   : > { %v311_v14 = vld [vmem:[%s1715_s11 + $0x378] sm:$0xff] }
  0x68   : > { %467 = vmatmul.mubr.f32.gmra.mrb[14].mxu0 %v214_v15  ;;  %627 = vmatmul.mubr.f32.gmra.mrb[14].mxu1 %v278_v16  ;;  %v246_v15 = vld [vmem:[%s1715_s11 + $0x170] sm:$0xff] }
  0x69   : > { %471 = vmatprep.mubr.f32.mxu0 %v217_v17  ;;  %631 = vmatprep.mubr.f32.mxu1 %v281_v18  ;;  %v310_v16 = vld [vmem:[%s1715_s11 + $0x370] sm:$0xff]  ;;  %v249_v17 = vld [vmem:[%s1715_s11 + $0x188] sm:$0xff] }
  0x6a   : > { %v313_v18 = vld [vmem:[%s1715_s11 + $0x388] sm:$0xff] }
  0x6c   : > { %472 = vmatmul.mubr.f32.gmra.mrb[16].mxu0 %v216_v19  ;;  %632 = vmatmul.mubr.f32.gmra.mrb[16].mxu1 %v280_v20  ;;  %v248_v19 = vld [vmem:[%s1715_s11 + $0x180] sm:$0xff] }
  0x6d   : > { %476 = vmatprep.mubr.f32.mxu0 %v219_v21  ;;  %636 = vmatprep.mubr.f32.mxu1 %v283_v22  ;;  %v312_v20 = vld [vmem:[%s1715_s11 + $0x380] sm:$0xff]  ;;  %v251_v21 = vld [vmem:[%s1715_s11 + $0x198] sm:$0xff] }
  0x6e   : > { %v315_v22 = vld [vmem:[%s1715_s11 + $0x398] sm:$0xff] }
  0x70   : > { %477 = vmatmul.mubr.f32.gmra.mrb[18].mxu0 %v218_v23  ;;  %637 = vmatmul.mubr.f32.gmra.mrb[18].mxu1 %v282_v24  ;;  %v250_v23 = vld [vmem:[%s1715_s11 + $0x190] sm:$0xff] }
  0x71   : > { %481 = vmatprep.mubr.f32.mxu0 %v221_v25  ;;  %641 = vmatprep.mubr.f32.mxu1 %v285_v26  ;;  %v314_v24 = vld [vmem:[%s1715_s11 + $0x390] sm:$0xff]  ;;  %v253_v25 = vld [vmem:[%s1715_s11 + $0x1a8] sm:$0xff] }
  0x72   : > { %v317_v26 = vld [vmem:[%s1715_s11 + $0x3a8] sm:$0xff] }
  0x74   : > { %482 = vmatmul.mubr.f32.gmra.mrb[20].mxu0 %v220_v27  ;;  %642 = vmatmul.mubr.f32.gmra.mrb[20].mxu1 %v284_v28  ;;  %v252_v27 = vld [vmem:[%s1715_s11 + $0x1a0] sm:$0xff] }
  0x75   : > { %486 = vmatprep.mubr.f32.mxu0 %v223_v29  ;;  %646 = vmatprep.mubr.f32.mxu1 %v287_v30  ;;  %v316_v28 = vld [vmem:[%s1715_s11 + $0x3a0] sm:$0xff]  ;;  %v255_v29 = vld [vmem:[%s1715_s11 + $0x1b8] sm:$0xff] }
  0x76   : > { %v319_v30 = vld [vmem:[%s1715_s11 + $0x3b8] sm:$0xff] }
  0x78   : > { %487 = vmatmul.mubr.f32.gmra.mrb[22].mxu0 %v222_v31  ;;  %647 = vmatmul.mubr.f32.gmra.mrb[22].mxu1 %v286_v32  ;;  %v254_v31 = vld [vmem:[%s1715_s11 + $0x1b0] sm:$0xff] }
  0x79   : > { %491 = vmatprep.mubr.f32.mxu0 %v225_v33  ;;  %651 = vmatprep.mubr.f32.mxu1 %v289_v34  ;;  %v318_v32 = vld [vmem:[%s1715_s11 + $0x3b0] sm:$0xff]  ;;  %v257_v33 = vld [vmem:[%s1715_s11 + $0x1c8] sm:$0xff] }
  0x7a   : > { %v321_v34 = vld [vmem:[%s1715_s11 + $0x3c8] sm:$0xff] }
  0x7c   : > { %492 = vmatmul.mubr.f32.gmra.mrb[24].mxu0 %v224_v35  ;;  %652 = vmatmul.mubr.f32.gmra.mrb[24].mxu1 %v288_v36  ;;  %v256_v35 = vld [vmem:[%s1715_s11 + $0x1c0] sm:$0xff] }
  0x7d   : > { %496 = vmatprep.mubr.f32.mxu0 %v227_v37  ;;  %656 = vmatprep.mubr.f32.mxu1 %v291_v38  ;;  %v320_v36 = vld [vmem:[%s1715_s11 + $0x3c0] sm:$0xff]  ;;  %v259_v37 = vld [vmem:[%s1715_s11 + $0x1d8] sm:$0xff] }
  0x7e   : > { %v323_v38 = vld [vmem:[%s1715_s11 + $0x3d8] sm:$0xff] }
  0x80   : > { %497 = vmatmul.mubr.f32.gmra.mrb[26].mxu0 %v226_v39  ;;  %657 = vmatmul.mubr.f32.gmra.mrb[26].mxu1 %v290_v40  ;;  %v258_v39 = vld [vmem:[%s1715_s11 + $0x1d0] sm:$0xff] }
  0x81   : > { %501 = vmatprep.mubr.f32.mxu0 %v229_v41  ;;  %661 = vmatprep.mubr.f32.mxu1 %v293_v42  ;;  %v322_v40 = vld [vmem:[%s1715_s11 + $0x3d0] sm:$0xff]  ;;  %v261_v41 = vld [vmem:[%s1715_s11 + $0x1e8] sm:$0xff] }
  0x82   : > { %v325_v42 = vld [vmem:[%s1715_s11 + $0x3e8] sm:$0xff] }
  0x84   : > { %502 = vmatmul.mubr.f32.gmra.mrb[28].mxu0 %v228_v43  ;;  %662 = vmatmul.mubr.f32.gmra.mrb[28].mxu1 %v292_v44  ;;  %v260_v43 = vld [vmem:[%s1715_s11 + $0x1e0] sm:$0xff] }
  0x85   : > { %506 = vmatprep.mubr.f32.mxu0 %v231_v45  ;;  %666 = vmatprep.mubr.f32.mxu1 %v295_v46  ;;  %v324_v44 = vld [vmem:[%s1715_s11 + $0x3e0] sm:$0xff]  ;;  %v263_v45 = vld [vmem:[%s1715_s11 + $0x1f8] sm:$0xff] }
  0x86   : > { %v327_v46 = vld [vmem:[%s1715_s11 + $0x3f8] sm:$0xff] }
  0x88   : > { %507 = vmatmul.mubr.f32.gmra.mrb[30].mxu0 %v230_v47  ;;  %667 = vmatmul.mubr.f32.gmra.mrb[30].mxu1 %v294_v48  ;;  %v262_v47 = vld [vmem:[%s1715_s11 + $0x1f0] sm:$0xff] }
  0x89   : > { %511 = vmatprep.mubr.f32.mxu0 %v233_v49  ;;  %671 = vmatprep.mubr.f32.mxu1 %v297_v50  ;;  %v326_v48 = vld [vmem:[%s1715_s11 + $0x3f0] sm:$0xff]  ;;  %v1955_v49 = vld [vmem:[%s2359_s2] ss:$0 sm:$0xff]  ;;  %s889_s11 = ssub.s32 (%p1681_p4), 100, %s1695_s27 }
  0x8a   : > { %p890_p8 = scmp.lt.s32.totalorder (%p1681_p4), %s889_s11, 64 }
  0x8c   : > { %512 = vmatmul.mubr.f32.gmra.mrb[32].mxu0 %v232_v51  ;;  %672 = vmatmul.mubr.f32.gmra.mrb[32].mxu1 %v296_v52 }
  0x8d   : > { %516 = vmatprep.mubr.f32.mxu0 %v235_v53  ;;  %676 = vmatprep.mubr.f32.mxu1 %v299_v54 }
  0x90   : > { %517 = vmatmul.mubr.f32.gmra.mrb[34].mxu0 %v234_v55  ;;  %677 = vmatmul.mubr.f32.gmra.mrb[34].mxu1 %v298_v56 }
  0x91   : > { %521 = vmatprep.mubr.f32.mxu0 %v237_v57  ;;  %681 = vmatprep.mubr.f32.mxu1 %v301_v58 }
  0x94   : > { %522 = vmatmul.mubr.f32.gmra.mrb[36].mxu0 %v236_v59  ;;  %682 = vmatmul.mubr.f32.gmra.mrb[36].mxu1 %v300_v60 }
  0x95   : > { %526 = vmatprep.mubr.f32.mxu0 %v239_v61  ;;  %686 = vmatprep.mubr.f32.mxu1 %v303_v62 }
  0x98   : > { %527 = vmatmul.mubr.f32.gmra.mrb[38].mxu0 %v238_v63  ;;  %687 = vmatmul.mubr.f32.gmra.mrb[38].mxu1 %v302_v0 }
  0x99   : > { %531 = vmatprep.mubr.f32.mxu0 %v241_v1  ;;  %691 = vmatprep.mubr.f32.mxu1 %v305_v2 }
  0x9c   : > { %532 = vmatmul.mubr.f32.gmra.mrb[40].mxu0 %v240_v3  ;;  %692 = vmatmul.mubr.f32.gmra.mrb[40].mxu1 %v304_v4 }
  0x9d   : > { %536 = vmatprep.mubr.f32.mxu0 %v243_v5  ;;  %696 = vmatprep.mubr.f32.mxu1 %v307_v6 }
  0xa0   : > { %537 = vmatmul.mubr.f32.gmra.mrb[42].mxu0 %v242_v7  ;;  %697 = vmatmul.mubr.f32.gmra.mrb[42].mxu1 %v306_v8 }
  0xa1   : > { %541 = vmatprep.mubr.f32.mxu0 %v245_v9  ;;  %701 = vmatprep.mubr.f32.mxu1 %v309_v10 }
  0xa4   : > { %542 = vmatmul.mubr.f32.gmra.mrb[44].mxu0 %v244_v11  ;;  %702 = vmatmul.mubr.f32.gmra.mrb[44].mxu1 %v308_v12 }
  0xa5   : > { %546 = vmatprep.mubr.f32.mxu0 %v247_v13  ;;  %706 = vmatprep.mubr.f32.mxu1 %v311_v14 }
  0xa8   : > { %547 = vmatmul.mubr.f32.gmra.mrb[46].mxu0 %v246_v15  ;;  %707 = vmatmul.mubr.f32.gmra.mrb[46].mxu1 %v310_v16 }
  0xa9   : > { %551 = vmatprep.mubr.f32.mxu0 %v249_v17  ;;  %711 = vmatprep.mubr.f32.mxu1 %v313_v18 }
  0xac   : > { %552 = vmatmul.mubr.f32.gmra.mrb[48].mxu0 %v248_v19  ;;  %712 = vmatmul.mubr.f32.gmra.mrb[48].mxu1 %v312_v20 }
  0xad   : > { %556 = vmatprep.mubr.f32.mxu0 %v251_v21  ;;  %716 = vmatprep.mubr.f32.mxu1 %v315_v22 }
  0xb0   : > { %557 = vmatmul.mubr.f32.gmra.mrb[50].mxu0 %v250_v23  ;;  %717 = vmatmul.mubr.f32.gmra.mrb[50].mxu1 %v314_v24 }
  0xb1   : > { %561 = vmatprep.mubr.f32.mxu0 %v253_v25  ;;  %721 = vmatprep.mubr.f32.mxu1 %v317_v26 }
  0xb4   : > { %562 = vmatmul.mubr.f32.gmra.mrb[52].mxu0 %v252_v27  ;;  %722 = vmatmul.mubr.f32.gmra.mrb[52].mxu1 %v316_v28 }
  0xb5   : > { %566 = vmatprep.mubr.f32.mxu0 %v255_v29  ;;  %726 = vmatprep.mubr.f32.mxu1 %v319_v30 }
  0xb8   : > { %567 = vmatmul.mubr.f32.gmra.mrb[54].mxu0 %v254_v31  ;;  %727 = vmatmul.mubr.f32.gmra.mrb[54].mxu1 %v318_v32 }
  0xb9   : > { %571 = vmatprep.mubr.f32.mxu0 %v257_v33  ;;  %731 = vmatprep.mubr.f32.mxu1 %v321_v34 }
  0xbc   : > { %572 = vmatmul.mubr.f32.gmra.mrb[56].mxu0 %v256_v35  ;;  %732 = vmatmul.mubr.f32.gmra.mrb[56].mxu1 %v320_v36 }
  0xbd   : > { %576 = vmatprep.mubr.f32.mxu0 %v259_v37  ;;  %736 = vmatprep.mubr.f32.mxu1 %v323_v38 }
  0xc0   : > { %577 = vmatmul.mubr.f32.gmra.mrb[58].mxu0 %v258_v39  ;;  %737 = vmatmul.mubr.f32.gmra.mrb[58].mxu1 %v322_v40 }
  0xc1   : > { %581 = vmatprep.mubr.f32.mxu0 %v261_v41  ;;  %741 = vmatprep.mubr.f32.mxu1 %v325_v42 }
  0xc4   : > { %582 = vmatmul.mubr.f32.gmra.mrb[60].mxu0 %v260_v43  ;;  %742 = vmatmul.mubr.f32.gmra.mrb[60].mxu1 %v324_v44 }
  0xc5   : > { %586 = vmatprep.mubr.f32.mxu0 %v263_v45  ;;  %746 = vmatprep.mubr.f32.mxu1 %v327_v46 }
  0xc8   : > { %587 = vmatmul.mubr.f32.gmra.mrb[62].mxu0 %v262_v47  ;;  %747 = vmatmul.mubr.f32.gmra.mrb[62].mxu1 %v326_v48 }
 0x11f   : > { %v433_v50 = vpop.f32.mrb[0].mxu0  ;;  %v593_v51 = vpop.f32.mrb[0].mxu1 }
 0x120   : > { %v434_v52 = vadd.f32 %v1955_v49, %v433_v50  ;;  %v594_v53 = vadd.f32 %v1955_v49, %v593_v51  ;;  %v435_v54 = vpop.f32.mrb[1].mxu0  ;;  %v595_v55 = vpop.f32.mrb[1].mxu1 }
 0x122   : > { %v752_v56 = vmax.f32 %v434_v52, 0.0  ;;  %v784_v57 = vmax.f32 %v594_v53, 0.0 }
 0x123   : > { %v438_v58 = vpop.f32.mrb[2].mxu0  ;;  %v598_v59 = vpop.f32.mrb[2].mxu1 }
 0x124   : > { %817 = vst.msk [vmem:[%s1959_s12] sm:$0xff] %vm816_vm0, %v752_v56  ;;  %849 = vst.msk [vmem:[%s1959_s12 + $0x100] sm:$0xff] %vm816_vm0, %v784_v57  ;;  %v439_v60 = vadd.f32 %v1955_v49, %v438_v58  ;;  %v599_v61 = vadd.f32 %v1955_v49, %v598_v59  ;;  %v440_v62 = vpop.f32.mrb[3].mxu0  ;;  %v600_v63 = vpop.f32.mrb[3].mxu1 }
 0x126   : > { %v753_v0 = vmax.f32 %v439_v60, 0.0  ;;  %v785_v1 = vmax.f32 %v599_v61, 0.0 }
 0x127   : > { %v443_v2 = vpop.f32.mrb[4].mxu0  ;;  %v603_v3 = vpop.f32.mrb[4].mxu1 }
 0x128   : > { %818 = vst.msk [vmem:[%s1959_s12 + $0x8] sm:$0xff] %vm816_vm0, %v753_v0  ;;  %850 = vst.msk [vmem:[%s1959_s12 + $0x108] sm:$0xff] %vm816_vm0, %v785_v1  ;;  %v444_v4 = vadd.f32 %v1955_v49, %v443_v2  ;;  %v604_v5 = vadd.f32 %v1955_v49, %v603_v3  ;;  %v445_v6 = vpop.f32.mrb[5].mxu0  ;;  %v605_v7 = vpop.f32.mrb[5].mxu1 }
 0x12a   : > { %v754_v8 = vmax.f32 %v444_v4, 0.0  ;;  %v786_v9 = vmax.f32 %v604_v5, 0.0 }
 0x12b   : > { %v448_v10 = vpop.f32.mrb[6].mxu0  ;;  %v608_v11 = vpop.f32.mrb[6].mxu1 }
 0x12c   : > { %819 = vst.msk [vmem:[%s1959_s12 + $0x10] sm:$0xff] %vm816_vm0, %v754_v8  ;;  %851 = vst.msk [vmem:[%s1959_s12 + $0x110] sm:$0xff] %vm816_vm0, %v786_v9  ;;  %v449_v12 = vadd.f32 %v1955_v49, %v448_v10  ;;  %v609_v13 = vadd.f32 %v1955_v49, %v608_v11  ;;  %v450_v14 = vpop.f32.mrb[7].mxu0  ;;  %v610_v15 = vpop.f32.mrb[7].mxu1 }
 0x12e   : > { %v755_v16 = vmax.f32 %v449_v12, 0.0  ;;  %v787_v17 = vmax.f32 %v609_v13, 0.0 }
 0x12f   : > { %v453_v18 = vpop.f32.mrb[8].mxu0  ;;  %v613_v19 = vpop.f32.mrb[8].mxu1 }
 0x130   : > { %820 = vst.msk [vmem:[%s1959_s12 + $0x18] sm:$0xff] %vm816_vm0, %v755_v16  ;;  %852 = vst.msk [vmem:[%s1959_s12 + $0x118] sm:$0xff] %vm816_vm0, %v787_v17  ;;  %v454_v20 = vadd.f32 %v1955_v49, %v453_v18  ;;  %v614_v21 = vadd.f32 %v1955_v49, %v613_v19  ;;  %v455_v22 = vpop.f32.mrb[9].mxu0  ;;  %v615_v23 = vpop.f32.mrb[9].mxu1 }
 0x132   : > { %v756_v24 = vmax.f32 %v454_v20, 0.0  ;;  %v788_v25 = vmax.f32 %v614_v21, 0.0 }
 0x133   : > { %v458_v26 = vpop.f32.mrb[10].mxu0  ;;  %v618_v27 = vpop.f32.mrb[10].mxu1 }
 0x134   : > { %821 = vst.msk [vmem:[%s1959_s12 + $0x20] sm:$0xff] %vm816_vm0, %v756_v24  ;;  %853 = vst.msk [vmem:[%s1959_s12 + $0x120] sm:$0xff] %vm816_vm0, %v788_v25  ;;  %v459_v28 = vadd.f32 %v1955_v49, %v458_v26  ;;  %v619_v29 = vadd.f32 %v1955_v49, %v618_v27  ;;  %v460_v30 = vpop.f32.mrb[11].mxu0  ;;  %v620_v31 = vpop.f32.mrb[11].mxu1 }
 0x136   : > { %v757_v32 = vmax.f32 %v459_v28, 0.0  ;;  %v789_v33 = vmax.f32 %v619_v29, 0.0 }
 0x137   : > { %v463_v34 = vpop.f32.mrb[12].mxu0  ;;  %v623_v35 = vpop.f32.mrb[12].mxu1 }
 0x138   : > { %822 = vst.msk [vmem:[%s1959_s12 + $0x28] sm:$0xff] %vm816_vm0, %v757_v32  ;;  %854 = vst.msk [vmem:[%s1959_s12 + $0x128] sm:$0xff] %vm816_vm0, %v789_v33  ;;  %v464_v36 = vadd.f32 %v1955_v49, %v463_v34  ;;  %v624_v37 = vadd.f32 %v1955_v49, %v623_v35  ;;  %v465_v38 = vpop.f32.mrb[13].mxu0  ;;  %v625_v39 = vpop.f32.mrb[13].mxu1 }
 0x13a   : > { %v758_v40 = vmax.f32 %v464_v36, 0.0  ;;  %v790_v41 = vmax.f32 %v624_v37, 0.0 }
 0x13b   : > { %v468_v42 = vpop.f32.mrb[14].mxu0  ;;  %v628_v43 = vpop.f32.mrb[14].mxu1 }
 0x13c   : > { %823 = vst.msk [vmem:[%s1959_s12 + $0x30] sm:$0xff] %vm816_vm0, %v758_v40  ;;  %855 = vst.msk [vmem:[%s1959_s12 + $0x130] sm:$0xff] %vm816_vm0, %v790_v41  ;;  %v469_v44 = vadd.f32 %v1955_v49, %v468_v42  ;;  %v629_v45 = vadd.f32 %v1955_v49, %v628_v43  ;;  %v470_v46 = vpop.f32.mrb[15].mxu0  ;;  %v630_v47 = vpop.f32.mrb[15].mxu1 }
 0x13e   : > { %v759_v48 = vmax.f32 %v469_v44, 0.0  ;;  %v791_v50 = vmax.f32 %v629_v45, 0.0 }
 0x13f   : > { %v473_v51 = vpop.f32.mrb[16].mxu0  ;;  %v633_v52 = vpop.f32.mrb[16].mxu1 }
 0x140   : > { %824 = vst.msk [vmem:[%s1959_s12 + $0x38] sm:$0xff] %vm816_vm0, %v759_v48  ;;  %856 = vst.msk [vmem:[%s1959_s12 + $0x138] sm:$0xff] %vm816_vm0, %v791_v50  ;;  %v474_v53 = vadd.f32 %v1955_v49, %v473_v51  ;;  %v634_v54 = vadd.f32 %v1955_v49, %v633_v52  ;;  %v475_v55 = vpop.f32.mrb[17].mxu0  ;;  %v635_v56 = vpop.f32.mrb[17].mxu1 }
 0x142   : > { %v760_v57 = vmax.f32 %v474_v53, 0.0  ;;  %v792_v58 = vmax.f32 %v634_v54, 0.0 }
 0x143   : > { %v478_v59 = vpop.f32.mrb[18].mxu0  ;;  %v638_v60 = vpop.f32.mrb[18].mxu1 }
 0x144   : > { %825 = vst.msk [vmem:[%s1959_s12 + $0x40] sm:$0xff] %vm816_vm0, %v760_v57  ;;  %857 = vst.msk [vmem:[%s1959_s12 + $0x140] sm:$0xff] %vm816_vm0, %v792_v58  ;;  %v479_v61 = vadd.f32 %v1955_v49, %v478_v59  ;;  %v639_v62 = vadd.f32 %v1955_v49, %v638_v60  ;;  %v480_v63 = vpop.f32.mrb[19].mxu0  ;;  %v640_v0 = vpop.f32.mrb[19].mxu1 }
 0x146   : > { %v761_v1 = vmax.f32 %v479_v61, 0.0  ;;  %v793_v2 = vmax.f32 %v639_v62, 0.0 }
 0x147   : > { %v483_v3 = vpop.f32.mrb[20].mxu0  ;;  %v643_v4 = vpop.f32.mrb[20].mxu1 }
 0x148   : > { %826 = vst.msk [vmem:[%s1959_s12 + $0x48] sm:$0xff] %vm816_vm0, %v761_v1  ;;  %858 = vst.msk [vmem:[%s1959_s12 + $0x148] sm:$0xff] %vm816_vm0, %v793_v2  ;;  %v484_v5 = vadd.f32 %v1955_v49, %v483_v3  ;;  %v644_v6 = vadd.f32 %v1955_v49, %v643_v4  ;;  %v485_v7 = vpop.f32.mrb[21].mxu0  ;;  %v645_v8 = vpop.f32.mrb[21].mxu1 }
 0x14a   : > { %v762_v9 = vmax.f32 %v484_v5, 0.0  ;;  %v794_v10 = vmax.f32 %v644_v6, 0.0 }
 0x14b   : > { %v488_v11 = vpop.f32.mrb[22].mxu0  ;;  %v648_v12 = vpop.f32.mrb[22].mxu1 }
 0x14c   : > { %827 = vst.msk [vmem:[%s1959_s12 + $0x50] sm:$0xff] %vm816_vm0, %v762_v9  ;;  %859 = vst.msk [vmem:[%s1959_s12 + $0x150] sm:$0xff] %vm816_vm0, %v794_v10  ;;  %v489_v13 = vadd.f32 %v1955_v49, %v488_v11  ;;  %v649_v14 = vadd.f32 %v1955_v49, %v648_v12  ;;  %v490_v15 = vpop.f32.mrb[23].mxu0  ;;  %v650_v16 = vpop.f32.mrb[23].mxu1 }
 0x14e   : > { %v763_v17 = vmax.f32 %v489_v13, 0.0  ;;  %v795_v18 = vmax.f32 %v649_v14, 0.0 }
 0x14f   : > { %v493_v19 = vpop.f32.mrb[24].mxu0  ;;  %v653_v20 = vpop.f32.mrb[24].mxu1 }
 0x150   : > { %828 = vst.msk [vmem:[%s1959_s12 + $0x58] sm:$0xff] %vm816_vm0, %v763_v17  ;;  %860 = vst.msk [vmem:[%s1959_s12 + $0x158] sm:$0xff] %vm816_vm0, %v795_v18  ;;  %v494_v21 = vadd.f32 %v1955_v49, %v493_v19  ;;  %v654_v22 = vadd.f32 %v1955_v49, %v653_v20  ;;  %v495_v23 = vpop.f32.mrb[25].mxu0  ;;  %v655_v24 = vpop.f32.mrb[25].mxu1 }
 0x152   : > { %v764_v25 = vmax.f32 %v494_v21, 0.0  ;;  %v796_v26 = vmax.f32 %v654_v22, 0.0 }
 0x153   : > { %v498_v27 = vpop.f32.mrb[26].mxu0  ;;  %v658_v28 = vpop.f32.mrb[26].mxu1 }
 0x154   : > { %829 = vst.msk [vmem:[%s1959_s12 + $0x60] sm:$0xff] %vm816_vm0, %v764_v25  ;;  %861 = vst.msk [vmem:[%s1959_s12 + $0x160] sm:$0xff] %vm816_vm0, %v796_v26  ;;  %v499_v29 = vadd.f32 %v1955_v49, %v498_v27  ;;  %v659_v30 = vadd.f32 %v1955_v49, %v658_v28  ;;  %v500_v31 = vpop.f32.mrb[27].mxu0  ;;  %v660_v32 = vpop.f32.mrb[27].mxu1 }
 0x156   : > { %v765_v33 = vmax.f32 %v499_v29, 0.0  ;;  %v797_v34 = vmax.f32 %v659_v30, 0.0 }
 0x157   : > { %v503_v35 = vpop.f32.mrb[28].mxu0  ;;  %v663_v36 = vpop.f32.mrb[28].mxu1 }
 0x158   : > { %830 = vst.msk [vmem:[%s1959_s12 + $0x68] sm:$0xff] %vm816_vm0, %v765_v33  ;;  %862 = vst.msk [vmem:[%s1959_s12 + $0x168] sm:$0xff] %vm816_vm0, %v797_v34  ;;  %v504_v37 = vadd.f32 %v1955_v49, %v503_v35  ;;  %v664_v38 = vadd.f32 %v1955_v49, %v663_v36  ;;  %v505_v39 = vpop.f32.mrb[29].mxu0  ;;  %v665_v40 = vpop.f32.mrb[29].mxu1 }
 0x15a   : > { %v766_v41 = vmax.f32 %v504_v37, 0.0  ;;  %v798_v42 = vmax.f32 %v664_v38, 0.0 }
 0x15b   : > { %v508_v43 = vpop.f32.mrb[30].mxu0  ;;  %v668_v44 = vpop.f32.mrb[30].mxu1 }
 0x15c   : > { %831 = vst.msk [vmem:[%s1959_s12 + $0x70] sm:$0xff] %vm816_vm0, %v766_v41  ;;  %863 = vst.msk [vmem:[%s1959_s12 + $0x170] sm:$0xff] %vm816_vm0, %v798_v42  ;;  %v509_v45 = vadd.f32 %v1955_v49, %v508_v43  ;;  %v669_v46 = vadd.f32 %v1955_v49, %v668_v44  ;;  %v510_v47 = vpop.f32.mrb[31].mxu0  ;;  %v670_v48 = vpop.f32.mrb[31].mxu1 }
 0x15e   : > { %v767_v50 = vmax.f32 %v509_v45, 0.0  ;;  %v799_v51 = vmax.f32 %v669_v46, 0.0 }
 0x15f   : > { %v513_v52 = vpop.f32.mrb[32].mxu0  ;;  %v673_v53 = vpop.f32.mrb[32].mxu1 }
 0x160   : > { %832 = vst.msk [vmem:[%s1959_s12 + $0x78] sm:$0xff] %vm816_vm0, %v767_v50  ;;  %864 = vst.msk [vmem:[%s1959_s12 + $0x178] sm:$0xff] %vm816_vm0, %v799_v51  ;;  %v514_v54 = vadd.f32 %v1955_v49, %v513_v52  ;;  %v674_v55 = vadd.f32 %v1955_v49, %v673_v53  ;;  %v515_v56 = vpop.f32.mrb[33].mxu0  ;;  %v675_v57 = vpop.f32.mrb[33].mxu1 }
 0x162   : > { %v768_v58 = vmax.f32 %v514_v54, 0.0  ;;  %v800_v59 = vmax.f32 %v674_v55, 0.0 }
 0x163   : > { %v518_v60 = vpop.f32.mrb[34].mxu0  ;;  %v678_v61 = vpop.f32.mrb[34].mxu1 }
 0x164   : > { %833 = vst.msk [vmem:[%s1959_s12 + $0x80] sm:$0xff] %vm816_vm0, %v768_v58  ;;  %865 = vst.msk [vmem:[%s1959_s12 + $0x180] sm:$0xff] %vm816_vm0, %v800_v59  ;;  %v519_v62 = vadd.f32 %v1955_v49, %v518_v60  ;;  %v679_v63 = vadd.f32 %v1955_v49, %v678_v61  ;;  %v520_v0 = vpop.f32.mrb[35].mxu0  ;;  %v680_v1 = vpop.f32.mrb[35].mxu1 }
 0x166   : > { %v769_v2 = vmax.f32 %v519_v62, 0.0  ;;  %v801_v3 = vmax.f32 %v679_v63, 0.0 }
 0x167   : > { %v523_v4 = vpop.f32.mrb[36].mxu0  ;;  %v683_v5 = vpop.f32.mrb[36].mxu1 }
 0x168   : > { %834 = vst.msk [vmem:[%s1959_s12 + $0x88] sm:$0xff] %vm816_vm0, %v769_v2  ;;  %866 = vst.msk [vmem:[%s1959_s12 + $0x188] sm:$0xff] %vm816_vm0, %v801_v3  ;;  %v524_v6 = vadd.f32 %v1955_v49, %v523_v4  ;;  %v684_v7 = vadd.f32 %v1955_v49, %v683_v5  ;;  %v525_v8 = vpop.f32.mrb[37].mxu0  ;;  %v685_v9 = vpop.f32.mrb[37].mxu1 }
 0x16a   : > { %v770_v10 = vmax.f32 %v524_v6, 0.0  ;;  %v802_v11 = vmax.f32 %v684_v7, 0.0 }
 0x16b   : > { %v528_v12 = vpop.f32.mrb[38].mxu0  ;;  %v688_v13 = vpop.f32.mrb[38].mxu1 }
 0x16c   : > { %835 = vst.msk [vmem:[%s1959_s12 + $0x90] sm:$0xff] %vm816_vm0, %v770_v10  ;;  %867 = vst.msk [vmem:[%s1959_s12 + $0x190] sm:$0xff] %vm816_vm0, %v802_v11  ;;  %v529_v14 = vadd.f32 %v1955_v49, %v528_v12  ;;  %v689_v15 = vadd.f32 %v1955_v49, %v688_v13  ;;  %v530_v16 = vpop.f32.mrb[39].mxu0  ;;  %v690_v17 = vpop.f32.mrb[39].mxu1 }
 0x16e   : > { %v771_v18 = vmax.f32 %v529_v14, 0.0  ;;  %v803_v19 = vmax.f32 %v689_v15, 0.0 }
 0x16f   : > { %v533_v20 = vpop.f32.mrb[40].mxu0  ;;  %v693_v21 = vpop.f32.mrb[40].mxu1 }
 0x170   : > { %836 = vst.msk [vmem:[%s1959_s12 + $0x98] sm:$0xff] %vm816_vm0, %v771_v18  ;;  %868 = vst.msk [vmem:[%s1959_s12 + $0x198] sm:$0xff] %vm816_vm0, %v803_v19  ;;  %v534_v22 = vadd.f32 %v1955_v49, %v533_v20  ;;  %v694_v23 = vadd.f32 %v1955_v49, %v693_v21  ;;  %v535_v24 = vpop.f32.mrb[41].mxu0  ;;  %v695_v25 = vpop.f32.mrb[41].mxu1 }
 0x172   : > { %v772_v26 = vmax.f32 %v534_v22, 0.0  ;;  %v804_v27 = vmax.f32 %v694_v23, 0.0 }
 0x173   : > { %v538_v28 = vpop.f32.mrb[42].mxu0  ;;  %v698_v29 = vpop.f32.mrb[42].mxu1 }
 0x174   : > { %837 = vst.msk [vmem:[%s1959_s12 + $0xa0] sm:$0xff] %vm816_vm0, %v772_v26  ;;  %869 = vst.msk [vmem:[%s1959_s12 + $0x1a0] sm:$0xff] %vm816_vm0, %v804_v27  ;;  %v539_v30 = vadd.f32 %v1955_v49, %v538_v28  ;;  %v699_v31 = vadd.f32 %v1955_v49, %v698_v29  ;;  %v540_v32 = vpop.f32.mrb[43].mxu0  ;;  %v700_v33 = vpop.f32.mrb[43].mxu1 }
 0x176   : > { %v773_v34 = vmax.f32 %v539_v30, 0.0  ;;  %v805_v35 = vmax.f32 %v699_v31, 0.0 }
 0x177   : > { %v543_v36 = vpop.f32.mrb[44].mxu0  ;;  %v703_v37 = vpop.f32.mrb[44].mxu1 }
 0x178   : > { %838 = vst.msk [vmem:[%s1959_s12 + $0xa8] sm:$0xff] %vm816_vm0, %v773_v34  ;;  %870 = vst.msk [vmem:[%s1959_s12 + $0x1a8] sm:$0xff] %vm816_vm0, %v805_v35  ;;  %v544_v38 = vadd.f32 %v1955_v49, %v543_v36  ;;  %v704_v39 = vadd.f32 %v1955_v49, %v703_v37  ;;  %v545_v40 = vpop.f32.mrb[45].mxu0  ;;  %v705_v41 = vpop.f32.mrb[45].mxu1 }
 0x17a   : > { %v774_v42 = vmax.f32 %v544_v38, 0.0  ;;  %v806_v43 = vmax.f32 %v704_v39, 0.0 }
 0x17b   : > { %v548_v44 = vpop.f32.mrb[46].mxu0  ;;  %v708_v45 = vpop.f32.mrb[46].mxu1 }
 0x17c   : > { %839 = vst.msk [vmem:[%s1959_s12 + $0xb0] sm:$0xff] %vm816_vm0, %v774_v42  ;;  %871 = vst.msk [vmem:[%s1959_s12 + $0x1b0] sm:$0xff] %vm816_vm0, %v806_v43  ;;  %v549_v46 = vadd.f32 %v1955_v49, %v548_v44  ;;  %v709_v47 = vadd.f32 %v1955_v49, %v708_v45  ;;  %v550_v48 = vpop.f32.mrb[47].mxu0  ;;  %v710_v50 = vpop.f32.mrb[47].mxu1 }
 0x17e   : > { %v775_v51 = vmax.f32 %v549_v46, 0.0  ;;  %v807_v52 = vmax.f32 %v709_v47, 0.0 }
 0x17f   : > { %v553_v53 = vpop.f32.mrb[48].mxu0  ;;  %v713_v54 = vpop.f32.mrb[48].mxu1 }
 0x180   : > { %840 = vst.msk [vmem:[%s1959_s12 + $0xb8] sm:$0xff] %vm816_vm0, %v775_v51  ;;  %872 = vst.msk [vmem:[%s1959_s12 + $0x1b8] sm:$0xff] %vm816_vm0, %v807_v52  ;;  %v554_v55 = vadd.f32 %v1955_v49, %v553_v53  ;;  %v714_v56 = vadd.f32 %v1955_v49, %v713_v54  ;;  %v555_v57 = vpop.f32.mrb[49].mxu0  ;;  %v715_v58 = vpop.f32.mrb[49].mxu1 }
 0x182   : > { %v776_v59 = vmax.f32 %v554_v55, 0.0  ;;  %v808_v60 = vmax.f32 %v714_v56, 0.0 }
 0x183   : > { %v558_v61 = vpop.f32.mrb[50].mxu0  ;;  %v718_v62 = vpop.f32.mrb[50].mxu1 }
 0x184   : > { %841 = vst.msk [vmem:[%s1959_s12 + $0xc0] sm:$0xff] %vm816_vm0, %v776_v59  ;;  %873 = vst.msk [vmem:[%s1959_s12 + $0x1c0] sm:$0xff] %vm816_vm0, %v808_v60  ;;  %v559_v63 = vadd.f32 %v1955_v49, %v558_v61  ;;  %v719_v0 = vadd.f32 %v1955_v49, %v718_v62  ;;  %v560_v1 = vpop.f32.mrb[51].mxu0  ;;  %v720_v2 = vpop.f32.mrb[51].mxu1 }
 0x186   : > { %v777_v3 = vmax.f32 %v559_v63, 0.0  ;;  %v809_v4 = vmax.f32 %v719_v0, 0.0 }
 0x187   : > { %v563_v5 = vpop.f32.mrb[52].mxu0  ;;  %v723_v6 = vpop.f32.mrb[52].mxu1 }
 0x188   : > { %842 = vst.msk [vmem:[%s1959_s12 + $0xc8] sm:$0xff] %vm816_vm0, %v777_v3  ;;  %874 = vst.msk [vmem:[%s1959_s12 + $0x1c8] sm:$0xff] %vm816_vm0, %v809_v4  ;;  %v564_v7 = vadd.f32 %v1955_v49, %v563_v5  ;;  %v724_v8 = vadd.f32 %v1955_v49, %v723_v6  ;;  %v565_v9 = vpop.f32.mrb[53].mxu0  ;;  %v725_v10 = vpop.f32.mrb[53].mxu1 }
 0x18a   : > { %v778_v11 = vmax.f32 %v564_v7, 0.0  ;;  %v810_v12 = vmax.f32 %v724_v8, 0.0 }
 0x18b   : > { %v568_v13 = vpop.f32.mrb[54].mxu0  ;;  %v728_v14 = vpop.f32.mrb[54].mxu1 }
 0x18c   : > { %843 = vst.msk [vmem:[%s1959_s12 + $0xd0] sm:$0xff] %vm816_vm0, %v778_v11  ;;  %875 = vst.msk [vmem:[%s1959_s12 + $0x1d0] sm:$0xff] %vm816_vm0, %v810_v12  ;;  %v569_v15 = vadd.f32 %v1955_v49, %v568_v13  ;;  %v729_v16 = vadd.f32 %v1955_v49, %v728_v14  ;;  %v570_v17 = vpop.f32.mrb[55].mxu0  ;;  %v730_v18 = vpop.f32.mrb[55].mxu1 }
 0x18e   : > { %v779_v19 = vmax.f32 %v569_v15, 0.0  ;;  %v811_v20 = vmax.f32 %v729_v16, 0.0 }
 0x18f   : > { %v573_v21 = vpop.f32.mrb[56].mxu0  ;;  %v733_v22 = vpop.f32.mrb[56].mxu1 }
 0x190   : > { %844 = vst.msk [vmem:[%s1959_s12 + $0xd8] sm:$0xff] %vm816_vm0, %v779_v19  ;;  %876 = vst.msk [vmem:[%s1959_s12 + $0x1d8] sm:$0xff] %vm816_vm0, %v811_v20  ;;  %v574_v23 = vadd.f32 %v1955_v49, %v573_v21  ;;  %v734_v24 = vadd.f32 %v1955_v49, %v733_v22  ;;  %v575_v25 = vpop.f32.mrb[57].mxu0  ;;  %v735_v26 = vpop.f32.mrb[57].mxu1 }
 0x192   : > { %v780_v27 = vmax.f32 %v574_v23, 0.0  ;;  %v812_v28 = vmax.f32 %v734_v24, 0.0 }
 0x193   : > { %v578_v29 = vpop.f32.mrb[58].mxu0  ;;  %v738_v30 = vpop.f32.mrb[58].mxu1 }
 0x194   : > { %845 = vst.msk [vmem:[%s1959_s12 + $0xe0] sm:$0xff] %vm816_vm0, %v780_v27  ;;  %877 = vst.msk [vmem:[%s1959_s12 + $0x1e0] sm:$0xff] %vm816_vm0, %v812_v28  ;;  %v579_v31 = vadd.f32 %v1955_v49, %v578_v29  ;;  %v739_v32 = vadd.f32 %v1955_v49, %v738_v30  ;;  %v580_v33 = vpop.f32.mrb[59].mxu0  ;;  %v740_v34 = vpop.f32.mrb[59].mxu1 }
 0x196   : > { %v781_v35 = vmax.f32 %v579_v31, 0.0  ;;  %v813_v36 = vmax.f32 %v739_v32, 0.0 }
 0x197   : > { %v583_v37 = vpop.f32.mrb[60].mxu0  ;;  %v743_v38 = vpop.f32.mrb[60].mxu1 }
 0x198   : > { %846 = vst.msk [vmem:[%s1959_s12 + $0xe8] sm:$0xff] %vm816_vm0, %v781_v35  ;;  %878 = vst.msk [vmem:[%s1959_s12 + $0x1e8] sm:$0xff] %vm816_vm0, %v813_v36  ;;  %v584_v39 = vadd.f32 %v1955_v49, %v583_v37  ;;  %v744_v40 = vadd.f32 %v1955_v49, %v743_v38  ;;  %v585_v41 = vpop.f32.mrb[61].mxu0  ;;  %v745_v42 = vpop.f32.mrb[61].mxu1 }
 0x19a   : > { %v782_v43 = vmax.f32 %v584_v39, 0.0  ;;  %v814_v44 = vmax.f32 %v744_v40, 0.0  ;;  %887 = sbr.rel (!%p1681_p4) target bundleno = 489 (0x1e9), region = 36 }
 0x19b   : > { %v588_v45 = vpop.f32.mrb[62].mxu0  ;;  %v748_v46 = vpop.f32.mrb[62].mxu1 }
 0x19c   : > { %847 = vst.msk [vmem:[%s1959_s12 + $0xf0] sm:$0xff] %vm816_vm0, %v782_v43  ;;  %879 = vst.msk [vmem:[%s1959_s12 + $0x1f0] sm:$0xff] %vm816_vm0, %v814_v44  ;;  %v589_v47 = vadd.f32 %v1955_v49, %v588_v45  ;;  %v749_v48 = vadd.f32 %v1955_v49, %v748_v46  ;;  %v590_v50 = vpop.f32.mrb[63].mxu0  ;;  %v750_v51 = vpop.f32.mrb[63].mxu1 }
 0x19e   : > { %v783_v52 = vmax.f32 %v589_v47, 0.0  ;;  %v815_v53 = vmax.f32 %v749_v48, 0.0 }
 0x1a0   : > { %848 = vst.msk [vmem:[%s1959_s12 + $0xf8] sm:$0xff] %vm816_vm0, %v783_v52  ;;  %880 = vst.msk [vmem:[%s1959_s12 + $0x1f8] sm:$0xff] %vm816_vm0, %v815_v53 }
 0x1a1   : > { %s2371_s11 = smov (!%p890_p8, %s889_s11), 64 }
 0x1a2   : > { %s1359_s21 = sshll.u32 %s2371_s11, 7 }
 0x1a3   : > { %p1362_p9 = scmp.eq.s32.totalorder %s1359_s21, 0 }
 0x1a4   : > { %s2164_s22 = sshrl.u32 (!%p1362_p9), %s2371_s11, 6 }
 0x1a5   : > { %898 = sbr.rel (%p1362_p9) target bundleno = 489 (0x1e9), region = 40  ;;  %p1363_p10 = scmp.le.s32.totalorder (!%p1362_p9), %s2164_s22, 0 }
 0x1ac   : > { %1304 = sbr.rel (%p1363_p10) target bundleno = 468 (0x1d4), region = 116  ;;  %s2362_s15 = smov (!%p1363_p10), %s2158_s18 }
 0x1ad   : > { %s2363_s20 = smov (!%p1363_p10), %s1959_s12  ;;  %s2173_s27 = smov (!%p1363_p10), 0  }
 0x1ae   : > { %s2175_s23 = smov (!%p1363_p10), 0  }
 0x1b3 LB: >> { %v1086_v49 = vld [vmem:[%s1609_s20] sm:$0xff]  ;;  %v1088_v54 = vld [vmem:[%s1609_s20 + $0x8] sm:$0xff]  ;;  %v1090_v55 = vld [vmem:[%s1609_s20 + $0x10] sm:$0xff]  ;;  %s1214_s24 = sadd.s32 1, %s1613_s27  ;;  %s1080_s23 = sadd.s32 1, %s1617_s23   ;;  %s1617_s23 = sphi %s2175_s23, %s1080_s23   ;;  %s1613_s27 = sphi %s2173_s27, %s2366_s27   ;;  %s1609_s20 = sphi %s2363_s20, %s2365_s20   ;;  %s1605_s15 = sphi %s2362_s15, %s2364_s15  }
 0x1b4   : >> { %1087 = vst [vmem:[%s1605_s15] sm:$0xff] %v1086_v49  ;;  %1089 = vst [vmem:[%s1605_s15 + $0x8] sm:$0xff] %v1088_v54  ;;  %v1092_v56 = vld [vmem:[%s1609_s20 + $0x18] sm:$0xff]  ;;  %v1094_v57 = vld [vmem:[%s1609_s20 + $0x20] sm:$0xff]  ;;  %p1215_p11 = scmp.ge.s32.totalorder %s1214_s24, %s2164_s22  ;;  %p1079_p12 = scmp.ge.s32.totalorder %s1080_s23, %s2164_s22 }
 0x1b5   : >> { %1091 = vst [vmem:[%s1605_s15 + $0x10] sm:$0xff] %v1090_v55  ;;  %v1096_v58 = vld [vmem:[%s1609_s20 + $0x28] sm:$0xff]  ;;  %1093 = vst [vmem:[%s1605_s15 + $0x18] sm:$0xff] %v1092_v56  ;;  %v1098_v59 = vld [vmem:[%s1609_s20 + $0x30] sm:$0xff] }
 0x1b6   : >> { %1095 = vst [vmem:[%s1605_s15 + $0x20] sm:$0xff] %v1094_v57  ;;  %1097 = vst [vmem:[%s1605_s15 + $0x28] sm:$0xff] %v1096_v58  ;;  %v1100_v60 = vld [vmem:[%s1609_s20 + $0x38] sm:$0xff]  ;;  %v1102_v61 = vld [vmem:[%s1609_s20 + $0x40] sm:$0xff]  ;;  %s2373_s24 = smov (%p1215_p11, %s1214_s24), 0 }
 0x1b7   : >> { %1099 = vst [vmem:[%s1605_s15 + $0x30] sm:$0xff] %v1098_v59  ;;  %1101 = vst [vmem:[%s1605_s15 + $0x38] sm:$0xff] %v1100_v60  ;;  %v1104_v62 = vld [vmem:[%s1609_s20 + $0x48] sm:$0xff]  ;;  %v1106_v63 = vld [vmem:[%s1609_s20 + $0x50] sm:$0xff]  ;;  %s1364_s25 = sshll.u32 %s2373_s24, 9  ;;  %s2366_s27 = smov %s2373_s24 }
 0x1b8   : >> { %1103 = vst [vmem:[%s1605_s15 + $0x40] sm:$0xff] %v1102_v61  ;;  %v1108_v0 = vld [vmem:[%s1609_s20 + $0x58] sm:$0xff]  ;;  %1105 = vst [vmem:[%s1605_s15 + $0x48] sm:$0xff] %v1104_v62  ;;  %v1110_v1 = vld [vmem:[%s1609_s20 + $0x60] sm:$0xff]  ;;  %s2231_s26 = scalar_lea.vmem %s1959_s12, %s1364_s25 [#allocation2]   ;;  %s2234_s28 = scalar_lea.vmem %s2158_s18, %s1364_s25  }
 0x1b9   : >> { %1107 = vst [vmem:[%s1605_s15 + $0x50] sm:$0xff] %v1106_v63  ;;  %1109 = vst [vmem:[%s1605_s15 + $0x58] sm:$0xff] %v1108_v0  ;;  %v1112_v2 = vld [vmem:[%s1609_s20 + $0x68] sm:$0xff]  ;;  %v1114_v3 = vld [vmem:[%s1609_s20 + $0x70] sm:$0xff] }
 0x1ba   : >> { %1111 = vst [vmem:[%s1605_s15 + $0x60] sm:$0xff] %v1110_v1  ;;  %1113 = vst [vmem:[%s1605_s15 + $0x68] sm:$0xff] %v1112_v2  ;;  %v1116_v4 = vld [vmem:[%s1609_s20 + $0x78] sm:$0xff]  ;;  %v1118_v5 = vld [vmem:[%s1609_s20 + $0x80] sm:$0xff] }
 0x1bb   : >> { %1115 = vst [vmem:[%s1605_s15 + $0x70] sm:$0xff] %v1114_v3  ;;  %v1120_v6 = vld [vmem:[%s1609_s20 + $0x88] sm:$0xff]  ;;  %1117 = vst [vmem:[%s1605_s15 + $0x78] sm:$0xff] %v1116_v4  ;;  %v1122_v7 = vld [vmem:[%s1609_s20 + $0x90] sm:$0xff] }
 0x1bc   : >> { %1119 = vst [vmem:[%s1605_s15 + $0x80] sm:$0xff] %v1118_v5  ;;  %1121 = vst [vmem:[%s1605_s15 + $0x88] sm:$0xff] %v1120_v6  ;;  %v1124_v8 = vld [vmem:[%s1609_s20 + $0x98] sm:$0xff]  ;;  %v1126_v9 = vld [vmem:[%s1609_s20 + $0xa0] sm:$0xff] }
 0x1bd   : >> { %1123 = vst [vmem:[%s1605_s15 + $0x90] sm:$0xff] %v1122_v7  ;;  %1125 = vst [vmem:[%s1605_s15 + $0x98] sm:$0xff] %v1124_v8  ;;  %v1128_v10 = vld [vmem:[%s1609_s20 + $0xa8] sm:$0xff]  ;;  %v1130_v11 = vld [vmem:[%s1609_s20 + $0xb0] sm:$0xff] }
 0x1be   : >> { %1127 = vst [vmem:[%s1605_s15 + $0xa0] sm:$0xff] %v1126_v9  ;;  %v1132_v12 = vld [vmem:[%s1609_s20 + $0xb8] sm:$0xff]  ;;  %1129 = vst [vmem:[%s1605_s15 + $0xa8] sm:$0xff] %v1128_v10  ;;  %v1134_v13 = vld [vmem:[%s1609_s20 + $0xc0] sm:$0xff] }
 0x1bf   : >> { %1131 = vst [vmem:[%s1605_s15 + $0xb0] sm:$0xff] %v1130_v11  ;;  %1133 = vst [vmem:[%s1605_s15 + $0xb8] sm:$0xff] %v1132_v12  ;;  %v1136_v14 = vld [vmem:[%s1609_s20 + $0xc8] sm:$0xff]  ;;  %v1138_v15 = vld [vmem:[%s1609_s20 + $0xd0] sm:$0xff] }
 0x1c0   : >> { %1135 = vst [vmem:[%s1605_s15 + $0xc0] sm:$0xff] %v1134_v13  ;;  %1137 = vst [vmem:[%s1605_s15 + $0xc8] sm:$0xff] %v1136_v14  ;;  %v1140_v16 = vld [vmem:[%s1609_s20 + $0xd8] sm:$0xff]  ;;  %v1142_v17 = vld [vmem:[%s1609_s20 + $0xe0] sm:$0xff] }
 0x1c1   : >> { %1139 = vst [vmem:[%s1605_s15 + $0xd0] sm:$0xff] %v1138_v15  ;;  %v1144_v18 = vld [vmem:[%s1609_s20 + $0xe8] sm:$0xff]  ;;  %1141 = vst [vmem:[%s1605_s15 + $0xd8] sm:$0xff] %v1140_v16  ;;  %v1146_v19 = vld [vmem:[%s1609_s20 + $0xf0] sm:$0xff] }
 0x1c2   : >> { %1143 = vst [vmem:[%s1605_s15 + $0xe0] sm:$0xff] %v1142_v17  ;;  %1145 = vst [vmem:[%s1605_s15 + $0xe8] sm:$0xff] %v1144_v18  ;;  %v1148_v20 = vld [vmem:[%s1609_s20 + $0xf8] sm:$0xff]  ;;  %v1150_v21 = vld [vmem:[%s1609_s20 + $0x100] sm:$0xff] }
 0x1c3   : >> { %1147 = vst [vmem:[%s1605_s15 + $0xf0] sm:$0xff] %v1146_v19  ;;  %1149 = vst [vmem:[%s1605_s15 + $0xf8] sm:$0xff] %v1148_v20  ;;  %v1152_v22 = vld [vmem:[%s1609_s20 + $0x108] sm:$0xff]  ;;  %v1154_v23 = vld [vmem:[%s1609_s20 + $0x110] sm:$0xff] }
 0x1c4   : >> { %1151 = vst [vmem:[%s1605_s15 + $0x100] sm:$0xff] %v1150_v21  ;;  %v1156_v24 = vld [vmem:[%s1609_s20 + $0x118] sm:$0xff]  ;;  %1153 = vst [vmem:[%s1605_s15 + $0x108] sm:$0xff] %v1152_v22  ;;  %v1158_v25 = vld [vmem:[%s1609_s20 + $0x120] sm:$0xff] }
 0x1c5   : >> { %1155 = vst [vmem:[%s1605_s15 + $0x110] sm:$0xff] %v1154_v23  ;;  %1157 = vst [vmem:[%s1605_s15 + $0x118] sm:$0xff] %v1156_v24  ;;  %v1160_v26 = vld [vmem:[%s1609_s20 + $0x128] sm:$0xff]  ;;  %v1162_v27 = vld [vmem:[%s1609_s20 + $0x130] sm:$0xff] }
 0x1c6   : >> { %1159 = vst [vmem:[%s1605_s15 + $0x120] sm:$0xff] %v1158_v25  ;;  %1161 = vst [vmem:[%s1605_s15 + $0x128] sm:$0xff] %v1160_v26  ;;  %v1164_v28 = vld [vmem:[%s1609_s20 + $0x138] sm:$0xff]  ;;  %v1166_v29 = vld [vmem:[%s1609_s20 + $0x140] sm:$0xff] }
 0x1c7   : >> { %1163 = vst [vmem:[%s1605_s15 + $0x130] sm:$0xff] %v1162_v27  ;;  %v1168_v30 = vld [vmem:[%s1609_s20 + $0x148] sm:$0xff]  ;;  %1165 = vst [vmem:[%s1605_s15 + $0x138] sm:$0xff] %v1164_v28  ;;  %v1170_v31 = vld [vmem:[%s1609_s20 + $0x150] sm:$0xff] }
 0x1c8   : >> { %1167 = vst [vmem:[%s1605_s15 + $0x140] sm:$0xff] %v1166_v29  ;;  %1169 = vst [vmem:[%s1605_s15 + $0x148] sm:$0xff] %v1168_v30  ;;  %v1172_v32 = vld [vmem:[%s1609_s20 + $0x158] sm:$0xff]  ;;  %v1174_v33 = vld [vmem:[%s1609_s20 + $0x160] sm:$0xff] }
 0x1c9   : >> { %1171 = vst [vmem:[%s1605_s15 + $0x150] sm:$0xff] %v1170_v31  ;;  %1173 = vst [vmem:[%s1605_s15 + $0x158] sm:$0xff] %v1172_v32  ;;  %v1176_v34 = vld [vmem:[%s1609_s20 + $0x168] sm:$0xff]  ;;  %v1178_v35 = vld [vmem:[%s1609_s20 + $0x170] sm:$0xff] }
 0x1ca   : >> { %1175 = vst [vmem:[%s1605_s15 + $0x160] sm:$0xff] %v1174_v33  ;;  %v1180_v36 = vld [vmem:[%s1609_s20 + $0x178] sm:$0xff]  ;;  %1177 = vst [vmem:[%s1605_s15 + $0x168] sm:$0xff] %v1176_v34  ;;  %v1182_v37 = vld [vmem:[%s1609_s20 + $0x180] sm:$0xff] }
 0x1cb   : >> { %1179 = vst [vmem:[%s1605_s15 + $0x170] sm:$0xff] %v1178_v35  ;;  %1181 = vst [vmem:[%s1605_s15 + $0x178] sm:$0xff] %v1180_v36  ;;  %v1184_v38 = vld [vmem:[%s1609_s20 + $0x188] sm:$0xff]  ;;  %v1186_v39 = vld [vmem:[%s1609_s20 + $0x190] sm:$0xff] }
 0x1cc   : >> { %1183 = vst [vmem:[%s1605_s15 + $0x180] sm:$0xff] %v1182_v37  ;;  %1185 = vst [vmem:[%s1605_s15 + $0x188] sm:$0xff] %v1184_v38  ;;  %v1188_v40 = vld [vmem:[%s1609_s20 + $0x198] sm:$0xff]  ;;  %v1190_v41 = vld [vmem:[%s1609_s20 + $0x1a0] sm:$0xff] }
 0x1cd   : >> { %1187 = vst [vmem:[%s1605_s15 + $0x190] sm:$0xff] %v1186_v39  ;;  %v1192_v42 = vld [vmem:[%s1609_s20 + $0x1a8] sm:$0xff]  ;;  %1189 = vst [vmem:[%s1605_s15 + $0x198] sm:$0xff] %v1188_v40  ;;  %v1194_v43 = vld [vmem:[%s1609_s20 + $0x1b0] sm:$0xff]  ;;  %1082 = sbr.rel (!%p1079_p12) target bundleno = 435 (0x1b3), region = 122 }
 0x1ce   : >> { %1191 = vst [vmem:[%s1605_s15 + $0x1a0] sm:$0xff] %v1190_v41  ;;  %1193 = vst [vmem:[%s1605_s15 + $0x1a8] sm:$0xff] %v1192_v42  ;;  %v1196_v44 = vld [vmem:[%s1609_s20 + $0x1b8] sm:$0xff]  ;;  %v1198_v45 = vld [vmem:[%s1609_s20 + $0x1c0] sm:$0xff] }
 0x1cf   : >> { %1195 = vst [vmem:[%s1605_s15 + $0x1b0] sm:$0xff] %v1194_v43  ;;  %1197 = vst [vmem:[%s1605_s15 + $0x1b8] sm:$0xff] %v1196_v44  ;;  %v1200_v46 = vld [vmem:[%s1609_s20 + $0x1c8] sm:$0xff]  ;;  %v1202_v47 = vld [vmem:[%s1609_s20 + $0x1d0] sm:$0xff] }
 0x1d0   : >> { %1199 = vst [vmem:[%s1605_s15 + $0x1c0] sm:$0xff] %v1198_v45  ;;  %v1204_v48 = vld [vmem:[%s1609_s20 + $0x1d8] sm:$0xff]  ;;  %1201 = vst [vmem:[%s1605_s15 + $0x1c8] sm:$0xff] %v1200_v46  ;;  %v1206_v50 = vld [vmem:[%s1609_s20 + $0x1e0] sm:$0xff] }
 0x1d1   : >> { %1203 = vst [vmem:[%s1605_s15 + $0x1d0] sm:$0xff] %v1202_v47  ;;  %1205 = vst [vmem:[%s1605_s15 + $0x1d8] sm:$0xff] %v1204_v48  ;;  %v1208_v51 = vld [vmem:[%s1609_s20 + $0x1e8] sm:$0xff]  ;;  %v1210_v52 = vld [vmem:[%s1609_s20 + $0x1f0] sm:$0xff] }
 0x1d2   : >> { %1207 = vst [vmem:[%s1605_s15 + $0x1e0] sm:$0xff] %v1206_v50  ;;  %1209 = vst [vmem:[%s1605_s15 + $0x1e8] sm:$0xff] %v1208_v51  ;;  %v1212_v53 = vld [vmem:[%s1609_s20 + $0x1f8] sm:$0xff]  ;;  %s2365_s20 = smov %s2231_s26 }
 0x1d3   : >> { %1211 = vst [vmem:[%s1605_s15 + $0x1f0] sm:$0xff] %v1210_v52  ;;  %1213 = vst [vmem:[%s1605_s15 + $0x1f8] sm:$0xff] %v1212_v53  ;;  %s2364_s15 = smov %s2234_s28 }
 0x1d4 PF: > { %s2339_s29 = sand.u32 63, %s2371_s11   ;;  %s1376_s30 = sshll.u32 %s2164_s22, 9 }
 0x1d5   : > { %s1225_s4 = scalar_lea.vmem %s1959_s12, %s1376_s30 [#allocation2]   ;;  %s1227_s5 = scalar_lea.vmem %s2158_s18, %s1376_s30  }
 0x1d6   : > { %p1369_p13 = scmp.le.s32.totalorder %s2339_s29, 0 }
 0x1d7   : > { %s1619_s6 = smov (!%p1369_p13), %s1227_s5   ;;  %s1623_s7 = smov (!%p1369_p13), %s1225_s4  }
 0x1d8   : > { %1318 = sbr.rel (%p1369_p13) target bundleno = 489 (0x1e9), region = 127  ;;  %s1627_s8 = smov (!%p1369_p13), 0  }
 0x1d9   : > { %s1631_s9 = smov (!%p1369_p13), 0  }
 0x1df LB: >> { %v1237_v49 = vld [vmem:[%s1625_s7] sm:$0xff]  ;;  %s1239_s11 = sadd.s32 1, %s1629_s8  ;;  %s1231_s9 = sadd.s32 1, %s1633_s9   ;;  %s1633_s9 = sphi %s1631_s9, %s1231_s9   ;;  %s1629_s8 = sphi %s1627_s8, %s1628_s8   ;;  %s1625_s7 = sphi %s1623_s7, %s1244_s7   ;;  %s1621_s6 = sphi %s1619_s6, %s1245_s6  }
 0x1e0   : >> { %1238 = vst [vmem:[%s1621_s6] sm:$0xff] %v1237_v49  ;;  %p1240_p0 = scmp.ge.s32.totalorder %s1239_s11, %s2339_s29  ;;  %p1230_p1 = scmp.ge.s32.totalorder %s1231_s9, %s2339_s29 }
 0x1e2   : >> { %s2375_s11 = smov (%p1240_p0, %s1239_s11), 0  ;;  %1233 = sbr.rel (!%p1230_p1) target bundleno = 479 (0x1df), region = 133 }
 0x1e3   : >> { %s1370_s12 = sshll.u32 %s2375_s11, 3  ;;  %s1628_s8 = smov %s2375_s11  }
 0x1e4   : >> { %s1244_s7 = scalar_lea.vmem %s1225_s4, %s1370_s12 [#allocation2]   ;;  %s1245_s6 = scalar_lea.vmem %s1227_s5, %s1370_s12  }
 0x1e9 PF: > { %p10_p2 = scmp.ge.s32.totalorder %s1671_s16, 4   ;;  %s2367_s12 = smov %s1597_s13 }
 0x1ea   : > { %s2368_s13 = smov %s1679_s19  ;;  %s2369_s14 = smov %s1671_s16 }
 0x1eb   :  { %12 = sbr.rel (!%p10_p2) target bundleno = 2 (0x2), region = 144 }

// kernel: convdqn_forward.5
= control target key start
LH: loop header
LB: loop body
LE: loop exit
PB: predicated region body
PF: predicated region fallthrough
CT: control target
= control target key end

     0   :  { %v696_v0 = vmov 0.0|0.0   ;;  %vm530_vm0 = vcmask 523264   ;;  %s1303_s1 = inlined_call_operand.vmem [shape: f32[512,64], index: 1, kind: input, shape index: {}]   ;;  %s1304_s0 = inlined_call_operand.vmem [shape: f32[162,512], index: 0, kind: input, shape index: {}]   ;;  %s1305_s2 = inlined_call_operand.vmem [shape: f32[1,64], index: 2, kind: input, shape index: {}]   ;;  %s1306_s3 = inlined_call_operand.vmem [shape: f32[162,64], index: 3, kind: output, shape index: {}]  }
   0x1   :  { %557 = vmatprep.subr.bf16.mxu1 %v696_v0  ;;  %v98_v1 = vld [vmem:[%s1303_s1] sm:$0xff]  ;;  %v99_v2 = vld [vmem:[%s1303_s1 + $0x8] sm:$0xff]  ;;  %605 = vmatprep.subr.bf16.mxu0 %v696_v0  ;;  %v100_v6 = vld [vmem:[%s1303_s1 + $0x10] sm:$0xff] }
   0x2   :  { %v130_v3 = vld [vmem:[%s1303_s1 + $0x100] sm:$0xff]  ;;  %v558_v4 = vpack.c.bf16 %v99_v2, %v98_v1  ;;  %v131_v5 = vld [vmem:[%s1303_s1 + $0x108] sm:$0xff]  ;;  %v101_v7 = vld [vmem:[%s1303_s1 + $0x18] sm:$0xff] }
   0x3   :  { %v606_v8 = vpack.c.bf16 %v131_v5, %v130_v3  ;;  %v132_v9 = vld [vmem:[%s1303_s1 + $0x110] sm:$0xff]  ;;  %v133_v10 = vld [vmem:[%s1303_s1 + $0x118] sm:$0xff]  ;;  %v561_v11 = vpack.c.bf16 %v101_v7, %v100_v6  ;;  %v102_v13 = vld [vmem:[%s1303_s1 + $0x20] sm:$0xff] }
   0x4   :  { %559 = vmatpush1.bf16.msra.mxu1 %v558_v4  ;;  %v609_v12 = vpack.c.bf16 %v133_v10, %v132_v9  ;;  %v103_v14 = vld [vmem:[%s1303_s1 + $0x28] sm:$0xff]  ;;  %v134_v15 = vld [vmem:[%s1303_s1 + $0x120] sm:$0xff]  ;;  %v104_v19 = vld [vmem:[%s1303_s1 + $0x30] sm:$0xff] }
   0x5   :  { %607 = vmatpush1.bf16.msra.mxu0 %v606_v8  ;;  %560 = vmatprep.subr.bf16.mxu1 %v696_v0  ;;  %v135_v16 = vld [vmem:[%s1303_s1 + $0x128] sm:$0xff]  ;;  %v564_v17 = vpack.c.bf16 %v103_v14, %v102_v13  ;;  %v105_v20 = vld [vmem:[%s1303_s1 + $0x38] sm:$0xff]  ;;  %v136_v21 = vld [vmem:[%s1303_s1 + $0x130] sm:$0xff] }
   0x6   :  { %608 = vmatprep.subr.bf16.mxu0 %v696_v0  ;;  %v612_v18 = vpack.c.bf16 %v135_v16, %v134_v15  ;;  %v137_v22 = vld [vmem:[%s1303_s1 + $0x138] sm:$0xff]  ;;  %v567_v23 = vpack.c.bf16 %v105_v20, %v104_v19  ;;  %v106_v25 = vld [vmem:[%s1303_s1 + $0x40] sm:$0xff]  ;;  %v107_v26 = vld [vmem:[%s1303_s1 + $0x48] sm:$0xff] }
   0x7   :  { %v615_v24 = vpack.c.bf16 %v137_v22, %v136_v21  ;;  %v138_v27 = vld [vmem:[%s1303_s1 + $0x140] sm:$0xff]  ;;  %v139_v28 = vld [vmem:[%s1303_s1 + $0x148] sm:$0xff]  ;;  %v570_v29 = vpack.c.bf16 %v107_v26, %v106_v25  ;;  %v108_v31 = vld [vmem:[%s1303_s1 + $0x50] sm:$0xff] }
   0x8   :  { %562 = vmatpush1.bf16.msra.mxu1 %v561_v11  ;;  %v618_v30 = vpack.c.bf16 %v139_v28, %v138_v27  ;;  %v109_v32 = vld [vmem:[%s1303_s1 + $0x58] sm:$0xff]  ;;  %v140_v33 = vld [vmem:[%s1303_s1 + $0x150] sm:$0xff]  ;;  %v110_v37 = vld [vmem:[%s1303_s1 + $0x60] sm:$0xff] }
   0x9   :  { %610 = vmatpush1.bf16.msra.mxu0 %v609_v12  ;;  %563 = vmatprep.subr.bf16.mxu1 %v696_v0  ;;  %v141_v34 = vld [vmem:[%s1303_s1 + $0x158] sm:$0xff]  ;;  %v573_v35 = vpack.c.bf16 %v109_v32, %v108_v31  ;;  %v111_v38 = vld [vmem:[%s1303_s1 + $0x68] sm:$0xff]  ;;  %v142_v39 = vld [vmem:[%s1303_s1 + $0x160] sm:$0xff] }
   0xa   :  { %611 = vmatprep.subr.bf16.mxu0 %v696_v0  ;;  %v621_v36 = vpack.c.bf16 %v141_v34, %v140_v33  ;;  %v143_v40 = vld [vmem:[%s1303_s1 + $0x168] sm:$0xff]  ;;  %v17_v42 = vld [vmem:[%s1304_s0 + $0x18] sm:$0xff]  ;;  %v576_v43 = vpack.c.bf16 %v111_v38, %v110_v37  ;;  %v112_v45 = vld [vmem:[%s1303_s1 + $0x70] sm:$0xff] }
   0xb   :  { %v15_v41 = vld [vmem:[%s1304_s0 + $0x8] sm:$0xff]  ;;  %403 = vmatprep.mubr.f32.mxu0 %v17_v42  ;;  %v624_v44 = vpack.c.bf16 %v143_v40, %v142_v39  ;;  %v113_v46 = vld [vmem:[%s1303_s1 + $0x78] sm:$0xff]  ;;  %v144_v47 = vld [vmem:[%s1303_s1 + $0x170] sm:$0xff] }
   0xc   :  { %565 = vmatpush1.bf16.msra.mxu1 %v564_v17  ;;  %233 = vmatprep.mubr.f32.mxu1 %v15_v41  ;;  %v145_v48 = vld [vmem:[%s1303_s1 + $0x178] sm:$0xff]  ;;  %v579_v49 = vpack.c.bf16 %v113_v46, %v112_v45  ;;  %v114_v51 = vld [vmem:[%s1303_s1 + $0x80] sm:$0xff]  ;;  %v115_v52 = vld [vmem:[%s1303_s1 + $0x88] sm:$0xff] }
   0xd   :  { %613 = vmatpush1.bf16.msra.mxu0 %v612_v18  ;;  %566 = vmatprep.subr.bf16.mxu1 %v696_v0  ;;  %v627_v50 = vpack.c.bf16 %v145_v48, %v144_v47  ;;  %v146_v53 = vld [vmem:[%s1303_s1 + $0x180] sm:$0xff]  ;;  %v147_v54 = vld [vmem:[%s1303_s1 + $0x188] sm:$0xff]  ;;  %v582_v55 = vpack.c.bf16 %v115_v52, %v114_v51  ;;  %v116_v57 = vld [vmem:[%s1303_s1 + $0x90] sm:$0xff] }
   0xe   :  { %614 = vmatprep.subr.bf16.mxu0 %v696_v0  ;;  %v630_v56 = vpack.c.bf16 %v147_v54, %v146_v53  ;;  %v117_v58 = vld [vmem:[%s1303_s1 + $0x98] sm:$0xff]  ;;  %v148_v59 = vld [vmem:[%s1303_s1 + $0x190] sm:$0xff]  ;;  %v118_v63 = vld [vmem:[%s1303_s1 + $0xa0] sm:$0xff] }
   0xf   :  { %v149_v60 = vld [vmem:[%s1303_s1 + $0x198] sm:$0xff]  ;;  %v585_v61 = vpack.c.bf16 %v117_v58, %v116_v57  ;;  %v119_v1 = vld [vmem:[%s1303_s1 + $0xa8] sm:$0xff]  ;;  %v150_v2 = vld [vmem:[%s1303_s1 + $0x1a0] sm:$0xff] }
  0x10   :  { %568 = vmatpush1.bf16.msra.mxu1 %v567_v23  ;;  %v633_v62 = vpack.c.bf16 %v149_v60, %v148_v59  ;;  %v151_v3 = vld [vmem:[%s1303_s1 + $0x1a8] sm:$0xff]  ;;  %v588_v4 = vpack.c.bf16 %v119_v1, %v118_v63  ;;  %v120_v6 = vld [vmem:[%s1303_s1 + $0xb0] sm:$0xff]  ;;  %v121_v7 = vld [vmem:[%s1303_s1 + $0xb8] sm:$0xff] }
  0x11   :  { %616 = vmatpush1.bf16.msra.mxu0 %v615_v24  ;;  %569 = vmatprep.subr.bf16.mxu1 %v696_v0  ;;  %v636_v5 = vpack.c.bf16 %v151_v3, %v150_v2  ;;  %v152_v8 = vld [vmem:[%s1303_s1 + $0x1b0] sm:$0xff]  ;;  %v153_v9 = vld [vmem:[%s1303_s1 + $0x1b8] sm:$0xff]  ;;  %v591_v10 = vpack.c.bf16 %v121_v7, %v120_v6  ;;  %v122_v12 = vld [vmem:[%s1303_s1 + $0xc0] sm:$0xff] }
  0x12   :  { %617 = vmatprep.subr.bf16.mxu0 %v696_v0  ;;  %v639_v11 = vpack.c.bf16 %v153_v9, %v152_v8  ;;  %v123_v13 = vld [vmem:[%s1303_s1 + $0xc8] sm:$0xff]  ;;  %v154_v14 = vld [vmem:[%s1303_s1 + $0x1c0] sm:$0xff]  ;;  %v124_v18 = vld [vmem:[%s1303_s1 + $0xd0] sm:$0xff] }
  0x13   :  { %v155_v15 = vld [vmem:[%s1303_s1 + $0x1c8] sm:$0xff]  ;;  %v594_v16 = vpack.c.bf16 %v123_v13, %v122_v12  ;;  %v125_v19 = vld [vmem:[%s1303_s1 + $0xd8] sm:$0xff]  ;;  %v156_v20 = vld [vmem:[%s1303_s1 + $0x1d0] sm:$0xff] }
  0x14   :  { %571 = vmatpush1.bf16.msra.mxu1 %v570_v29  ;;  %v642_v17 = vpack.c.bf16 %v155_v15, %v154_v14  ;;  %v157_v21 = vld [vmem:[%s1303_s1 + $0x1d8] sm:$0xff]  ;;  %v597_v22 = vpack.c.bf16 %v125_v19, %v124_v18  ;;  %v126_v24 = vld [vmem:[%s1303_s1 + $0xe0] sm:$0xff]  ;;  %v127_v25 = vld [vmem:[%s1303_s1 + $0xe8] sm:$0xff] }
  0x15   :  { %619 = vmatpush1.bf16.msra.mxu0 %v618_v30  ;;  %572 = vmatprep.subr.bf16.mxu1 %v696_v0  ;;  %v645_v23 = vpack.c.bf16 %v157_v21, %v156_v20  ;;  %v158_v26 = vld [vmem:[%s1303_s1 + $0x1e0] sm:$0xff]  ;;  %v159_v27 = vld [vmem:[%s1303_s1 + $0x1e8] sm:$0xff]  ;;  %v600_v28 = vpack.c.bf16 %v127_v25, %v126_v24  ;;  %v128_v30 = vld [vmem:[%s1303_s1 + $0xf0] sm:$0xff] }
  0x16   :  { %620 = vmatprep.subr.bf16.mxu0 %v696_v0  ;;  %v648_v29 = vpack.c.bf16 %v159_v27, %v158_v26  ;;  %v129_v31 = vld [vmem:[%s1303_s1 + $0xf8] sm:$0xff]  ;;  %v160_v32 = vld [vmem:[%s1303_s1 + $0x1f0] sm:$0xff]  ;;  %v19_v38 = vld [vmem:[%s1304_s0 + $0x28] sm:$0xff] }
  0x17   :  { %v161_v33 = vld [vmem:[%s1303_s1 + $0x1f8] sm:$0xff]  ;;  %v603_v34 = vpack.c.bf16 %v129_v31, %v128_v30  ;;  %v16_v37 = vld [vmem:[%s1304_s0 + $0x10] sm:$0xff]  ;;  %v23_v41 = vld [vmem:[%s1304_s0 + $0x48] sm:$0xff] }
  0x18   :  { %574 = vmatpush1.bf16.msra.mxu1 %v573_v35  ;;  %v651_v35 = vpack.c.bf16 %v161_v33, %v160_v32  ;;  %v21_v39 = vld [vmem:[%s1304_s0 + $0x38] sm:$0xff]  ;;  %v20_v40 = vld [vmem:[%s1304_s0 + $0x30] sm:$0xff]  ;;  %v27_v45 = vld [vmem:[%s1304_s0 + $0x68] sm:$0xff] }
  0x19   :  { %622 = vmatpush1.bf16.msra.mxu0 %v621_v36  ;;  %575 = vmatprep.subr.bf16.mxu1 %v696_v0  ;;  %v14_v36 = vld [vmem:[%s1304_s0] sm:$0xff]  ;;  %v25_v42 = vld [vmem:[%s1304_s0 + $0x58] sm:$0xff]  ;;  %v28_v48 = vld [vmem:[%s1304_s0 + $0x70] sm:$0xff] }
  0x1a   :  { %623 = vmatprep.subr.bf16.mxu0 %v696_v0  ;;  %v29_v46 = vld [vmem:[%s1304_s0 + $0x78] sm:$0xff]  ;;  %v26_v47 = vld [vmem:[%s1304_s0 + $0x60] sm:$0xff]  ;;  %v32_v52 = vld [vmem:[%s1304_s0 + $0x90] sm:$0xff] }
  0x1b   :  { %v30_v51 = vld [vmem:[%s1304_s0 + $0x80] sm:$0xff]  ;;  %v35_v53 = vld [vmem:[%s1304_s0 + $0xa8] sm:$0xff]  ;;  %v37_v54 = vld [vmem:[%s1304_s0 + $0xb8] sm:$0xff] }
  0x1c   :  { %577 = vmatpush1.bf16.msra.mxu1 %v576_v43  ;;  %v22_v43 = vld [vmem:[%s1304_s0 + $0x40] sm:$0xff]  ;;  %v39_v57 = vld [vmem:[%s1304_s0 + $0xc8] sm:$0xff]  ;;  %v41_v58 = vld [vmem:[%s1304_s0 + $0xd8] sm:$0xff] }
  0x1d   :  { %625 = vmatpush1.bf16.msra.mxu0 %v624_v44  ;;  %578 = vmatprep.subr.bf16.mxu1 %v696_v0  ;;  %v24_v44 = vld [vmem:[%s1304_s0 + $0x50] sm:$0xff]  ;;  %v38_v59 = vld [vmem:[%s1304_s0 + $0xc0] sm:$0xff]  ;;  %v47_v2 = vld [vmem:[%s1304_s0 + $0x108] sm:$0xff] }
  0x1e   :  { %626 = vmatprep.subr.bf16.mxu0 %v696_v0  ;;  %v40_v60 = vld [vmem:[%s1304_s0 + $0xd0] sm:$0xff]  ;;  %v42_v63 = vld [vmem:[%s1304_s0 + $0xe0] sm:$0xff]  ;;  %v49_v3 = vld [vmem:[%s1304_s0 + $0x118] sm:$0xff] }
  0x1f   :  { %v44_v1 = vld [vmem:[%s1304_s0 + $0xf0] sm:$0xff]  ;;  %v51_v6 = vld [vmem:[%s1304_s0 + $0x128] sm:$0xff]  ;;  %v53_v7 = vld [vmem:[%s1304_s0 + $0x138] sm:$0xff] }
  0x20   :  { %580 = vmatpush1.bf16.msra.mxu1 %v579_v49  ;;  %v31_v49 = vld [vmem:[%s1304_s0 + $0x88] sm:$0xff]  ;;  %v50_v8 = vld [vmem:[%s1304_s0 + $0x120] sm:$0xff]  ;;  %v52_v9 = vld [vmem:[%s1304_s0 + $0x130] sm:$0xff] }
  0x21   :  { %628 = vmatpush1.bf16.msra.mxu0 %v627_v50  ;;  %581 = vmatprep.subr.bf16.mxu1 %v696_v0  ;;  %v33_v50 = vld [vmem:[%s1304_s0 + $0x98] sm:$0xff]  ;;  %v54_v12 = vld [vmem:[%s1304_s0 + $0x140] sm:$0xff]  ;;  %v56_v13 = vld [vmem:[%s1304_s0 + $0x150] sm:$0xff] }
  0x22   :  { %629 = vmatprep.subr.bf16.mxu0 %v696_v0  ;;  %v59_v14 = vld [vmem:[%s1304_s0 + $0x168] sm:$0xff]  ;;  %v61_v15 = vld [vmem:[%s1304_s0 + $0x178] sm:$0xff]  ;;  %v62_v20 = vld [vmem:[%s1304_s0 + $0x180] sm:$0xff] }
  0x23   :  { %v63_v18 = vld [vmem:[%s1304_s0 + $0x188] sm:$0xff]  ;;  %v65_v19 = vld [vmem:[%s1304_s0 + $0x198] sm:$0xff]  ;;  %v64_v21 = vld [vmem:[%s1304_s0 + $0x190] sm:$0xff] }
  0x24   :  { %583 = vmatpush1.bf16.msra.mxu1 %v582_v55  ;;  %v34_v55 = vld [vmem:[%s1304_s0 + $0xa0] sm:$0xff]  ;;  %v68_v25 = vld [vmem:[%s1304_s0 + $0x1b0] sm:$0xff]  ;;  %v71_v26 = vld [vmem:[%s1304_s0 + $0x1c8] sm:$0xff] }
  0x25   :  { %631 = vmatpush1.bf16.msra.mxu0 %v630_v56  ;;  %584 = vmatprep.subr.bf16.mxu1 %v696_v0  ;;  %v36_v56 = vld [vmem:[%s1304_s0 + $0xb0] sm:$0xff]  ;;  %v66_v24 = vld [vmem:[%s1304_s0 + $0x1a0] sm:$0xff]  ;;  %v73_v27 = vld [vmem:[%s1304_s0 + $0x1d8] sm:$0xff] }
  0x26   :  { %632 = vmatprep.subr.bf16.mxu0 %v696_v0  ;;  %v75_v30 = vld [vmem:[%s1304_s0 + $0x1e8] sm:$0xff]  ;;  %v77_v31 = vld [vmem:[%s1304_s0 + $0x1f8] sm:$0xff]  ;;  %v74_v32 = vld [vmem:[%s1304_s0 + $0x1e0] sm:$0xff] }
  0x27   :  { %v76_v33 = vld [vmem:[%s1304_s0 + $0x1f0] sm:$0xff] }
  0x28   :  { %586 = vmatpush1.bf16.msra.mxu1 %v585_v61  ;;  %v43_v61 = vld [vmem:[%s1304_s0 + $0xe8] sm:$0xff] }
  0x29   :  { %634 = vmatpush1.bf16.msra.mxu0 %v633_v62  ;;  %587 = vmatprep.subr.bf16.mxu1 %v696_v0  ;;  %v45_v62 = vld [vmem:[%s1304_s0 + $0xf8] sm:$0xff] }
  0x2a   :  { %635 = vmatprep.subr.bf16.mxu0 %v696_v0 }
  0x2c   :  { %589 = vmatpush1.bf16.msra.mxu1 %v588_v4  ;;  %v46_v4 = vld [vmem:[%s1304_s0 + $0x100] sm:$0xff] }
  0x2d   :  { %637 = vmatpush1.bf16.msra.mxu0 %v636_v5  ;;  %590 = vmatprep.subr.bf16.mxu1 %v696_v0  ;;  %v48_v5 = vld [vmem:[%s1304_s0 + $0x110] sm:$0xff] }
  0x2e   :  { %638 = vmatprep.subr.bf16.mxu0 %v696_v0 }
  0x30   :  { %592 = vmatpush1.bf16.msra.mxu1 %v591_v10  ;;  %v55_v10 = vld [vmem:[%s1304_s0 + $0x148] sm:$0xff] }
  0x31   :  { %640 = vmatpush1.bf16.msra.mxu0 %v639_v11  ;;  %593 = vmatprep.subr.bf16.mxu1 %v696_v0  ;;  %v57_v11 = vld [vmem:[%s1304_s0 + $0x158] sm:$0xff] }
  0x32   :  { %641 = vmatprep.subr.bf16.mxu0 %v696_v0 }
  0x34   :  { %595 = vmatpush1.bf16.msra.mxu1 %v594_v16  ;;  %v58_v16 = vld [vmem:[%s1304_s0 + $0x160] sm:$0xff] }
  0x35   :  { %643 = vmatpush1.bf16.msra.mxu0 %v642_v17  ;;  %596 = vmatprep.subr.bf16.mxu1 %v696_v0  ;;  %v60_v17 = vld [vmem:[%s1304_s0 + $0x170] sm:$0xff] }
  0x36   :  { %644 = vmatprep.subr.bf16.mxu0 %v696_v0 }
  0x38   :  { %598 = vmatpush1.bf16.msra.mxu1 %v597_v22  ;;  %v67_v22 = vld [vmem:[%s1304_s0 + $0x1a8] sm:$0xff] }
  0x39   :  { %646 = vmatpush1.bf16.msra.mxu0 %v645_v23  ;;  %599 = vmatprep.subr.bf16.mxu1 %v696_v0  ;;  %v69_v23 = vld [vmem:[%s1304_s0 + $0x1b8] sm:$0xff] }
  0x3a   :  { %647 = vmatprep.subr.bf16.mxu0 %v696_v0 }
  0x3c   :  { %601 = vmatpush1.bf16.msra.mxu1 %v600_v28  ;;  %v70_v28 = vld [vmem:[%s1304_s0 + $0x1c0] sm:$0xff] }
  0x3d   :  { %649 = vmatpush1.bf16.msra.mxu0 %v648_v29  ;;  %602 = vmatprep.subr.bf16.mxu1 %v696_v0  ;;  %v72_v29 = vld [vmem:[%s1304_s0 + $0x1d0] sm:$0xff] }
  0x3e   :  { %650 = vmatprep.subr.bf16.mxu0 %v696_v0  ;;  %v18_v0 = vld [vmem:[%s1304_s0 + $0x20] sm:$0xff] }
  0x40   :  { %604 = vmatpush1.bf16.msra.mxu1 %v603_v34  ;;  %v79_v34 = vld [vmem:[%s1304_s0 + $0x208] sm:$0xff] }
  0x41   :  { %652 = vmatpush1.bf16.msra.mxu0 %v651_v35  ;;  %v81_v35 = vld [vmem:[%s1304_s0 + $0x218] sm:$0xff] }
  0x43   :  { %234 = vmatmul.mubr.f32.vlgmr.msra.gmra.mrb[0].mxu1 %v14_v36  ;;  %v78_v36 = vld [vmem:[%s1304_s0 + $0x200] sm:$0xff] }
  0x44   :  { %404 = vmatmul.mubr.f32.vlgmr.msra.gmra.mrb[0].mxu0 %v16_v37  ;;  %238 = vmatprep.mubr.f32.mxu1 %v19_v38  ;;  %v80_v37 = vld [vmem:[%s1304_s0 + $0x210] sm:$0xff]  ;;  %v83_v38 = vld [vmem:[%s1304_s0 + $0x228] sm:$0xff] }
  0x45   :  { %408 = vmatprep.mubr.f32.mxu0 %v21_v39  ;;  %v85_v39 = vld [vmem:[%s1304_s0 + $0x238] sm:$0xff] }
  0x47   :  { %239 = vmatmul.mubr.f32.gmra.mrb[2].mxu1 %v18_v0  ;;  %v82_v0 = vld [vmem:[%s1304_s0 + $0x220] sm:$0xff] }
  0x48   :  { %409 = vmatmul.mubr.f32.gmra.mrb[2].mxu0 %v20_v40  ;;  %243 = vmatprep.mubr.f32.mxu1 %v23_v41  ;;  %v84_v40 = vld [vmem:[%s1304_s0 + $0x230] sm:$0xff]  ;;  %v87_v41 = vld [vmem:[%s1304_s0 + $0x248] sm:$0xff] }
  0x49   :  { %413 = vmatprep.mubr.f32.mxu0 %v25_v42  ;;  %v89_v42 = vld [vmem:[%s1304_s0 + $0x258] sm:$0xff] }
  0x4b   :  { %244 = vmatmul.mubr.f32.gmra.mrb[4].mxu1 %v22_v43  ;;  %v86_v43 = vld [vmem:[%s1304_s0 + $0x240] sm:$0xff] }
  0x4c   :  { %414 = vmatmul.mubr.f32.gmra.mrb[4].mxu0 %v24_v44  ;;  %248 = vmatprep.mubr.f32.mxu1 %v27_v45  ;;  %v88_v44 = vld [vmem:[%s1304_s0 + $0x250] sm:$0xff]  ;;  %v91_v45 = vld [vmem:[%s1304_s0 + $0x268] sm:$0xff] }
  0x4d   :  { %418 = vmatprep.mubr.f32.mxu0 %v29_v46  ;;  %v93_v46 = vld [vmem:[%s1304_s0 + $0x278] sm:$0xff] }
  0x4f   :  { %249 = vmatmul.mubr.f32.gmra.mrb[6].mxu1 %v26_v47  ;;  %v90_v47 = vld [vmem:[%s1304_s0 + $0x260] sm:$0xff] }
  0x50   :  { %419 = vmatmul.mubr.f32.gmra.mrb[6].mxu0 %v28_v48  ;;  %253 = vmatprep.mubr.f32.mxu1 %v31_v49  ;;  %v92_v48 = vld [vmem:[%s1304_s0 + $0x270] sm:$0xff]  ;;  %v95_v49 = vld [vmem:[%s1304_s0 + $0x288] sm:$0xff] }
  0x51   :  { %423 = vmatprep.mubr.f32.mxu0 %v33_v50  ;;  %v97_v50 = vld [vmem:[%s1304_s0 + $0x298] sm:$0xff] }
  0x53   :  { %254 = vmatmul.mubr.f32.gmra.mrb[8].mxu1 %v30_v51  ;;  %v94_v51 = vld [vmem:[%s1304_s0 + $0x280] sm:$0xff] }
  0x54   :  { %424 = vmatmul.mubr.f32.gmra.mrb[8].mxu0 %v32_v52  ;;  %258 = vmatprep.mubr.f32.mxu1 %v35_v53  ;;  %v96_v52 = vld [vmem:[%s1304_s0 + $0x290] sm:$0xff]  ;;  %v1196_v53 = vld [vmem:[%s1305_s2] ss:$0 sm:$0xff] }
  0x55   :  { %428 = vmatprep.mubr.f32.mxu0 %v37_v54 }
  0x57   :  { %259 = vmatmul.mubr.f32.gmra.mrb[10].mxu1 %v34_v55 }
  0x58   :  { %429 = vmatmul.mubr.f32.gmra.mrb[10].mxu0 %v36_v56  ;;  %263 = vmatprep.mubr.f32.mxu1 %v39_v57 }
  0x59   :  { %433 = vmatprep.mubr.f32.mxu0 %v41_v58 }
  0x5b   :  { %264 = vmatmul.mubr.f32.gmra.mrb[12].mxu1 %v38_v59 }
  0x5c   :  { %434 = vmatmul.mubr.f32.gmra.mrb[12].mxu0 %v40_v60  ;;  %268 = vmatprep.mubr.f32.mxu1 %v43_v61 }
  0x5d   :  { %438 = vmatprep.mubr.f32.mxu0 %v45_v62 }
  0x5f   :  { %269 = vmatmul.mubr.f32.gmra.mrb[14].mxu1 %v42_v63 }
  0x60   :  { %439 = vmatmul.mubr.f32.gmra.mrb[14].mxu0 %v44_v1  ;;  %273 = vmatprep.mubr.f32.mxu1 %v47_v2 }
  0x61   :  { %443 = vmatprep.mubr.f32.mxu0 %v49_v3 }
  0x63   :  { %274 = vmatmul.mubr.f32.gmra.mrb[16].mxu1 %v46_v4 }
  0x64   :  { %444 = vmatmul.mubr.f32.gmra.mrb[16].mxu0 %v48_v5  ;;  %278 = vmatprep.mubr.f32.mxu1 %v51_v6 }
  0x65   :  { %448 = vmatprep.mubr.f32.mxu0 %v53_v7 }
  0x67   :  { %279 = vmatmul.mubr.f32.gmra.mrb[18].mxu1 %v50_v8 }
  0x68   :  { %449 = vmatmul.mubr.f32.gmra.mrb[18].mxu0 %v52_v9  ;;  %283 = vmatprep.mubr.f32.mxu1 %v55_v10 }
  0x69   :  { %453 = vmatprep.mubr.f32.mxu0 %v57_v11 }
  0x6b   :  { %284 = vmatmul.mubr.f32.gmra.mrb[20].mxu1 %v54_v12 }
  0x6c   :  { %454 = vmatmul.mubr.f32.gmra.mrb[20].mxu0 %v56_v13  ;;  %288 = vmatprep.mubr.f32.mxu1 %v59_v14 }
  0x6d   :  { %458 = vmatprep.mubr.f32.mxu0 %v61_v15 }
  0x6f   :  { %289 = vmatmul.mubr.f32.gmra.mrb[22].mxu1 %v58_v16 }
  0x70   :  { %459 = vmatmul.mubr.f32.gmra.mrb[22].mxu0 %v60_v17  ;;  %293 = vmatprep.mubr.f32.mxu1 %v63_v18 }
  0x71   :  { %463 = vmatprep.mubr.f32.mxu0 %v65_v19 }
  0x73   :  { %294 = vmatmul.mubr.f32.gmra.mrb[24].mxu1 %v62_v20 }
  0x74   :  { %464 = vmatmul.mubr.f32.gmra.mrb[24].mxu0 %v64_v21  ;;  %298 = vmatprep.mubr.f32.mxu1 %v67_v22 }
  0x75   :  { %468 = vmatprep.mubr.f32.mxu0 %v69_v23 }
  0x77   :  { %299 = vmatmul.mubr.f32.gmra.mrb[26].mxu1 %v66_v24 }
  0x78   :  { %469 = vmatmul.mubr.f32.gmra.mrb[26].mxu0 %v68_v25  ;;  %303 = vmatprep.mubr.f32.mxu1 %v71_v26 }
  0x79   :  { %473 = vmatprep.mubr.f32.mxu0 %v73_v27 }
  0x7b   :  { %304 = vmatmul.mubr.f32.gmra.mrb[28].mxu1 %v70_v28 }
  0x7c   :  { %474 = vmatmul.mubr.f32.gmra.mrb[28].mxu0 %v72_v29  ;;  %308 = vmatprep.mubr.f32.mxu1 %v75_v30 }
  0x7d   :  { %478 = vmatprep.mubr.f32.mxu0 %v77_v31 }
  0x7f   :  { %309 = vmatmul.mubr.f32.gmra.mrb[30].mxu1 %v74_v32 }
  0x80   :  { %479 = vmatmul.mubr.f32.gmra.mrb[30].mxu0 %v76_v33  ;;  %313 = vmatprep.mubr.f32.mxu1 %v79_v34 }
  0x81   :  { %483 = vmatprep.mubr.f32.mxu0 %v81_v35 }
  0x83   :  { %314 = vmatmul.mubr.f32.gmra.mrb[32].mxu1 %v78_v36 }
  0x84   :  { %484 = vmatmul.mubr.f32.gmra.mrb[32].mxu0 %v80_v37  ;;  %318 = vmatprep.mubr.f32.mxu1 %v83_v38 }
  0x85   :  { %488 = vmatprep.mubr.f32.mxu0 %v85_v39 }
  0x87   :  { %319 = vmatmul.mubr.f32.gmra.mrb[34].mxu1 %v82_v0 }
  0x88   :  { %489 = vmatmul.mubr.f32.gmra.mrb[34].mxu0 %v84_v40  ;;  %323 = vmatprep.mubr.f32.mxu1 %v87_v41 }
  0x89   :  { %493 = vmatprep.mubr.f32.mxu0 %v89_v42 }
  0x8b   :  { %324 = vmatmul.mubr.f32.gmra.mrb[36].mxu1 %v86_v43 }
  0x8c   :  { %494 = vmatmul.mubr.f32.gmra.mrb[36].mxu0 %v88_v44  ;;  %328 = vmatprep.mubr.f32.mxu1 %v91_v45 }
  0x8d   :  { %498 = vmatprep.mubr.f32.mxu0 %v93_v46 }
  0x8f   :  { %329 = vmatmul.mubr.f32.gmra.mrb[38].mxu1 %v90_v47 }
  0x90   :  { %499 = vmatmul.mubr.f32.gmra.mrb[38].mxu0 %v92_v48  ;;  %333 = vmatprep.mubr.f32.mxu1 %v95_v49 }
  0x91   :  { %503 = vmatprep.mubr.f32.mxu0 %v97_v50 }
  0x93   :  { %334 = vmatmul.mubr.f32.gmra.mrb[40].mxu1 %v94_v51 }
  0x94   :  { %504 = vmatmul.mubr.f32.gmra.mrb[40].mxu0 %v96_v52 }
 0x116   :  { %v235_v54 = vpop.f32.mrb[0].mxu1 }
 0x117   :  { %v236_v55 = vadd.f32 %v1196_v53, %v235_v54  ;;  %v237_v56 = vpop.f32.mrb[1].mxu1  ;;  %v405_v57 = vpop.f32.mrb[0].mxu0 }
 0x118   :  { %v407_v58 = vpop.f32.mrb[1].mxu0 }
 0x119   :  { %v406_v59 = vadd.f32 %v405_v57, %v236_v55 }
 0x11a   :  { %v240_v60 = vpop.f32.mrb[2].mxu1 }
 0x11b   :  { %v509_v61 = vmax.f32 %v406_v59, 0.0  ;;  %v241_v62 = vadd.f32 %v1196_v53, %v240_v60  ;;  %v242_v63 = vpop.f32.mrb[3].mxu1  ;;  %v410_v1 = vpop.f32.mrb[2].mxu0 }
 0x11c   :  { %v412_v2 = vpop.f32.mrb[3].mxu0 }
 0x11d   :  { %531 = vst.msk [vmem:[%s1306_s3] sm:$0xff] %vm530_vm0, %v509_v61  ;;  %v411_v3 = vadd.f32 %v410_v1, %v241_v62 }
 0x11e   :  { %v245_v4 = vpop.f32.mrb[4].mxu1 }
 0x11f   :  { %v510_v5 = vmax.f32 %v411_v3, 0.0  ;;  %v246_v6 = vadd.f32 %v1196_v53, %v245_v4  ;;  %v247_v7 = vpop.f32.mrb[5].mxu1  ;;  %v415_v8 = vpop.f32.mrb[4].mxu0 }
 0x120   :  { %v417_v9 = vpop.f32.mrb[5].mxu0 }
 0x121   :  { %532 = vst.msk [vmem:[%s1306_s3 + $0x8] sm:$0xff] %vm530_vm0, %v510_v5  ;;  %v416_v10 = vadd.f32 %v415_v8, %v246_v6 }
 0x122   :  { %v250_v11 = vpop.f32.mrb[6].mxu1 }
 0x123   :  { %v511_v12 = vmax.f32 %v416_v10, 0.0  ;;  %v251_v13 = vadd.f32 %v1196_v53, %v250_v11  ;;  %v252_v14 = vpop.f32.mrb[7].mxu1  ;;  %v420_v15 = vpop.f32.mrb[6].mxu0 }
 0x124   :  { %v422_v16 = vpop.f32.mrb[7].mxu0 }
 0x125   :  { %533 = vst.msk [vmem:[%s1306_s3 + $0x10] sm:$0xff] %vm530_vm0, %v511_v12  ;;  %v421_v17 = vadd.f32 %v420_v15, %v251_v13 }
 0x126   :  { %v255_v18 = vpop.f32.mrb[8].mxu1 }
 0x127   :  { %v512_v19 = vmax.f32 %v421_v17, 0.0  ;;  %v256_v20 = vadd.f32 %v1196_v53, %v255_v18  ;;  %v257_v21 = vpop.f32.mrb[9].mxu1  ;;  %v425_v22 = vpop.f32.mrb[8].mxu0 }
 0x128   :  { %v427_v23 = vpop.f32.mrb[9].mxu0 }
 0x129   :  { %534 = vst.msk [vmem:[%s1306_s3 + $0x18] sm:$0xff] %vm530_vm0, %v512_v19  ;;  %v426_v24 = vadd.f32 %v425_v22, %v256_v20 }
 0x12a   :  { %v260_v25 = vpop.f32.mrb[10].mxu1 }
 0x12b   :  { %v513_v26 = vmax.f32 %v426_v24, 0.0  ;;  %v261_v27 = vadd.f32 %v1196_v53, %v260_v25  ;;  %v262_v28 = vpop.f32.mrb[11].mxu1  ;;  %v430_v29 = vpop.f32.mrb[10].mxu0 }
 0x12c   :  { %v432_v30 = vpop.f32.mrb[11].mxu0 }
 0x12d   :  { %535 = vst.msk [vmem:[%s1306_s3 + $0x20] sm:$0xff] %vm530_vm0, %v513_v26  ;;  %v431_v31 = vadd.f32 %v430_v29, %v261_v27 }
 0x12e   :  { %v265_v32 = vpop.f32.mrb[12].mxu1 }
 0x12f   :  { %v514_v33 = vmax.f32 %v431_v31, 0.0  ;;  %v266_v34 = vadd.f32 %v1196_v53, %v265_v32  ;;  %v267_v35 = vpop.f32.mrb[13].mxu1  ;;  %v435_v36 = vpop.f32.mrb[12].mxu0 }
 0x130   :  { %v437_v37 = vpop.f32.mrb[13].mxu0 }
 0x131   :  { %536 = vst.msk [vmem:[%s1306_s3 + $0x28] sm:$0xff] %vm530_vm0, %v514_v33  ;;  %v436_v38 = vadd.f32 %v435_v36, %v266_v34 }
 0x132   :  { %v270_v39 = vpop.f32.mrb[14].mxu1 }
 0x133   :  { %v515_v0 = vmax.f32 %v436_v38, 0.0  ;;  %v271_v40 = vadd.f32 %v1196_v53, %v270_v39  ;;  %v272_v41 = vpop.f32.mrb[15].mxu1  ;;  %v440_v42 = vpop.f32.mrb[14].mxu0 }
 0x134   :  { %v442_v43 = vpop.f32.mrb[15].mxu0 }
 0x135   :  { %537 = vst.msk [vmem:[%s1306_s3 + $0x30] sm:$0xff] %vm530_vm0, %v515_v0  ;;  %v441_v44 = vadd.f32 %v440_v42, %v271_v40 }
 0x136   :  { %v275_v45 = vpop.f32.mrb[16].mxu1 }
 0x137   :  { %v516_v46 = vmax.f32 %v441_v44, 0.0  ;;  %v276_v47 = vadd.f32 %v1196_v53, %v275_v45  ;;  %v277_v48 = vpop.f32.mrb[17].mxu1  ;;  %v445_v49 = vpop.f32.mrb[16].mxu0 }
 0x138   :  { %v447_v50 = vpop.f32.mrb[17].mxu0 }
 0x139   :  { %538 = vst.msk [vmem:[%s1306_s3 + $0x38] sm:$0xff] %vm530_vm0, %v516_v46  ;;  %v446_v51 = vadd.f32 %v445_v49, %v276_v47 }
 0x13a   :  { %v280_v52 = vpop.f32.mrb[18].mxu1 }
 0x13b   :  { %v517_v54 = vmax.f32 %v446_v51, 0.0  ;;  %v281_v55 = vadd.f32 %v1196_v53, %v280_v52  ;;  %v282_v56 = vpop.f32.mrb[19].mxu1  ;;  %v450_v57 = vpop.f32.mrb[18].mxu0 }
 0x13c   :  { %v452_v58 = vpop.f32.mrb[19].mxu0 }
 0x13d   :  { %539 = vst.msk [vmem:[%s1306_s3 + $0x40] sm:$0xff] %vm530_vm0, %v517_v54  ;;  %v451_v59 = vadd.f32 %v450_v57, %v281_v55 }
 0x13e   :  { %v285_v60 = vpop.f32.mrb[20].mxu1 }
 0x13f   :  { %v518_v61 = vmax.f32 %v451_v59, 0.0  ;;  %v286_v62 = vadd.f32 %v1196_v53, %v285_v60  ;;  %v287_v63 = vpop.f32.mrb[21].mxu1  ;;  %v455_v1 = vpop.f32.mrb[20].mxu0 }
 0x140   :  { %v457_v2 = vpop.f32.mrb[21].mxu0 }
 0x141   :  { %540 = vst.msk [vmem:[%s1306_s3 + $0x48] sm:$0xff] %vm530_vm0, %v518_v61  ;;  %v456_v3 = vadd.f32 %v455_v1, %v286_v62 }
 0x142   :  { %v290_v4 = vpop.f32.mrb[22].mxu1 }
 0x143   :  { %v519_v5 = vmax.f32 %v456_v3, 0.0  ;;  %v291_v6 = vadd.f32 %v1196_v53, %v290_v4  ;;  %v292_v7 = vpop.f32.mrb[23].mxu1  ;;  %v460_v8 = vpop.f32.mrb[22].mxu0 }
 0x144   :  { %v462_v9 = vpop.f32.mrb[23].mxu0 }
 0x145   :  { %541 = vst.msk [vmem:[%s1306_s3 + $0x50] sm:$0xff] %vm530_vm0, %v519_v5  ;;  %v461_v10 = vadd.f32 %v460_v8, %v291_v6 }
 0x146   :  { %v295_v11 = vpop.f32.mrb[24].mxu1 }
 0x147   :  { %v520_v12 = vmax.f32 %v461_v10, 0.0  ;;  %v296_v13 = vadd.f32 %v1196_v53, %v295_v11  ;;  %v297_v14 = vpop.f32.mrb[25].mxu1  ;;  %v465_v15 = vpop.f32.mrb[24].mxu0 }
 0x148   :  { %v467_v16 = vpop.f32.mrb[25].mxu0 }
 0x149   :  { %542 = vst.msk [vmem:[%s1306_s3 + $0x58] sm:$0xff] %vm530_vm0, %v520_v12  ;;  %v466_v17 = vadd.f32 %v465_v15, %v296_v13 }
 0x14a   :  { %v300_v18 = vpop.f32.mrb[26].mxu1 }
 0x14b   :  { %v521_v19 = vmax.f32 %v466_v17, 0.0  ;;  %v301_v20 = vadd.f32 %v1196_v53, %v300_v18  ;;  %v302_v21 = vpop.f32.mrb[27].mxu1  ;;  %v470_v22 = vpop.f32.mrb[26].mxu0 }
 0x14c   :  { %v472_v23 = vpop.f32.mrb[27].mxu0 }
 0x14d   :  { %543 = vst.msk [vmem:[%s1306_s3 + $0x60] sm:$0xff] %vm530_vm0, %v521_v19  ;;  %v471_v24 = vadd.f32 %v470_v22, %v301_v20 }
 0x14e   :  { %v305_v25 = vpop.f32.mrb[28].mxu1 }
 0x14f   :  { %v522_v26 = vmax.f32 %v471_v24, 0.0  ;;  %v306_v27 = vadd.f32 %v1196_v53, %v305_v25  ;;  %v307_v28 = vpop.f32.mrb[29].mxu1  ;;  %v475_v29 = vpop.f32.mrb[28].mxu0 }
 0x150   :  { %v477_v30 = vpop.f32.mrb[29].mxu0 }
 0x151   :  { %544 = vst.msk [vmem:[%s1306_s3 + $0x68] sm:$0xff] %vm530_vm0, %v522_v26  ;;  %v476_v31 = vadd.f32 %v475_v29, %v306_v27 }
 0x152   :  { %v310_v32 = vpop.f32.mrb[30].mxu1 }
 0x153   :  { %v523_v33 = vmax.f32 %v476_v31, 0.0  ;;  %v311_v34 = vadd.f32 %v1196_v53, %v310_v32  ;;  %v312_v35 = vpop.f32.mrb[31].mxu1  ;;  %v480_v36 = vpop.f32.mrb[30].mxu0 }
 0x154   :  { %v482_v37 = vpop.f32.mrb[31].mxu0 }
 0x155   :  { %545 = vst.msk [vmem:[%s1306_s3 + $0x70] sm:$0xff] %vm530_vm0, %v523_v33  ;;  %v481_v38 = vadd.f32 %v480_v36, %v311_v34 }
 0x156   :  { %v315_v39 = vpop.f32.mrb[32].mxu1 }
 0x157   :  { %v524_v0 = vmax.f32 %v481_v38, 0.0  ;;  %v316_v40 = vadd.f32 %v1196_v53, %v315_v39  ;;  %v317_v41 = vpop.f32.mrb[33].mxu1  ;;  %v485_v42 = vpop.f32.mrb[32].mxu0 }
 0x158   :  { %v487_v43 = vpop.f32.mrb[33].mxu0 }
 0x159   :  { %546 = vst.msk [vmem:[%s1306_s3 + $0x78] sm:$0xff] %vm530_vm0, %v524_v0  ;;  %v486_v44 = vadd.f32 %v485_v42, %v316_v40 }
 0x15a   :  { %v320_v45 = vpop.f32.mrb[34].mxu1 }
 0x15b   :  { %v525_v46 = vmax.f32 %v486_v44, 0.0  ;;  %v321_v47 = vadd.f32 %v1196_v53, %v320_v45  ;;  %v322_v48 = vpop.f32.mrb[35].mxu1  ;;  %v490_v49 = vpop.f32.mrb[34].mxu0 }
 0x15c   :  { %v492_v50 = vpop.f32.mrb[35].mxu0 }
 0x15d   :  { %547 = vst.msk [vmem:[%s1306_s3 + $0x80] sm:$0xff] %vm530_vm0, %v525_v46  ;;  %v491_v51 = vadd.f32 %v490_v49, %v321_v47 }
 0x15e   :  { %v325_v52 = vpop.f32.mrb[36].mxu1 }
 0x15f   :  { %v526_v54 = vmax.f32 %v491_v51, 0.0  ;;  %v326_v55 = vadd.f32 %v1196_v53, %v325_v52  ;;  %v327_v56 = vpop.f32.mrb[37].mxu1  ;;  %v495_v57 = vpop.f32.mrb[36].mxu0 }
 0x160   :  { %v497_v58 = vpop.f32.mrb[37].mxu0 }
 0x161   :  { %548 = vst.msk [vmem:[%s1306_s3 + $0x88] sm:$0xff] %vm530_vm0, %v526_v54  ;;  %v496_v59 = vadd.f32 %v495_v57, %v326_v55 }
 0x162   :  { %v330_v60 = vpop.f32.mrb[38].mxu1 }
 0x163   :  { %v527_v61 = vmax.f32 %v496_v59, 0.0  ;;  %v331_v62 = vadd.f32 %v1196_v53, %v330_v60  ;;  %v332_v63 = vpop.f32.mrb[39].mxu1  ;;  %v500_v1 = vpop.f32.mrb[38].mxu0 }
 0x164   :  { %v502_v2 = vpop.f32.mrb[39].mxu0 }
 0x165   :  { %549 = vst.msk [vmem:[%s1306_s3 + $0x90] sm:$0xff] %vm530_vm0, %v527_v61  ;;  %v501_v3 = vadd.f32 %v500_v1, %v331_v62 }
 0x166   :  { %v335_v4 = vpop.f32.mrb[40].mxu1 }
 0x167   :  { %v528_v5 = vmax.f32 %v501_v3, 0.0  ;;  %v336_v6 = vadd.f32 %v1196_v53, %v335_v4  ;;  %v337_v7 = vpop.f32.mrb[41].mxu1  ;;  %v505_v8 = vpop.f32.mrb[40].mxu0 }
 0x168   :  { %v507_v9 = vpop.f32.mrb[41].mxu0 }
 0x169   :  { %550 = vst.msk [vmem:[%s1306_s3 + $0x98] sm:$0xff] %vm530_vm0, %v528_v5  ;;  %v506_v10 = vadd.f32 %v505_v8, %v336_v6 }
 0x16b   :  { %v529_v11 = vmax.f32 %v506_v10, 0.0 }
 0x16d   :  { %551 = vst.msk [vmem:[%s1306_s3 + $0xa0] sm:$0xff] %vm530_vm0, %v529_v11 }

// kernel: convdqn_forward.6
= control target key start
LH: loop header
LB: loop body
LE: loop exit
PB: predicated region body
PF: predicated region fallthrough
CT: control target
= control target key end

     0   :  { %vm938_vm0 = vmmov 0   ;;  %vm158_vm1 = vcmask 523264   ;;  %s1488_s1 = inlined_call_operand.vmem [shape: f32[576,64], index: 1, kind: input, shape index: {}]   ;;  %s1489_s0 = inlined_call_operand.vmem [shape: f32[98,576], index: 0, kind: input, shape index: {}]   ;;  %s1490_s2 = inlined_call_operand.vmem [shape: f32[1,64], index: 2, kind: input, shape index: {}]   ;;  %s1491_s3 = inlined_call_operand.vmem [shape: f32[98,64], index: 3, kind: output, shape index: {}]  }
   0x1   :  { %v95_v0 = vld [vmem:[%s1488_s1 + $0x80] sm:$0xff]  ;;  %v96_v1 = vld [vmem:[%s1488_s1 + $0x88] sm:$0xff]  ;;  %v97_v11 = vld [vmem:[%s1488_s1 + $0x90] sm:$0xff] }
   0x2   :  { %v127_v2 = vld [vmem:[%s1488_s1 + $0x180] sm:$0xff]  ;;  %v850_v3 = vpack.c.bf16 %v96_v1, %v95_v0  ;;  %v128_v4 = vld [vmem:[%s1488_s1 + $0x188] sm:$0xff]  ;;  %v98_v13 = vld [vmem:[%s1488_s1 + $0x98] sm:$0xff] }
   0x3   :  { %v79_v5 = vld [vmem:[%s1488_s1] sm:$0xff]  ;;  %v80_v6 = vld [vmem:[%s1488_s1 + $0x8] sm:$0xff]  ;;  %v882_v7 = vpack.c.bf16 %v128_v4, %v127_v2  ;;  %v129_v14 = vld [vmem:[%s1488_s1 + $0x190] sm:$0xff]  ;;  %v854_v16 = vpack.c.bf16 %v98_v13, %v97_v11 }
   0x4   :  { %v852_v8 = vpack.c.bf16 %v80_v6, %v79_v5  ;;  %v111_v9 = vld [vmem:[%s1488_s1 + $0x100] sm:$0xff]  ;;  %v112_v10 = vld [vmem:[%s1488_s1 + $0x108] sm:$0xff]  ;;  %851 = vmatprep.subr.bf16.mxu0 %v850_v3  ;;  %v130_v15 = vld [vmem:[%s1488_s1 + $0x198] sm:$0xff] }
   0x5   :  { %v884_v12 = vpack.c.bf16 %v112_v10, %v111_v9  ;;  %883 = vmatprep.subr.bf16.mxu1 %v882_v7  ;;  %v886_v17 = vpack.c.bf16 %v130_v15, %v129_v14  ;;  %v81_v18 = vld [vmem:[%s1488_s1 + $0x10] sm:$0xff]  ;;  %v82_v19 = vld [vmem:[%s1488_s1 + $0x18] sm:$0xff]  ;;  %v99_v23 = vld [vmem:[%s1488_s1 + $0xa0] sm:$0xff] }
   0x6   :  { %853 = vmatpush3.bf16.msra.mxu0 %v852_v8  ;;  %v113_v20 = vld [vmem:[%s1488_s1 + $0x110] sm:$0xff]  ;;  %v856_v21 = vpack.c.bf16 %v82_v19, %v81_v18  ;;  %v114_v22 = vld [vmem:[%s1488_s1 + $0x118] sm:$0xff]  ;;  %v100_v24 = vld [vmem:[%s1488_s1 + $0xa8] sm:$0xff] }
   0x7   :  { %885 = vmatpush3.bf16.msra.mxu1 %v884_v12  ;;  %855 = vmatprep.subr.bf16.mxu0 %v854_v16  ;;  %v888_v25 = vpack.c.bf16 %v114_v22, %v113_v20  ;;  %v858_v26 = vpack.c.bf16 %v100_v24, %v99_v23  ;;  %v131_v27 = vld [vmem:[%s1488_s1 + $0x1a0] sm:$0xff]  ;;  %v132_v28 = vld [vmem:[%s1488_s1 + $0x1a8] sm:$0xff]  ;;  %v101_v35 = vld [vmem:[%s1488_s1 + $0xb0] sm:$0xff] }
   0x8   :  { %887 = vmatprep.subr.bf16.mxu1 %v886_v17  ;;  %v83_v29 = vld [vmem:[%s1488_s1 + $0x20] sm:$0xff]  ;;  %v890_v30 = vpack.c.bf16 %v132_v28, %v131_v27  ;;  %v84_v31 = vld [vmem:[%s1488_s1 + $0x28] sm:$0xff]  ;;  %v102_v36 = vld [vmem:[%s1488_s1 + $0xb8] sm:$0xff] }
   0x9   :  { %v115_v32 = vld [vmem:[%s1488_s1 + $0x120] sm:$0xff]  ;;  %v116_v33 = vld [vmem:[%s1488_s1 + $0x128] sm:$0xff]  ;;  %v860_v34 = vpack.c.bf16 %v84_v31, %v83_v29  ;;  %v133_v37 = vld [vmem:[%s1488_s1 + $0x1b0] sm:$0xff]  ;;  %v862_v39 = vpack.c.bf16 %v102_v36, %v101_v35 }
   0xa   :  { %857 = vmatpush3.bf16.msra.mxu0 %v856_v21  ;;  %v892_v38 = vpack.c.bf16 %v116_v33, %v115_v32  ;;  %v134_v40 = vld [vmem:[%s1488_s1 + $0x1b8] sm:$0xff]  ;;  %v85_v41 = vld [vmem:[%s1488_s1 + $0x30] sm:$0xff]  ;;  %v103_v46 = vld [vmem:[%s1488_s1 + $0xc0] sm:$0xff] }
   0xb   :  { %889 = vmatpush3.bf16.msra.mxu1 %v888_v25  ;;  %859 = vmatprep.subr.bf16.mxu0 %v858_v26  ;;  %v86_v42 = vld [vmem:[%s1488_s1 + $0x38] sm:$0xff]  ;;  %v894_v43 = vpack.c.bf16 %v134_v40, %v133_v37  ;;  %v117_v44 = vld [vmem:[%s1488_s1 + $0x130] sm:$0xff]  ;;  %v104_v47 = vld [vmem:[%s1488_s1 + $0xc8] sm:$0xff] }
   0xc   :  { %891 = vmatprep.subr.bf16.mxu1 %v890_v30  ;;  %v118_v45 = vld [vmem:[%s1488_s1 + $0x138] sm:$0xff]  ;;  %v135_v48 = vld [vmem:[%s1488_s1 + $0x1c0] sm:$0xff]  ;;  %v136_v49 = vld [vmem:[%s1488_s1 + $0x1c8] sm:$0xff]  ;;  %v864_v50 = vpack.c.bf16 %v86_v42, %v85_v41  ;;  %v866_v52 = vpack.c.bf16 %v104_v47, %v103_v46 }
   0xd   :  { %v896_v51 = vpack.c.bf16 %v118_v45, %v117_v44  ;;  %v87_v53 = vld [vmem:[%s1488_s1 + $0x40] sm:$0xff]  ;;  %v88_v54 = vld [vmem:[%s1488_s1 + $0x48] sm:$0xff]  ;;  %v898_v56 = vpack.c.bf16 %v136_v49, %v135_v48  ;;  %v105_v58 = vld [vmem:[%s1488_s1 + $0xd0] sm:$0xff] }
   0xe   :  { %861 = vmatpush3.bf16.msra.mxu0 %v860_v34  ;;  %v119_v55 = vld [vmem:[%s1488_s1 + $0x140] sm:$0xff]  ;;  %v120_v57 = vld [vmem:[%s1488_s1 + $0x148] sm:$0xff]  ;;  %v106_v59 = vld [vmem:[%s1488_s1 + $0xd8] sm:$0xff]  ;;  %v868_v62 = vpack.c.bf16 %v88_v54, %v87_v53 }
   0xf   :  { %893 = vmatpush3.bf16.msra.mxu1 %v892_v38  ;;  %863 = vmatprep.subr.bf16.mxu0 %v862_v39  ;;  %v137_v60 = vld [vmem:[%s1488_s1 + $0x1d0] sm:$0xff]  ;;  %v138_v61 = vld [vmem:[%s1488_s1 + $0x1d8] sm:$0xff]  ;;  %v900_v63 = vpack.c.bf16 %v120_v57, %v119_v55  ;;  %v870_v0 = vpack.c.bf16 %v106_v59, %v105_v58  ;;  %v107_v6 = vld [vmem:[%s1488_s1 + $0xe0] sm:$0xff]  ;;  %v937_v39 = vmov 0.0|0.0  }
  0x10   :  { %895 = vmatprep.subr.bf16.mxu1 %v894_v43  ;;  %v89_v1 = vld [vmem:[%s1488_s1 + $0x50] sm:$0xff]  ;;  %v90_v2 = vld [vmem:[%s1488_s1 + $0x58] sm:$0xff]  ;;  %v902_v4 = vpack.c.bf16 %v138_v61, %v137_v60  ;;  %v108_v7 = vld [vmem:[%s1488_s1 + $0xe8] sm:$0xff] }
  0x11   :  { %v121_v3 = vld [vmem:[%s1488_s1 + $0x150] sm:$0xff]  ;;  %v122_v5 = vld [vmem:[%s1488_s1 + $0x158] sm:$0xff]  ;;  %v139_v8 = vld [vmem:[%s1488_s1 + $0x1e0] sm:$0xff]  ;;  %v872_v10 = vpack.c.bf16 %v90_v2, %v89_v1  ;;  %v874_v14 = vpack.c.bf16 %v108_v7, %v107_v6 }
  0x12   :  { %865 = vmatpush3.bf16.msra.mxu0 %v864_v50  ;;  %v140_v9 = vld [vmem:[%s1488_s1 + $0x1e8] sm:$0xff]  ;;  %v91_v11 = vld [vmem:[%s1488_s1 + $0x60] sm:$0xff]  ;;  %v904_v13 = vpack.c.bf16 %v122_v5, %v121_v3  ;;  %v17_v17 = vld [vmem:[%s1489_s0 + $0x18] sm:$0xff] }
  0x13   :  { %897 = vmatpush3.bf16.msra.mxu1 %v896_v51  ;;  %867 = vmatprep.subr.bf16.mxu0 %v866_v52  ;;  %v92_v12 = vld [vmem:[%s1488_s1 + $0x68] sm:$0xff]  ;;  %v123_v15 = vld [vmem:[%s1488_s1 + $0x160] sm:$0xff]  ;;  %v906_v18 = vpack.c.bf16 %v140_v9, %v139_v8  ;;  %v109_v20 = vld [vmem:[%s1488_s1 + $0xf0] sm:$0xff] }
  0x14   :  { %899 = vmatprep.subr.bf16.mxu1 %v898_v56  ;;  %v15_v16 = vld [vmem:[%s1489_s0 + $0x8] sm:$0xff]  ;;  %v110_v21 = vld [vmem:[%s1488_s1 + $0xf8] sm:$0xff]  ;;  %v141_v22 = vld [vmem:[%s1488_s1 + $0x1f0] sm:$0xff]  ;;  %392 = vmatprep.mubr.f32.mxu1 %v17_v17  ;;  %v876_v24 = vpack.c.bf16 %v92_v12, %v91_v11 }
  0x15   :  { %v124_v19 = vld [vmem:[%s1488_s1 + $0x168] sm:$0xff]  ;;  %262 = vmatprep.mubr.f32.mxu0 %v15_v16  ;;  %v142_v23 = vld [vmem:[%s1488_s1 + $0x1f8] sm:$0xff]  ;;  %v878_v26 = vpack.c.bf16 %v110_v21, %v109_v20  ;;  %v93_v27 = vld [vmem:[%s1488_s1 + $0x70] sm:$0xff] }
  0x16   :  { %869 = vmatpush3.bf16.msra.mxu0 %v868_v62  ;;  %v908_v25 = vpack.c.bf16 %v124_v19, %v123_v15  ;;  %v94_v28 = vld [vmem:[%s1488_s1 + $0x78] sm:$0xff]  ;;  %v910_v29 = vpack.c.bf16 %v142_v23, %v141_v22  ;;  %v125_v30 = vld [vmem:[%s1488_s1 + $0x170] sm:$0xff]  ;;  %v143_v34 = vld [vmem:[%s1488_s1 + $0x200] sm:$0xff] }
  0x17   :  { %901 = vmatpush3.bf16.msra.mxu1 %v900_v63  ;;  %871 = vmatprep.subr.bf16.mxu0 %v870_v0  ;;  %v126_v31 = vld [vmem:[%s1488_s1 + $0x178] sm:$0xff]  ;;  %v880_v32 = vpack.c.bf16 %v94_v28, %v93_v27  ;;  %v144_v35 = vld [vmem:[%s1488_s1 + $0x208] sm:$0xff]  ;;  %v14_v36 = vld [vmem:[%s1489_s0] sm:$0xff] }
  0x18   :  { %903 = vmatprep.subr.bf16.mxu1 %v902_v4  ;;  %v912_v33 = vpack.c.bf16 %v126_v31, %v125_v30  ;;  %v915_v37 = vpack.c.bf16 %v144_v35, %v143_v34  ;;  %v16_v38 = vld [vmem:[%s1489_s0 + $0x10] sm:$0xff]  ;;  %v22_v41 = vld [vmem:[%s1489_s0 + $0x40] sm:$0xff]  ;;  %v146_v43 = vld [vmem:[%s1488_s1 + $0x218] sm:$0xff] }
  0x19   :  { %v20_v40 = vld [vmem:[%s1489_s0 + $0x30] sm:$0xff]  ;;  %v19_v44 = vld [vmem:[%s1489_s0 + $0x28] sm:$0xff]  ;;  %v21_v45 = vld [vmem:[%s1489_s0 + $0x38] sm:$0xff] }
  0x1a   :  { %873 = vmatpush3.bf16.msra.mxu0 %v872_v10  ;;  %v145_v42 = vld [vmem:[%s1488_s1 + $0x210] sm:$0xff]  ;;  %v25_v46 = vld [vmem:[%s1489_s0 + $0x58] sm:$0xff]  ;;  %v27_v48 = vld [vmem:[%s1489_s0 + $0x68] sm:$0xff] }
  0x1b   :  { %905 = vmatpush3.bf16.msra.mxu1 %v904_v13  ;;  %875 = vmatprep.subr.bf16.mxu0 %v874_v14  ;;  %v918_v47 = vpack.c.bf16 %v146_v43, %v145_v42  ;;  %v147_v49 = vld [vmem:[%s1488_s1 + $0x220] sm:$0xff]  ;;  %v148_v50 = vld [vmem:[%s1488_s1 + $0x228] sm:$0xff]  ;;  %v24_v51 = vld [vmem:[%s1489_s0 + $0x50] sm:$0xff] }
  0x1c   :  { %907 = vmatprep.subr.bf16.mxu1 %v906_v18  ;;  %v26_v52 = vld [vmem:[%s1489_s0 + $0x60] sm:$0xff]  ;;  %v921_v54 = vpack.c.bf16 %v148_v50, %v147_v49  ;;  %v32_v55 = vld [vmem:[%s1489_s0 + $0x90] sm:$0xff]  ;;  %v150_v57 = vld [vmem:[%s1488_s1 + $0x238] sm:$0xff] }
  0x1d   :  { %v30_v53 = vld [vmem:[%s1489_s0 + $0x80] sm:$0xff]  ;;  %v149_v56 = vld [vmem:[%s1488_s1 + $0x230] sm:$0xff]  ;;  %v29_v58 = vld [vmem:[%s1489_s0 + $0x78] sm:$0xff] }
  0x1e   :  { %877 = vmatpush3.bf16.msra.mxu0 %v876_v24  ;;  %v31_v59 = vld [vmem:[%s1489_s0 + $0x88] sm:$0xff]  ;;  %v924_v61 = vpack.c.bf16 %v150_v57, %v149_v56  ;;  %v37_v62 = vld [vmem:[%s1489_s0 + $0xb8] sm:$0xff]  ;;  %v34_v63 = vld [vmem:[%s1489_s0 + $0xa0] sm:$0xff] }
  0x1f   :  { %909 = vmatpush3.bf16.msra.mxu1 %v908_v25  ;;  %879 = vmatprep.subr.bf16.mxu0 %v878_v26  ;;  %v35_v60 = vld [vmem:[%s1489_s0 + $0xa8] sm:$0xff]  ;;  %v36_v0 = vld [vmem:[%s1489_s0 + $0xb0] sm:$0xff]  ;;  %v42_v2 = vld [vmem:[%s1489_s0 + $0xe0] sm:$0xff] }
  0x20   :  { %911 = vmatprep.subr.bf16.mxu1 %v910_v29  ;;  %v40_v1 = vld [vmem:[%s1489_s0 + $0xd0] sm:$0xff]  ;;  %v39_v3 = vld [vmem:[%s1489_s0 + $0xc8] sm:$0xff]  ;;  %v41_v4 = vld [vmem:[%s1489_s0 + $0xd8] sm:$0xff] }
  0x21   :  { %v45_v5 = vld [vmem:[%s1489_s0 + $0xf8] sm:$0xff]  ;;  %v47_v6 = vld [vmem:[%s1489_s0 + $0x108] sm:$0xff]  ;;  %v44_v7 = vld [vmem:[%s1489_s0 + $0xf0] sm:$0xff] }
  0x22   :  { %881 = vmatpush3.bf16.msra.mxu0 %v880_v32  ;;  %v46_v8 = vld [vmem:[%s1489_s0 + $0x100] sm:$0xff]  ;;  %v52_v10 = vld [vmem:[%s1489_s0 + $0x130] sm:$0xff]  ;;  %v49_v11 = vld [vmem:[%s1489_s0 + $0x118] sm:$0xff] }
  0x23   :  { %913 = vmatpush3.bf16.msra.mxu1 %v912_v33  ;;  %914 = vmatprep.subr.bf16.mxu0 %v937_v39  ;;  %v50_v9 = vld [vmem:[%s1489_s0 + $0x120] sm:$0xff]  ;;  %v51_v12 = vld [vmem:[%s1489_s0 + $0x128] sm:$0xff]  ;;  %v57_v14 = vld [vmem:[%s1489_s0 + $0x158] sm:$0xff]  ;;  %v939_v33 = vmov 0.0  }
  0x24   :  { %926 = vmatprep.subr.bf16.mxu1 %v937_v39  ;;  %v55_v13 = vld [vmem:[%s1489_s0 + $0x148] sm:$0xff]  ;;  %v54_v15 = vld [vmem:[%s1489_s0 + $0x140] sm:$0xff]  ;;  %v56_v16 = vld [vmem:[%s1489_s0 + $0x150] sm:$0xff] }
  0x25   :  { %263 = vmatmul.mubr.f32.vlgmr.msra.gmra.mrb[0].mxu0 %v14_v36  ;;  %v60_v17 = vld [vmem:[%s1489_s0 + $0x170] sm:$0xff]  ;;  %v62_v18 = vld [vmem:[%s1489_s0 + $0x180] sm:$0xff]  ;;  %v59_v19 = vld [vmem:[%s1489_s0 + $0x168] sm:$0xff] }
  0x26   :  { %393 = vmatmul.mubr.f32.vlgmr.msra.gmra.mrb[0].mxu1 %v16_v38  ;;  %916 = vmatpush3.bf16.msra.mxu0 %v915_v37  ;;  %v61_v20 = vld [vmem:[%s1489_s0 + $0x178] sm:$0xff]  ;;  %v67_v22 = vld [vmem:[%s1489_s0 + $0x1a8] sm:$0xff]  ;;  %v64_v23 = vld [vmem:[%s1489_s0 + $0x190] sm:$0xff] }
  0x27   :  { %267 = vmatprep.mubr.f32.mxu0 %v20_v40  ;;  %397 = vmatprep.mubr.f32.mxu1 %v22_v41  ;;  %v65_v21 = vld [vmem:[%s1489_s0 + $0x198] sm:$0xff]  ;;  %v66_v24 = vld [vmem:[%s1489_s0 + $0x1a0] sm:$0xff]  ;;  %v72_v26 = vld [vmem:[%s1489_s0 + $0x1d0] sm:$0xff] }
  0x28   :  { %930 = vmatpush3.bf16.msra.mxu1 %v915_v37  ;;  %917 = vmatprep.subr.bf16.mxu0 %v937_v39  ;;  %v70_v25 = vld [vmem:[%s1489_s0 + $0x1c0] sm:$0xff]  ;;  %v69_v27 = vld [vmem:[%s1489_s0 + $0x1b8] sm:$0xff]  ;;  %v71_v28 = vld [vmem:[%s1489_s0 + $0x1c8] sm:$0xff] }
  0x29   :  { %268 = vmatmul.mubr.f32.gmra.mrb[2].mxu0 %v19_v44  ;;  %927 = vmatprep.subr.bf16.mxu1 %v937_v39  ;;  %v75_v29 = vld [vmem:[%s1489_s0 + $0x1e8] sm:$0xff]  ;;  %v77_v30 = vld [vmem:[%s1489_s0 + $0x1f8] sm:$0xff]  ;;  %v74_v31 = vld [vmem:[%s1489_s0 + $0x1e0] sm:$0xff] }
  0x2a   :  { %398 = vmatmul.mubr.f32.gmra.mrb[2].mxu1 %v21_v45  ;;  %272 = vmatprep.mubr.f32.mxu0 %v25_v46  ;;  %v76_v32 = vld [vmem:[%s1489_s0 + $0x1f0] sm:$0xff]  ;;  %v18_v34 = vld [vmem:[%s1489_s0 + $0x20] sm:$0xff]  ;;  %v53_v35 = vld [vmem:[%s1489_s0 + $0x138] sm:$0xff] }
  0x2b   :  { %402 = vmatprep.mubr.f32.mxu1 %v27_v48  ;;  %919 = vmatpush3.bf16.msra.mxu0 %v918_v47  ;;  %v23_v36 = vld [vmem:[%s1489_s0 + $0x48] sm:$0xff]  ;;  %v58_v37 = vld [vmem:[%s1489_s0 + $0x160] sm:$0xff]  ;;  %v28_v38 = vld [vmem:[%s1489_s0 + $0x70] sm:$0xff] }
  0x2c   :  { %931 = vmatpush3.bf16.msra.mxu1 %v918_v47  ;;  %920 = vmatprep.subr.bf16.mxu0 %v937_v39  ;;  %v33_v40 = vld [vmem:[%s1489_s0 + $0x98] sm:$0xff]  ;;  %v68_v41 = vld [vmem:[%s1489_s0 + $0x1b0] sm:$0xff]  ;;  %v38_v42 = vld [vmem:[%s1489_s0 + $0xc0] sm:$0xff] }
  0x2d   :  { %273 = vmatmul.mubr.f32.gmra.mrb[4].mxu0 %v24_v51  ;;  %928 = vmatprep.subr.bf16.mxu1 %v937_v39  ;;  %v73_v43 = vld [vmem:[%s1489_s0 + $0x1d8] sm:$0xff]  ;;  %v43_v44 = vld [vmem:[%s1489_s0 + $0xe8] sm:$0xff]  ;;  %v78_v45 = vld [vmem:[%s1489_s0 + $0x200] sm:$0xff] }
  0x2e   :  { %403 = vmatmul.mubr.f32.gmra.mrb[4].mxu1 %v26_v52  ;;  %277 = vmatprep.mubr.f32.mxu0 %v30_v53  ;;  %v48_v46 = vld [vmem:[%s1489_s0 + $0x110] sm:$0xff]  ;;  %v1400_v48 = vld [vmem:[%s1490_s2] ss:$0 sm:$0xff] }
  0x2f   :  { %407 = vmatprep.mubr.f32.mxu1 %v32_v55  ;;  %922 = vmatpush3.bf16.msra.mxu0 %v921_v54 }
  0x30   :  { %932 = vmatpush3.bf16.msra.mxu1 %v921_v54  ;;  %923 = vmatprep.subr.bf16.mxu0 %v937_v39 }
  0x31   :  { %278 = vmatmul.mubr.f32.gmra.mrb[6].mxu0 %v29_v58  ;;  %929 = vmatprep.subr.bf16.mxu1 %v937_v39  ;;  %v63_v39 = vld [vmem:[%s1489_s0 + $0x188] sm:$0xff] }
  0x32   :  { %408 = vmatmul.mubr.f32.gmra.mrb[6].mxu1 %v31_v59  ;;  %282 = vmatprep.mubr.f32.mxu0 %v35_v60 }
  0x33   :  { %412 = vmatprep.mubr.f32.mxu1 %v37_v62  ;;  %925 = vmatpush3.bf16.msra.mxu0 %v924_v61 }
  0x34   :  { %933 = vmatpush3.bf16.msra.mxu1 %v924_v61 }
  0x35   :  { %283 = vmatmul.mubr.f32.gmra.mrb[8].mxu0 %v34_v63 }
  0x36   :  { %413 = vmatmul.mubr.f32.gmra.mrb[8].mxu1 %v36_v0  ;;  %287 = vmatprep.mubr.f32.mxu0 %v40_v1 }
  0x37   :  { %417 = vmatprep.mubr.f32.mxu1 %v42_v2 }
  0x39   :  { %288 = vmatmul.mubr.f32.gmra.mrb[10].mxu0 %v39_v3 }
  0x3a   :  { %418 = vmatmul.mubr.f32.gmra.mrb[10].mxu1 %v41_v4  ;;  %292 = vmatprep.mubr.f32.mxu0 %v45_v5 }
  0x3b   :  { %422 = vmatprep.mubr.f32.mxu1 %v47_v6 }
  0x3d   :  { %293 = vmatmul.mubr.f32.gmra.mrb[12].mxu0 %v44_v7 }
  0x3e   :  { %423 = vmatmul.mubr.f32.gmra.mrb[12].mxu1 %v46_v8  ;;  %297 = vmatprep.mubr.f32.mxu0 %v50_v9 }
  0x3f   :  { %427 = vmatprep.mubr.f32.mxu1 %v52_v10 }
  0x41   :  { %298 = vmatmul.mubr.f32.gmra.mrb[14].mxu0 %v49_v11 }
  0x42   :  { %428 = vmatmul.mubr.f32.gmra.mrb[14].mxu1 %v51_v12  ;;  %302 = vmatprep.mubr.f32.mxu0 %v55_v13 }
  0x43   :  { %432 = vmatprep.mubr.f32.mxu1 %v57_v14 }
  0x45   :  { %303 = vmatmul.mubr.f32.gmra.mrb[16].mxu0 %v54_v15 }
  0x46   :  { %433 = vmatmul.mubr.f32.gmra.mrb[16].mxu1 %v56_v16  ;;  %307 = vmatprep.mubr.f32.mxu0 %v60_v17 }
  0x47   :  { %437 = vmatprep.mubr.f32.mxu1 %v62_v18 }
  0x49   :  { %308 = vmatmul.mubr.f32.gmra.mrb[18].mxu0 %v59_v19 }
  0x4a   :  { %438 = vmatmul.mubr.f32.gmra.mrb[18].mxu1 %v61_v20  ;;  %312 = vmatprep.mubr.f32.mxu0 %v65_v21 }
  0x4b   :  { %442 = vmatprep.mubr.f32.mxu1 %v67_v22 }
  0x4d   :  { %313 = vmatmul.mubr.f32.gmra.mrb[20].mxu0 %v64_v23 }
  0x4e   :  { %443 = vmatmul.mubr.f32.gmra.mrb[20].mxu1 %v66_v24  ;;  %317 = vmatprep.mubr.f32.mxu0 %v70_v25 }
  0x4f   :  { %447 = vmatprep.mubr.f32.mxu1 %v72_v26 }
  0x51   :  { %318 = vmatmul.mubr.f32.gmra.mrb[22].mxu0 %v69_v27 }
  0x52   :  { %448 = vmatmul.mubr.f32.gmra.mrb[22].mxu1 %v71_v28  ;;  %322 = vmatprep.mubr.f32.mxu0 %v75_v29 }
  0x53   :  { %452 = vmatprep.mubr.f32.mxu1 %v77_v30 }
  0x55   :  { %323 = vmatmul.mubr.f32.gmra.mrb[24].mxu0 %v74_v31 }
  0x56   :  { %453 = vmatmul.mubr.f32.gmra.mrb[24].mxu1 %v76_v32  ;;  %811 = vmatprep.mubr.msk.f32.mxu0 %vm938_vm0, %v939_v33 }
  0x57   :  { %832 = vmatprep.mubr.msk.f32.mxu1 %vm938_vm0, %v939_v33 }
  0x59   :  { %812 = vmatmul.mubr.msk.f32.vlgmr.msra.gmra.mrb[26].mxu0 %vm158_vm1, %v18_v34 }
  0x5a   :  { %833 = vmatmul.mubr.msk.f32.vlgmr.msra.gmra.mrb[26].mxu1 %vm158_vm1, %v53_v35  ;;  %814 = vmatprep.mubr.msk.f32.mxu0 %vm938_vm0, %v939_v33 }
  0x5b   :  { %835 = vmatprep.mubr.msk.f32.mxu1 %vm938_vm0, %v939_v33 }
  0x5d   :  { %815 = vmatmul.mubr.msk.f32.gmra.mrb[28].mxu0 %vm158_vm1, %v23_v36 }
  0x5e   :  { %836 = vmatmul.mubr.msk.f32.gmra.mrb[28].mxu1 %vm158_vm1, %v58_v37  ;;  %817 = vmatprep.mubr.msk.f32.mxu0 %vm938_vm0, %v939_v33 }
  0x5f   :  { %838 = vmatprep.mubr.msk.f32.mxu1 %vm938_vm0, %v939_v33 }
  0x61   :  { %818 = vmatmul.mubr.msk.f32.gmra.mrb[30].mxu0 %vm158_vm1, %v28_v38 }
  0x62   :  { %839 = vmatmul.mubr.msk.f32.gmra.mrb[30].mxu1 %vm158_vm1, %v63_v39  ;;  %820 = vmatprep.mubr.msk.f32.mxu0 %vm938_vm0, %v939_v33 }
  0x63   :  { %841 = vmatprep.mubr.msk.f32.mxu1 %vm938_vm0, %v939_v33 }
  0x65   :  { %821 = vmatmul.mubr.msk.f32.gmra.mrb[32].mxu0 %vm158_vm1, %v33_v40 }
  0x66   :  { %842 = vmatmul.mubr.msk.f32.gmra.mrb[32].mxu1 %vm158_vm1, %v68_v41  ;;  %823 = vmatprep.mubr.msk.f32.mxu0 %vm938_vm0, %v939_v33 }
  0x67   :  { %844 = vmatprep.mubr.msk.f32.mxu1 %vm938_vm0, %v939_v33 }
  0x69   :  { %824 = vmatmul.mubr.msk.f32.gmra.mrb[34].mxu0 %vm158_vm1, %v38_v42 }
  0x6a   :  { %845 = vmatmul.mubr.msk.f32.gmra.mrb[34].mxu1 %vm158_vm1, %v73_v43  ;;  %826 = vmatprep.mubr.msk.f32.mxu0 %vm938_vm0, %v939_v33 }
  0x6b   :  { %847 = vmatprep.mubr.msk.f32.mxu1 %vm938_vm0, %v939_v33 }
  0x6d   :  { %827 = vmatmul.mubr.msk.f32.gmra.mrb[36].mxu0 %vm158_vm1, %v43_v44 }
  0x6e   :  { %848 = vmatmul.mubr.msk.f32.gmra.mrb[36].mxu1 %vm158_vm1, %v78_v45  ;;  %829 = vmatprep.mubr.msk.f32.mxu0 %vm938_vm0, %v939_v33 }
  0x71   :  { %830 = vmatmul.mubr.msk.f32.gmra.mrb[38].mxu0 %vm158_vm1, %v48_v46 }
  0xf8   :  { %v664_v47 = vpop.f32.mrb[0].mxu0 }
  0xf9   :  { %v665_v49 = vpop.f32.mrb[1].mxu0  ;;  %v735_v50 = vpop.f32.mrb[0].mxu1 }
  0xfa   :  { %v666_v51 = vadd.f32 %v665_v49, %v664_v47  ;;  %v736_v52 = vpop.f32.mrb[1].mxu1 }
  0xfb   :  { %v737_v53 = vadd.f32 %v736_v52, %v735_v50 }
  0xfc   :  { %v265_v54 = vadd.f32 %v666_v51, %v1400_v48  ;;  %v667_v55 = vpop.f32.mrb[2].mxu0 }
  0xfd   :  { %v668_v56 = vpop.f32.mrb[3].mxu0  ;;  %v738_v57 = vpop.f32.mrb[2].mxu1 }
  0xfe   :  { %v669_v58 = vadd.f32 %v668_v56, %v667_v55  ;;  %v739_v59 = vpop.f32.mrb[3].mxu1  ;;  %v1403_v60 = vadd.f32 %v737_v53, %v265_v54 }
  0xff   :  { %v740_v61 = vadd.f32 %v739_v59, %v738_v57 }
 0x100   :  { %v270_v62 = vadd.f32 %v669_v58, %v1400_v48  ;;  %v670_v63 = vpop.f32.mrb[4].mxu0 }
 0x101   :  { %v671_v0 = vpop.f32.mrb[5].mxu0  ;;  %v741_v1 = vpop.f32.mrb[4].mxu1 }
 0x102   :  { %v672_v2 = vadd.f32 %v671_v0, %v670_v63  ;;  %v742_v3 = vpop.f32.mrb[5].mxu1  ;;  %v1406_v4 = vadd.f32 %v740_v61, %v270_v62 }
 0x103   :  { %v743_v5 = vadd.f32 %v742_v3, %v741_v1 }
 0x104   :  { %v275_v6 = vadd.f32 %v672_v2, %v1400_v48  ;;  %v673_v7 = vpop.f32.mrb[6].mxu0 }
 0x105   :  { %v674_v8 = vpop.f32.mrb[7].mxu0  ;;  %v744_v9 = vpop.f32.mrb[6].mxu1 }
 0x106   :  { %v675_v10 = vadd.f32 %v674_v8, %v673_v7  ;;  %v745_v11 = vpop.f32.mrb[7].mxu1  ;;  %v1409_v12 = vadd.f32 %v743_v5, %v275_v6 }
 0x107   :  { %v746_v13 = vadd.f32 %v745_v11, %v744_v9 }
 0x108   :  { %v280_v14 = vadd.f32 %v675_v10, %v1400_v48  ;;  %v676_v15 = vpop.f32.mrb[8].mxu0 }
 0x109   :  { %v677_v16 = vpop.f32.mrb[9].mxu0  ;;  %v747_v17 = vpop.f32.mrb[8].mxu1 }
 0x10a   :  { %v678_v18 = vadd.f32 %v677_v16, %v676_v15  ;;  %v748_v19 = vpop.f32.mrb[9].mxu1  ;;  %v1412_v20 = vadd.f32 %v746_v13, %v280_v14 }
 0x10b   :  { %v749_v21 = vadd.f32 %v748_v19, %v747_v17 }
 0x10c   :  { %v285_v22 = vadd.f32 %v678_v18, %v1400_v48  ;;  %v679_v23 = vpop.f32.mrb[10].mxu0 }
 0x10d   :  { %v680_v24 = vpop.f32.mrb[11].mxu0  ;;  %v750_v25 = vpop.f32.mrb[10].mxu1 }
 0x10e   :  { %v681_v26 = vadd.f32 %v680_v24, %v679_v23  ;;  %v751_v27 = vpop.f32.mrb[11].mxu1  ;;  %v1415_v28 = vadd.f32 %v749_v21, %v285_v22 }
 0x10f   :  { %v752_v29 = vadd.f32 %v751_v27, %v750_v25 }
 0x110   :  { %v290_v30 = vadd.f32 %v681_v26, %v1400_v48  ;;  %v682_v31 = vpop.f32.mrb[12].mxu0 }
 0x111   :  { %v683_v32 = vpop.f32.mrb[13].mxu0  ;;  %v753_v33 = vpop.f32.mrb[12].mxu1 }
 0x112   :  { %v684_v34 = vadd.f32 %v683_v32, %v682_v31  ;;  %v754_v35 = vpop.f32.mrb[13].mxu1  ;;  %v1418_v36 = vadd.f32 %v752_v29, %v290_v30 }
 0x113   :  { %v755_v37 = vadd.f32 %v754_v35, %v753_v33 }
 0x114   :  { %v295_v38 = vadd.f32 %v684_v34, %v1400_v48  ;;  %v685_v39 = vpop.f32.mrb[14].mxu0 }
 0x115   :  { %v686_v40 = vpop.f32.mrb[15].mxu0  ;;  %v756_v41 = vpop.f32.mrb[14].mxu1 }
 0x116   :  { %v687_v42 = vadd.f32 %v686_v40, %v685_v39  ;;  %v757_v43 = vpop.f32.mrb[15].mxu1  ;;  %v1421_v44 = vadd.f32 %v755_v37, %v295_v38 }
 0x117   :  { %v758_v45 = vadd.f32 %v757_v43, %v756_v41 }
 0x118   :  { %v300_v46 = vadd.f32 %v687_v42, %v1400_v48  ;;  %v688_v47 = vpop.f32.mrb[16].mxu0 }
 0x119   :  { %v689_v49 = vpop.f32.mrb[17].mxu0  ;;  %v759_v50 = vpop.f32.mrb[16].mxu1 }
 0x11a   :  { %v690_v51 = vadd.f32 %v689_v49, %v688_v47  ;;  %v760_v52 = vpop.f32.mrb[17].mxu1  ;;  %v430_v53 = vadd.f32 %v758_v45, %v300_v46 }
 0x11b   :  { %v761_v54 = vadd.f32 %v760_v52, %v759_v50 }
 0x11c   :  { %v305_v55 = vadd.f32 %v690_v51, %v1400_v48  ;;  %v691_v56 = vpop.f32.mrb[18].mxu0 }
 0x11d   :  { %v692_v57 = vpop.f32.mrb[19].mxu0  ;;  %v762_v58 = vpop.f32.mrb[18].mxu1 }
 0x11e   :  { %v693_v59 = vadd.f32 %v692_v57, %v691_v56  ;;  %v763_v61 = vpop.f32.mrb[19].mxu1  ;;  %v435_v62 = vadd.f32 %v761_v54, %v305_v55 }
 0x11f   :  { %v764_v63 = vadd.f32 %v763_v61, %v762_v58 }
 0x120   :  { %v310_v0 = vadd.f32 %v693_v59, %v1400_v48  ;;  %v694_v1 = vpop.f32.mrb[20].mxu0 }
 0x121   :  { %v695_v2 = vpop.f32.mrb[21].mxu0  ;;  %v765_v3 = vpop.f32.mrb[20].mxu1 }
 0x122   :  { %v696_v5 = vadd.f32 %v695_v2, %v694_v1  ;;  %v766_v6 = vpop.f32.mrb[21].mxu1  ;;  %v440_v7 = vadd.f32 %v764_v63, %v310_v0 }
 0x123   :  { %v767_v8 = vadd.f32 %v766_v6, %v765_v3 }
 0x124   :  { %v315_v9 = vadd.f32 %v696_v5, %v1400_v48  ;;  %v697_v10 = vpop.f32.mrb[22].mxu0 }
 0x125   :  { %v698_v11 = vpop.f32.mrb[23].mxu0  ;;  %v768_v13 = vpop.f32.mrb[22].mxu1 }
 0x126   :  { %v699_v14 = vadd.f32 %v698_v11, %v697_v10  ;;  %v769_v15 = vpop.f32.mrb[23].mxu1  ;;  %v445_v16 = vadd.f32 %v767_v8, %v315_v9 }
 0x127   :  { %v770_v17 = vadd.f32 %v769_v15, %v768_v13 }
 0x128   :  { %v320_v18 = vadd.f32 %v699_v14, %v1400_v48  ;;  %v700_v19 = vpop.f32.mrb[24].mxu0 }
 0x129   :  { %v701_v21 = vpop.f32.mrb[25].mxu0  ;;  %v771_v22 = vpop.f32.mrb[24].mxu1 }
 0x12a   :  { %v702_v23 = vadd.f32 %v701_v21, %v700_v19  ;;  %v772_v24 = vpop.f32.mrb[25].mxu1  ;;  %v450_v25 = vadd.f32 %v770_v17, %v320_v18 }
 0x12b   :  { %v773_v26 = vadd.f32 %v772_v24, %v771_v22 }
 0x12c   :  { %v325_v27 = vadd.f32 %v702_v23, %v1400_v48  ;;  %v524_v29 = vpop.f32.mrb[26].mxu0 }
 0x12d   :  { %v525_v30 = vadd.f32 %v524_v29, %v1403_v60  ;;  %v559_v31 = vpop.f32.mrb[26].mxu1  ;;  %v813_v32 = vpop.f32.mrb[27].mxu0 }
 0x12e   :  { %v560_v33 = vadd.f32 %v559_v31, %v430_v53  ;;  %v834_v34 = vpop.f32.mrb[27].mxu1  ;;  %v455_v35 = vadd.f32 %v773_v26, %v325_v27 }
 0x12f   :  { %v588_v37 = vmax.f32 %v525_v30, 0.0 }
 0x130   :  { %v595_v38 = vmax.f32 %v560_v33, 0.0  ;;  %v529_v39 = vpop.f32.mrb[28].mxu0 }
 0x131   :  { %601 = vst.msk [vmem:[%s1491_s3] sm:$0xff] %vm158_vm1, %v588_v37  ;;  %v530_v40 = vadd.f32 %v529_v39, %v1406_v4  ;;  %v564_v41 = vpop.f32.mrb[28].mxu1  ;;  %v816_v48 = vpop.f32.mrb[29].mxu0 }
 0x132   :  { %608 = vst.msk [vmem:[%s1491_s3 + $0x38] sm:$0xff] %vm158_vm1, %v595_v38  ;;  %v565_v60 = vadd.f32 %v564_v41, %v435_v62  ;;  %v837_v42 = vpop.f32.mrb[29].mxu1 }
 0x133   :  { %v589_v43 = vmax.f32 %v530_v40, 0.0 }
 0x134   :  { %v596_v45 = vmax.f32 %v565_v60, 0.0  ;;  %v534_v46 = vpop.f32.mrb[30].mxu0 }
 0x135   :  { %602 = vst.msk [vmem:[%s1491_s3 + $0x8] sm:$0xff] %vm158_vm1, %v589_v43  ;;  %v535_v47 = vadd.f32 %v534_v46, %v1409_v12  ;;  %v569_v4 = vpop.f32.mrb[30].mxu1  ;;  %v819_v49 = vpop.f32.mrb[31].mxu0 }
 0x136   :  { %609 = vst.msk [vmem:[%s1491_s3 + $0x40] sm:$0xff] %vm158_vm1, %v596_v45  ;;  %v570_v50 = vadd.f32 %v569_v4, %v440_v7  ;;  %v840_v51 = vpop.f32.mrb[31].mxu1 }
 0x137   :  { %v590_v52 = vmax.f32 %v535_v47, 0.0 }
 0x138   :  { %v597_v53 = vmax.f32 %v570_v50, 0.0  ;;  %v539_v54 = vpop.f32.mrb[32].mxu0 }
 0x139   :  { %603 = vst.msk [vmem:[%s1491_s3 + $0x10] sm:$0xff] %vm158_vm1, %v590_v52  ;;  %v540_v55 = vadd.f32 %v539_v54, %v1412_v20  ;;  %v574_v12 = vpop.f32.mrb[32].mxu1  ;;  %v822_v56 = vpop.f32.mrb[33].mxu0 }
 0x13a   :  { %610 = vst.msk [vmem:[%s1491_s3 + $0x48] sm:$0xff] %vm158_vm1, %v597_v53  ;;  %v575_v57 = vadd.f32 %v574_v12, %v445_v16  ;;  %v843_v58 = vpop.f32.mrb[33].mxu1 }
 0x13b   :  { %v591_v59 = vmax.f32 %v540_v55, 0.0 }
 0x13c   :  { %v598_v61 = vmax.f32 %v575_v57, 0.0  ;;  %v544_v62 = vpop.f32.mrb[34].mxu0 }
 0x13d   :  { %604 = vst.msk [vmem:[%s1491_s3 + $0x18] sm:$0xff] %vm158_vm1, %v591_v59  ;;  %v545_v63 = vadd.f32 %v544_v62, %v1415_v28  ;;  %v579_v20 = vpop.f32.mrb[34].mxu1  ;;  %v825_v0 = vpop.f32.mrb[35].mxu0 }
 0x13e   :  { %611 = vst.msk [vmem:[%s1491_s3 + $0x50] sm:$0xff] %vm158_vm1, %v598_v61  ;;  %v580_v1 = vadd.f32 %v579_v20, %v450_v25  ;;  %v846_v2 = vpop.f32.mrb[35].mxu1 }
 0x13f   :  { %v592_v3 = vmax.f32 %v545_v63, 0.0 }
 0x140   :  { %v599_v5 = vmax.f32 %v580_v1, 0.0  ;;  %v549_v6 = vpop.f32.mrb[36].mxu0 }
 0x141   :  { %605 = vst.msk [vmem:[%s1491_s3 + $0x20] sm:$0xff] %vm158_vm1, %v592_v3  ;;  %v550_v7 = vadd.f32 %v549_v6, %v1418_v36  ;;  %v584_v28 = vpop.f32.mrb[36].mxu1  ;;  %v828_v8 = vpop.f32.mrb[37].mxu0 }
 0x142   :  { %612 = vst.msk [vmem:[%s1491_s3 + $0x58] sm:$0xff] %vm158_vm1, %v599_v5  ;;  %v585_v9 = vadd.f32 %v584_v28, %v455_v35  ;;  %v849_v10 = vpop.f32.mrb[37].mxu1 }
 0x143   :  { %v593_v11 = vmax.f32 %v550_v7, 0.0 }
 0x144   :  { %v600_v13 = vmax.f32 %v585_v9, 0.0  ;;  %v554_v14 = vpop.f32.mrb[38].mxu0 }
 0x145   :  { %606 = vst.msk [vmem:[%s1491_s3 + $0x28] sm:$0xff] %vm158_vm1, %v593_v11  ;;  %v555_v15 = vadd.f32 %v554_v14, %v1421_v44  ;;  %v831_v36 = vpop.f32.mrb[39].mxu0 }
 0x146   :  { %613 = vst.msk [vmem:[%s1491_s3 + $0x60] sm:$0xff] %vm158_vm1, %v600_v13 }
 0x147   :  { %v594_v16 = vmax.f32 %v555_v15, 0.0 }
 0x149   :  { %607 = vst.msk [vmem:[%s1491_s3 + $0x30] sm:$0xff] %vm158_vm1, %v594_v16 }

// kernel: convdqn_forward.7
= control target key start
LH: loop header
LB: loop body
LE: loop exit
PB: predicated region body
PF: predicated region fallthrough
CT: control target
= control target key end

     0   :  { %10 = vsyncpa [#allocation3], 0  ;;  %vm1924_vm0 = vcmask 523264   ;;  %vm3988_vm1 = vcmask 48128   ;;  %s10990_s0 = inlined_call_operand.vmem [shape: f32[2,3136], index: 0, kind: input, shape index: {}]   ;;  %s10991_s1 = inlined_call_operand.vmem [shape: f32[3136,512], index: 1, kind: input, shape index: {}]   ;;  %s10992_s2 = inlined_call_operand.vmem [shape: f32[1,512], index: 2, kind: input, shape index: {}]   ;;  %s10993_s3 = inlined_call_operand.vmem [shape: f32[512,6], index: 3, kind: input, shape index: {}]   ;;  %s10994_s4 = inlined_call_operand.vmem [shape: f32[1,6], index: 4, kind: input, shape index: {}]   ;;  %s10995_s5 = inlined_call_operand.hbm [shape: f32[2,6], index: 5, kind: output, shape index: {}]  }
   0x1   :  { %v50_v0 = vld [vmem:[%s10991_s1 + $0x8] sm:$0xff]  ;;  %v52_v3 = vld [vmem:[%s10991_s1 + $0x18] sm:$0xff]  ;;  %v49_v5 = vld [vmem:[%s10991_s1] sm:$0xff] }
   0x2   :  { %v54_v1 = vld [vmem:[%s10991_s1 + $0x28] sm:$0xff]  ;;  %v56_v4 = vld [vmem:[%s10991_s1 + $0x38] sm:$0xff]  ;;  %v53_v7 = vld [vmem:[%s10991_s1 + $0x20] sm:$0xff] }
   0x3   :  { %v4079_v2 = vpack.c.bf16 %v54_v1, %v50_v0  ;;  %v4863_v6 = vpack.c.bf16 %v56_v4, %v52_v3  ;;  %v51_v8 = vld [vmem:[%s10991_s1 + $0x10] sm:$0xff]  ;;  %v4081_v10 = vpack.c.bf16 %v53_v7, %v49_v5  ;;  %v58_v12 = vld [vmem:[%s10991_s1 + $0x48] sm:$0xff]  ;;  %v60_v14 = vld [vmem:[%s10991_s1 + $0x58] sm:$0xff] }
   0x4   :  { %v55_v9 = vld [vmem:[%s10991_s1 + $0x30] sm:$0xff]  ;;  %v62_v13 = vld [vmem:[%s10991_s1 + $0x68] sm:$0xff]  ;;  %v64_v16 = vld [vmem:[%s10991_s1 + $0x78] sm:$0xff] }
   0x5   :  { %4080 = vmatprep.subr.bf16.mxu0 %v4079_v2  ;;  %v4865_v11 = vpack.c.bf16 %v55_v9, %v51_v8  ;;  %4864 = vmatprep.subr.bf16.mxu1 %v4863_v6  ;;  %v4083_v15 = vpack.c.bf16 %v62_v13, %v58_v12  ;;  %v57_v17 = vld [vmem:[%s10991_s1 + $0x40] sm:$0xff]  ;;  %v4867_v19 = vpack.c.bf16 %v64_v16, %v60_v14  ;;  %v59_v21 = vld [vmem:[%s10991_s1 + $0x50] sm:$0xff]  ;;  %v66_v23 = vld [vmem:[%s10991_s1 + $0x88] sm:$0xff] }
   0x6   :  { %v61_v18 = vld [vmem:[%s10991_s1 + $0x60] sm:$0xff]  ;;  %4082 = vmatpush1.bf16.msra.mxu0 %v4081_v10  ;;  %v63_v22 = vld [vmem:[%s10991_s1 + $0x70] sm:$0xff]  ;;  %v70_v25 = vld [vmem:[%s10991_s1 + $0xa8] sm:$0xff] }
   0x7   :  { %4866 = vmatpush1.bf16.msra.mxu1 %v4865_v11  ;;  %v4085_v20 = vpack.c.bf16 %v61_v18, %v57_v17  ;;  %4084 = vmatprep.subr.bf16.mxu0 %v4083_v15  ;;  %v4869_v24 = vpack.c.bf16 %v63_v22, %v59_v21  ;;  %v68_v26 = vld [vmem:[%s10991_s1 + $0x98] sm:$0xff]  ;;  %v4087_v28 = vpack.c.bf16 %v70_v25, %v66_v23  ;;  %v65_v30 = vld [vmem:[%s10991_s1 + $0x80] sm:$0xff]  ;;  %v67_v32 = vld [vmem:[%s10991_s1 + $0x90] sm:$0xff] }
   0x8   :  { %v72_v27 = vld [vmem:[%s10991_s1 + $0xb8] sm:$0xff]  ;;  %4868 = vmatprep.subr.bf16.mxu1 %v4867_v19  ;;  %v69_v31 = vld [vmem:[%s10991_s1 + $0xa0] sm:$0xff]  ;;  %v71_v33 = vld [vmem:[%s10991_s1 + $0xb0] sm:$0xff] }
   0x9   :  { %v4871_v29 = vpack.c.bf16 %v72_v27, %v68_v26  ;;  %v74_v34 = vld [vmem:[%s10991_s1 + $0xc8] sm:$0xff]  ;;  %v4089_v36 = vpack.c.bf16 %v69_v31, %v65_v30  ;;  %v4873_v37 = vpack.c.bf16 %v71_v33, %v67_v32  ;;  %v76_v38 = vld [vmem:[%s10991_s1 + $0xd8] sm:$0xff]  ;;  %v73_v40 = vld [vmem:[%s10991_s1 + $0xc0] sm:$0xff] }
   0xa   :  { %v78_v35 = vld [vmem:[%s10991_s1 + $0xe8] sm:$0xff]  ;;  %4086 = vmatpush1.bf16.msra.mxu0 %v4085_v20  ;;  %v80_v39 = vld [vmem:[%s10991_s1 + $0xf8] sm:$0xff]  ;;  %v77_v43 = vld [vmem:[%s10991_s1 + $0xe0] sm:$0xff] }
   0xb   :  { %4870 = vmatpush1.bf16.msra.mxu1 %v4869_v24  ;;  %4088 = vmatprep.subr.bf16.mxu0 %v4087_v28  ;;  %v4091_v41 = vpack.c.bf16 %v78_v35, %v74_v34  ;;  %v4875_v42 = vpack.c.bf16 %v80_v39, %v76_v38  ;;  %v75_v44 = vld [vmem:[%s10991_s1 + $0xd0] sm:$0xff]  ;;  %v82_v46 = vld [vmem:[%s10991_s1 + $0x108] sm:$0xff]  ;;  %v84_v48 = vld [vmem:[%s10991_s1 + $0x118] sm:$0xff]  ;;  %v4093_v50 = vpack.c.bf16 %v77_v43, %v73_v40 }
   0xc   :  { %4872 = vmatprep.subr.bf16.mxu1 %v4871_v29  ;;  %v79_v45 = vld [vmem:[%s10991_s1 + $0xf0] sm:$0xff]  ;;  %v86_v47 = vld [vmem:[%s10991_s1 + $0x128] sm:$0xff]  ;;  %v88_v49 = vld [vmem:[%s10991_s1 + $0x138] sm:$0xff] }
   0xd   :  { %v4877_v51 = vpack.c.bf16 %v79_v45, %v75_v44  ;;  %v81_v52 = vld [vmem:[%s10991_s1 + $0x100] sm:$0xff]  ;;  %v4095_v54 = vpack.c.bf16 %v86_v47, %v82_v46  ;;  %v4879_v55 = vpack.c.bf16 %v88_v49, %v84_v48  ;;  %v83_v56 = vld [vmem:[%s10991_s1 + $0x110] sm:$0xff]  ;;  %v90_v58 = vld [vmem:[%s10991_s1 + $0x148] sm:$0xff] }
   0xe   :  { %4090 = vmatpush1.bf16.msra.mxu0 %v4089_v36  ;;  %v85_v53 = vld [vmem:[%s10991_s1 + $0x120] sm:$0xff]  ;;  %v87_v57 = vld [vmem:[%s10991_s1 + $0x130] sm:$0xff]  ;;  %v94_v59 = vld [vmem:[%s10991_s1 + $0x168] sm:$0xff] }
   0xf   :  { %4874 = vmatpush1.bf16.msra.mxu1 %v4873_v37  ;;  %4092 = vmatprep.subr.bf16.mxu0 %v4091_v41  ;;  %v92_v60 = vld [vmem:[%s10991_s1 + $0x158] sm:$0xff]  ;;  %v4097_v62 = vpack.c.bf16 %v85_v53, %v81_v52  ;;  %v4881_v63 = vpack.c.bf16 %v87_v57, %v83_v56  ;;  %v89_v0 = vld [vmem:[%s10991_s1 + $0x140] sm:$0xff]  ;;  %v4099_v2 = vpack.c.bf16 %v94_v59, %v90_v58  ;;  %v91_v4 = vld [vmem:[%s10991_s1 + $0x150] sm:$0xff]  ;;  %v5830_v56 = vmov 1983009808  }
  0x10   :  { %4876 = vmatprep.subr.bf16.mxu1 %v4875_v42  ;;  %v96_v61 = vld [vmem:[%s10991_s1 + $0x178] sm:$0xff]  ;;  %v93_v1 = vld [vmem:[%s10991_s1 + $0x160] sm:$0xff]  ;;  %v95_v5 = vld [vmem:[%s10991_s1 + $0x170] sm:$0xff]  ;;  %v1672_v57 = vunpack.c.l.s4 %v5830_v56 }
  0x11   :  { %v4883_v3 = vpack.c.bf16 %v96_v61, %v92_v60  ;;  %v98_v6 = vld [vmem:[%s10991_s1 + $0x188] sm:$0xff]  ;;  %v100_v8 = vld [vmem:[%s10991_s1 + $0x198] sm:$0xff]  ;;  %v4101_v10 = vpack.c.bf16 %v93_v1, %v89_v0  ;;  %v4885_v11 = vpack.c.bf16 %v95_v5, %v91_v4  ;;  %v97_v12 = vld [vmem:[%s10991_s1 + $0x180] sm:$0xff] }
  0x12   :  { %4094 = vmatpush1.bf16.msra.mxu0 %v4093_v50  ;;  %v102_v7 = vld [vmem:[%s10991_s1 + $0x1a8] sm:$0xff]  ;;  %v104_v9 = vld [vmem:[%s10991_s1 + $0x1b8] sm:$0xff]  ;;  %v101_v13 = vld [vmem:[%s10991_s1 + $0x1a0] sm:$0xff] }
  0x13   :  { %4878 = vmatpush1.bf16.msra.mxu1 %v4877_v51  ;;  %4096 = vmatprep.subr.bf16.mxu0 %v4095_v54  ;;  %v4103_v14 = vpack.c.bf16 %v102_v7, %v98_v6  ;;  %v4887_v15 = vpack.c.bf16 %v104_v9, %v100_v8  ;;  %v99_v16 = vld [vmem:[%s10991_s1 + $0x190] sm:$0xff]  ;;  %v106_v18 = vld [vmem:[%s10991_s1 + $0x1c8] sm:$0xff]  ;;  %v108_v20 = vld [vmem:[%s10991_s1 + $0x1d8] sm:$0xff]  ;;  %v4105_v22 = vpack.c.bf16 %v101_v13, %v97_v12  ;;  %v1673_v7 = vunpack.c.0.s8 %v1672_v57 }
  0x14   :  { %4880 = vmatprep.subr.bf16.mxu1 %v4879_v55  ;;  %v103_v17 = vld [vmem:[%s10991_s1 + $0x1b0] sm:$0xff]  ;;  %v110_v19 = vld [vmem:[%s10991_s1 + $0x1e8] sm:$0xff]  ;;  %v112_v21 = vld [vmem:[%s10991_s1 + $0x1f8] sm:$0xff]  ;;  %v1619_v55 = vlaneseq }
  0x15   :  { %v4889_v23 = vpack.c.bf16 %v103_v17, %v99_v16  ;;  %v105_v24 = vld [vmem:[%s10991_s1 + $0x1c0] sm:$0xff]  ;;  %v4107_v26 = vpack.c.bf16 %v110_v19, %v106_v18  ;;  %v4891_v27 = vpack.c.bf16 %v112_v21, %v108_v20  ;;  %v107_v28 = vld [vmem:[%s10991_s1 + $0x1d0] sm:$0xff]  ;;  %v114_v30 = vld [vmem:[%s10991_s1 + $0x208] sm:$0xff] }
  0x16   :  { %4098 = vmatpush1.bf16.msra.mxu0 %v4097_v62  ;;  %v109_v25 = vld [vmem:[%s10991_s1 + $0x1e0] sm:$0xff]  ;;  %v111_v29 = vld [vmem:[%s10991_s1 + $0x1f0] sm:$0xff]  ;;  %v118_v31 = vld [vmem:[%s10991_s1 + $0x228] sm:$0xff]  ;;  %v6132_v6 = vshrl.u32 %v1619_v55, 7 }
  0x17   :  { %4882 = vmatpush1.bf16.msra.mxu1 %v4881_v63  ;;  %4100 = vmatprep.subr.bf16.mxu0 %v4099_v2  ;;  %v116_v32 = vld [vmem:[%s10991_s1 + $0x218] sm:$0xff]  ;;  %v4109_v34 = vpack.c.bf16 %v109_v25, %v105_v24  ;;  %v4893_v35 = vpack.c.bf16 %v111_v29, %v107_v28  ;;  %v113_v36 = vld [vmem:[%s10991_s1 + $0x200] sm:$0xff]  ;;  %v4111_v38 = vpack.c.bf16 %v118_v31, %v114_v30  ;;  %v115_v40 = vld [vmem:[%s10991_s1 + $0x210] sm:$0xff] }
  0x18   :  { %4884 = vmatprep.subr.bf16.mxu1 %v4883_v3  ;;  %v120_v33 = vld [vmem:[%s10991_s1 + $0x238] sm:$0xff]  ;;  %v117_v37 = vld [vmem:[%s10991_s1 + $0x220] sm:$0xff]  ;;  %v119_v41 = vld [vmem:[%s10991_s1 + $0x230] sm:$0xff] }
  0x19   :  { %v4895_v39 = vpack.c.bf16 %v120_v33, %v116_v32  ;;  %v122_v42 = vld [vmem:[%s10991_s1 + $0x248] sm:$0xff]  ;;  %v124_v44 = vld [vmem:[%s10991_s1 + $0x258] sm:$0xff]  ;;  %v4113_v46 = vpack.c.bf16 %v117_v37, %v113_v36  ;;  %v4897_v47 = vpack.c.bf16 %v119_v41, %v115_v40  ;;  %v121_v48 = vld [vmem:[%s10991_s1 + $0x240] sm:$0xff] }
  0x1a   :  { %4102 = vmatpush1.bf16.msra.mxu0 %v4101_v10  ;;  %v126_v43 = vld [vmem:[%s10991_s1 + $0x268] sm:$0xff]  ;;  %v128_v45 = vld [vmem:[%s10991_s1 + $0x278] sm:$0xff]  ;;  %v125_v49 = vld [vmem:[%s10991_s1 + $0x260] sm:$0xff] }
  0x1b   :  { %4886 = vmatpush1.bf16.msra.mxu1 %v4885_v11  ;;  %4104 = vmatprep.subr.bf16.mxu0 %v4103_v14  ;;  %v4115_v50 = vpack.c.bf16 %v126_v43, %v122_v42  ;;  %v4899_v51 = vpack.c.bf16 %v128_v45, %v124_v44  ;;  %v123_v52 = vld [vmem:[%s10991_s1 + $0x250] sm:$0xff]  ;;  %v130_v54 = vld [vmem:[%s10991_s1 + $0x288] sm:$0xff]  ;;  %v132_v59 = vld [vmem:[%s10991_s1 + $0x298] sm:$0xff]  ;;  %v4117_v61 = vpack.c.bf16 %v125_v49, %v121_v48 }
  0x1c   :  { %4888 = vmatprep.subr.bf16.mxu1 %v4887_v15  ;;  %v127_v53 = vld [vmem:[%s10991_s1 + $0x270] sm:$0xff]  ;;  %v134_v58 = vld [vmem:[%s10991_s1 + $0x2a8] sm:$0xff]  ;;  %v136_v60 = vld [vmem:[%s10991_s1 + $0x2b8] sm:$0xff] }
  0x1d   :  { %v4901_v62 = vpack.c.bf16 %v127_v53, %v123_v52  ;;  %v129_v63 = vld [vmem:[%s10991_s1 + $0x280] sm:$0xff]  ;;  %v4119_v1 = vpack.c.bf16 %v134_v58, %v130_v54  ;;  %v4903_v2 = vpack.c.bf16 %v136_v60, %v132_v59  ;;  %v131_v3 = vld [vmem:[%s10991_s1 + $0x290] sm:$0xff]  ;;  %v138_v5 = vld [vmem:[%s10991_s1 + $0x2c8] sm:$0xff] }
  0x1e   :  { %4106 = vmatpush1.bf16.msra.mxu0 %v4105_v22  ;;  %v133_v0 = vld [vmem:[%s10991_s1 + $0x2a0] sm:$0xff]  ;;  %v135_v4 = vld [vmem:[%s10991_s1 + $0x2b0] sm:$0xff]  ;;  %v142_v8 = vld [vmem:[%s10991_s1 + $0x2e8] sm:$0xff] }
  0x1f   :  { %4890 = vmatpush1.bf16.msra.mxu1 %v4889_v23  ;;  %4108 = vmatprep.subr.bf16.mxu0 %v4107_v26  ;;  %v140_v9 = vld [vmem:[%s10991_s1 + $0x2d8] sm:$0xff]  ;;  %v137_v11 = vld [vmem:[%s10991_s1 + $0x2c0] sm:$0xff]  ;;  %v4121_v13 = vpack.c.bf16 %v133_v0, %v129_v63  ;;  %v4905_v14 = vpack.c.bf16 %v135_v4, %v131_v3  ;;  %v139_v15 = vld [vmem:[%s10991_s1 + $0x2d0] sm:$0xff]  ;;  %v4123_v18 = vpack.c.bf16 %v142_v8, %v138_v5 }
  0x20   :  { %4892 = vmatprep.subr.bf16.mxu1 %v4891_v27  ;;  %v144_v10 = vld [vmem:[%s10991_s1 + $0x2f8] sm:$0xff]  ;;  %v141_v12 = vld [vmem:[%s10991_s1 + $0x2e0] sm:$0xff]  ;;  %v143_v16 = vld [vmem:[%s10991_s1 + $0x2f0] sm:$0xff]  ;;  %v6168_v23 = vsub.s32 %v1673_v7, %v6132_v6 }
  0x21   :  { %v146_v17 = vld [vmem:[%s10991_s1 + $0x308] sm:$0xff]  ;;  %v4907_v19 = vpack.c.bf16 %v144_v10, %v140_v9  ;;  %v148_v21 = vld [vmem:[%s10991_s1 + $0x318] sm:$0xff]  ;;  %v5768_v24 = vld [vmem:[%s10990_s0] ss:$50 sps:$4 sm:$0xff]   ;;  %v4125_v25 = vpack.c.bf16 %v141_v12, %v137_v11  ;;  %v4909_v26 = vpack.c.bf16 %v143_v16, %v139_v15 }
  0x22   :  { %4110 = vmatpush1.bf16.msra.mxu0 %v4109_v34  ;;  %v150_v20 = vld [vmem:[%s10991_s1 + $0x328] sm:$0xff]  ;;  %v152_v22 = vld [vmem:[%s10991_s1 + $0x338] sm:$0xff]  ;;  %v145_v27 = vld [vmem:[%s10991_s1 + $0x300] sm:$0xff] }
  0x23   :  { %4894 = vmatpush1.bf16.msra.mxu1 %v4893_v35  ;;  %4112 = vmatprep.subr.bf16.mxu0 %v4111_v38  ;;  %v149_v28 = vld [vmem:[%s10991_s1 + $0x320] sm:$0xff]  ;;  %v4127_v30 = vpack.c.bf16 %v150_v20, %v146_v17  ;;  %v4911_v31 = vpack.c.bf16 %v152_v22, %v148_v21  ;;  %v147_v32 = vld [vmem:[%s10991_s1 + $0x310] sm:$0xff]  ;;  %v154_v34 = vld [vmem:[%s10991_s1 + $0x348] sm:$0xff]  ;;  %v6192_v35 = vrot.slane %v5768_v24, %v6168_v23 }
  0x24   :  { %4896 = vmatprep.subr.bf16.mxu1 %v4895_v39  ;;  %v5771_v29 = vld [vmem:[%s10990_s0 + $0x64] ss:$50 sps:$4 sm:$0xff]   ;;  %v158_v36 = vld [vmem:[%s10991_s1 + $0x368] sm:$0xff]  ;;  %v4129_v40 = vpack.c.bf16 %v149_v28, %v145_v27 }
  0x25   :  { %v151_v33 = vld [vmem:[%s10991_s1 + $0x330] sm:$0xff]  ;;  %v156_v37 = vld [vmem:[%s10991_s1 + $0x358] sm:$0xff]  ;;  %v6204_v39 = vrot.slane %v5771_v29, %v6168_v23  ;;  %v153_v42 = vld [vmem:[%s10991_s1 + $0x340] sm:$0xff]  ;;  %v4131_v45 = vpack.c.bf16 %v158_v36, %v154_v34 }
  0x26   :  { %4114 = vmatpush1.bf16.msra.mxu0 %v4113_v46  ;;  %v160_v38 = vld [vmem:[%s10991_s1 + $0x378] sm:$0xff]  ;;  %v4913_v41 = vpack.c.bf16 %v151_v33, %v147_v32  ;;  %v157_v43 = vld [vmem:[%s10991_s1 + $0x360] sm:$0xff]  ;;  %v159_v48 = vld [vmem:[%s10991_s1 + $0x370] sm:$0xff] }
  0x27   :  { %4898 = vmatpush1.bf16.msra.mxu1 %v4897_v47  ;;  %4116 = vmatprep.subr.bf16.mxu0 %v4115_v50  ;;  %v1700_v44 = vcombine.high %v6192_v35, %v6204_v39  ;;  %v4915_v46 = vpack.c.bf16 %v160_v38, %v156_v37  ;;  %v155_v47 = vld [vmem:[%s10991_s1 + $0x350] sm:$0xff]  ;;  %v162_v49 = vld [vmem:[%s10991_s1 + $0x388] sm:$0xff]  ;;  %v168_v52 = vld [vmem:[%s10991_s1 + $0x3b8] sm:$0xff]  ;;  %v4133_v53 = vpack.c.bf16 %v157_v43, %v153_v42 }
  0x28   :  { %4900 = vmatprep.subr.bf16.mxu1 %v4899_v51  ;;  %v166_v50 = vld [vmem:[%s10991_s1 + $0x3a8] sm:$0xff]  ;;  %v164_v51 = vld [vmem:[%s10991_s1 + $0x398] sm:$0xff]  ;;  %v4917_v54 = vpack.c.bf16 %v159_v48, %v155_v47  ;;  %v161_v55 = vld [vmem:[%s10991_s1 + $0x380] sm:$0xff] }
  0x29   :  { %1991 = vmatprep.mubr.f32.mxu0 %v1700_v44  ;;  %2914 = vmatprep.mubr.f32.mxu1 %v1700_v44  ;;  %v165_v56 = vld [vmem:[%s10991_s1 + $0x3a0] sm:$0xff]  ;;  %v4135_v57 = vpack.c.bf16 %v166_v50, %v162_v49  ;;  %v4919_v58 = vpack.c.bf16 %v168_v52, %v164_v51  ;;  %v163_v59 = vld [vmem:[%s10991_s1 + $0x390] sm:$0xff]  ;;  %v172_v63 = vld [vmem:[%s10991_s1 + $0x3d8] sm:$0xff] }
  0x2a   :  { %4118 = vmatpush1.bf16.msra.mxu0 %v4117_v61  ;;  %v167_v60 = vld [vmem:[%s10991_s1 + $0x3b0] sm:$0xff]  ;;  %v170_v61 = vld [vmem:[%s10991_s1 + $0x3c8] sm:$0xff]  ;;  %v176_v0 = vld [vmem:[%s10991_s1 + $0x3f8] sm:$0xff] }
  0x2b   :  { %4902 = vmatpush1.bf16.msra.mxu1 %v4901_v62  ;;  %4120 = vmatprep.subr.bf16.mxu0 %v4119_v1  ;;  %v174_v62 = vld [vmem:[%s10991_s1 + $0x3e8] sm:$0xff]  ;;  %v169_v1 = vld [vmem:[%s10991_s1 + $0x3c0] sm:$0xff]  ;;  %v4921_v3 = vpack.c.bf16 %v167_v60, %v163_v59  ;;  %v171_v5 = vld [vmem:[%s10991_s1 + $0x3d0] sm:$0xff]  ;;  %v4923_v9 = vpack.c.bf16 %v176_v0, %v172_v63 }
  0x2c   :  { %4904 = vmatprep.subr.bf16.mxu1 %v4903_v2  ;;  %v4137_v2 = vpack.c.bf16 %v165_v56, %v161_v55  ;;  %v173_v4 = vld [vmem:[%s10991_s1 + $0x3e0] sm:$0xff]  ;;  %v175_v7 = vld [vmem:[%s10991_s1 + $0x3f0] sm:$0xff]  ;;  %v4139_v8 = vpack.c.bf16 %v174_v62, %v170_v61  ;;  %v5773_v11 = vld [vmem:[%s10990_s0 + $0x68] ss:$50 sps:$4 sm:$0xff]  }
  0x2d   :  { %v5770_v10 = vld [vmem:[%s10990_s0 + $0x4] ss:$50 sps:$4 sm:$0xff]   ;;  %v178_v12 = vld [vmem:[%s10991_s1 + $0x408] sm:$0xff]  ;;  %v4141_v16 = vpack.c.bf16 %v173_v4, %v169_v1  ;;  %v4925_v17 = vpack.c.bf16 %v175_v7, %v171_v5 }
  0x2e   :  { %4122 = vmatpush1.bf16.msra.mxu0 %v4121_v13  ;;  %v182_v13 = vld [vmem:[%s10991_s1 + $0x428] sm:$0xff]  ;;  %v184_v15 = vld [vmem:[%s10991_s1 + $0x438] sm:$0xff]  ;;  %v179_v22 = vld [vmem:[%s10991_s1 + $0x410] sm:$0xff]  ;;  %v6311_v29 = vrot.slane %v5770_v10, %v6168_v23 }
  0x2f   :  { %4906 = vmatpush1.bf16.msra.mxu1 %v4905_v14  ;;  %4124 = vmatprep.subr.bf16.mxu0 %v4123_v18  ;;  %v180_v14 = vld [vmem:[%s10991_s1 + $0x418] sm:$0xff]  ;;  %v177_v18 = vld [vmem:[%s10991_s1 + $0x400] sm:$0xff]  ;;  %v4143_v20 = vpack.c.bf16 %v182_v13, %v178_v12  ;;  %v183_v24 = vld [vmem:[%s10991_s1 + $0x430] sm:$0xff] }
  0x30   :  { %4908 = vmatprep.subr.bf16.mxu1 %v4907_v19  ;;  %v181_v19 = vld [vmem:[%s10991_s1 + $0x420] sm:$0xff]  ;;  %v4927_v21 = vpack.c.bf16 %v184_v15, %v180_v14  ;;  %v188_v27 = vld [vmem:[%s10991_s1 + $0x458] sm:$0xff]  ;;  %v4929_v33 = vpack.c.bf16 %v183_v24, %v179_v22  ;;  %v195_v51 = vld [vmem:[%s10991_s1 + $0x490] sm:$0xff] }
  0x31   :  { %v192_v28 = vld [vmem:[%s10991_s1 + $0x478] sm:$0xff]  ;;  %v4145_v32 = vpack.c.bf16 %v181_v19, %v177_v18  ;;  %v185_v34 = vld [vmem:[%s10991_s1 + $0x440] sm:$0xff]  ;;  %v199_v52 = vld [vmem:[%s10991_s1 + $0x4b0] sm:$0xff] }
  0x32   :  { %4126 = vmatpush1.bf16.msra.mxu0 %v4125_v25  ;;  %v186_v25 = vld [vmem:[%s10991_s1 + $0x448] sm:$0xff]  ;;  %v189_v36 = vld [vmem:[%s10991_s1 + $0x460] sm:$0xff]  ;;  %v4931_v38 = vpack.c.bf16 %v192_v28, %v188_v27  ;;  %v196_v42 = vld [vmem:[%s10991_s1 + $0x498] sm:$0xff] }
  0x33   :  { %4910 = vmatpush1.bf16.msra.mxu1 %v4909_v26  ;;  %4128 = vmatprep.subr.bf16.mxu0 %v4127_v30  ;;  %v190_v26 = vld [vmem:[%s10991_s1 + $0x468] sm:$0xff]  ;;  %v6314_v30 = vrot.slane %v5773_v11, %v6168_v23  ;;  %v200_v43 = vld [vmem:[%s10991_s1 + $0x4b8] sm:$0xff]  ;;  %v193_v47 = vld [vmem:[%s10991_s1 + $0x480] sm:$0xff] }
  0x34   :  { %4912 = vmatprep.subr.bf16.mxu1 %v4911_v31  ;;  %v1699_v31 = vcombine.low %v6192_v35, %v6204_v39  ;;  %v4147_v37 = vpack.c.bf16 %v190_v26, %v186_v25  ;;  %v187_v35 = vld [vmem:[%s10991_s1 + $0x450] sm:$0xff]  ;;  %v197_v48 = vld [vmem:[%s10991_s1 + $0x4a0] sm:$0xff]  ;;  %v4935_v50 = vpack.c.bf16 %v200_v43, %v196_v42  ;;  %v204_v55 = vld [vmem:[%s10991_s1 + $0x4d8] sm:$0xff] }
  0x35   :  { %v191_v39 = vld [vmem:[%s10991_s1 + $0x470] sm:$0xff]  ;;  %v1702_v44 = vcombine.high %v6311_v29, %v6314_v30  ;;  %v208_v56 = vld [vmem:[%s10991_s1 + $0x4f8] sm:$0xff]  ;;  %v201_v59 = vld [vmem:[%s10991_s1 + $0x4c0] sm:$0xff] }
  0x36   :  { %4130 = vmatpush1.bf16.msra.mxu0 %v4129_v40  ;;  %v194_v40 = vld [vmem:[%s10991_s1 + $0x488] sm:$0xff]  ;;  %v205_v60 = vld [vmem:[%s10991_s1 + $0x4e0] sm:$0xff]  ;;  %v4939_v62 = vpack.c.bf16 %v208_v56, %v204_v55  ;;  %v203_v63 = vld [vmem:[%s10991_s1 + $0x4d0] sm:$0xff] }
  0x37   :  { %4914 = vmatpush1.bf16.msra.mxu1 %v4913_v41  ;;  %4132 = vmatprep.subr.bf16.mxu0 %v4131_v45  ;;  %v198_v41 = vld [vmem:[%s10991_s1 + $0x4a8] sm:$0xff]  ;;  %v4149_v45 = vpack.c.bf16 %v189_v36, %v185_v34  ;;  %v207_v0 = vld [vmem:[%s10991_s1 + $0x4f0] sm:$0xff]  ;;  %v216_v4 = vld [vmem:[%s10991_s1 + $0x538] sm:$0xff]  ;;  %v4157_v5 = vpack.c.bf16 %v205_v60, %v201_v59 }
  0x38   :  { %4916 = vmatprep.subr.bf16.mxu1 %v4915_v46  ;;  %v4933_v46 = vpack.c.bf16 %v191_v39, %v187_v35  ;;  %v4151_v49 = vpack.c.bf16 %v198_v41, %v194_v40  ;;  %v210_v1 = vld [vmem:[%s10991_s1 + $0x508] sm:$0xff]  ;;  %v4941_v7 = vpack.c.bf16 %v207_v0, %v203_v63  ;;  %v211_v12 = vld [vmem:[%s10991_s1 + $0x510] sm:$0xff]  ;;  %v225_v36 = vld [vmem:[%s10991_s1 + $0x580] sm:$0xff] }
  0x39   :  { %v215_v13 = vld [vmem:[%s10991_s1 + $0x530] sm:$0xff]  ;;  %v218_v14 = vld [vmem:[%s10991_s1 + $0x548] sm:$0xff]  ;;  %v236_v43 = vld [vmem:[%s10991_s1 + $0x5d8] sm:$0xff] }
  0x3a   :  { %4134 = vmatpush1.bf16.msra.mxu0 %v4133_v53  ;;  %v202_v53 = vld [vmem:[%s10991_s1 + $0x4c8] sm:$0xff]  ;;  %v4945_v19 = vpack.c.bf16 %v215_v13, %v211_v12  ;;  %v219_v25 = vld [vmem:[%s10991_s1 + $0x550] sm:$0xff]  ;;  %v244_v55 = vld [vmem:[%s10991_s1 + $0x618] sm:$0xff] }
  0x3b   :  { %4918 = vmatpush1.bf16.msra.mxu1 %v4917_v54  ;;  %4136 = vmatprep.subr.bf16.mxu0 %v4135_v57  ;;  %v206_v54 = vld [vmem:[%s10991_s1 + $0x4e8] sm:$0xff]  ;;  %v4153_v57 = vpack.c.bf16 %v197_v48, %v193_v47  ;;  %v223_v26 = vld [vmem:[%s10991_s1 + $0x570] sm:$0xff]  ;;  %v233_v47 = vld [vmem:[%s10991_s1 + $0x5c0] sm:$0xff] }
  0x3c   :  { %4920 = vmatprep.subr.bf16.mxu1 %v4919_v58  ;;  %v4937_v58 = vpack.c.bf16 %v199_v52, %v195_v51  ;;  %v4155_v61 = vpack.c.bf16 %v206_v54, %v202_v53  ;;  %v222_v15 = vld [vmem:[%s10991_s1 + $0x568] sm:$0xff]  ;;  %v4949_v34 = vpack.c.bf16 %v223_v26, %v219_v25  ;;  %v227_v39 = vld [vmem:[%s10991_s1 + $0x590] sm:$0xff]  ;;  %v237_v48 = vld [vmem:[%s10991_s1 + $0x5e0] sm:$0xff] }
  0x3d   :  { %v4163_v22 = vpack.c.bf16 %v222_v15, %v218_v14  ;;  %v226_v27 = vld [vmem:[%s10991_s1 + $0x588] sm:$0xff]  ;;  %v231_v40 = vld [vmem:[%s10991_s1 + $0x5b0] sm:$0xff]  ;;  %v248_v56 = vld [vmem:[%s10991_s1 + $0x638] sm:$0xff] }
  0x3e   :  { %4138 = vmatpush1.bf16.msra.mxu0 %v4137_v2  ;;  %v214_v2 = vld [vmem:[%s10991_s1 + $0x528] sm:$0xff]  ;;  %v235_v51 = vld [vmem:[%s10991_s1 + $0x5d0] sm:$0xff]  ;;  %v241_v59 = vld [vmem:[%s10991_s1 + $0x600] sm:$0xff] }
  0x3f   :  { %4922 = vmatpush1.bf16.msra.mxu1 %v4921_v3  ;;  %4140 = vmatprep.subr.bf16.mxu0 %v4139_v8  ;;  %v212_v3 = vld [vmem:[%s10991_s1 + $0x518] sm:$0xff]  ;;  %v209_v8 = vld [vmem:[%s10991_s1 + $0x500] sm:$0xff]  ;;  %v4159_v10 = vpack.c.bf16 %v214_v2, %v210_v1  ;;  %v230_v28 = vld [vmem:[%s10991_s1 + $0x5a8] sm:$0xff] }
  0x40   :  { %4924 = vmatprep.subr.bf16.mxu1 %v4923_v9  ;;  %v213_v9 = vld [vmem:[%s10991_s1 + $0x520] sm:$0xff]  ;;  %v4943_v11 = vpack.c.bf16 %v216_v4, %v212_v3  ;;  %v234_v41 = vld [vmem:[%s10991_s1 + $0x5c8] sm:$0xff]  ;;  %v239_v52 = vld [vmem:[%s10991_s1 + $0x5f0] sm:$0xff] }
  0x41   :  { %v4161_v18 = vpack.c.bf16 %v213_v9, %v209_v8  ;;  %v238_v42 = vld [vmem:[%s10991_s1 + $0x5e8] sm:$0xff]  ;;  %v245_v60 = vld [vmem:[%s10991_s1 + $0x620] sm:$0xff]  ;;  %v243_v63 = vld [vmem:[%s10991_s1 + $0x610] sm:$0xff] }
  0x42   :  { %4142 = vmatpush1.bf16.msra.mxu0 %v4141_v16  ;;  %v220_v16 = vld [vmem:[%s10991_s1 + $0x558] sm:$0xff]  ;;  %v242_v53 = vld [vmem:[%s10991_s1 + $0x608] sm:$0xff]  ;;  %v247_v0 = vld [vmem:[%s10991_s1 + $0x630] sm:$0xff] }
  0x43   :  { %4926 = vmatpush1.bf16.msra.mxu1 %v4925_v17  ;;  %4144 = vmatprep.subr.bf16.mxu0 %v4143_v20  ;;  %v224_v17 = vld [vmem:[%s10991_s1 + $0x578] sm:$0xff]  ;;  %v217_v20 = vld [vmem:[%s10991_s1 + $0x540] sm:$0xff]  ;;  %v246_v54 = vld [vmem:[%s10991_s1 + $0x628] sm:$0xff] }
  0x44   :  { %4928 = vmatprep.subr.bf16.mxu1 %v4927_v21  ;;  %v221_v21 = vld [vmem:[%s10991_s1 + $0x560] sm:$0xff]  ;;  %v4947_v24 = vpack.c.bf16 %v224_v17, %v220_v16  ;;  %v250_v1 = vld [vmem:[%s10991_s1 + $0x648] sm:$0xff]  ;;  %v252_v3 = vld [vmem:[%s10991_s1 + $0x658] sm:$0xff] }
  0x45   :  { %1992 = vmatmul.mubr.f32.vlgmr.msra.gmra.mrb[0].mxu0 %v1699_v31  ;;  %v254_v2 = vld [vmem:[%s10991_s1 + $0x668] sm:$0xff]  ;;  %v256_v4 = vld [vmem:[%s10991_s1 + $0x678] sm:$0xff]  ;;  %v249_v8 = vld [vmem:[%s10991_s1 + $0x640] sm:$0xff] }
  0x46   :  { %2915 = vmatmul.mubr.f32.vlgmr.msra.gmra.mrb[0].mxu1 %v1699_v31  ;;  %4146 = vmatpush1.bf16.msra.mxu0 %v4145_v32  ;;  %v228_v31 = vld [vmem:[%s10991_s1 + $0x598] sm:$0xff]  ;;  %v253_v9 = vld [vmem:[%s10991_s1 + $0x660] sm:$0xff]  ;;  %v251_v12 = vld [vmem:[%s10991_s1 + $0x650] sm:$0xff] }
  0x47   :  { %4930 = vmatpush1.bf16.msra.mxu1 %v4929_v33  ;;  %4148 = vmatprep.subr.bf16.mxu0 %v4147_v37  ;;  %v232_v32 = vld [vmem:[%s10991_s1 + $0x5b8] sm:$0xff]  ;;  %v4165_v33 = vpack.c.bf16 %v221_v21, %v217_v20  ;;  %v229_v37 = vld [vmem:[%s10991_s1 + $0x5a0] sm:$0xff]  ;;  %v255_v13 = vld [vmem:[%s10991_s1 + $0x670] sm:$0xff] }
  0x48   :  { %4932 = vmatprep.subr.bf16.mxu1 %v4931_v38  ;;  %2062 = vmatprep.mubr.f32.mxu0 %v1702_v44  ;;  %v4167_v38 = vpack.c.bf16 %v230_v28, %v226_v27  ;;  %v4951_v35 = vpack.c.bf16 %v232_v32, %v228_v31  ;;  %v258_v14 = vld [vmem:[%s10991_s1 + $0x688] sm:$0xff]  ;;  %v260_v16 = vld [vmem:[%s10991_s1 + $0x698] sm:$0xff]  ;;  %v257_v20 = vld [vmem:[%s10991_s1 + $0x680] sm:$0xff] }
  0x49   :  { %2985 = vmatprep.mubr.f32.mxu1 %v1702_v44  ;;  %v240_v44 = vld [vmem:[%s10991_s1 + $0x5f8] sm:$0xff]  ;;  %v262_v15 = vld [vmem:[%s10991_s1 + $0x6a8] sm:$0xff]  ;;  %v261_v21 = vld [vmem:[%s10991_s1 + $0x6a0] sm:$0xff] }
  0x4a   :  { %4150 = vmatpush1.bf16.msra.mxu0 %v4149_v45  ;;  %v4169_v45 = vpack.c.bf16 %v229_v37, %v225_v36  ;;  %v264_v17 = vld [vmem:[%s10991_s1 + $0x6b8] sm:$0xff]  ;;  %v259_v25 = vld [vmem:[%s10991_s1 + $0x690] sm:$0xff]  ;;  %v266_v27 = vld [vmem:[%s10991_s1 + $0x6c8] sm:$0xff] }
  0x4b   :  { %4934 = vmatpush1.bf16.msra.mxu1 %v4933_v46  ;;  %4152 = vmatprep.subr.bf16.mxu0 %v4151_v49  ;;  %v4953_v46 = vpack.c.bf16 %v231_v40, %v227_v39  ;;  %v4171_v49 = vpack.c.bf16 %v238_v42, %v234_v41  ;;  %v263_v26 = vld [vmem:[%s10991_s1 + $0x6b0] sm:$0xff]  ;;  %v270_v28 = vld [vmem:[%s10991_s1 + $0x6e8] sm:$0xff]  ;;  %v268_v31 = vld [vmem:[%s10991_s1 + $0x6d8] sm:$0xff] }
  0x4c   :  { %4936 = vmatprep.subr.bf16.mxu1 %v4935_v50  ;;  %v4955_v50 = vpack.c.bf16 %v240_v44, %v236_v43  ;;  %v272_v32 = vld [vmem:[%s10991_s1 + $0x6f8] sm:$0xff]  ;;  %v265_v36 = vld [vmem:[%s10991_s1 + $0x6c0] sm:$0xff]  ;;  %v267_v39 = vld [vmem:[%s10991_s1 + $0x6d0] sm:$0xff] }
  0x4d   :  { %v269_v37 = vld [vmem:[%s10991_s1 + $0x6e0] sm:$0xff]  ;;  %v271_v40 = vld [vmem:[%s10991_s1 + $0x6f0] sm:$0xff]  ;;  %v274_v41 = vld [vmem:[%s10991_s1 + $0x708] sm:$0xff] }
  0x4e   :  { %4154 = vmatpush1.bf16.msra.mxu0 %v4153_v57  ;;  %v4173_v57 = vpack.c.bf16 %v237_v48, %v233_v47  ;;  %v278_v42 = vld [vmem:[%s10991_s1 + $0x728] sm:$0xff]  ;;  %v276_v43 = vld [vmem:[%s10991_s1 + $0x718] sm:$0xff]  ;;  %v273_v47 = vld [vmem:[%s10991_s1 + $0x700] sm:$0xff] }
  0x4f   :  { %4938 = vmatpush1.bf16.msra.mxu1 %v4937_v58  ;;  %4156 = vmatprep.subr.bf16.mxu0 %v4155_v61  ;;  %v4957_v58 = vpack.c.bf16 %v239_v52, %v235_v51  ;;  %v4175_v61 = vpack.c.bf16 %v246_v54, %v242_v53  ;;  %v280_v44 = vld [vmem:[%s10991_s1 + $0x738] sm:$0xff]  ;;  %v277_v48 = vld [vmem:[%s10991_s1 + $0x720] sm:$0xff]  ;;  %v275_v51 = vld [vmem:[%s10991_s1 + $0x710] sm:$0xff] }
  0x50   :  { %4940 = vmatprep.subr.bf16.mxu1 %v4939_v62  ;;  %v4959_v62 = vpack.c.bf16 %v248_v56, %v244_v55  ;;  %v279_v52 = vld [vmem:[%s10991_s1 + $0x730] sm:$0xff]  ;;  %v282_v53 = vld [vmem:[%s10991_s1 + $0x748] sm:$0xff]  ;;  %v284_v55 = vld [vmem:[%s10991_s1 + $0x758] sm:$0xff] }
  0x51   :  { %v286_v54 = vld [vmem:[%s10991_s1 + $0x768] sm:$0xff]  ;;  %v288_v56 = vld [vmem:[%s10991_s1 + $0x778] sm:$0xff] }
  0x52   :  { %4158 = vmatpush1.bf16.msra.mxu0 %v4157_v5  ;;  %v4177_v5 = vpack.c.bf16 %v245_v60, %v241_v59  ;;  %v281_v59 = vld [vmem:[%s10991_s1 + $0x740] sm:$0xff] }
  0x53   :  { %4942 = vmatpush1.bf16.msra.mxu1 %v4941_v7  ;;  %4160 = vmatprep.subr.bf16.mxu0 %v4159_v10  ;;  %v4961_v7 = vpack.c.bf16 %v247_v0, %v243_v63  ;;  %v4179_v10 = vpack.c.bf16 %v254_v2, %v250_v1  ;;  %v285_v60 = vld [vmem:[%s10991_s1 + $0x760] sm:$0xff]  ;;  %v283_v63 = vld [vmem:[%s10991_s1 + $0x750] sm:$0xff]  ;;  %v290_v1 = vld [vmem:[%s10991_s1 + $0x788] sm:$0xff] }
  0x54   :  { %4944 = vmatprep.subr.bf16.mxu1 %v4943_v11  ;;  %v4963_v11 = vpack.c.bf16 %v256_v4, %v252_v3  ;;  %v287_v0 = vld [vmem:[%s10991_s1 + $0x770] sm:$0xff]  ;;  %v294_v2 = vld [vmem:[%s10991_s1 + $0x7a8] sm:$0xff]  ;;  %v292_v3 = vld [vmem:[%s10991_s1 + $0x798] sm:$0xff] }
  0x55   :  { %v296_v4 = vld [vmem:[%s10991_s1 + $0x7b8] sm:$0xff] }
  0x56   :  { %4162 = vmatpush1.bf16.msra.mxu0 %v4161_v18  ;;  %v4181_v18 = vpack.c.bf16 %v253_v9, %v249_v8  ;;  %v289_v8 = vld [vmem:[%s10991_s1 + $0x780] sm:$0xff] }
  0x57   :  { %4946 = vmatpush1.bf16.msra.mxu1 %v4945_v19  ;;  %4164 = vmatprep.subr.bf16.mxu0 %v4163_v22  ;;  %v4965_v19 = vpack.c.bf16 %v255_v13, %v251_v12  ;;  %v4183_v22 = vpack.c.bf16 %v262_v15, %v258_v14  ;;  %v293_v9 = vld [vmem:[%s10991_s1 + $0x7a0] sm:$0xff]  ;;  %v291_v12 = vld [vmem:[%s10991_s1 + $0x790] sm:$0xff]  ;;  %v298_v14 = vld [vmem:[%s10991_s1 + $0x7c8] sm:$0xff] }
  0x58   :  { %4948 = vmatprep.subr.bf16.mxu1 %v4947_v24  ;;  %v4967_v24 = vpack.c.bf16 %v264_v17, %v260_v16  ;;  %v295_v13 = vld [vmem:[%s10991_s1 + $0x7b0] sm:$0xff]  ;;  %v302_v15 = vld [vmem:[%s10991_s1 + $0x7e8] sm:$0xff]  ;;  %v300_v16 = vld [vmem:[%s10991_s1 + $0x7d8] sm:$0xff] }
  0x59   :  { %v304_v17 = vld [vmem:[%s10991_s1 + $0x7f8] sm:$0xff] }
  0x5a   :  { %4166 = vmatpush1.bf16.msra.mxu0 %v4165_v33  ;;  %v4185_v33 = vpack.c.bf16 %v261_v21, %v257_v20  ;;  %v297_v20 = vld [vmem:[%s10991_s1 + $0x7c0] sm:$0xff] }
  0x5b   :  { %4950 = vmatpush1.bf16.msra.mxu1 %v4949_v34  ;;  %4168 = vmatprep.subr.bf16.mxu0 %v4167_v38  ;;  %v4969_v34 = vpack.c.bf16 %v263_v26, %v259_v25  ;;  %v4187_v38 = vpack.c.bf16 %v270_v28, %v266_v27  ;;  %v301_v21 = vld [vmem:[%s10991_s1 + $0x7e0] sm:$0xff]  ;;  %v299_v25 = vld [vmem:[%s10991_s1 + $0x7d0] sm:$0xff]  ;;  %v306_v27 = vld [vmem:[%s10991_s1 + $0x808] sm:$0xff] }
  0x5c   :  { %4952 = vmatprep.subr.bf16.mxu1 %v4951_v35  ;;  %v4971_v35 = vpack.c.bf16 %v272_v32, %v268_v31  ;;  %v303_v26 = vld [vmem:[%s10991_s1 + $0x7f0] sm:$0xff]  ;;  %v310_v28 = vld [vmem:[%s10991_s1 + $0x828] sm:$0xff]  ;;  %v308_v31 = vld [vmem:[%s10991_s1 + $0x818] sm:$0xff] }
  0x5d   :  { %v312_v32 = vld [vmem:[%s10991_s1 + $0x838] sm:$0xff] }
  0x5e   :  { %4170 = vmatpush1.bf16.msra.mxu0 %v4169_v45  ;;  %v4189_v45 = vpack.c.bf16 %v269_v37, %v265_v36  ;;  %v305_v36 = vld [vmem:[%s10991_s1 + $0x800] sm:$0xff] }
  0x5f   :  { %4954 = vmatpush1.bf16.msra.mxu1 %v4953_v46  ;;  %4172 = vmatprep.subr.bf16.mxu0 %v4171_v49  ;;  %v4973_v46 = vpack.c.bf16 %v271_v40, %v267_v39  ;;  %v4191_v49 = vpack.c.bf16 %v278_v42, %v274_v41  ;;  %v309_v37 = vld [vmem:[%s10991_s1 + $0x820] sm:$0xff]  ;;  %v307_v39 = vld [vmem:[%s10991_s1 + $0x810] sm:$0xff]  ;;  %v314_v41 = vld [vmem:[%s10991_s1 + $0x848] sm:$0xff] }
  0x60   :  { %4956 = vmatprep.subr.bf16.mxu1 %v4955_v50  ;;  %v4975_v50 = vpack.c.bf16 %v280_v44, %v276_v43  ;;  %v311_v40 = vld [vmem:[%s10991_s1 + $0x830] sm:$0xff]  ;;  %v318_v42 = vld [vmem:[%s10991_s1 + $0x868] sm:$0xff]  ;;  %v316_v43 = vld [vmem:[%s10991_s1 + $0x858] sm:$0xff] }
  0x61   :  { %v320_v44 = vld [vmem:[%s10991_s1 + $0x878] sm:$0xff] }
  0x62   :  { %4174 = vmatpush1.bf16.msra.mxu0 %v4173_v57  ;;  %v4193_v57 = vpack.c.bf16 %v277_v48, %v273_v47  ;;  %v317_v47 = vld [vmem:[%s10991_s1 + $0x860] sm:$0xff]  ;;  %v4209_v48 = vpack.c.bf16 %v309_v37, %v305_v36  ;;  %v348_v36 = vld [vmem:[%s10991_s1 + $0x958] sm:$0xff] }
  0x63   :  { %4958 = vmatpush1.bf16.msra.mxu1 %v4957_v58  ;;  %4176 = vmatprep.subr.bf16.mxu0 %v4175_v61  ;;  %v4977_v58 = vpack.c.bf16 %v279_v52, %v275_v51  ;;  %v4195_v61 = vpack.c.bf16 %v286_v54, %v282_v53  ;;  %v4211_v51 = vpack.c.bf16 %v318_v42, %v314_v41  ;;  %v326_v53 = vld [vmem:[%s10991_s1 + $0x8a8] sm:$0xff]  ;;  %v324_v54 = vld [vmem:[%s10991_s1 + $0x898] sm:$0xff] }
  0x64   :  { %4960 = vmatprep.subr.bf16.mxu1 %v4959_v62  ;;  %v4979_v62 = vpack.c.bf16 %v288_v56, %v284_v55  ;;  %v4995_v52 = vpack.c.bf16 %v320_v44, %v316_v43  ;;  %v328_v55 = vld [vmem:[%s10991_s1 + $0x8b8] sm:$0xff]  ;;  %v347_v43 = vld [vmem:[%s10991_s1 + $0x950] sm:$0xff] }
  0x65   :  { %v5774_v56 = vld [vmem:[%s10990_s0 + $0x8] ss:$50 sps:$4 sm:$0xff]   ;;  %v351_v44 = vld [vmem:[%s10991_s1 + $0x970] sm:$0xff] }
  0x66   :  { %4178 = vmatpush1.bf16.msra.mxu0 %v4177_v5  ;;  %v4197_v5 = vpack.c.bf16 %v285_v60, %v281_v59  ;;  %v352_v37 = vld [vmem:[%s10991_s1 + $0x978] sm:$0xff] }
  0x67   :  { %4962 = vmatpush1.bf16.msra.mxu1 %v4961_v7  ;;  %4180 = vmatprep.subr.bf16.mxu0 %v4179_v10  ;;  %v4981_v7 = vpack.c.bf16 %v287_v0, %v283_v63  ;;  %v4199_v10 = vpack.c.bf16 %v294_v2, %v290_v1  ;;  %v4999_v63 = vpack.c.bf16 %v328_v55, %v324_v54  ;;  %v323_v0 = vld [vmem:[%s10991_s1 + $0x890] sm:$0xff]  ;;  %v330_v2 = vld [vmem:[%s10991_s1 + $0x8c8] sm:$0xff] }
  0x68   :  { %4964 = vmatprep.subr.bf16.mxu1 %v4963_v11  ;;  %v4983_v11 = vpack.c.bf16 %v296_v4, %v292_v3  ;;  %v327_v1 = vld [vmem:[%s10991_s1 + $0x8b0] sm:$0xff]  ;;  %v6752_v3 = vrot.slane %v5774_v56, %v6168_v23  ;;  %v5011_v42 = vpack.c.bf16 %v352_v37, %v348_v36  ;;  %v362_v55 = vld [vmem:[%s10991_s1 + $0x9c8] sm:$0xff]  ;;  %v388_v36 = vld [vmem:[%s10991_s1 + $0xa98] sm:$0xff] }
  0x69   :  { %v359_v54 = vld [vmem:[%s10991_s1 + $0x9b0] sm:$0xff]  ;;  %v366_v56 = vld [vmem:[%s10991_s1 + $0x9e8] sm:$0xff]  ;;  %v392_v37 = vld [vmem:[%s10991_s1 + $0xab8] sm:$0xff] }
  0x6a   :  { %4182 = vmatpush1.bf16.msra.mxu0 %v4181_v18  ;;  %v4201_v18 = vpack.c.bf16 %v293_v9, %v289_v8  ;;  %v336_v8 = vld [vmem:[%s10991_s1 + $0x8f8] sm:$0xff] }
  0x6b   :  { %4966 = vmatpush1.bf16.msra.mxu1 %v4965_v19  ;;  %4184 = vmatprep.subr.bf16.mxu0 %v4183_v22  ;;  %v4985_v19 = vpack.c.bf16 %v295_v13, %v291_v12  ;;  %v4203_v22 = vpack.c.bf16 %v302_v15, %v298_v14  ;;  %v329_v12 = vld [vmem:[%s10991_s1 + $0x8c0] sm:$0xff] }
  0x6c   :  { %4968 = vmatprep.subr.bf16.mxu1 %v4967_v24  ;;  %v4987_v24 = vpack.c.bf16 %v304_v17, %v300_v16  ;;  %v333_v13 = vld [vmem:[%s10991_s1 + $0x8e0] sm:$0xff]  ;;  %v331_v16 = vld [vmem:[%s10991_s1 + $0x8d0] sm:$0xff] }
  0x6d   :  { %v335_v17 = vld [vmem:[%s10991_s1 + $0x8f0] sm:$0xff] }
  0x6e   :  { %4186 = vmatpush1.bf16.msra.mxu0 %v4185_v33  ;;  %v4205_v33 = vpack.c.bf16 %v301_v21, %v297_v20  ;;  %v340_v20 = vld [vmem:[%s10991_s1 + $0x918] sm:$0xff] }
  0x6f   :  { %4970 = vmatpush1.bf16.msra.mxu1 %v4969_v34  ;;  %4188 = vmatprep.subr.bf16.mxu0 %v4187_v38  ;;  %v4989_v34 = vpack.c.bf16 %v303_v26, %v299_v25  ;;  %v4207_v38 = vpack.c.bf16 %v310_v28, %v306_v27  ;;  %v344_v21 = vld [vmem:[%s10991_s1 + $0x938] sm:$0xff]  ;;  %v337_v25 = vld [vmem:[%s10991_s1 + $0x900] sm:$0xff] }
  0x70   :  { %4972 = vmatprep.subr.bf16.mxu1 %v4971_v35  ;;  %v4991_v35 = vpack.c.bf16 %v312_v32, %v308_v31  ;;  %v341_v26 = vld [vmem:[%s10991_s1 + $0x920] sm:$0xff]  ;;  %v5007_v28 = vpack.c.bf16 %v344_v21, %v340_v20  ;;  %v339_v31 = vld [vmem:[%s10991_s1 + $0x910] sm:$0xff]  ;;  %v380_v20 = vld [vmem:[%s10991_s1 + $0xa58] sm:$0xff] }
  0x71   :  { %v343_v32 = vld [vmem:[%s10991_s1 + $0x930] sm:$0xff]  ;;  %v384_v21 = vld [vmem:[%s10991_s1 + $0xa78] sm:$0xff] }
  0x72   :  { %4190 = vmatpush1.bf16.msra.mxu0 %v4189_v45  ;;  %v1701_v45 = vcombine.low %v6311_v29, %v6314_v30  ;;  %v319_v29 = vld [vmem:[%s10991_s1 + $0x870] sm:$0xff]  ;;  %v322_v30 = vld [vmem:[%s10991_s1 + $0x888] sm:$0xff] }
  0x73   :  { %4974 = vmatpush1.bf16.msra.mxu1 %v4973_v46  ;;  %4192 = vmatprep.subr.bf16.mxu0 %v4191_v49  ;;  %v313_v46 = vld [vmem:[%s10991_s1 + $0x840] sm:$0xff]  ;;  %v4993_v49 = vpack.c.bf16 %v311_v40, %v307_v39  ;;  %v4215_v60 = vpack.c.bf16 %v326_v53, %v322_v30  ;;  %v355_v53 = vld [vmem:[%s10991_s1 + $0x990] sm:$0xff] }
  0x74   :  { %4976 = vmatprep.subr.bf16.mxu1 %v4975_v50  ;;  %v315_v50 = vld [vmem:[%s10991_s1 + $0x850] sm:$0xff]  ;;  %v345_v39 = vld [vmem:[%s10991_s1 + $0x940] sm:$0xff] }
  0x75   :  { %v4997_v59 = vpack.c.bf16 %v319_v29, %v315_v50  ;;  %v349_v40 = vld [vmem:[%s10991_s1 + $0x960] sm:$0xff]  ;;  %v5013_v50 = vpack.c.bf16 %v351_v44, %v347_v43  ;;  %v387_v43 = vld [vmem:[%s10991_s1 + $0xa90] sm:$0xff] }
  0x76   :  { %4194 = vmatpush1.bf16.msra.mxu0 %v4193_v57  ;;  %v5776_v57 = vld [vmem:[%s10990_s0 + $0x6c] ss:$50 sps:$4 sm:$0xff]   ;;  %v391_v44 = vld [vmem:[%s10991_s1 + $0xab0] sm:$0xff] }
  0x77   :  { %4978 = vmatpush1.bf16.msra.mxu1 %v4977_v58  ;;  %4196 = vmatprep.subr.bf16.mxu0 %v4195_v61  ;;  %v4213_v58 = vpack.c.bf16 %v317_v47, %v313_v46  ;;  %v321_v61 = vld [vmem:[%s10991_s1 + $0x880] sm:$0xff]  ;;  %v6755_v4 = vrot.slane %v5776_v57, %v6168_v23  ;;  %v358_v46 = vld [vmem:[%s10991_s1 + $0x9a8] sm:$0xff]  ;;  %v356_v47 = vld [vmem:[%s10991_s1 + $0x998] sm:$0xff] }
  0x78   :  { %4980 = vmatprep.subr.bf16.mxu1 %v4979_v62  ;;  %v325_v62 = vld [vmem:[%s10991_s1 + $0x8a0] sm:$0xff]  ;;  %v364_v57 = vld [vmem:[%s10991_s1 + $0x9d8] sm:$0xff] }
  0x79   :  { %v1736_v9 = vcombine.high %v6752_v3, %v6755_v4  ;;  %v353_v29 = vld [vmem:[%s10991_s1 + $0x980] sm:$0xff] }
  0x7a   :  { %4198 = vmatpush1.bf16.msra.mxu0 %v4197_v5  ;;  %v334_v5 = vld [vmem:[%s10991_s1 + $0x8e8] sm:$0xff]  ;;  %v357_v30 = vld [vmem:[%s10991_s1 + $0x9a0] sm:$0xff] }
  0x7b   :  { %4982 = vmatpush1.bf16.msra.mxu1 %v4981_v7  ;;  %4200 = vmatprep.subr.bf16.mxu0 %v4199_v10  ;;  %v332_v7 = vld [vmem:[%s10991_s1 + $0x8d8] sm:$0xff]  ;;  %v4217_v10 = vpack.c.bf16 %v325_v62, %v321_v61  ;;  %v4219_v14 = vpack.c.bf16 %v334_v5, %v330_v2  ;;  %v361_v61 = vld [vmem:[%s10991_s1 + $0x9c0] sm:$0xff]  ;;  %v367_v2 = vld [vmem:[%s10991_s1 + $0x9f0] sm:$0xff] }
  0x7c   :  { %4984 = vmatprep.subr.bf16.mxu1 %v4983_v11  ;;  %v5001_v11 = vpack.c.bf16 %v327_v1, %v323_v0  ;;  %v5003_v15 = vpack.c.bf16 %v336_v8, %v332_v7  ;;  %v365_v62 = vld [vmem:[%s10991_s1 + $0x9e0] sm:$0xff]  ;;  %v363_v1 = vld [vmem:[%s10991_s1 + $0x9d0] sm:$0xff]  ;;  %v370_v5 = vld [vmem:[%s10991_s1 + $0xa08] sm:$0xff] }
  0x7d   :  { %v374_v7 = vld [vmem:[%s10991_s1 + $0xa28] sm:$0xff]  ;;  %v372_v8 = vld [vmem:[%s10991_s1 + $0xa18] sm:$0xff] }
  0x7e   :  { %4202 = vmatpush1.bf16.msra.mxu0 %v4201_v18  ;;  %v338_v18 = vld [vmem:[%s10991_s1 + $0x908] sm:$0xff] }
  0x7f   :  { %4986 = vmatpush1.bf16.msra.mxu1 %v4985_v19  ;;  %4204 = vmatprep.subr.bf16.mxu0 %v4203_v22  ;;  %v342_v19 = vld [vmem:[%s10991_s1 + $0x928] sm:$0xff]  ;;  %v4221_v22 = vpack.c.bf16 %v333_v13, %v329_v12  ;;  %v369_v12 = vld [vmem:[%s10991_s1 + $0xa00] sm:$0xff] }
  0x80   :  { %4988 = vmatprep.subr.bf16.mxu1 %v4987_v24  ;;  %v5005_v24 = vpack.c.bf16 %v335_v17, %v331_v16  ;;  %v4223_v27 = vpack.c.bf16 %v342_v19, %v338_v18  ;;  %v373_v13 = vld [vmem:[%s10991_s1 + $0xa20] sm:$0xff]  ;;  %v371_v16 = vld [vmem:[%s10991_s1 + $0xa10] sm:$0xff]  ;;  %v378_v18 = vld [vmem:[%s10991_s1 + $0xa48] sm:$0xff] }
  0x81   :  { %v375_v17 = vld [vmem:[%s10991_s1 + $0xa30] sm:$0xff]  ;;  %v382_v19 = vld [vmem:[%s10991_s1 + $0xa68] sm:$0xff] }
  0x82   :  { %4206 = vmatpush1.bf16.msra.mxu0 %v4205_v33  ;;  %v346_v33 = vld [vmem:[%s10991_s1 + $0x948] sm:$0xff] }
  0x83   :  { %4990 = vmatpush1.bf16.msra.mxu1 %v4989_v34  ;;  %4208 = vmatprep.subr.bf16.mxu0 %v4207_v38  ;;  %v350_v34 = vld [vmem:[%s10991_s1 + $0x968] sm:$0xff]  ;;  %v4225_v38 = vpack.c.bf16 %v341_v26, %v337_v25  ;;  %v377_v25 = vld [vmem:[%s10991_s1 + $0xa40] sm:$0xff] }
  0x84   :  { %4992 = vmatprep.subr.bf16.mxu1 %v4991_v35  ;;  %v5009_v35 = vpack.c.bf16 %v343_v32, %v339_v31  ;;  %v4227_v41 = vpack.c.bf16 %v350_v34, %v346_v33  ;;  %v381_v26 = vld [vmem:[%s10991_s1 + $0xa60] sm:$0xff]  ;;  %v379_v31 = vld [vmem:[%s10991_s1 + $0xa50] sm:$0xff]  ;;  %v386_v33 = vld [vmem:[%s10991_s1 + $0xa88] sm:$0xff] }
  0x85   :  { %2063 = vmatmul.mubr.f32.vlgmr.msra.gmra.mrb[0].mxu0 %v1701_v45  ;;  %v383_v32 = vld [vmem:[%s10991_s1 + $0xa70] sm:$0xff]  ;;  %v390_v34 = vld [vmem:[%s10991_s1 + $0xaa8] sm:$0xff] }
  0x86   :  { %2986 = vmatmul.mubr.f32.vlgmr.msra.gmra.mrb[0].mxu1 %v1701_v45  ;;  %4210 = vmatpush1.bf16.msra.mxu0 %v4209_v48  ;;  %v354_v45 = vld [vmem:[%s10991_s1 + $0x988] sm:$0xff]  ;;  %v360_v48 = vld [vmem:[%s10991_s1 + $0x9b8] sm:$0xff] }
  0x87   :  { %4994 = vmatpush1.bf16.msra.mxu1 %v4993_v49  ;;  %4212 = vmatprep.subr.bf16.mxu0 %v4211_v51  ;;  %v4229_v49 = vpack.c.bf16 %v349_v40, %v345_v39  ;;  %v4231_v51 = vpack.c.bf16 %v358_v46, %v354_v45  ;;  %v385_v39 = vld [vmem:[%s10991_s1 + $0xa80] sm:$0xff]  ;;  %v394_v45 = vld [vmem:[%s10991_s1 + $0xac8] sm:$0xff] }
  0x88   :  { %4996 = vmatprep.subr.bf16.mxu1 %v4995_v52  ;;  %2133 = vmatprep.mubr.f32.mxu0 %v1736_v9  ;;  %v5015_v52 = vpack.c.bf16 %v360_v48, %v356_v47  ;;  %v389_v40 = vld [vmem:[%s10991_s1 + $0xaa0] sm:$0xff]  ;;  %v398_v46 = vld [vmem:[%s10991_s1 + $0xae8] sm:$0xff]  ;;  %v396_v47 = vld [vmem:[%s10991_s1 + $0xad8] sm:$0xff] }
  0x89   :  { %3056 = vmatprep.mubr.f32.mxu1 %v1736_v9  ;;  %v376_v9 = vld [vmem:[%s10991_s1 + $0xa38] sm:$0xff] }
  0x8a   :  { %4214 = vmatpush1.bf16.msra.mxu0 %v4213_v58  ;;  %v368_v58 = vld [vmem:[%s10991_s1 + $0x9f8] sm:$0xff] }
  0x8b   :  { %4998 = vmatpush1.bf16.msra.mxu1 %v4997_v59  ;;  %4216 = vmatprep.subr.bf16.mxu0 %v4215_v60  ;;  %v4233_v59 = vpack.c.bf16 %v357_v30, %v353_v29  ;;  %v5017_v60 = vpack.c.bf16 %v359_v54, %v355_v53  ;;  %v5019_v0 = vpack.c.bf16 %v368_v58, %v364_v57  ;;  %v400_v48 = vld [vmem:[%s10991_s1 + $0xaf8] sm:$0xff]  ;;  %v393_v29 = vld [vmem:[%s10991_s1 + $0xac0] sm:$0xff]  ;;  %v395_v53 = vld [vmem:[%s10991_s1 + $0xad0] sm:$0xff] }
  0x8c   :  { %5000 = vmatprep.subr.bf16.mxu1 %v4999_v63  ;;  %v4235_v63 = vpack.c.bf16 %v366_v56, %v362_v55  ;;  %v397_v30 = vld [vmem:[%s10991_s1 + $0xae0] sm:$0xff]  ;;  %v399_v54 = vld [vmem:[%s10991_s1 + $0xaf0] sm:$0xff]  ;;  %v402_v55 = vld [vmem:[%s10991_s1 + $0xb08] sm:$0xff] }
  0x8d   :  { %v406_v56 = vld [vmem:[%s10991_s1 + $0xb28] sm:$0xff]  ;;  %v404_v57 = vld [vmem:[%s10991_s1 + $0xb18] sm:$0xff] }
  0x8e   :  { %4218 = vmatpush1.bf16.msra.mxu0 %v4217_v10  ;;  %v4237_v10 = vpack.c.bf16 %v365_v62, %v361_v61  ;;  %v408_v58 = vld [vmem:[%s10991_s1 + $0xb38] sm:$0xff]  ;;  %v401_v61 = vld [vmem:[%s10991_s1 + $0xb00] sm:$0xff] }
  0x8f   :  { %5002 = vmatpush1.bf16.msra.mxu1 %v5001_v11  ;;  %4220 = vmatprep.subr.bf16.mxu0 %v4219_v14  ;;  %v5021_v11 = vpack.c.bf16 %v367_v2, %v363_v1  ;;  %v4239_v14 = vpack.c.bf16 %v374_v7, %v370_v5  ;;  %v405_v62 = vld [vmem:[%s10991_s1 + $0xb20] sm:$0xff]  ;;  %v403_v1 = vld [vmem:[%s10991_s1 + $0xb10] sm:$0xff]  ;;  %v410_v5 = vld [vmem:[%s10991_s1 + $0xb48] sm:$0xff] }
  0x90   :  { %5004 = vmatprep.subr.bf16.mxu1 %v5003_v15  ;;  %v5023_v15 = vpack.c.bf16 %v376_v9, %v372_v8  ;;  %v407_v2 = vld [vmem:[%s10991_s1 + $0xb30] sm:$0xff]  ;;  %v414_v7 = vld [vmem:[%s10991_s1 + $0xb68] sm:$0xff]  ;;  %v412_v8 = vld [vmem:[%s10991_s1 + $0xb58] sm:$0xff] }
  0x91   :  { %v416_v9 = vld [vmem:[%s10991_s1 + $0xb78] sm:$0xff] }
  0x92   :  { %4222 = vmatpush1.bf16.msra.mxu0 %v4221_v22  ;;  %v4241_v22 = vpack.c.bf16 %v373_v13, %v369_v12  ;;  %v409_v12 = vld [vmem:[%s10991_s1 + $0xb40] sm:$0xff] }
  0x93   :  { %5006 = vmatpush1.bf16.msra.mxu1 %v5005_v24  ;;  %4224 = vmatprep.subr.bf16.mxu0 %v4223_v27  ;;  %v5025_v24 = vpack.c.bf16 %v375_v17, %v371_v16  ;;  %v4243_v27 = vpack.c.bf16 %v382_v19, %v378_v18  ;;  %v413_v13 = vld [vmem:[%s10991_s1 + $0xb60] sm:$0xff]  ;;  %v411_v16 = vld [vmem:[%s10991_s1 + $0xb50] sm:$0xff]  ;;  %v418_v18 = vld [vmem:[%s10991_s1 + $0xb88] sm:$0xff] }
  0x94   :  { %5008 = vmatprep.subr.bf16.mxu1 %v5007_v28  ;;  %v5027_v28 = vpack.c.bf16 %v384_v21, %v380_v20  ;;  %v415_v17 = vld [vmem:[%s10991_s1 + $0xb70] sm:$0xff]  ;;  %v422_v19 = vld [vmem:[%s10991_s1 + $0xba8] sm:$0xff]  ;;  %v420_v20 = vld [vmem:[%s10991_s1 + $0xb98] sm:$0xff] }
  0x95   :  { %v424_v21 = vld [vmem:[%s10991_s1 + $0xbb8] sm:$0xff] }
  0x96   :  { %4226 = vmatpush1.bf16.msra.mxu0 %v4225_v38  ;;  %v4245_v38 = vpack.c.bf16 %v381_v26, %v377_v25  ;;  %v417_v25 = vld [vmem:[%s10991_s1 + $0xb80] sm:$0xff] }
  0x97   :  { %5010 = vmatpush1.bf16.msra.mxu1 %v5009_v35  ;;  %4228 = vmatprep.subr.bf16.mxu0 %v4227_v41  ;;  %v5029_v35 = vpack.c.bf16 %v383_v32, %v379_v31  ;;  %v4247_v41 = vpack.c.bf16 %v390_v34, %v386_v33  ;;  %v421_v26 = vld [vmem:[%s10991_s1 + $0xba0] sm:$0xff]  ;;  %v419_v31 = vld [vmem:[%s10991_s1 + $0xb90] sm:$0xff]  ;;  %v426_v33 = vld [vmem:[%s10991_s1 + $0xbc8] sm:$0xff] }
  0x98   :  { %5012 = vmatprep.subr.bf16.mxu1 %v5011_v42  ;;  %v5031_v42 = vpack.c.bf16 %v392_v37, %v388_v36  ;;  %v423_v32 = vld [vmem:[%s10991_s1 + $0xbb0] sm:$0xff]  ;;  %v430_v34 = vld [vmem:[%s10991_s1 + $0xbe8] sm:$0xff]  ;;  %v428_v36 = vld [vmem:[%s10991_s1 + $0xbd8] sm:$0xff] }
  0x99   :  { %v432_v37 = vld [vmem:[%s10991_s1 + $0xbf8] sm:$0xff] }
  0x9a   :  { %4230 = vmatpush1.bf16.msra.mxu0 %v4229_v49  ;;  %v4249_v49 = vpack.c.bf16 %v389_v40, %v385_v39  ;;  %v5049_v39 = vpack.c.bf16 %v423_v32, %v419_v31  ;;  %v429_v40 = vld [vmem:[%s10991_s1 + $0xbe0] sm:$0xff] }
  0x9b   :  { %5014 = vmatpush1.bf16.msra.mxu1 %v5013_v50  ;;  %4232 = vmatprep.subr.bf16.mxu0 %v4231_v51  ;;  %v5033_v50 = vpack.c.bf16 %v391_v44, %v387_v43  ;;  %v4251_v51 = vpack.c.bf16 %v398_v46, %v394_v45  ;;  %v4267_v43 = vpack.c.bf16 %v430_v34, %v426_v33  ;;  %v434_v45 = vld [vmem:[%s10991_s1 + $0xc08] sm:$0xff]  ;;  %v457_v31 = vld [vmem:[%s10991_s1 + $0xcc0] sm:$0xff] }
  0x9c   :  { %5016 = vmatprep.subr.bf16.mxu1 %v5015_v52  ;;  %v5035_v52 = vpack.c.bf16 %v400_v48, %v396_v47  ;;  %v5051_v44 = vpack.c.bf16 %v432_v37, %v428_v36  ;;  %v438_v46 = vld [vmem:[%s10991_s1 + $0xc28] sm:$0xff]  ;;  %v436_v47 = vld [vmem:[%s10991_s1 + $0xc18] sm:$0xff]  ;;  %v461_v32 = vld [vmem:[%s10991_s1 + $0xce0] sm:$0xff] }
  0x9d   :  { %v440_v48 = vld [vmem:[%s10991_s1 + $0xc38] sm:$0xff]  ;;  %v459_v36 = vld [vmem:[%s10991_s1 + $0xcd0] sm:$0xff] }
  0x9e   :  { %4234 = vmatpush1.bf16.msra.mxu0 %v4233_v59  ;;  %v4253_v59 = vpack.c.bf16 %v397_v30, %v393_v29  ;;  %v463_v37 = vld [vmem:[%s10991_s1 + $0xcf0] sm:$0xff] }
  0x9f   :  { %5018 = vmatpush1.bf16.msra.mxu1 %v5017_v60  ;;  %4236 = vmatprep.subr.bf16.mxu0 %v4235_v63  ;;  %v5037_v60 = vpack.c.bf16 %v399_v54, %v395_v53  ;;  %v4255_v63 = vpack.c.bf16 %v406_v56, %v402_v55  ;;  %v4271_v53 = vpack.c.bf16 %v438_v46, %v434_v45  ;;  %v435_v55 = vld [vmem:[%s10991_s1 + $0xc10] sm:$0xff] }
  0xa0   :  { %5020 = vmatprep.subr.bf16.mxu1 %v5019_v0  ;;  %v5039_v0 = vpack.c.bf16 %v408_v58, %v404_v57  ;;  %v5055_v54 = vpack.c.bf16 %v440_v48, %v436_v47  ;;  %v439_v56 = vld [vmem:[%s10991_s1 + $0xc30] sm:$0xff]  ;;  %v442_v57 = vld [vmem:[%s10991_s1 + $0xc48] sm:$0xff] }
  0xa1   :  { %v446_v58 = vld [vmem:[%s10991_s1 + $0xc68] sm:$0xff]  ;;  %v467_v47 = vld [vmem:[%s10991_s1 + $0xd10] sm:$0xff] }
  0xa2   :  { %4238 = vmatpush1.bf16.msra.mxu0 %v4237_v10  ;;  %v4257_v10 = vpack.c.bf16 %v405_v62, %v401_v61  ;;  %v471_v48 = vld [vmem:[%s10991_s1 + $0xd30] sm:$0xff] }
  0xa3   :  { %5022 = vmatpush1.bf16.msra.mxu1 %v5021_v11  ;;  %4240 = vmatprep.subr.bf16.mxu0 %v4239_v14  ;;  %v5041_v11 = vpack.c.bf16 %v407_v2, %v403_v1  ;;  %v4259_v14 = vpack.c.bf16 %v414_v7, %v410_v5  ;;  %v5057_v1 = vpack.c.bf16 %v439_v56, %v435_v55  ;;  %v441_v2 = vld [vmem:[%s10991_s1 + $0xc40] sm:$0xff] }
  0xa4   :  { %5024 = vmatprep.subr.bf16.mxu1 %v5023_v15  ;;  %v5043_v15 = vpack.c.bf16 %v416_v9, %v412_v8  ;;  %v445_v5 = vld [vmem:[%s10991_s1 + $0xc60] sm:$0xff]  ;;  %v4275_v7 = vpack.c.bf16 %v446_v58, %v442_v57  ;;  %v450_v9 = vld [vmem:[%s10991_s1 + $0xc88] sm:$0xff]  ;;  %v475_v57 = vld [vmem:[%s10991_s1 + $0xd50] sm:$0xff] }
  0xa5   :  { %v479_v58 = vld [vmem:[%s10991_s1 + $0xd70] sm:$0xff] }
  0xa6   :  { %4242 = vmatpush1.bf16.msra.mxu0 %v4241_v22  ;;  %v4261_v22 = vpack.c.bf16 %v413_v13, %v409_v12  ;;  %v456_v12 = vld [vmem:[%s10991_s1 + $0xcb8] sm:$0xff] }
  0xa7   :  { %5026 = vmatpush1.bf16.msra.mxu1 %v5025_v24  ;;  %4244 = vmatprep.subr.bf16.mxu0 %v4243_v27  ;;  %v5045_v24 = vpack.c.bf16 %v415_v17, %v411_v16  ;;  %v4263_v27 = vpack.c.bf16 %v422_v19, %v418_v18  ;;  %v449_v16 = vld [vmem:[%s10991_s1 + $0xc80] sm:$0xff] }
  0xa8   :  { %5028 = vmatprep.subr.bf16.mxu1 %v5027_v28  ;;  %v5047_v28 = vpack.c.bf16 %v424_v21, %v420_v20  ;;  %v453_v17 = vld [vmem:[%s10991_s1 + $0xca0] sm:$0xff]  ;;  %v451_v20 = vld [vmem:[%s10991_s1 + $0xc90] sm:$0xff] }
  0xa9   :  { %v455_v21 = vld [vmem:[%s10991_s1 + $0xcb0] sm:$0xff] }
  0xaa   :  { %4246 = vmatpush1.bf16.msra.mxu0 %v4245_v38  ;;  %v425_v38 = vld [vmem:[%s10991_s1 + $0xbc0] sm:$0xff] }
  0xab   :  { %5030 = vmatpush1.bf16.msra.mxu1 %v5029_v35  ;;  %4248 = vmatprep.subr.bf16.mxu0 %v4247_v41  ;;  %v4265_v35 = vpack.c.bf16 %v421_v26, %v417_v25  ;;  %v427_v41 = vld [vmem:[%s10991_s1 + $0xbd0] sm:$0xff]  ;;  %v4269_v29 = vpack.c.bf16 %v429_v40, %v425_v38  ;;  %v460_v25 = vld [vmem:[%s10991_s1 + $0xcd8] sm:$0xff]  ;;  %v466_v38 = vld [vmem:[%s10991_s1 + $0xd08] sm:$0xff] }
  0xac   :  { %5032 = vmatprep.subr.bf16.mxu1 %v5031_v42  ;;  %v431_v42 = vld [vmem:[%s10991_s1 + $0xbf0] sm:$0xff]  ;;  %v464_v26 = vld [vmem:[%s10991_s1 + $0xcf8] sm:$0xff] }
  0xad   :  { %v5053_v30 = vpack.c.bf16 %v431_v42, %v427_v41  ;;  %v5067_v34 = vpack.c.bf16 %v464_v26, %v460_v25  ;;  %v472_v40 = vld [vmem:[%s10991_s1 + $0xd38] sm:$0xff]  ;;  %v4285_v41 = vpack.c.bf16 %v461_v32, %v457_v31  ;;  %v5069_v42 = vpack.c.bf16 %v463_v37, %v459_v36  ;;  %v497_v31 = vld [vmem:[%s10991_s1 + $0xe00] sm:$0xff]  ;;  %v499_v36 = vld [vmem:[%s10991_s1 + $0xe10] sm:$0xff] }
  0xae   :  { %4250 = vmatpush1.bf16.msra.mxu0 %v4249_v49  ;;  %v5778_v49 = vld [vmem:[%s10990_s0 + $0xc] ss:$50 sps:$4 sm:$0xff]   ;;  %v503_v37 = vld [vmem:[%s10991_s1 + $0xe30] sm:$0xff] }
  0xaf   :  { %5034 = vmatpush1.bf16.msra.mxu1 %v5033_v50  ;;  %4252 = vmatprep.subr.bf16.mxu0 %v4251_v51  ;;  %v5779_v50 = vld [vmem:[%s10990_s0 + $0x70] ss:$50 sps:$4 sm:$0xff]   ;;  %v7111_v61 = vrot.slane %v5778_v49, %v6168_v23  ;;  %v474_v49 = vld [vmem:[%s10991_s1 + $0xd48] sm:$0xff]  ;;  %v500_v25 = vld [vmem:[%s10991_s1 + $0xe18] sm:$0xff] }
  0xb0   :  { %5036 = vmatprep.subr.bf16.mxu1 %v5035_v52  ;;  %v433_v51 = vld [vmem:[%s10991_s1 + $0xc00] sm:$0xff]  ;;  %v7114_v62 = vrot.slane %v5779_v50, %v6168_v23  ;;  %v478_v50 = vld [vmem:[%s10991_s1 + $0xd68] sm:$0xff]  ;;  %v504_v26 = vld [vmem:[%s10991_s1 + $0xe38] sm:$0xff] }
  0xb1   :  { %v437_v52 = vld [vmem:[%s10991_s1 + $0xc20] sm:$0xff]  ;;  %v4291_v55 = vpack.c.bf16 %v478_v50, %v474_v49  ;;  %v514_v49 = vld [vmem:[%s10991_s1 + $0xe88] sm:$0xff] }
  0xb2   :  { %4254 = vmatpush1.bf16.msra.mxu0 %v4253_v59  ;;  %v444_v59 = vld [vmem:[%s10991_s1 + $0xc58] sm:$0xff]  ;;  %v1738_v13 = vcombine.high %v7111_v61, %v7114_v62  ;;  %v501_v32 = vld [vmem:[%s10991_s1 + $0xe20] sm:$0xff]  ;;  %v518_v50 = vld [vmem:[%s10991_s1 + $0xea8] sm:$0xff] }
  0xb3   :  { %5038 = vmatpush1.bf16.msra.mxu1 %v5037_v60  ;;  %4256 = vmatprep.subr.bf16.mxu0 %v4255_v63  ;;  %v448_v60 = vld [vmem:[%s10991_s1 + $0xc78] sm:$0xff]  ;;  %v1735_v63 = vcombine.low %v6752_v3, %v6755_v4  ;;  %v443_v3 = vld [vmem:[%s10991_s1 + $0xc50] sm:$0xff] }
  0xb4   :  { %5040 = vmatprep.subr.bf16.mxu1 %v5039_v0  ;;  %v4273_v0 = vpack.c.bf16 %v437_v52, %v433_v51  ;;  %v5059_v8 = vpack.c.bf16 %v448_v60, %v444_v59  ;;  %v447_v4 = vld [vmem:[%s10991_s1 + $0xc70] sm:$0xff]  ;;  %v5073_v52 = vpack.c.bf16 %v471_v48, %v467_v47  ;;  %v482_v59 = vld [vmem:[%s10991_s1 + $0xd88] sm:$0xff] }
  0xb5   :  { %v486_v60 = vld [vmem:[%s10991_s1 + $0xda8] sm:$0xff]  ;;  %v507_v47 = vld [vmem:[%s10991_s1 + $0xe50] sm:$0xff] }
  0xb6   :  { %4258 = vmatpush1.bf16.msra.mxu0 %v4257_v10  ;;  %v454_v10 = vld [vmem:[%s10991_s1 + $0xca8] sm:$0xff]  ;;  %v511_v48 = vld [vmem:[%s10991_s1 + $0xe70] sm:$0xff] }
  0xb7   :  { %5042 = vmatpush1.bf16.msra.mxu1 %v5041_v11  ;;  %4260 = vmatprep.subr.bf16.mxu0 %v4259_v14  ;;  %v452_v11 = vld [vmem:[%s10991_s1 + $0xc98] sm:$0xff]  ;;  %v4277_v14 = vpack.c.bf16 %v445_v5, %v441_v2  ;;  %v4279_v18 = vpack.c.bf16 %v454_v10, %v450_v9  ;;  %v5077_v2 = vpack.c.bf16 %v479_v58, %v475_v57  ;;  %v481_v5 = vld [vmem:[%s10991_s1 + $0xd80] sm:$0xff]  ;;  %v487_v9 = vld [vmem:[%s10991_s1 + $0xdb0] sm:$0xff] }
  0xb8   :  { %5044 = vmatprep.subr.bf16.mxu1 %v5043_v15  ;;  %v5061_v15 = vpack.c.bf16 %v447_v4, %v443_v3  ;;  %v5063_v19 = vpack.c.bf16 %v456_v12, %v452_v11  ;;  %v483_v4 = vld [vmem:[%s10991_s1 + $0xd90] sm:$0xff]  ;;  %v490_v10 = vld [vmem:[%s10991_s1 + $0xdc8] sm:$0xff]  ;;  %v492_v12 = vld [vmem:[%s10991_s1 + $0xdd8] sm:$0xff] }
  0xb9   :  { %v494_v11 = vld [vmem:[%s10991_s1 + $0xde8] sm:$0xff]  ;;  %v515_v57 = vld [vmem:[%s10991_s1 + $0xe90] sm:$0xff] }
  0xba   :  { %4262 = vmatpush1.bf16.msra.mxu0 %v4261_v22  ;;  %v458_v22 = vld [vmem:[%s10991_s1 + $0xcc8] sm:$0xff]  ;;  %v519_v58 = vld [vmem:[%s10991_s1 + $0xeb0] sm:$0xff] }
  0xbb   :  { %5046 = vmatpush1.bf16.msra.mxu1 %v5045_v24  ;;  %4264 = vmatprep.subr.bf16.mxu0 %v4263_v27  ;;  %v462_v24 = vld [vmem:[%s10991_s1 + $0xce8] sm:$0xff]  ;;  %v4281_v27 = vpack.c.bf16 %v453_v17, %v449_v16  ;;  %v5081_v17 = vpack.c.bf16 %v487_v9, %v483_v4  ;;  %v523_v4 = vld [vmem:[%s10991_s1 + $0xed0] sm:$0xff] }
  0xbc   :  { %5048 = vmatprep.subr.bf16.mxu1 %v5047_v28  ;;  %v5065_v28 = vpack.c.bf16 %v455_v21, %v451_v20  ;;  %v4283_v33 = vpack.c.bf16 %v462_v24, %v458_v22  ;;  %v498_v20 = vld [vmem:[%s10991_s1 + $0xe08] sm:$0xff]  ;;  %v4299_v21 = vpack.c.bf16 %v494_v11, %v490_v10  ;;  %v527_v9 = vld [vmem:[%s10991_s1 + $0xef0] sm:$0xff] }
  0xbd   :  { %v502_v24 = vld [vmem:[%s10991_s1 + $0xe28] sm:$0xff] }
  0xbe   :  { %4266 = vmatpush1.bf16.msra.mxu0 %v4265_v35  ;;  %v470_v35 = vld [vmem:[%s10991_s1 + $0xd28] sm:$0xff] }
  0xbf   :  { %5050 = vmatpush1.bf16.msra.mxu1 %v5049_v39  ;;  %4268 = vmatprep.subr.bf16.mxu0 %v4267_v43  ;;  %v468_v39 = vld [vmem:[%s10991_s1 + $0xd18] sm:$0xff]  ;;  %v465_v43 = vld [vmem:[%s10991_s1 + $0xd00] sm:$0xff]  ;;  %v4287_v45 = vpack.c.bf16 %v470_v35, %v466_v38  ;;  %v506_v38 = vld [vmem:[%s10991_s1 + $0xe48] sm:$0xff] }
  0xc0   :  { %5052 = vmatprep.subr.bf16.mxu1 %v5051_v44  ;;  %v469_v44 = vld [vmem:[%s10991_s1 + $0xd20] sm:$0xff]  ;;  %v5071_v46 = vpack.c.bf16 %v472_v40, %v468_v39  ;;  %v510_v35 = vld [vmem:[%s10991_s1 + $0xe68] sm:$0xff]  ;;  %v508_v39 = vld [vmem:[%s10991_s1 + $0xe58] sm:$0xff] }
  0xc1   :  { %v4289_v51 = vpack.c.bf16 %v469_v44, %v465_v43  ;;  %v512_v40 = vld [vmem:[%s10991_s1 + $0xe78] sm:$0xff]  ;;  %v505_v43 = vld [vmem:[%s10991_s1 + $0xe40] sm:$0xff]  ;;  %v530_v10 = vld [vmem:[%s10991_s1 + $0xf08] sm:$0xff] }
  0xc2   :  { %4270 = vmatpush1.bf16.msra.mxu0 %v4269_v29  ;;  %v476_v29 = vld [vmem:[%s10991_s1 + $0xd58] sm:$0xff]  ;;  %v509_v44 = vld [vmem:[%s10991_s1 + $0xe60] sm:$0xff]  ;;  %v534_v11 = vld [vmem:[%s10991_s1 + $0xf28] sm:$0xff] }
  0xc3   :  { %5054 = vmatpush1.bf16.msra.mxu1 %v5053_v30  ;;  %4272 = vmatprep.subr.bf16.mxu0 %v4271_v53  ;;  %v480_v30 = vld [vmem:[%s10991_s1 + $0xd78] sm:$0xff]  ;;  %v473_v53 = vld [vmem:[%s10991_s1 + $0xd40] sm:$0xff] }
  0xc4   :  { %5056 = vmatprep.subr.bf16.mxu1 %v5055_v54  ;;  %v477_v54 = vld [vmem:[%s10991_s1 + $0xd60] sm:$0xff]  ;;  %v5075_v56 = vpack.c.bf16 %v480_v30, %v476_v29  ;;  %v516_v29 = vld [vmem:[%s10991_s1 + $0xe98] sm:$0xff] }
  0xc5   :  { %2134 = vmatmul.mubr.f32.vlgmr.msra.gmra.mrb[0].mxu0 %v1735_v63  ;;  %v520_v30 = vld [vmem:[%s10991_s1 + $0xeb8] sm:$0xff] }
  0xc6   :  { %3057 = vmatmul.mubr.f32.vlgmr.msra.gmra.mrb[0].mxu1 %v1735_v63  ;;  %4274 = vmatpush1.bf16.msra.mxu0 %v4273_v0  ;;  %v484_v63 = vld [vmem:[%s10991_s1 + $0xd98] sm:$0xff] }
  0xc7   :  { %5058 = vmatpush1.bf16.msra.mxu1 %v5057_v1  ;;  %4276 = vmatprep.subr.bf16.mxu0 %v4275_v7  ;;  %v488_v0 = vld [vmem:[%s10991_s1 + $0xdb8] sm:$0xff]  ;;  %v4293_v1 = vpack.c.bf16 %v477_v54, %v473_v53  ;;  %v485_v7 = vld [vmem:[%s10991_s1 + $0xda0] sm:$0xff] }
  0xc8   :  { %5060 = vmatprep.subr.bf16.mxu1 %v5059_v8  ;;  %2204 = vmatprep.mubr.f32.mxu0 %v1738_v13  ;;  %v4295_v8 = vpack.c.bf16 %v486_v60, %v482_v59  ;;  %v5079_v3 = vpack.c.bf16 %v488_v0, %v484_v63  ;;  %v4297_v16 = vpack.c.bf16 %v485_v7, %v481_v5  ;;  %v513_v53 = vld [vmem:[%s10991_s1 + $0xe80] sm:$0xff]  ;;  %v522_v59 = vld [vmem:[%s10991_s1 + $0xec8] sm:$0xff]  ;;  %v524_v63 = vld [vmem:[%s10991_s1 + $0xed8] sm:$0xff] }
  0xc9   :  { %3127 = vmatprep.mubr.f32.mxu1 %v1738_v13  ;;  %v496_v13 = vld [vmem:[%s10991_s1 + $0xdf8] sm:$0xff]  ;;  %v517_v54 = vld [vmem:[%s10991_s1 + $0xea0] sm:$0xff]  ;;  %v526_v60 = vld [vmem:[%s10991_s1 + $0xee8] sm:$0xff] }
  0xca   :  { %4278 = vmatpush1.bf16.msra.mxu0 %v4277_v14  ;;  %v489_v14 = vld [vmem:[%s10991_s1 + $0xdc0] sm:$0xff]  ;;  %v5083_v22 = vpack.c.bf16 %v496_v13, %v492_v12  ;;  %v528_v0 = vld [vmem:[%s10991_s1 + $0xef8] sm:$0xff] }
  0xcb   :  { %5062 = vmatpush1.bf16.msra.mxu1 %v5061_v15  ;;  %4280 = vmatprep.subr.bf16.mxu0 %v4279_v18  ;;  %v493_v15 = vld [vmem:[%s10991_s1 + $0xde0] sm:$0xff]  ;;  %v491_v18 = vld [vmem:[%s10991_s1 + $0xdd0] sm:$0xff]  ;;  %v532_v12 = vld [vmem:[%s10991_s1 + $0xf18] sm:$0xff] }
  0xcc   :  { %5064 = vmatprep.subr.bf16.mxu1 %v5063_v19  ;;  %v495_v19 = vld [vmem:[%s10991_s1 + $0xdf0] sm:$0xff]  ;;  %v521_v5 = vld [vmem:[%s10991_s1 + $0xec0] sm:$0xff]  ;;  %v536_v13 = vld [vmem:[%s10991_s1 + $0xf38] sm:$0xff] }
  0xcd   :  { %v525_v7 = vld [vmem:[%s10991_s1 + $0xee0] sm:$0xff] }
  0xce   :  { %4282 = vmatpush1.bf16.msra.mxu0 %v4281_v27  ;;  %v4301_v27 = vpack.c.bf16 %v493_v15, %v489_v14  ;;  %v4317_v14 = vpack.c.bf16 %v525_v7, %v521_v5  ;;  %v5101_v15 = vpack.c.bf16 %v527_v9, %v523_v4 }
  0xcf   :  { %5066 = vmatpush1.bf16.msra.mxu1 %v5065_v28  ;;  %4284 = vmatprep.subr.bf16.mxu0 %v4283_v33  ;;  %v5085_v28 = vpack.c.bf16 %v495_v19, %v491_v18  ;;  %v4303_v33 = vpack.c.bf16 %v502_v24, %v498_v20  ;;  %v4319_v18 = vpack.c.bf16 %v534_v11, %v530_v10  ;;  %v531_v20 = vld [vmem:[%s10991_s1 + $0xf10] sm:$0xff]  ;;  %v542_v24 = vld [vmem:[%s10991_s1 + $0xf68] sm:$0xff] }
  0xd0   :  { %5068 = vmatprep.subr.bf16.mxu1 %v5067_v34  ;;  %v5087_v34 = vpack.c.bf16 %v504_v26, %v500_v25  ;;  %v5103_v19 = vpack.c.bf16 %v536_v13, %v532_v12  ;;  %v540_v25 = vld [vmem:[%s10991_s1 + $0xf58] sm:$0xff]  ;;  %v563_v10 = vld [vmem:[%s10991_s1 + $0x1010] sm:$0xff]  ;;  %v570_v12 = vld [vmem:[%s10991_s1 + $0x1048] sm:$0xff] }
  0xd1   :  { %v544_v26 = vld [vmem:[%s10991_s1 + $0xf78] sm:$0xff]  ;;  %v567_v11 = vld [vmem:[%s10991_s1 + $0x1030] sm:$0xff]  ;;  %v574_v13 = vld [vmem:[%s10991_s1 + $0x1068] sm:$0xff] }
  0xd2   :  { %4286 = vmatpush1.bf16.msra.mxu0 %v4285_v41  ;;  %v4305_v41 = vpack.c.bf16 %v501_v32, %v497_v31  ;;  %v537_v31 = vld [vmem:[%s10991_s1 + $0xf40] sm:$0xff] }
  0xd3   :  { %5070 = vmatpush1.bf16.msra.mxu1 %v5069_v42  ;;  %4288 = vmatprep.subr.bf16.mxu0 %v4287_v45  ;;  %v5089_v42 = vpack.c.bf16 %v503_v37, %v499_v36  ;;  %v4307_v45 = vpack.c.bf16 %v510_v35, %v506_v38  ;;  %v541_v32 = vld [vmem:[%s10991_s1 + $0xf60] sm:$0xff]  ;;  %v539_v36 = vld [vmem:[%s10991_s1 + $0xf50] sm:$0xff]  ;;  %v546_v38 = vld [vmem:[%s10991_s1 + $0xf88] sm:$0xff] }
  0xd4   :  { %5072 = vmatprep.subr.bf16.mxu1 %v5071_v46  ;;  %v5091_v46 = vpack.c.bf16 %v512_v40, %v508_v39  ;;  %v543_v37 = vld [vmem:[%s10991_s1 + $0xf70] sm:$0xff]  ;;  %v550_v35 = vld [vmem:[%s10991_s1 + $0xfa8] sm:$0xff]  ;;  %v548_v39 = vld [vmem:[%s10991_s1 + $0xf98] sm:$0xff] }
  0xd5   :  { %v552_v40 = vld [vmem:[%s10991_s1 + $0xfb8] sm:$0xff] }
  0xd6   :  { %4290 = vmatpush1.bf16.msra.mxu0 %v4289_v51  ;;  %v4309_v51 = vpack.c.bf16 %v509_v44, %v505_v43  ;;  %v545_v43 = vld [vmem:[%s10991_s1 + $0xf80] sm:$0xff] }
  0xd7   :  { %5074 = vmatpush1.bf16.msra.mxu1 %v5073_v52  ;;  %4292 = vmatprep.subr.bf16.mxu0 %v4291_v55  ;;  %v5093_v52 = vpack.c.bf16 %v511_v48, %v507_v47  ;;  %v4311_v55 = vpack.c.bf16 %v518_v50, %v514_v49  ;;  %v549_v44 = vld [vmem:[%s10991_s1 + $0xfa0] sm:$0xff]  ;;  %v547_v47 = vld [vmem:[%s10991_s1 + $0xf90] sm:$0xff]  ;;  %v554_v49 = vld [vmem:[%s10991_s1 + $0xfc8] sm:$0xff] }
  0xd8   :  { %5076 = vmatprep.subr.bf16.mxu1 %v5075_v56  ;;  %v5095_v56 = vpack.c.bf16 %v520_v30, %v516_v29  ;;  %v551_v48 = vld [vmem:[%s10991_s1 + $0xfb0] sm:$0xff]  ;;  %v558_v50 = vld [vmem:[%s10991_s1 + $0xfe8] sm:$0xff]  ;;  %v556_v29 = vld [vmem:[%s10991_s1 + $0xfd8] sm:$0xff] }
  0xd9   :  { %v560_v30 = vld [vmem:[%s10991_s1 + $0xff8] sm:$0xff] }
  0xda   :  { %4294 = vmatpush1.bf16.msra.mxu0 %v4293_v1  ;;  %v4313_v1 = vpack.c.bf16 %v517_v54, %v513_v53  ;;  %v5113_v53 = vpack.c.bf16 %v551_v48, %v547_v47  ;;  %v557_v54 = vld [vmem:[%s10991_s1 + $0xfe0] sm:$0xff] }
  0xdb   :  { %5078 = vmatpush1.bf16.msra.mxu1 %v5077_v2  ;;  %4296 = vmatprep.subr.bf16.mxu0 %v4295_v8  ;;  %v5097_v2 = vpack.c.bf16 %v519_v58, %v515_v57  ;;  %v4315_v8 = vpack.c.bf16 %v526_v60, %v522_v59  ;;  %v4331_v57 = vpack.c.bf16 %v558_v50, %v554_v49  ;;  %v562_v59 = vld [vmem:[%s10991_s1 + $0x1008] sm:$0xff]  ;;  %v585_v47 = vld [vmem:[%s10991_s1 + $0x10c0] sm:$0xff] }
  0xdc   :  { %5080 = vmatprep.subr.bf16.mxu1 %v5079_v3  ;;  %v5099_v3 = vpack.c.bf16 %v528_v0, %v524_v63  ;;  %v5115_v58 = vpack.c.bf16 %v560_v30, %v556_v29  ;;  %v566_v60 = vld [vmem:[%s10991_s1 + $0x1028] sm:$0xff]  ;;  %v564_v63 = vld [vmem:[%s10991_s1 + $0x1018] sm:$0xff]  ;;  %v589_v48 = vld [vmem:[%s10991_s1 + $0x10e0] sm:$0xff] }
  0xdd   :  { %v568_v0 = vld [vmem:[%s10991_s1 + $0x1038] sm:$0xff]  ;;  %v4335_v4 = vpack.c.bf16 %v566_v60, %v562_v59  ;;  %v587_v29 = vld [vmem:[%s10991_s1 + $0x10d0] sm:$0xff] }
  0xde   :  { %4298 = vmatpush1.bf16.msra.mxu0 %v4297_v16  ;;  %v529_v16 = vld [vmem:[%s10991_s1 + $0xf00] sm:$0xff]  ;;  %v5119_v9 = vpack.c.bf16 %v568_v0, %v564_v63  ;;  %v591_v30 = vld [vmem:[%s10991_s1 + $0x10f0] sm:$0xff] }
  0xdf   :  { %5082 = vmatpush1.bf16.msra.mxu1 %v5081_v17  ;;  %4300 = vmatprep.subr.bf16.mxu0 %v4299_v21  ;;  %v533_v17 = vld [vmem:[%s10991_s1 + $0xf20] sm:$0xff]  ;;  %v535_v21 = vld [vmem:[%s10991_s1 + $0xf30] sm:$0xff] }
  0xe0   :  { %5084 = vmatprep.subr.bf16.mxu1 %v5083_v22  ;;  %v538_v22 = vld [vmem:[%s10991_s1 + $0xf48] sm:$0xff]  ;;  %v595_v63 = vld [vmem:[%s10991_s1 + $0x1110] sm:$0xff] }
  0xe1   :  { %v599_v0 = vld [vmem:[%s10991_s1 + $0x1130] sm:$0xff] }
  0xe2   :  { %4302 = vmatpush1.bf16.msra.mxu0 %v4301_v27  ;;  %v4321_v27 = vpack.c.bf16 %v533_v17, %v529_v16 }
  0xe3   :  { %5086 = vmatpush1.bf16.msra.mxu1 %v5085_v28  ;;  %4304 = vmatprep.subr.bf16.mxu0 %v4303_v33  ;;  %v5105_v28 = vpack.c.bf16 %v535_v21, %v531_v20  ;;  %v4323_v33 = vpack.c.bf16 %v542_v24, %v538_v22  ;;  %v5121_v20 = vpack.c.bf16 %v567_v11, %v563_v10  ;;  %v569_v21 = vld [vmem:[%s10991_s1 + $0x1040] sm:$0xff] }
  0xe4   :  { %5088 = vmatprep.subr.bf16.mxu1 %v5087_v34  ;;  %v5107_v34 = vpack.c.bf16 %v544_v26, %v540_v25  ;;  %v573_v22 = vld [vmem:[%s10991_s1 + $0x1060] sm:$0xff]  ;;  %v4339_v24 = vpack.c.bf16 %v574_v13, %v570_v12  ;;  %v578_v26 = vld [vmem:[%s10991_s1 + $0x1088] sm:$0xff]  ;;  %v603_v12 = vld [vmem:[%s10991_s1 + $0x1150] sm:$0xff] }
  0xe5   :  { %v607_v13 = vld [vmem:[%s10991_s1 + $0x1170] sm:$0xff] }
  0xe6   :  { %4306 = vmatpush1.bf16.msra.mxu0 %v4305_v41  ;;  %v4325_v41 = vpack.c.bf16 %v541_v32, %v537_v31  ;;  %v584_v31 = vld [vmem:[%s10991_s1 + $0x10b8] sm:$0xff] }
  0xe7   :  { %5090 = vmatpush1.bf16.msra.mxu1 %v5089_v42  ;;  %4308 = vmatprep.subr.bf16.mxu0 %v4307_v45  ;;  %v5109_v42 = vpack.c.bf16 %v543_v37, %v539_v36  ;;  %v4327_v45 = vpack.c.bf16 %v550_v35, %v546_v38  ;;  %v577_v36 = vld [vmem:[%s10991_s1 + $0x1080] sm:$0xff] }
  0xe8   :  { %5092 = vmatprep.subr.bf16.mxu1 %v5091_v46  ;;  %v5111_v46 = vpack.c.bf16 %v552_v40, %v548_v39  ;;  %v581_v37 = vld [vmem:[%s10991_s1 + $0x10a0] sm:$0xff]  ;;  %v579_v39 = vld [vmem:[%s10991_s1 + $0x1090] sm:$0xff] }
  0xe9   :  { %v583_v40 = vld [vmem:[%s10991_s1 + $0x10b0] sm:$0xff] }
  0xea   :  { %4310 = vmatpush1.bf16.msra.mxu0 %v4309_v51  ;;  %v553_v51 = vld [vmem:[%s10991_s1 + $0xfc0] sm:$0xff] }
  0xeb   :  { %5094 = vmatpush1.bf16.msra.mxu1 %v5093_v52  ;;  %4312 = vmatprep.subr.bf16.mxu0 %v4311_v55  ;;  %v4329_v52 = vpack.c.bf16 %v549_v44, %v545_v43  ;;  %v555_v55 = vld [vmem:[%s10991_s1 + $0xfd0] sm:$0xff]  ;;  %v4333_v5 = vpack.c.bf16 %v557_v54, %v553_v51  ;;  %v588_v43 = vld [vmem:[%s10991_s1 + $0x10d8] sm:$0xff]  ;;  %v594_v51 = vld [vmem:[%s10991_s1 + $0x1108] sm:$0xff] }
  0xec   :  { %5096 = vmatprep.subr.bf16.mxu1 %v5095_v56  ;;  %v559_v56 = vld [vmem:[%s10991_s1 + $0xff0] sm:$0xff]  ;;  %v592_v44 = vld [vmem:[%s10991_s1 + $0x10f8] sm:$0xff] }
  0xed   :  { %v5117_v7 = vpack.c.bf16 %v559_v56, %v555_v55  ;;  %v5131_v50 = vpack.c.bf16 %v592_v44, %v588_v43  ;;  %v600_v54 = vld [vmem:[%s10991_s1 + $0x1138] sm:$0xff]  ;;  %v4349_v55 = vpack.c.bf16 %v589_v48, %v585_v47  ;;  %v5133_v56 = vpack.c.bf16 %v591_v30, %v587_v29  ;;  %v625_v47 = vld [vmem:[%s10991_s1 + $0x1200] sm:$0xff]  ;;  %v631_v30 = vld [vmem:[%s10991_s1 + $0x1230] sm:$0xff] }
  0xee   :  { %4314 = vmatpush1.bf16.msra.mxu0 %v4313_v1  ;;  %v5780_v1 = vld [vmem:[%s10990_s0 + $0x10] ss:$50 sps:$4 sm:$0xff]   ;;  %v628_v43 = vld [vmem:[%s10991_s1 + $0x1218] sm:$0xff] }
  0xef   :  { %5098 = vmatpush1.bf16.msra.mxu1 %v5097_v2  ;;  %4316 = vmatprep.subr.bf16.mxu0 %v4315_v8  ;;  %v5782_v2 = vld [vmem:[%s10990_s0 + $0x74] ss:$50 sps:$4 sm:$0xff]   ;;  %v7511_v16 = vrot.slane %v5780_v1, %v6168_v23  ;;  %v632_v44 = vld [vmem:[%s10991_s1 + $0x1238] sm:$0xff] }
  0xf0   :  { %5100 = vmatprep.subr.bf16.mxu1 %v5099_v3  ;;  %v561_v8 = vld [vmem:[%s10991_s1 + $0x1000] sm:$0xff]  ;;  %v7514_v17 = vrot.slane %v5782_v2, %v6168_v23  ;;  %v602_v1 = vld [vmem:[%s10991_s1 + $0x1148] sm:$0xff]  ;;  %v5151_v29 = vpack.c.bf16 %v632_v44, %v628_v43  ;;  %v668_v43 = vld [vmem:[%s10991_s1 + $0x1358] sm:$0xff] }
  0xf1   :  { %v565_v3 = vld [vmem:[%s10991_s1 + $0x1020] sm:$0xff]  ;;  %v606_v2 = vld [vmem:[%s10991_s1 + $0x1168] sm:$0xff]  ;;  %v672_v44 = vld [vmem:[%s10991_s1 + $0x1378] sm:$0xff] }
  0xf2   :  { %4318 = vmatpush1.bf16.msra.mxu0 %v4317_v14  ;;  %v572_v14 = vld [vmem:[%s10991_s1 + $0x1058] sm:$0xff]  ;;  %v1772_v32 = vcombine.high %v7511_v16, %v7514_v17  ;;  %v4355_v10 = vpack.c.bf16 %v606_v2, %v602_v1  ;;  %v629_v48 = vld [vmem:[%s10991_s1 + $0x1220] sm:$0xff]  ;;  %v642_v1 = vld [vmem:[%s10991_s1 + $0x1288] sm:$0xff] }
  0xf3   :  { %5102 = vmatpush1.bf16.msra.mxu1 %v5101_v15  ;;  %4320 = vmatprep.subr.bf16.mxu0 %v4319_v18  ;;  %v576_v15 = vld [vmem:[%s10991_s1 + $0x1078] sm:$0xff]  ;;  %v1737_v18 = vcombine.low %v7111_v61, %v7114_v62  ;;  %v571_v61 = vld [vmem:[%s10991_s1 + $0x1050] sm:$0xff]  ;;  %v646_v2 = vld [vmem:[%s10991_s1 + $0x12a8] sm:$0xff] }
  0xf4   :  { %5104 = vmatprep.subr.bf16.mxu1 %v5103_v19  ;;  %v4337_v19 = vpack.c.bf16 %v565_v3, %v561_v8  ;;  %v5123_v25 = vpack.c.bf16 %v576_v15, %v572_v14  ;;  %v575_v62 = vld [vmem:[%s10991_s1 + $0x1070] sm:$0xff]  ;;  %v5137_v3 = vpack.c.bf16 %v599_v0, %v595_v63  ;;  %v610_v14 = vld [vmem:[%s10991_s1 + $0x1188] sm:$0xff] }
  0xf5   :  { %v614_v15 = vld [vmem:[%s10991_s1 + $0x11a8] sm:$0xff]  ;;  %v639_v0 = vld [vmem:[%s10991_s1 + $0x1270] sm:$0xff] }
  0xf6   :  { %4322 = vmatpush1.bf16.msra.mxu0 %v4321_v27  ;;  %v582_v27 = vld [vmem:[%s10991_s1 + $0x10a8] sm:$0xff] }
  0xf7   :  { %5106 = vmatpush1.bf16.msra.mxu1 %v5105_v28  ;;  %4324 = vmatprep.subr.bf16.mxu0 %v4323_v33  ;;  %v580_v28 = vld [vmem:[%s10991_s1 + $0x1098] sm:$0xff]  ;;  %v4341_v33 = vpack.c.bf16 %v573_v22, %v569_v21  ;;  %v4343_v38 = vpack.c.bf16 %v582_v27, %v578_v26  ;;  %v5141_v21 = vpack.c.bf16 %v607_v13, %v603_v12  ;;  %v609_v22 = vld [vmem:[%s10991_s1 + $0x1180] sm:$0xff]  ;;  %v615_v26 = vld [vmem:[%s10991_s1 + $0x11b0] sm:$0xff] }
  0xf8   :  { %5108 = vmatprep.subr.bf16.mxu1 %v5107_v34  ;;  %v5125_v34 = vpack.c.bf16 %v575_v62, %v571_v61  ;;  %v5127_v35 = vpack.c.bf16 %v584_v31, %v580_v28  ;;  %v611_v62 = vld [vmem:[%s10991_s1 + $0x1190] sm:$0xff]  ;;  %v618_v27 = vld [vmem:[%s10991_s1 + $0x11c8] sm:$0xff]  ;;  %v620_v31 = vld [vmem:[%s10991_s1 + $0x11d8] sm:$0xff] }
  0xf9   :  { %v622_v28 = vld [vmem:[%s10991_s1 + $0x11e8] sm:$0xff]  ;;  %v647_v13 = vld [vmem:[%s10991_s1 + $0x12b0] sm:$0xff] }
  0xfa   :  { %4326 = vmatpush1.bf16.msra.mxu0 %v4325_v41  ;;  %v586_v41 = vld [vmem:[%s10991_s1 + $0x10c8] sm:$0xff] }
  0xfb   :  { %5110 = vmatpush1.bf16.msra.mxu1 %v5109_v42  ;;  %4328 = vmatprep.subr.bf16.mxu0 %v4327_v45  ;;  %v590_v42 = vld [vmem:[%s10991_s1 + $0x10e8] sm:$0xff]  ;;  %v4345_v45 = vpack.c.bf16 %v581_v37, %v577_v36  ;;  %v617_v36 = vld [vmem:[%s10991_s1 + $0x11c0] sm:$0xff] }
  0xfc   :  { %5112 = vmatprep.subr.bf16.mxu1 %v5111_v46  ;;  %v5129_v46 = vpack.c.bf16 %v583_v40, %v579_v39  ;;  %v4347_v49 = vpack.c.bf16 %v590_v42, %v586_v41  ;;  %v621_v37 = vld [vmem:[%s10991_s1 + $0x11e0] sm:$0xff]  ;;  %v623_v40 = vld [vmem:[%s10991_s1 + $0x11f0] sm:$0xff]  ;;  %v626_v41 = vld [vmem:[%s10991_s1 + $0x1208] sm:$0xff] }
  0xfd   :  { %v630_v42 = vld [vmem:[%s10991_s1 + $0x1228] sm:$0xff] }
  0xfe   :  { %4330 = vmatpush1.bf16.msra.mxu0 %v4329_v52  ;;  %v598_v52 = vld [vmem:[%s10991_s1 + $0x1128] sm:$0xff] }
  0xff   :  { %5114 = vmatpush1.bf16.msra.mxu1 %v5113_v53  ;;  %4332 = vmatprep.subr.bf16.mxu0 %v4331_v57  ;;  %v596_v53 = vld [vmem:[%s10991_s1 + $0x1118] sm:$0xff]  ;;  %v593_v57 = vld [vmem:[%s10991_s1 + $0x1100] sm:$0xff]  ;;  %v4351_v59 = vpack.c.bf16 %v598_v52, %v594_v51  ;;  %v634_v51 = vld [vmem:[%s10991_s1 + $0x1248] sm:$0xff] }
 0x100   :  { %5116 = vmatprep.subr.bf16.mxu1 %v5115_v58  ;;  %v597_v58 = vld [vmem:[%s10991_s1 + $0x1120] sm:$0xff]  ;;  %v5135_v60 = vpack.c.bf16 %v600_v54, %v596_v53  ;;  %v638_v52 = vld [vmem:[%s10991_s1 + $0x1268] sm:$0xff]  ;;  %v636_v53 = vld [vmem:[%s10991_s1 + $0x1258] sm:$0xff] }
 0x101   :  { %v4353_v8 = vpack.c.bf16 %v597_v58, %v593_v57  ;;  %v640_v54 = vld [vmem:[%s10991_s1 + $0x1278] sm:$0xff]  ;;  %v633_v57 = vld [vmem:[%s10991_s1 + $0x1240] sm:$0xff] }
 0x102   :  { %4334 = vmatpush1.bf16.msra.mxu0 %v4333_v5  ;;  %v604_v5 = vld [vmem:[%s10991_s1 + $0x1158] sm:$0xff]  ;;  %v637_v58 = vld [vmem:[%s10991_s1 + $0x1260] sm:$0xff]  ;;  %v5155_v63 = vpack.c.bf16 %v640_v54, %v636_v53 }
 0x103   :  { %5118 = vmatpush1.bf16.msra.mxu1 %v5117_v7  ;;  %4336 = vmatprep.subr.bf16.mxu0 %v4335_v4  ;;  %v608_v7 = vld [vmem:[%s10991_s1 + $0x1178] sm:$0xff]  ;;  %v601_v4 = vld [vmem:[%s10991_s1 + $0x1140] sm:$0xff] }
 0x104   :  { %5120 = vmatprep.subr.bf16.mxu1 %v5119_v9  ;;  %v605_v9 = vld [vmem:[%s10991_s1 + $0x1160] sm:$0xff]  ;;  %v5139_v11 = vpack.c.bf16 %v608_v7, %v604_v5  ;;  %v644_v5 = vld [vmem:[%s10991_s1 + $0x1298] sm:$0xff] }
 0x105   :  { %2205 = vmatmul.mubr.f32.vlgmr.msra.gmra.mrb[0].mxu0 %v1737_v18  ;;  %v648_v7 = vld [vmem:[%s10991_s1 + $0x12b8] sm:$0xff] }
 0x106   :  { %3128 = vmatmul.mubr.f32.vlgmr.msra.gmra.mrb[0].mxu1 %v1737_v18  ;;  %4338 = vmatpush1.bf16.msra.mxu0 %v4337_v19  ;;  %v612_v18 = vld [vmem:[%s10991_s1 + $0x1198] sm:$0xff]  ;;  %v5159_v12 = vpack.c.bf16 %v648_v7, %v644_v5 }
 0x107   :  { %5122 = vmatpush1.bf16.msra.mxu1 %v5121_v20  ;;  %4340 = vmatprep.subr.bf16.mxu0 %v4339_v24  ;;  %v616_v19 = vld [vmem:[%s10991_s1 + $0x11b8] sm:$0xff]  ;;  %v4357_v20 = vpack.c.bf16 %v605_v9, %v601_v4  ;;  %v613_v24 = vld [vmem:[%s10991_s1 + $0x11a0] sm:$0xff] }
 0x108   :  { %5124 = vmatprep.subr.bf16.mxu1 %v5123_v25  ;;  %2275 = vmatprep.mubr.f32.mxu0 %v1772_v32  ;;  %v4359_v25 = vpack.c.bf16 %v614_v15, %v610_v14  ;;  %v5143_v61 = vpack.c.bf16 %v616_v19, %v612_v18  ;;  %v641_v4 = vld [vmem:[%s10991_s1 + $0x1280] sm:$0xff]  ;;  %v650_v14 = vld [vmem:[%s10991_s1 + $0x12c8] sm:$0xff]  ;;  %v652_v18 = vld [vmem:[%s10991_s1 + $0x12d8] sm:$0xff] }
 0x109   :  { %3198 = vmatprep.mubr.f32.mxu1 %v1772_v32  ;;  %v624_v32 = vld [vmem:[%s10991_s1 + $0x11f8] sm:$0xff]  ;;  %v645_v9 = vld [vmem:[%s10991_s1 + $0x12a0] sm:$0xff]  ;;  %v654_v15 = vld [vmem:[%s10991_s1 + $0x12e8] sm:$0xff] }
 0x10a   :  { %4342 = vmatpush1.bf16.msra.mxu0 %v4341_v33  ;;  %v4361_v33 = vpack.c.bf16 %v613_v24, %v609_v22  ;;  %v5147_v39 = vpack.c.bf16 %v624_v32, %v620_v31  ;;  %v656_v19 = vld [vmem:[%s10991_s1 + $0x12f8] sm:$0xff]  ;;  %v649_v22 = vld [vmem:[%s10991_s1 + $0x12c0] sm:$0xff] }
 0x10b   :  { %5126 = vmatpush1.bf16.msra.mxu1 %v5125_v34  ;;  %4344 = vmatprep.subr.bf16.mxu0 %v4343_v38  ;;  %v5145_v34 = vpack.c.bf16 %v615_v26, %v611_v62  ;;  %v619_v38 = vld [vmem:[%s10991_s1 + $0x11d0] sm:$0xff]  ;;  %v653_v24 = vld [vmem:[%s10991_s1 + $0x12e0] sm:$0xff]  ;;  %v660_v31 = vld [vmem:[%s10991_s1 + $0x1318] sm:$0xff] }
 0x10c   :  { %5128 = vmatprep.subr.bf16.mxu1 %v5127_v35  ;;  %v4363_v35 = vpack.c.bf16 %v622_v28, %v618_v27  ;;  %v651_v62 = vld [vmem:[%s10991_s1 + $0x12d0] sm:$0xff]  ;;  %v658_v27 = vld [vmem:[%s10991_s1 + $0x1308] sm:$0xff]  ;;  %v664_v32 = vld [vmem:[%s10991_s1 + $0x1338] sm:$0xff] }
 0x10d   :  { %v655_v26 = vld [vmem:[%s10991_s1 + $0x12f0] sm:$0xff]  ;;  %v662_v28 = vld [vmem:[%s10991_s1 + $0x1328] sm:$0xff]  ;;  %v676_v53 = vld [vmem:[%s10991_s1 + $0x1398] sm:$0xff] }
 0x10e   :  { %4346 = vmatpush1.bf16.msra.mxu0 %v4345_v45  ;;  %v4365_v45 = vpack.c.bf16 %v621_v37, %v617_v36  ;;  %v657_v36 = vld [vmem:[%s10991_s1 + $0x1300] sm:$0xff]  ;;  %v680_v54 = vld [vmem:[%s10991_s1 + $0x13b8] sm:$0xff] }
 0x10f   :  { %5130 = vmatpush1.bf16.msra.mxu1 %v5129_v46  ;;  %4348 = vmatprep.subr.bf16.mxu0 %v4347_v49  ;;  %v5149_v46 = vpack.c.bf16 %v623_v40, %v619_v38  ;;  %v627_v49 = vld [vmem:[%s10991_s1 + $0x1210] sm:$0xff]  ;;  %v661_v37 = vld [vmem:[%s10991_s1 + $0x1320] sm:$0xff]  ;;  %v4383_v38 = vpack.c.bf16 %v662_v28, %v658_v27  ;;  %v684_v5 = vld [vmem:[%s10991_s1 + $0x13d8] sm:$0xff] }
 0x110   :  { %5132 = vmatprep.subr.bf16.mxu1 %v5131_v50  ;;  %v4367_v50 = vpack.c.bf16 %v630_v42, %v626_v41  ;;  %v663_v40 = vld [vmem:[%s10991_s1 + $0x1330] sm:$0xff]  ;;  %v666_v41 = vld [vmem:[%s10991_s1 + $0x1348] sm:$0xff]  ;;  %v688_v7 = vld [vmem:[%s10991_s1 + $0x13f8] sm:$0xff] }
 0x111   :  { %v670_v42 = vld [vmem:[%s10991_s1 + $0x1368] sm:$0xff]  ;;  %v691_v27 = vld [vmem:[%s10991_s1 + $0x1410] sm:$0xff] }
 0x112   :  { %4350 = vmatpush1.bf16.msra.mxu0 %v4349_v55  ;;  %v4369_v55 = vpack.c.bf16 %v629_v48, %v625_v47  ;;  %v665_v47 = vld [vmem:[%s10991_s1 + $0x1340] sm:$0xff]  ;;  %v695_v28 = vld [vmem:[%s10991_s1 + $0x1430] sm:$0xff] }
 0x113   :  { %5134 = vmatpush1.bf16.msra.mxu1 %v5133_v56  ;;  %4352 = vmatprep.subr.bf16.mxu0 %v4351_v59  ;;  %v5153_v56 = vpack.c.bf16 %v631_v30, %v627_v49  ;;  %v635_v59 = vld [vmem:[%s10991_s1 + $0x1250] sm:$0xff]  ;;  %v669_v48 = vld [vmem:[%s10991_s1 + $0x1360] sm:$0xff]  ;;  %v4387_v49 = vpack.c.bf16 %v670_v42, %v666_v41 }
 0x114   :  { %5136 = vmatprep.subr.bf16.mxu1 %v5135_v60  ;;  %v4371_v60 = vpack.c.bf16 %v638_v52, %v634_v51  ;;  %v671_v30 = vld [vmem:[%s10991_s1 + $0x1370] sm:$0xff]  ;;  %v674_v51 = vld [vmem:[%s10991_s1 + $0x1388] sm:$0xff]  ;;  %v701_v41 = vld [vmem:[%s10991_s1 + $0x1460] sm:$0xff] }
 0x115   :  { %v678_v52 = vld [vmem:[%s10991_s1 + $0x13a8] sm:$0xff] }
 0x116   :  { %4354 = vmatpush1.bf16.msra.mxu0 %v4353_v8  ;;  %v4373_v8 = vpack.c.bf16 %v637_v58, %v633_v57  ;;  %v673_v57 = vld [vmem:[%s10991_s1 + $0x1380] sm:$0xff] }
 0x117   :  { %5138 = vmatpush1.bf16.msra.mxu1 %v5137_v3  ;;  %4356 = vmatprep.subr.bf16.mxu0 %v4355_v10  ;;  %v5157_v3 = vpack.c.bf16 %v639_v0, %v635_v59  ;;  %v643_v10 = vld [vmem:[%s10991_s1 + $0x1290] sm:$0xff]  ;;  %v677_v58 = vld [vmem:[%s10991_s1 + $0x13a0] sm:$0xff]  ;;  %v4391_v59 = vpack.c.bf16 %v678_v52, %v674_v51 }
 0x118   :  { %5140 = vmatprep.subr.bf16.mxu1 %v5139_v11  ;;  %v4375_v11 = vpack.c.bf16 %v646_v2, %v642_v1  ;;  %v679_v0 = vld [vmem:[%s10991_s1 + $0x13b0] sm:$0xff]  ;;  %v682_v1 = vld [vmem:[%s10991_s1 + $0x13c8] sm:$0xff] }
 0x119   :  { %v686_v2 = vld [vmem:[%s10991_s1 + $0x13e8] sm:$0xff] }
 0x11a   :  { %4358 = vmatpush1.bf16.msra.mxu0 %v4357_v20  ;;  %v4377_v20 = vpack.c.bf16 %v645_v9, %v641_v4  ;;  %v685_v9 = vld [vmem:[%s10991_s1 + $0x13e0] sm:$0xff] }
 0x11b   :  { %5142 = vmatpush1.bf16.msra.mxu1 %v5141_v21  ;;  %4360 = vmatprep.subr.bf16.mxu0 %v4359_v25  ;;  %v5161_v21 = vpack.c.bf16 %v647_v13, %v643_v10  ;;  %v4379_v25 = vpack.c.bf16 %v654_v15, %v650_v14  ;;  %v683_v10 = vld [vmem:[%s10991_s1 + $0x13d0] sm:$0xff]  ;;  %v5179_v13 = vpack.c.bf16 %v688_v7, %v684_v5  ;;  %v690_v14 = vld [vmem:[%s10991_s1 + $0x1408] sm:$0xff] }
 0x11c   :  { %5144 = vmatprep.subr.bf16.mxu1 %v5143_v61  ;;  %v5163_v61 = vpack.c.bf16 %v656_v19, %v652_v18  ;;  %v694_v15 = vld [vmem:[%s10991_s1 + $0x1428] sm:$0xff]  ;;  %v692_v18 = vld [vmem:[%s10991_s1 + $0x1418] sm:$0xff]  ;;  %v715_v5 = vld [vmem:[%s10991_s1 + $0x14d0] sm:$0xff] }
 0x11d   :  { %v696_v19 = vld [vmem:[%s10991_s1 + $0x1438] sm:$0xff]  ;;  %v719_v7 = vld [vmem:[%s10991_s1 + $0x14f0] sm:$0xff] }
 0x11e   :  { %4362 = vmatpush1.bf16.msra.mxu0 %v4361_v33  ;;  %v4381_v33 = vpack.c.bf16 %v653_v24, %v649_v22 }
 0x11f   :  { %5146 = vmatpush1.bf16.msra.mxu1 %v5145_v34  ;;  %4364 = vmatprep.subr.bf16.mxu0 %v4363_v35  ;;  %v5165_v34 = vpack.c.bf16 %v655_v26, %v651_v62  ;;  %v5167_v35 = vpack.c.bf16 %v664_v32, %v660_v31  ;;  %v4399_v62 = vpack.c.bf16 %v694_v15, %v690_v14  ;;  %v698_v31 = vld [vmem:[%s10991_s1 + $0x1448] sm:$0xff] }
 0x120   :  { %5148 = vmatprep.subr.bf16.mxu1 %v5147_v39  ;;  %v659_v39 = vld [vmem:[%s10991_s1 + $0x1310] sm:$0xff]  ;;  %v5183_v26 = vpack.c.bf16 %v696_v19, %v692_v18  ;;  %v702_v32 = vld [vmem:[%s10991_s1 + $0x1468] sm:$0xff] }
 0x121   :  { %v4403_v42 = vpack.c.bf16 %v702_v32, %v698_v31  ;;  %v723_v18 = vld [vmem:[%s10991_s1 + $0x1510] sm:$0xff] }
 0x122   :  { %4366 = vmatpush1.bf16.msra.mxu0 %v4365_v45  ;;  %v4385_v45 = vpack.c.bf16 %v661_v37, %v657_v36  ;;  %v727_v19 = vld [vmem:[%s10991_s1 + $0x1530] sm:$0xff] }
 0x123   :  { %5150 = vmatpush1.bf16.msra.mxu1 %v5149_v46  ;;  %4368 = vmatprep.subr.bf16.mxu0 %v4367_v50  ;;  %v5169_v46 = vpack.c.bf16 %v663_v40, %v659_v39  ;;  %v5171_v50 = vpack.c.bf16 %v672_v44, %v668_v43  ;;  %v5185_v39 = vpack.c.bf16 %v695_v28, %v691_v27  ;;  %v697_v40 = vld [vmem:[%s10991_s1 + $0x1440] sm:$0xff]  ;;  %v706_v44 = vld [vmem:[%s10991_s1 + $0x1488] sm:$0xff]  ;;  %v731_v31 = vld [vmem:[%s10991_s1 + $0x1550] sm:$0xff] }
 0x124   :  { %5152 = vmatprep.subr.bf16.mxu1 %v5151_v29  ;;  %v667_v29 = vld [vmem:[%s10991_s1 + $0x1350] sm:$0xff] }
 0x125   :  { %v735_v32 = vld [vmem:[%s10991_s1 + $0x1570] sm:$0xff] }
 0x126   :  { %4370 = vmatpush1.bf16.msra.mxu0 %v4369_v55  ;;  %v4389_v55 = vpack.c.bf16 %v669_v48, %v665_v47  ;;  %v712_v47 = vld [vmem:[%s10991_s1 + $0x14b8] sm:$0xff] }
 0x127   :  { %5154 = vmatpush1.bf16.msra.mxu1 %v5153_v56  ;;  %4372 = vmatprep.subr.bf16.mxu0 %v4371_v60  ;;  %v5173_v56 = vpack.c.bf16 %v671_v30, %v667_v29  ;;  %v5175_v60 = vpack.c.bf16 %v680_v54, %v676_v53  ;;  %v705_v29 = vld [vmem:[%s10991_s1 + $0x1480] sm:$0xff]  ;;  %v707_v53 = vld [vmem:[%s10991_s1 + $0x1490] sm:$0xff] }
 0x128   :  { %5156 = vmatprep.subr.bf16.mxu1 %v5155_v63  ;;  %v675_v63 = vld [vmem:[%s10991_s1 + $0x1390] sm:$0xff]  ;;  %v709_v30 = vld [vmem:[%s10991_s1 + $0x14a0] sm:$0xff] }
 0x129   :  { %v5177_v4 = vpack.c.bf16 %v679_v0, %v675_v63  ;;  %v711_v54 = vld [vmem:[%s10991_s1 + $0x14b0] sm:$0xff]  ;;  %v713_v63 = vld [vmem:[%s10991_s1 + $0x14c0] sm:$0xff] }
 0x12a   :  { %4374 = vmatpush1.bf16.msra.mxu0 %v4373_v8  ;;  %v681_v8 = vld [vmem:[%s10991_s1 + $0x13c0] sm:$0xff] }
 0x12b   :  { %5158 = vmatpush1.bf16.msra.mxu1 %v5157_v3  ;;  %4376 = vmatprep.subr.bf16.mxu0 %v4375_v11  ;;  %v4393_v3 = vpack.c.bf16 %v677_v58, %v673_v57  ;;  %v687_v11 = vld [vmem:[%s10991_s1 + $0x13f0] sm:$0xff]  ;;  %v4397_v22 = vpack.c.bf16 %v685_v9, %v681_v8  ;;  %v716_v57 = vld [vmem:[%s10991_s1 + $0x14d8] sm:$0xff]  ;;  %v717_v0 = vld [vmem:[%s10991_s1 + $0x14e0] sm:$0xff] }
 0x12c   :  { %5160 = vmatprep.subr.bf16.mxu1 %v5159_v12  ;;  %v4395_v12 = vpack.c.bf16 %v686_v2, %v682_v1  ;;  %v5181_v24 = vpack.c.bf16 %v687_v11, %v683_v10  ;;  %v720_v58 = vld [vmem:[%s10991_s1 + $0x14f8] sm:$0xff]  ;;  %v722_v8 = vld [vmem:[%s10991_s1 + $0x1508] sm:$0xff]  ;;  %v4413_v10 = vpack.c.bf16 %v717_v0, %v713_v63  ;;  %v5197_v11 = vpack.c.bf16 %v719_v7, %v715_v5  ;;  %v753_v63 = vld [vmem:[%s10991_s1 + $0x1600] sm:$0xff] }
 0x12d   :  { %v5195_v2 = vpack.c.bf16 %v720_v58, %v716_v57  ;;  %v728_v9 = vld [vmem:[%s10991_s1 + $0x1538] sm:$0xff]  ;;  %v757_v0 = vld [vmem:[%s10991_s1 + $0x1620] sm:$0xff]  ;;  %v755_v5 = vld [vmem:[%s10991_s1 + $0x1610] sm:$0xff] }
 0x12e   :  { %4378 = vmatpush1.bf16.msra.mxu0 %v4377_v20  ;;  %v5784_v20 = vld [vmem:[%s10990_s0 + $0x14] ss:$50 sps:$4 sm:$0xff]   ;;  %v756_v57 = vld [vmem:[%s10991_s1 + $0x1618] sm:$0xff] }
 0x12f   :  { %5162 = vmatpush1.bf16.msra.mxu1 %v5161_v21  ;;  %4380 = vmatprep.subr.bf16.mxu0 %v4379_v25  ;;  %v5785_v21 = vld [vmem:[%s10990_s0 + $0x78] ss:$50 sps:$4 sm:$0xff]   ;;  %v689_v25 = vld [vmem:[%s10991_s1 + $0x1400] sm:$0xff]  ;;  %v7911_v36 = vrot.slane %v5784_v20, %v6168_v23  ;;  %v759_v7 = vld [vmem:[%s10991_s1 + $0x1630] sm:$0xff] }
 0x130   :  { %5164 = vmatprep.subr.bf16.mxu1 %v5163_v61  ;;  %v693_v61 = vld [vmem:[%s10991_s1 + $0x1420] sm:$0xff]  ;;  %v7914_v37 = vrot.slane %v5785_v21, %v6168_v23  ;;  %v730_v20 = vld [vmem:[%s10991_s1 + $0x1548] sm:$0xff]  ;;  %v760_v58 = vld [vmem:[%s10991_s1 + $0x1638] sm:$0xff] }
 0x131   :  { %v734_v21 = vld [vmem:[%s10991_s1 + $0x1568] sm:$0xff] }
 0x132   :  { %4382 = vmatpush1.bf16.msra.mxu0 %v4381_v33  ;;  %v700_v33 = vld [vmem:[%s10991_s1 + $0x1458] sm:$0xff]  ;;  %v1774_v48 = vcombine.high %v7911_v36, %v7914_v37  ;;  %v4419_v27 = vpack.c.bf16 %v734_v21, %v730_v20  ;;  %v770_v20 = vld [vmem:[%s10991_s1 + $0x1688] sm:$0xff] }
 0x133   :  { %5166 = vmatpush1.bf16.msra.mxu1 %v5165_v34  ;;  %4384 = vmatprep.subr.bf16.mxu0 %v4383_v38  ;;  %v704_v34 = vld [vmem:[%s10991_s1 + $0x1478] sm:$0xff]  ;;  %v1771_v38 = vcombine.low %v7511_v16, %v7514_v17  ;;  %v699_v16 = vld [vmem:[%s10991_s1 + $0x1450] sm:$0xff]  ;;  %v774_v21 = vld [vmem:[%s10991_s1 + $0x16a8] sm:$0xff] }
 0x134   :  { %5168 = vmatprep.subr.bf16.mxu1 %v5167_v35  ;;  %v4401_v35 = vpack.c.bf16 %v693_v61, %v689_v25  ;;  %v5187_v43 = vpack.c.bf16 %v704_v34, %v700_v33  ;;  %v703_v17 = vld [vmem:[%s10991_s1 + $0x1470] sm:$0xff]  ;;  %v5201_v61 = vpack.c.bf16 %v727_v19, %v723_v18  ;;  %v738_v33 = vld [vmem:[%s10991_s1 + $0x1588] sm:$0xff] }
 0x135   :  { %v742_v34 = vld [vmem:[%s10991_s1 + $0x15a8] sm:$0xff]  ;;  %v763_v18 = vld [vmem:[%s10991_s1 + $0x1650] sm:$0xff] }
 0x136   :  { %4386 = vmatpush1.bf16.msra.mxu0 %v4385_v45  ;;  %v710_v45 = vld [vmem:[%s10991_s1 + $0x14a8] sm:$0xff]  ;;  %v767_v19 = vld [vmem:[%s10991_s1 + $0x1670] sm:$0xff] }
 0x137   :  { %5170 = vmatpush1.bf16.msra.mxu1 %v5169_v46  ;;  %4388 = vmatprep.subr.bf16.mxu0 %v4387_v49  ;;  %v708_v46 = vld [vmem:[%s10991_s1 + $0x1498] sm:$0xff]  ;;  %v4405_v49 = vpack.c.bf16 %v701_v41, %v697_v40  ;;  %v4407_v51 = vpack.c.bf16 %v710_v45, %v706_v44  ;;  %v5205_v40 = vpack.c.bf16 %v735_v32, %v731_v31  ;;  %v737_v41 = vld [vmem:[%s10991_s1 + $0x1580] sm:$0xff]  ;;  %v743_v44 = vld [vmem:[%s10991_s1 + $0x15b0] sm:$0xff] }
 0x138   :  { %5172 = vmatprep.subr.bf16.mxu1 %v5171_v50  ;;  %v5189_v50 = vpack.c.bf16 %v703_v17, %v699_v16  ;;  %v5191_v52 = vpack.c.bf16 %v712_v47, %v708_v46  ;;  %v739_v17 = vld [vmem:[%s10991_s1 + $0x1590] sm:$0xff]  ;;  %v746_v45 = vld [vmem:[%s10991_s1 + $0x15c8] sm:$0xff]  ;;  %v748_v47 = vld [vmem:[%s10991_s1 + $0x15d8] sm:$0xff] }
 0x139   :  { %v750_v46 = vld [vmem:[%s10991_s1 + $0x15e8] sm:$0xff]  ;;  %v771_v31 = vld [vmem:[%s10991_s1 + $0x1690] sm:$0xff] }
 0x13a   :  { %4390 = vmatpush1.bf16.msra.mxu0 %v4389_v55  ;;  %v714_v55 = vld [vmem:[%s10991_s1 + $0x14c8] sm:$0xff]  ;;  %v775_v32 = vld [vmem:[%s10991_s1 + $0x16b0] sm:$0xff] }
 0x13b   :  { %5174 = vmatpush1.bf16.msra.mxu1 %v5173_v56  ;;  %4392 = vmatprep.subr.bf16.mxu0 %v4391_v59  ;;  %v718_v56 = vld [vmem:[%s10991_s1 + $0x14e8] sm:$0xff]  ;;  %v4409_v59 = vpack.c.bf16 %v709_v30, %v705_v29  ;;  %v745_v29 = vld [vmem:[%s10991_s1 + $0x15c0] sm:$0xff] }
 0x13c   :  { %5176 = vmatprep.subr.bf16.mxu1 %v5175_v60  ;;  %v5193_v60 = vpack.c.bf16 %v711_v54, %v707_v53  ;;  %v4411_v1 = vpack.c.bf16 %v718_v56, %v714_v55  ;;  %v749_v30 = vld [vmem:[%s10991_s1 + $0x15e0] sm:$0xff]  ;;  %v747_v53 = vld [vmem:[%s10991_s1 + $0x15d0] sm:$0xff]  ;;  %v754_v55 = vld [vmem:[%s10991_s1 + $0x1608] sm:$0xff] }
 0x13d   :  { %v751_v54 = vld [vmem:[%s10991_s1 + $0x15f0] sm:$0xff]  ;;  %v758_v56 = vld [vmem:[%s10991_s1 + $0x1628] sm:$0xff] }
 0x13e   :  { %4394 = vmatpush1.bf16.msra.mxu0 %v4393_v3  ;;  %v726_v3 = vld [vmem:[%s10991_s1 + $0x1528] sm:$0xff] }
 0x13f   :  { %5178 = vmatpush1.bf16.msra.mxu1 %v5177_v4  ;;  %4396 = vmatprep.subr.bf16.mxu0 %v4395_v12  ;;  %v724_v4 = vld [vmem:[%s10991_s1 + $0x1518] sm:$0xff]  ;;  %v721_v12 = vld [vmem:[%s10991_s1 + $0x1500] sm:$0xff]  ;;  %v4415_v14 = vpack.c.bf16 %v726_v3, %v722_v8  ;;  %v762_v8 = vld [vmem:[%s10991_s1 + $0x1648] sm:$0xff] }
 0x140   :  { %5180 = vmatprep.subr.bf16.mxu1 %v5179_v13  ;;  %v725_v13 = vld [vmem:[%s10991_s1 + $0x1520] sm:$0xff]  ;;  %v5199_v15 = vpack.c.bf16 %v728_v9, %v724_v4  ;;  %v766_v3 = vld [vmem:[%s10991_s1 + $0x1668] sm:$0xff]  ;;  %v764_v4 = vld [vmem:[%s10991_s1 + $0x1658] sm:$0xff] }
 0x141   :  { %v4417_v25 = vpack.c.bf16 %v725_v13, %v721_v12  ;;  %v768_v9 = vld [vmem:[%s10991_s1 + $0x1678] sm:$0xff]  ;;  %v761_v12 = vld [vmem:[%s10991_s1 + $0x1640] sm:$0xff] }
 0x142   :  { %4398 = vmatpush1.bf16.msra.mxu0 %v4397_v22  ;;  %v732_v22 = vld [vmem:[%s10991_s1 + $0x1558] sm:$0xff]  ;;  %v765_v13 = vld [vmem:[%s10991_s1 + $0x1660] sm:$0xff] }
 0x143   :  { %5182 = vmatpush1.bf16.msra.mxu1 %v5181_v24  ;;  %4400 = vmatprep.subr.bf16.mxu0 %v4399_v62  ;;  %v736_v24 = vld [vmem:[%s10991_s1 + $0x1578] sm:$0xff]  ;;  %v729_v62 = vld [vmem:[%s10991_s1 + $0x1540] sm:$0xff] }
 0x144   :  { %5184 = vmatprep.subr.bf16.mxu1 %v5183_v26  ;;  %v733_v26 = vld [vmem:[%s10991_s1 + $0x1560] sm:$0xff]  ;;  %v5203_v28 = vpack.c.bf16 %v736_v24, %v732_v22  ;;  %v772_v22 = vld [vmem:[%s10991_s1 + $0x1698] sm:$0xff] }
 0x145   :  { %2276 = vmatmul.mubr.f32.vlgmr.msra.gmra.mrb[0].mxu0 %v1771_v38  ;;  %v776_v24 = vld [vmem:[%s10991_s1 + $0x16b8] sm:$0xff] }
 0x146   :  { %3199 = vmatmul.mubr.f32.vlgmr.msra.gmra.mrb[0].mxu1 %v1771_v38  ;;  %4402 = vmatpush1.bf16.msra.mxu0 %v4401_v35  ;;  %v740_v38 = vld [vmem:[%s10991_s1 + $0x1598] sm:$0xff] }
 0x147   :  { %5186 = vmatpush1.bf16.msra.mxu1 %v5185_v39  ;;  %4404 = vmatprep.subr.bf16.mxu0 %v4403_v42  ;;  %v744_v35 = vld [vmem:[%s10991_s1 + $0x15b8] sm:$0xff]  ;;  %v4421_v39 = vpack.c.bf16 %v733_v26, %v729_v62  ;;  %v741_v42 = vld [vmem:[%s10991_s1 + $0x15a0] sm:$0xff] }
 0x148   :  { %5188 = vmatprep.subr.bf16.mxu1 %v5187_v43  ;;  %2346 = vmatprep.mubr.f32.mxu0 %v1774_v48  ;;  %v4423_v43 = vpack.c.bf16 %v742_v34, %v738_v33  ;;  %v5207_v16 = vpack.c.bf16 %v744_v35, %v740_v38  ;;  %v769_v62 = vld [vmem:[%s10991_s1 + $0x1680] sm:$0xff]  ;;  %v778_v33 = vld [vmem:[%s10991_s1 + $0x16c8] sm:$0xff]  ;;  %v780_v38 = vld [vmem:[%s10991_s1 + $0x16d8] sm:$0xff] }
 0x149   :  { %3269 = vmatprep.mubr.f32.mxu1 %v1774_v48  ;;  %v752_v48 = vld [vmem:[%s10991_s1 + $0x15f8] sm:$0xff]  ;;  %v773_v26 = vld [vmem:[%s10991_s1 + $0x16a0] sm:$0xff]  ;;  %v782_v34 = vld [vmem:[%s10991_s1 + $0x16e8] sm:$0xff] }
 0x14a   :  { %4406 = vmatpush1.bf16.msra.mxu0 %v4405_v49  ;;  %v4425_v49 = vpack.c.bf16 %v741_v42, %v737_v41  ;;  %v784_v35 = vld [vmem:[%s10991_s1 + $0x16f8] sm:$0xff]  ;;  %v777_v41 = vld [vmem:[%s10991_s1 + $0x16c0] sm:$0xff] }
 0x14b   :  { %5190 = vmatpush1.bf16.msra.mxu1 %v5189_v50  ;;  %4408 = vmatprep.subr.bf16.mxu0 %v4407_v51  ;;  %v5209_v50 = vpack.c.bf16 %v743_v44, %v739_v17  ;;  %v4427_v51 = vpack.c.bf16 %v750_v46, %v746_v45  ;;  %v781_v42 = vld [vmem:[%s10991_s1 + $0x16e0] sm:$0xff]  ;;  %v779_v17 = vld [vmem:[%s10991_s1 + $0x16d0] sm:$0xff]  ;;  %v786_v45 = vld [vmem:[%s10991_s1 + $0x1708] sm:$0xff] }
 0x14c   :  { %5192 = vmatprep.subr.bf16.mxu1 %v5191_v52  ;;  %v5211_v52 = vpack.c.bf16 %v752_v48, %v748_v47  ;;  %v783_v44 = vld [vmem:[%s10991_s1 + $0x16f0] sm:$0xff]  ;;  %v790_v46 = vld [vmem:[%s10991_s1 + $0x1728] sm:$0xff]  ;;  %v788_v47 = vld [vmem:[%s10991_s1 + $0x1718] sm:$0xff] }
 0x14d   :  { %v792_v48 = vld [vmem:[%s10991_s1 + $0x1738] sm:$0xff] }
 0x14e   :  { %4410 = vmatpush1.bf16.msra.mxu0 %v4409_v59  ;;  %v4429_v59 = vpack.c.bf16 %v749_v30, %v745_v29  ;;  %v785_v29 = vld [vmem:[%s10991_s1 + $0x1700] sm:$0xff] }
 0x14f   :  { %5194 = vmatpush1.bf16.msra.mxu1 %v5193_v60  ;;  %4412 = vmatprep.subr.bf16.mxu0 %v4411_v1  ;;  %v5213_v60 = vpack.c.bf16 %v751_v54, %v747_v53  ;;  %v4431_v1 = vpack.c.bf16 %v758_v56, %v754_v55  ;;  %v789_v30 = vld [vmem:[%s10991_s1 + $0x1720] sm:$0xff]  ;;  %v787_v53 = vld [vmem:[%s10991_s1 + $0x1710] sm:$0xff]  ;;  %v794_v55 = vld [vmem:[%s10991_s1 + $0x1748] sm:$0xff] }
 0x150   :  { %5196 = vmatprep.subr.bf16.mxu1 %v5195_v2  ;;  %v5215_v2 = vpack.c.bf16 %v760_v58, %v756_v57  ;;  %v791_v54 = vld [vmem:[%s10991_s1 + $0x1730] sm:$0xff]  ;;  %v798_v56 = vld [vmem:[%s10991_s1 + $0x1768] sm:$0xff]  ;;  %v796_v57 = vld [vmem:[%s10991_s1 + $0x1758] sm:$0xff] }
 0x151   :  { %v800_v58 = vld [vmem:[%s10991_s1 + $0x1778] sm:$0xff] }
 0x152   :  { %4414 = vmatpush1.bf16.msra.mxu0 %v4413_v10  ;;  %v4433_v10 = vpack.c.bf16 %v757_v0, %v753_v63  ;;  %v793_v63 = vld [vmem:[%s10991_s1 + $0x1740] sm:$0xff] }
 0x153   :  { %5198 = vmatpush1.bf16.msra.mxu1 %v5197_v11  ;;  %4416 = vmatprep.subr.bf16.mxu0 %v4415_v14  ;;  %v5217_v11 = vpack.c.bf16 %v759_v7, %v755_v5  ;;  %v4435_v14 = vpack.c.bf16 %v766_v3, %v762_v8  ;;  %v797_v0 = vld [vmem:[%s10991_s1 + $0x1760] sm:$0xff]  ;;  %v795_v5 = vld [vmem:[%s10991_s1 + $0x1750] sm:$0xff]  ;;  %v802_v8 = vld [vmem:[%s10991_s1 + $0x1788] sm:$0xff] }
 0x154   :  { %5200 = vmatprep.subr.bf16.mxu1 %v5199_v15  ;;  %v5219_v15 = vpack.c.bf16 %v768_v9, %v764_v4  ;;  %v799_v7 = vld [vmem:[%s10991_s1 + $0x1770] sm:$0xff]  ;;  %v806_v3 = vld [vmem:[%s10991_s1 + $0x17a8] sm:$0xff]  ;;  %v804_v4 = vld [vmem:[%s10991_s1 + $0x1798] sm:$0xff] }
 0x155   :  { %v808_v9 = vld [vmem:[%s10991_s1 + $0x17b8] sm:$0xff] }
 0x156   :  { %4418 = vmatpush1.bf16.msra.mxu0 %v4417_v25  ;;  %v4437_v25 = vpack.c.bf16 %v765_v13, %v761_v12  ;;  %v801_v12 = vld [vmem:[%s10991_s1 + $0x1780] sm:$0xff] }
 0x157   :  { %5202 = vmatpush1.bf16.msra.mxu1 %v5201_v61  ;;  %4420 = vmatprep.subr.bf16.mxu0 %v4419_v27  ;;  %v5221_v61 = vpack.c.bf16 %v767_v19, %v763_v18  ;;  %v4439_v27 = vpack.c.bf16 %v774_v21, %v770_v20  ;;  %v805_v13 = vld [vmem:[%s10991_s1 + $0x17a0] sm:$0xff]  ;;  %v803_v18 = vld [vmem:[%s10991_s1 + $0x1790] sm:$0xff]  ;;  %v810_v20 = vld [vmem:[%s10991_s1 + $0x17c8] sm:$0xff] }
 0x158   :  { %5204 = vmatprep.subr.bf16.mxu1 %v5203_v28  ;;  %v5223_v28 = vpack.c.bf16 %v776_v24, %v772_v22  ;;  %v807_v19 = vld [vmem:[%s10991_s1 + $0x17b0] sm:$0xff]  ;;  %v814_v21 = vld [vmem:[%s10991_s1 + $0x17e8] sm:$0xff]  ;;  %v812_v22 = vld [vmem:[%s10991_s1 + $0x17d8] sm:$0xff] }
 0x159   :  { %v816_v24 = vld [vmem:[%s10991_s1 + $0x17f8] sm:$0xff] }
 0x15a   :  { %4422 = vmatpush1.bf16.msra.mxu0 %v4421_v39  ;;  %v4441_v39 = vpack.c.bf16 %v773_v26, %v769_v62  ;;  %v5241_v62 = vpack.c.bf16 %v807_v19, %v803_v18  ;;  %v813_v26 = vld [vmem:[%s10991_s1 + $0x17e0] sm:$0xff] }
 0x15b   :  { %5206 = vmatpush1.bf16.msra.mxu1 %v5205_v40  ;;  %4424 = vmatprep.subr.bf16.mxu0 %v4423_v43  ;;  %v5225_v40 = vpack.c.bf16 %v775_v32, %v771_v31  ;;  %v4443_v43 = vpack.c.bf16 %v782_v34, %v778_v33  ;;  %v4459_v31 = vpack.c.bf16 %v814_v21, %v810_v20  ;;  %v818_v33 = vld [vmem:[%s10991_s1 + $0x1808] sm:$0xff]  ;;  %v841_v18 = vld [vmem:[%s10991_s1 + $0x18c0] sm:$0xff] }
 0x15c   :  { %5208 = vmatprep.subr.bf16.mxu1 %v5207_v16  ;;  %v5227_v16 = vpack.c.bf16 %v784_v35, %v780_v38  ;;  %v5243_v32 = vpack.c.bf16 %v816_v24, %v812_v22  ;;  %v822_v34 = vld [vmem:[%s10991_s1 + $0x1828] sm:$0xff]  ;;  %v820_v38 = vld [vmem:[%s10991_s1 + $0x1818] sm:$0xff]  ;;  %v845_v19 = vld [vmem:[%s10991_s1 + $0x18e0] sm:$0xff] }
 0x15d   :  { %v824_v35 = vld [vmem:[%s10991_s1 + $0x1838] sm:$0xff]  ;;  %v843_v22 = vld [vmem:[%s10991_s1 + $0x18d0] sm:$0xff] }
 0x15e   :  { %4426 = vmatpush1.bf16.msra.mxu0 %v4425_v49  ;;  %v4445_v49 = vpack.c.bf16 %v781_v42, %v777_v41  ;;  %v847_v24 = vld [vmem:[%s10991_s1 + $0x18f0] sm:$0xff] }
 0x15f   :  { %5210 = vmatpush1.bf16.msra.mxu1 %v5209_v50  ;;  %4428 = vmatprep.subr.bf16.mxu0 %v4427_v51  ;;  %v5229_v50 = vpack.c.bf16 %v783_v44, %v779_v17  ;;  %v4447_v51 = vpack.c.bf16 %v790_v46, %v786_v45  ;;  %v4463_v17 = vpack.c.bf16 %v822_v34, %v818_v33  ;;  %v819_v45 = vld [vmem:[%s10991_s1 + $0x1810] sm:$0xff] }
 0x160   :  { %5212 = vmatprep.subr.bf16.mxu1 %v5211_v52  ;;  %v5231_v52 = vpack.c.bf16 %v792_v48, %v788_v47  ;;  %v5247_v44 = vpack.c.bf16 %v824_v35, %v820_v38  ;;  %v823_v46 = vld [vmem:[%s10991_s1 + $0x1830] sm:$0xff]  ;;  %v826_v47 = vld [vmem:[%s10991_s1 + $0x1848] sm:$0xff] }
 0x161   :  { %v830_v48 = vld [vmem:[%s10991_s1 + $0x1868] sm:$0xff]  ;;  %v851_v38 = vld [vmem:[%s10991_s1 + $0x1910] sm:$0xff] }
 0x162   :  { %4430 = vmatpush1.bf16.msra.mxu0 %v4429_v59  ;;  %v4449_v59 = vpack.c.bf16 %v789_v30, %v785_v29  ;;  %v855_v35 = vld [vmem:[%s10991_s1 + $0x1930] sm:$0xff] }
 0x163   :  { %5214 = vmatpush1.bf16.msra.mxu1 %v5213_v60  ;;  %4432 = vmatprep.subr.bf16.mxu0 %v4431_v1  ;;  %v5233_v60 = vpack.c.bf16 %v791_v54, %v787_v53  ;;  %v4451_v1 = vpack.c.bf16 %v798_v56, %v794_v55  ;;  %v5249_v53 = vpack.c.bf16 %v823_v46, %v819_v45  ;;  %v825_v54 = vld [vmem:[%s10991_s1 + $0x1840] sm:$0xff] }
 0x164   :  { %5216 = vmatprep.subr.bf16.mxu1 %v5215_v2  ;;  %v5235_v2 = vpack.c.bf16 %v800_v58, %v796_v57  ;;  %v829_v55 = vld [vmem:[%s10991_s1 + $0x1860] sm:$0xff]  ;;  %v4467_v56 = vpack.c.bf16 %v830_v48, %v826_v47  ;;  %v834_v58 = vld [vmem:[%s10991_s1 + $0x1888] sm:$0xff]  ;;  %v859_v47 = vld [vmem:[%s10991_s1 + $0x1950] sm:$0xff] }
 0x165   :  { %v863_v48 = vld [vmem:[%s10991_s1 + $0x1970] sm:$0xff] }
 0x166   :  { %4434 = vmatpush1.bf16.msra.mxu0 %v4433_v10  ;;  %v4453_v10 = vpack.c.bf16 %v797_v0, %v793_v63  ;;  %v840_v63 = vld [vmem:[%s10991_s1 + $0x18b8] sm:$0xff] }
 0x167   :  { %5218 = vmatpush1.bf16.msra.mxu1 %v5217_v11  ;;  %4436 = vmatprep.subr.bf16.mxu0 %v4435_v14  ;;  %v5237_v11 = vpack.c.bf16 %v799_v7, %v795_v5  ;;  %v4455_v14 = vpack.c.bf16 %v806_v3, %v802_v8  ;;  %v833_v5 = vld [vmem:[%s10991_s1 + $0x1880] sm:$0xff] }
 0x168   :  { %5220 = vmatprep.subr.bf16.mxu1 %v5219_v15  ;;  %v5239_v15 = vpack.c.bf16 %v808_v9, %v804_v4  ;;  %v837_v7 = vld [vmem:[%s10991_s1 + $0x18a0] sm:$0xff]  ;;  %v835_v4 = vld [vmem:[%s10991_s1 + $0x1890] sm:$0xff] }
 0x169   :  { %v839_v9 = vld [vmem:[%s10991_s1 + $0x18b0] sm:$0xff] }
 0x16a   :  { %4438 = vmatpush1.bf16.msra.mxu0 %v4437_v25  ;;  %v809_v25 = vld [vmem:[%s10991_s1 + $0x17c0] sm:$0xff] }
 0x16b   :  { %5222 = vmatpush1.bf16.msra.mxu1 %v5221_v61  ;;  %4440 = vmatprep.subr.bf16.mxu0 %v4439_v27  ;;  %v4457_v61 = vpack.c.bf16 %v805_v13, %v801_v12  ;;  %v811_v27 = vld [vmem:[%s10991_s1 + $0x17d0] sm:$0xff]  ;;  %v4461_v41 = vpack.c.bf16 %v813_v26, %v809_v25  ;;  %v844_v12 = vld [vmem:[%s10991_s1 + $0x18d8] sm:$0xff]  ;;  %v850_v25 = vld [vmem:[%s10991_s1 + $0x1908] sm:$0xff] }
 0x16c   :  { %5224 = vmatprep.subr.bf16.mxu1 %v5223_v28  ;;  %v815_v28 = vld [vmem:[%s10991_s1 + $0x17f0] sm:$0xff]  ;;  %v848_v13 = vld [vmem:[%s10991_s1 + $0x18f8] sm:$0xff] }
 0x16d   :  { %v5245_v42 = vpack.c.bf16 %v815_v28, %v811_v27  ;;  %v5259_v21 = vpack.c.bf16 %v848_v13, %v844_v12  ;;  %v856_v26 = vld [vmem:[%s10991_s1 + $0x1938] sm:$0xff]  ;;  %v4477_v27 = vpack.c.bf16 %v845_v19, %v841_v18  ;;  %v5261_v28 = vpack.c.bf16 %v847_v24, %v843_v22  ;;  %v881_v18 = vld [vmem:[%s10991_s1 + $0x1a00] sm:$0xff]  ;;  %v883_v22 = vld [vmem:[%s10991_s1 + $0x1a10] sm:$0xff] }
 0x16e   :  { %4442 = vmatpush1.bf16.msra.mxu0 %v4441_v39  ;;  %v5786_v39 = vld [vmem:[%s10990_s0 + $0x18] ss:$50 sps:$4 sm:$0xff]   ;;  %v885_v19 = vld [vmem:[%s10991_s1 + $0x1a20] sm:$0xff]  ;;  %v887_v24 = vld [vmem:[%s10991_s1 + $0x1a30] sm:$0xff] }
 0x16f   :  { %5226 = vmatpush1.bf16.msra.mxu1 %v5225_v40  ;;  %4444 = vmatprep.subr.bf16.mxu0 %v4443_v43  ;;  %v5788_v40 = vld [vmem:[%s10990_s0 + $0x7c] ss:$50 sps:$4 sm:$0xff]   ;;  %v817_v43 = vld [vmem:[%s10991_s1 + $0x1800] sm:$0xff]  ;;  %v8311_v29 = vrot.slane %v5786_v39, %v6168_v23 }
 0x170   :  { %5228 = vmatprep.subr.bf16.mxu1 %v5227_v16  ;;  %v821_v16 = vld [vmem:[%s10991_s1 + $0x1820] sm:$0xff]  ;;  %v8314_v30 = vrot.slane %v5788_v40, %v6168_v23  ;;  %v858_v39 = vld [vmem:[%s10991_s1 + $0x1948] sm:$0xff]  ;;  %v884_v12 = vld [vmem:[%s10991_s1 + $0x1a18] sm:$0xff] }
 0x171   :  { %v862_v40 = vld [vmem:[%s10991_s1 + $0x1968] sm:$0xff]  ;;  %v888_v13 = vld [vmem:[%s10991_s1 + $0x1a38] sm:$0xff] }
 0x172   :  { %4446 = vmatpush1.bf16.msra.mxu0 %v4445_v49  ;;  %v828_v49 = vld [vmem:[%s10991_s1 + $0x1858] sm:$0xff]  ;;  %v1808_v0 = vcombine.high %v8311_v29, %v8314_v30  ;;  %v4483_v45 = vpack.c.bf16 %v862_v40, %v858_v39  ;;  %v898_v39 = vld [vmem:[%s10991_s1 + $0x1a88] sm:$0xff] }
 0x173   :  { %5230 = vmatpush1.bf16.msra.mxu1 %v5229_v50  ;;  %4448 = vmatprep.subr.bf16.mxu0 %v4447_v51  ;;  %v832_v50 = vld [vmem:[%s10991_s1 + $0x1878] sm:$0xff]  ;;  %v1773_v51 = vcombine.low %v7911_v36, %v7914_v37  ;;  %v827_v36 = vld [vmem:[%s10991_s1 + $0x1850] sm:$0xff]  ;;  %v902_v40 = vld [vmem:[%s10991_s1 + $0x1aa8] sm:$0xff] }
 0x174   :  { %5232 = vmatprep.subr.bf16.mxu1 %v5231_v52  ;;  %v4465_v52 = vpack.c.bf16 %v821_v16, %v817_v43  ;;  %v5251_v57 = vpack.c.bf16 %v832_v50, %v828_v49  ;;  %v831_v37 = vld [vmem:[%s10991_s1 + $0x1870] sm:$0xff]  ;;  %v5265_v16 = vpack.c.bf16 %v855_v35, %v851_v38  ;;  %v866_v49 = vld [vmem:[%s10991_s1 + $0x1988] sm:$0xff] }
 0x175   :  { %v870_v50 = vld [vmem:[%s10991_s1 + $0x19a8] sm:$0xff]  ;;  %v891_v38 = vld [vmem:[%s10991_s1 + $0x1a50] sm:$0xff] }
 0x176   :  { %4450 = vmatpush1.bf16.msra.mxu0 %v4449_v59  ;;  %v838_v59 = vld [vmem:[%s10991_s1 + $0x18a8] sm:$0xff]  ;;  %v895_v35 = vld [vmem:[%s10991_s1 + $0x1a70] sm:$0xff] }
 0x177   :  { %5234 = vmatpush1.bf16.msra.mxu1 %v5233_v60  ;;  %4452 = vmatprep.subr.bf16.mxu0 %v4451_v1  ;;  %v836_v60 = vld [vmem:[%s10991_s1 + $0x1898] sm:$0xff]  ;;  %v4469_v1 = vpack.c.bf16 %v829_v55, %v825_v54  ;;  %v4471_v8 = vpack.c.bf16 %v838_v59, %v834_v58  ;;  %v5269_v54 = vpack.c.bf16 %v863_v48, %v859_v47  ;;  %v865_v55 = vld [vmem:[%s10991_s1 + $0x1980] sm:$0xff]  ;;  %v871_v58 = vld [vmem:[%s10991_s1 + $0x19b0] sm:$0xff] }
 0x178   :  { %5236 = vmatprep.subr.bf16.mxu1 %v5235_v2  ;;  %v5253_v2 = vpack.c.bf16 %v831_v37, %v827_v36  ;;  %v5255_v3 = vpack.c.bf16 %v840_v63, %v836_v60  ;;  %v867_v37 = vld [vmem:[%s10991_s1 + $0x1990] sm:$0xff]  ;;  %v874_v59 = vld [vmem:[%s10991_s1 + $0x19c8] sm:$0xff]  ;;  %v876_v63 = vld [vmem:[%s10991_s1 + $0x19d8] sm:$0xff] }
 0x179   :  { %v878_v60 = vld [vmem:[%s10991_s1 + $0x19e8] sm:$0xff]  ;;  %v899_v47 = vld [vmem:[%s10991_s1 + $0x1a90] sm:$0xff] }
 0x17a   :  { %4454 = vmatpush1.bf16.msra.mxu0 %v4453_v10  ;;  %v842_v10 = vld [vmem:[%s10991_s1 + $0x18c8] sm:$0xff]  ;;  %v903_v48 = vld [vmem:[%s10991_s1 + $0x1ab0] sm:$0xff] }
 0x17b   :  { %5238 = vmatpush1.bf16.msra.mxu1 %v5237_v11  ;;  %4456 = vmatprep.subr.bf16.mxu0 %v4455_v14  ;;  %v846_v11 = vld [vmem:[%s10991_s1 + $0x18e8] sm:$0xff]  ;;  %v4473_v14 = vpack.c.bf16 %v837_v7, %v833_v5  ;;  %v873_v5 = vld [vmem:[%s10991_s1 + $0x19c0] sm:$0xff] }
 0x17c   :  { %5240 = vmatprep.subr.bf16.mxu1 %v5239_v15  ;;  %v5257_v15 = vpack.c.bf16 %v839_v9, %v835_v4  ;;  %v4475_v20 = vpack.c.bf16 %v846_v11, %v842_v10  ;;  %v877_v7 = vld [vmem:[%s10991_s1 + $0x19e0] sm:$0xff]  ;;  %v875_v4 = vld [vmem:[%s10991_s1 + $0x19d0] sm:$0xff]  ;;  %v882_v10 = vld [vmem:[%s10991_s1 + $0x1a08] sm:$0xff] }
 0x17d   :  { %v879_v9 = vld [vmem:[%s10991_s1 + $0x19f0] sm:$0xff]  ;;  %v886_v11 = vld [vmem:[%s10991_s1 + $0x1a28] sm:$0xff] }
 0x17e   :  { %4458 = vmatpush1.bf16.msra.mxu0 %v4457_v61  ;;  %v854_v61 = vld [vmem:[%s10991_s1 + $0x1928] sm:$0xff] }
 0x17f   :  { %5242 = vmatpush1.bf16.msra.mxu1 %v5241_v62  ;;  %4460 = vmatprep.subr.bf16.mxu0 %v4459_v31  ;;  %v852_v62 = vld [vmem:[%s10991_s1 + $0x1918] sm:$0xff]  ;;  %v849_v31 = vld [vmem:[%s10991_s1 + $0x1900] sm:$0xff]  ;;  %v4479_v33 = vpack.c.bf16 %v854_v61, %v850_v25  ;;  %v890_v25 = vld [vmem:[%s10991_s1 + $0x1a48] sm:$0xff] }
 0x180   :  { %5244 = vmatprep.subr.bf16.mxu1 %v5243_v32  ;;  %v853_v32 = vld [vmem:[%s10991_s1 + $0x1920] sm:$0xff]  ;;  %v5263_v34 = vpack.c.bf16 %v856_v26, %v852_v62  ;;  %v894_v61 = vld [vmem:[%s10991_s1 + $0x1a68] sm:$0xff]  ;;  %v892_v62 = vld [vmem:[%s10991_s1 + $0x1a58] sm:$0xff] }
 0x181   :  { %v4481_v43 = vpack.c.bf16 %v853_v32, %v849_v31  ;;  %v896_v26 = vld [vmem:[%s10991_s1 + $0x1a78] sm:$0xff]  ;;  %v889_v31 = vld [vmem:[%s10991_s1 + $0x1a40] sm:$0xff] }
 0x182   :  { %4462 = vmatpush1.bf16.msra.mxu0 %v4461_v41  ;;  %v860_v41 = vld [vmem:[%s10991_s1 + $0x1958] sm:$0xff]  ;;  %v893_v32 = vld [vmem:[%s10991_s1 + $0x1a60] sm:$0xff] }
 0x183   :  { %5246 = vmatpush1.bf16.msra.mxu1 %v5245_v42  ;;  %4464 = vmatprep.subr.bf16.mxu0 %v4463_v17  ;;  %v864_v42 = vld [vmem:[%s10991_s1 + $0x1978] sm:$0xff]  ;;  %v857_v17 = vld [vmem:[%s10991_s1 + $0x1940] sm:$0xff] }
 0x184   :  { %5248 = vmatprep.subr.bf16.mxu1 %v5247_v44  ;;  %v861_v44 = vld [vmem:[%s10991_s1 + $0x1960] sm:$0xff]  ;;  %v5267_v46 = vpack.c.bf16 %v864_v42, %v860_v41  ;;  %v900_v41 = vld [vmem:[%s10991_s1 + $0x1a98] sm:$0xff] }
 0x185   :  { %2347 = vmatmul.mubr.f32.vlgmr.msra.gmra.mrb[0].mxu0 %v1773_v51  ;;  %v904_v42 = vld [vmem:[%s10991_s1 + $0x1ab8] sm:$0xff] }
 0x186   :  { %3270 = vmatmul.mubr.f32.vlgmr.msra.gmra.mrb[0].mxu1 %v1773_v51  ;;  %4466 = vmatpush1.bf16.msra.mxu0 %v4465_v52  ;;  %v868_v51 = vld [vmem:[%s10991_s1 + $0x1998] sm:$0xff] }
 0x187   :  { %5250 = vmatpush1.bf16.msra.mxu1 %v5249_v53  ;;  %4468 = vmatprep.subr.bf16.mxu0 %v4467_v56  ;;  %v872_v52 = vld [vmem:[%s10991_s1 + $0x19b8] sm:$0xff]  ;;  %v4485_v53 = vpack.c.bf16 %v861_v44, %v857_v17  ;;  %v869_v56 = vld [vmem:[%s10991_s1 + $0x19a0] sm:$0xff] }
 0x188   :  { %5252 = vmatprep.subr.bf16.mxu1 %v5251_v57  ;;  %2417 = vmatprep.mubr.f32.mxu0 %v1808_v0  ;;  %v4487_v57 = vpack.c.bf16 %v870_v50, %v866_v49  ;;  %v5271_v36 = vpack.c.bf16 %v872_v52, %v868_v51  ;;  %v897_v17 = vld [vmem:[%s10991_s1 + $0x1a80] sm:$0xff]  ;;  %v906_v49 = vld [vmem:[%s10991_s1 + $0x1ac8] sm:$0xff]  ;;  %v908_v51 = vld [vmem:[%s10991_s1 + $0x1ad8] sm:$0xff] }
 0x189   :  { %3340 = vmatprep.mubr.f32.mxu1 %v1808_v0  ;;  %v880_v0 = vld [vmem:[%s10991_s1 + $0x19f8] sm:$0xff]  ;;  %v901_v44 = vld [vmem:[%s10991_s1 + $0x1aa0] sm:$0xff]  ;;  %v910_v50 = vld [vmem:[%s10991_s1 + $0x1ae8] sm:$0xff] }
 0x18a   :  { %4470 = vmatpush1.bf16.msra.mxu0 %v4469_v1  ;;  %v4489_v1 = vpack.c.bf16 %v869_v56, %v865_v55  ;;  %v912_v52 = vld [vmem:[%s10991_s1 + $0x1af8] sm:$0xff]  ;;  %v905_v55 = vld [vmem:[%s10991_s1 + $0x1ac0] sm:$0xff] }
 0x18b   :  { %5254 = vmatpush1.bf16.msra.mxu1 %v5253_v2  ;;  %4472 = vmatprep.subr.bf16.mxu0 %v4471_v8  ;;  %v5273_v2 = vpack.c.bf16 %v871_v58, %v867_v37  ;;  %v4491_v8 = vpack.c.bf16 %v878_v60, %v874_v59  ;;  %v909_v56 = vld [vmem:[%s10991_s1 + $0x1ae0] sm:$0xff]  ;;  %v907_v37 = vld [vmem:[%s10991_s1 + $0x1ad0] sm:$0xff]  ;;  %v914_v59 = vld [vmem:[%s10991_s1 + $0x1b08] sm:$0xff] }
 0x18c   :  { %5256 = vmatprep.subr.bf16.mxu1 %v5255_v3  ;;  %v5275_v3 = vpack.c.bf16 %v880_v0, %v876_v63  ;;  %v911_v58 = vld [vmem:[%s10991_s1 + $0x1af0] sm:$0xff]  ;;  %v918_v60 = vld [vmem:[%s10991_s1 + $0x1b28] sm:$0xff]  ;;  %v916_v63 = vld [vmem:[%s10991_s1 + $0x1b18] sm:$0xff] }
 0x18d   :  { %v920_v0 = vld [vmem:[%s10991_s1 + $0x1b38] sm:$0xff] }
 0x18e   :  { %4474 = vmatpush1.bf16.msra.mxu0 %v4473_v14  ;;  %v4493_v14 = vpack.c.bf16 %v877_v7, %v873_v5  ;;  %v913_v5 = vld [vmem:[%s10991_s1 + $0x1b00] sm:$0xff] }
 0x18f   :  { %5258 = vmatpush1.bf16.msra.mxu1 %v5257_v15  ;;  %4476 = vmatprep.subr.bf16.mxu0 %v4475_v20  ;;  %v5277_v15 = vpack.c.bf16 %v879_v9, %v875_v4  ;;  %v4495_v20 = vpack.c.bf16 %v886_v11, %v882_v10  ;;  %v917_v7 = vld [vmem:[%s10991_s1 + $0x1b20] sm:$0xff]  ;;  %v915_v4 = vld [vmem:[%s10991_s1 + $0x1b10] sm:$0xff]  ;;  %v922_v10 = vld [vmem:[%s10991_s1 + $0x1b48] sm:$0xff] }
 0x190   :  { %5260 = vmatprep.subr.bf16.mxu1 %v5259_v21  ;;  %v5279_v21 = vpack.c.bf16 %v888_v13, %v884_v12  ;;  %v919_v9 = vld [vmem:[%s10991_s1 + $0x1b30] sm:$0xff]  ;;  %v926_v11 = vld [vmem:[%s10991_s1 + $0x1b68] sm:$0xff]  ;;  %v924_v12 = vld [vmem:[%s10991_s1 + $0x1b58] sm:$0xff] }
 0x191   :  { %v928_v13 = vld [vmem:[%s10991_s1 + $0x1b78] sm:$0xff] }
 0x192   :  { %4478 = vmatpush1.bf16.msra.mxu0 %v4477_v27  ;;  %v4497_v27 = vpack.c.bf16 %v885_v19, %v881_v18  ;;  %v921_v18 = vld [vmem:[%s10991_s1 + $0x1b40] sm:$0xff] }
 0x193   :  { %5262 = vmatpush1.bf16.msra.mxu1 %v5261_v28  ;;  %4480 = vmatprep.subr.bf16.mxu0 %v4479_v33  ;;  %v5281_v28 = vpack.c.bf16 %v887_v24, %v883_v22  ;;  %v4499_v33 = vpack.c.bf16 %v894_v61, %v890_v25  ;;  %v925_v19 = vld [vmem:[%s10991_s1 + $0x1b60] sm:$0xff]  ;;  %v923_v22 = vld [vmem:[%s10991_s1 + $0x1b50] sm:$0xff]  ;;  %v930_v25 = vld [vmem:[%s10991_s1 + $0x1b88] sm:$0xff] }
 0x194   :  { %5264 = vmatprep.subr.bf16.mxu1 %v5263_v34  ;;  %v5283_v34 = vpack.c.bf16 %v896_v26, %v892_v62  ;;  %v927_v24 = vld [vmem:[%s10991_s1 + $0x1b70] sm:$0xff]  ;;  %v934_v61 = vld [vmem:[%s10991_s1 + $0x1ba8] sm:$0xff]  ;;  %v932_v62 = vld [vmem:[%s10991_s1 + $0x1b98] sm:$0xff] }
 0x195   :  { %v936_v26 = vld [vmem:[%s10991_s1 + $0x1bb8] sm:$0xff] }
 0x196   :  { %4482 = vmatpush1.bf16.msra.mxu0 %v4481_v43  ;;  %v4501_v43 = vpack.c.bf16 %v893_v32, %v889_v31  ;;  %v929_v31 = vld [vmem:[%s10991_s1 + $0x1b80] sm:$0xff] }
 0x197   :  { %5266 = vmatpush1.bf16.msra.mxu1 %v5265_v16  ;;  %4484 = vmatprep.subr.bf16.mxu0 %v4483_v45  ;;  %v5285_v16 = vpack.c.bf16 %v895_v35, %v891_v38  ;;  %v4503_v45 = vpack.c.bf16 %v902_v40, %v898_v39  ;;  %v933_v32 = vld [vmem:[%s10991_s1 + $0x1ba0] sm:$0xff]  ;;  %v931_v38 = vld [vmem:[%s10991_s1 + $0x1b90] sm:$0xff]  ;;  %v938_v39 = vld [vmem:[%s10991_s1 + $0x1bc8] sm:$0xff] }
 0x198   :  { %5268 = vmatprep.subr.bf16.mxu1 %v5267_v46  ;;  %v5287_v46 = vpack.c.bf16 %v904_v42, %v900_v41  ;;  %v935_v35 = vld [vmem:[%s10991_s1 + $0x1bb0] sm:$0xff]  ;;  %v942_v40 = vld [vmem:[%s10991_s1 + $0x1be8] sm:$0xff]  ;;  %v940_v41 = vld [vmem:[%s10991_s1 + $0x1bd8] sm:$0xff] }
 0x199   :  { %v944_v42 = vld [vmem:[%s10991_s1 + $0x1bf8] sm:$0xff] }
 0x19a   :  { %4486 = vmatpush1.bf16.msra.mxu0 %v4485_v53  ;;  %v4505_v53 = vpack.c.bf16 %v901_v44, %v897_v17  ;;  %v5305_v17 = vpack.c.bf16 %v935_v35, %v931_v38  ;;  %v941_v44 = vld [vmem:[%s10991_s1 + $0x1be0] sm:$0xff] }
 0x19b   :  { %5270 = vmatpush1.bf16.msra.mxu1 %v5269_v54  ;;  %4488 = vmatprep.subr.bf16.mxu0 %v4487_v57  ;;  %v5289_v54 = vpack.c.bf16 %v903_v48, %v899_v47  ;;  %v4507_v57 = vpack.c.bf16 %v910_v50, %v906_v49  ;;  %v4523_v47 = vpack.c.bf16 %v942_v40, %v938_v39  ;;  %v946_v49 = vld [vmem:[%s10991_s1 + $0x1c08] sm:$0xff]  ;;  %v969_v38 = vld [vmem:[%s10991_s1 + $0x1cc0] sm:$0xff] }
 0x19c   :  { %5272 = vmatprep.subr.bf16.mxu1 %v5271_v36  ;;  %v5291_v36 = vpack.c.bf16 %v912_v52, %v908_v51  ;;  %v5307_v48 = vpack.c.bf16 %v944_v42, %v940_v41  ;;  %v950_v50 = vld [vmem:[%s10991_s1 + $0x1c28] sm:$0xff]  ;;  %v948_v51 = vld [vmem:[%s10991_s1 + $0x1c18] sm:$0xff]  ;;  %v973_v35 = vld [vmem:[%s10991_s1 + $0x1ce0] sm:$0xff] }
 0x19d   :  { %v952_v52 = vld [vmem:[%s10991_s1 + $0x1c38] sm:$0xff]  ;;  %v971_v41 = vld [vmem:[%s10991_s1 + $0x1cd0] sm:$0xff] }
 0x19e   :  { %4490 = vmatpush1.bf16.msra.mxu0 %v4489_v1  ;;  %v4509_v1 = vpack.c.bf16 %v909_v56, %v905_v55  ;;  %v975_v42 = vld [vmem:[%s10991_s1 + $0x1cf0] sm:$0xff] }
 0x19f   :  { %5274 = vmatpush1.bf16.msra.mxu1 %v5273_v2  ;;  %4492 = vmatprep.subr.bf16.mxu0 %v4491_v8  ;;  %v5293_v2 = vpack.c.bf16 %v911_v58, %v907_v37  ;;  %v4511_v8 = vpack.c.bf16 %v918_v60, %v914_v59  ;;  %v4527_v37 = vpack.c.bf16 %v950_v50, %v946_v49  ;;  %v947_v59 = vld [vmem:[%s10991_s1 + $0x1c10] sm:$0xff] }
 0x1a0   :  { %5276 = vmatprep.subr.bf16.mxu1 %v5275_v3  ;;  %v5295_v3 = vpack.c.bf16 %v920_v0, %v916_v63  ;;  %v5311_v58 = vpack.c.bf16 %v952_v52, %v948_v51  ;;  %v951_v60 = vld [vmem:[%s10991_s1 + $0x1c30] sm:$0xff]  ;;  %v954_v63 = vld [vmem:[%s10991_s1 + $0x1c48] sm:$0xff] }
 0x1a1   :  { %v958_v0 = vld [vmem:[%s10991_s1 + $0x1c68] sm:$0xff]  ;;  %v979_v51 = vld [vmem:[%s10991_s1 + $0x1d10] sm:$0xff] }
 0x1a2   :  { %4494 = vmatpush1.bf16.msra.mxu0 %v4493_v14  ;;  %v4513_v14 = vpack.c.bf16 %v917_v7, %v913_v5  ;;  %v983_v52 = vld [vmem:[%s10991_s1 + $0x1d30] sm:$0xff] }
 0x1a3   :  { %5278 = vmatpush1.bf16.msra.mxu1 %v5277_v15  ;;  %4496 = vmatprep.subr.bf16.mxu0 %v4495_v20  ;;  %v5297_v15 = vpack.c.bf16 %v919_v9, %v915_v4  ;;  %v4515_v20 = vpack.c.bf16 %v926_v11, %v922_v10  ;;  %v5313_v4 = vpack.c.bf16 %v951_v60, %v947_v59  ;;  %v953_v9 = vld [vmem:[%s10991_s1 + $0x1c40] sm:$0xff] }
 0x1a4   :  { %5280 = vmatprep.subr.bf16.mxu1 %v5279_v21  ;;  %v5299_v21 = vpack.c.bf16 %v928_v13, %v924_v12  ;;  %v957_v10 = vld [vmem:[%s10991_s1 + $0x1c60] sm:$0xff]  ;;  %v4531_v11 = vpack.c.bf16 %v958_v0, %v954_v63  ;;  %v962_v13 = vld [vmem:[%s10991_s1 + $0x1c88] sm:$0xff]  ;;  %v987_v63 = vld [vmem:[%s10991_s1 + $0x1d50] sm:$0xff] }
 0x1a5   :  { %v991_v0 = vld [vmem:[%s10991_s1 + $0x1d70] sm:$0xff] }
 0x1a6   :  { %4498 = vmatpush1.bf16.msra.mxu0 %v4497_v27  ;;  %v4517_v27 = vpack.c.bf16 %v925_v19, %v921_v18  ;;  %v968_v18 = vld [vmem:[%s10991_s1 + $0x1cb8] sm:$0xff] }
 0x1a7   :  { %5282 = vmatpush1.bf16.msra.mxu1 %v5281_v28  ;;  %4500 = vmatprep.subr.bf16.mxu0 %v4499_v33  ;;  %v5301_v28 = vpack.c.bf16 %v927_v24, %v923_v22  ;;  %v4519_v33 = vpack.c.bf16 %v934_v61, %v930_v25  ;;  %v961_v22 = vld [vmem:[%s10991_s1 + $0x1c80] sm:$0xff] }
 0x1a8   :  { %5284 = vmatprep.subr.bf16.mxu1 %v5283_v34  ;;  %v5303_v34 = vpack.c.bf16 %v936_v26, %v932_v62  ;;  %v965_v24 = vld [vmem:[%s10991_s1 + $0x1ca0] sm:$0xff]  ;;  %v963_v62 = vld [vmem:[%s10991_s1 + $0x1c90] sm:$0xff] }
 0x1a9   :  { %v967_v26 = vld [vmem:[%s10991_s1 + $0x1cb0] sm:$0xff] }
 0x1aa   :  { %4502 = vmatpush1.bf16.msra.mxu0 %v4501_v43  ;;  %v937_v43 = vld [vmem:[%s10991_s1 + $0x1bc0] sm:$0xff] }
 0x1ab   :  { %5286 = vmatpush1.bf16.msra.mxu1 %v5285_v16  ;;  %4504 = vmatprep.subr.bf16.mxu0 %v4503_v45  ;;  %v4521_v16 = vpack.c.bf16 %v933_v32, %v929_v31  ;;  %v939_v45 = vld [vmem:[%s10991_s1 + $0x1bd0] sm:$0xff]  ;;  %v4525_v55 = vpack.c.bf16 %v941_v44, %v937_v43  ;;  %v972_v31 = vld [vmem:[%s10991_s1 + $0x1cd8] sm:$0xff]  ;;  %v978_v43 = vld [vmem:[%s10991_s1 + $0x1d08] sm:$0xff] }
 0x1ac   :  { %5288 = vmatprep.subr.bf16.mxu1 %v5287_v46  ;;  %v943_v46 = vld [vmem:[%s10991_s1 + $0x1bf0] sm:$0xff]  ;;  %v976_v32 = vld [vmem:[%s10991_s1 + $0x1cf8] sm:$0xff] }
 0x1ad   :  { %v5309_v56 = vpack.c.bf16 %v943_v46, %v939_v45  ;;  %v5323_v40 = vpack.c.bf16 %v976_v32, %v972_v31  ;;  %v984_v44 = vld [vmem:[%s10991_s1 + $0x1d38] sm:$0xff]  ;;  %v4541_v45 = vpack.c.bf16 %v973_v35, %v969_v38  ;;  %v5325_v46 = vpack.c.bf16 %v975_v42, %v971_v41  ;;  %v1009_v38 = vld [vmem:[%s10991_s1 + $0x1e00] sm:$0xff]  ;;  %v1011_v41 = vld [vmem:[%s10991_s1 + $0x1e10] sm:$0xff] }
 0x1ae   :  { %4506 = vmatpush1.bf16.msra.mxu0 %v4505_v53  ;;  %v5790_v53 = vld [vmem:[%s10990_s0 + $0x1c] ss:$50 sps:$4 sm:$0xff]   ;;  %v1013_v35 = vld [vmem:[%s10991_s1 + $0x1e20] sm:$0xff] }
 0x1af   :  { %5290 = vmatpush1.bf16.msra.mxu1 %v5289_v54  ;;  %4508 = vmatprep.subr.bf16.mxu0 %v4507_v57  ;;  %v5791_v54 = vld [vmem:[%s10990_s0 + $0x80] ss:$50 sps:$4 sm:$0xff]   ;;  %v8711_v5 = vrot.slane %v5790_v53, %v6168_v23  ;;  %v986_v53 = vld [vmem:[%s10991_s1 + $0x1d48] sm:$0xff]  ;;  %v1012_v31 = vld [vmem:[%s10991_s1 + $0x1e18] sm:$0xff] }
 0x1b0   :  { %5292 = vmatprep.subr.bf16.mxu1 %v5291_v36  ;;  %v945_v57 = vld [vmem:[%s10991_s1 + $0x1c00] sm:$0xff]  ;;  %v8714_v7 = vrot.slane %v5791_v54, %v6168_v23  ;;  %v990_v54 = vld [vmem:[%s10991_s1 + $0x1d68] sm:$0xff]  ;;  %v1016_v32 = vld [vmem:[%s10991_s1 + $0x1e38] sm:$0xff] }
 0x1b1   :  { %v949_v36 = vld [vmem:[%s10991_s1 + $0x1c20] sm:$0xff]  ;;  %v4547_v59 = vpack.c.bf16 %v990_v54, %v986_v53  ;;  %v1015_v42 = vld [vmem:[%s10991_s1 + $0x1e30] sm:$0xff]  ;;  %v1026_v53 = vld [vmem:[%s10991_s1 + $0x1e88] sm:$0xff] }
 0x1b2   :  { %4510 = vmatpush1.bf16.msra.mxu0 %v4509_v1  ;;  %v956_v1 = vld [vmem:[%s10991_s1 + $0x1c58] sm:$0xff]  ;;  %v1810_v19 = vcombine.high %v8711_v5, %v8714_v7  ;;  %v1030_v54 = vld [vmem:[%s10991_s1 + $0x1ea8] sm:$0xff] }
 0x1b3   :  { %5294 = vmatpush1.bf16.msra.mxu1 %v5293_v2  ;;  %4512 = vmatprep.subr.bf16.mxu0 %v4511_v8  ;;  %v960_v2 = vld [vmem:[%s10991_s1 + $0x1c78] sm:$0xff]  ;;  %v1807_v8 = vcombine.low %v8311_v29, %v8314_v30  ;;  %v955_v29 = vld [vmem:[%s10991_s1 + $0x1c50] sm:$0xff] }
 0x1b4   :  { %5296 = vmatprep.subr.bf16.mxu1 %v5295_v3  ;;  %v4529_v3 = vpack.c.bf16 %v949_v36, %v945_v57  ;;  %v5315_v12 = vpack.c.bf16 %v960_v2, %v956_v1  ;;  %v959_v30 = vld [vmem:[%s10991_s1 + $0x1c70] sm:$0xff]  ;;  %v5329_v36 = vpack.c.bf16 %v983_v52, %v979_v51  ;;  %v994_v1 = vld [vmem:[%s10991_s1 + $0x1d88] sm:$0xff] }
 0x1b5   :  { %v998_v2 = vld [vmem:[%s10991_s1 + $0x1da8] sm:$0xff]  ;;  %v1019_v51 = vld [vmem:[%s10991_s1 + $0x1e50] sm:$0xff] }
 0x1b6   :  { %4514 = vmatpush1.bf16.msra.mxu0 %v4513_v14  ;;  %v966_v14 = vld [vmem:[%s10991_s1 + $0x1ca8] sm:$0xff]  ;;  %v1023_v52 = vld [vmem:[%s10991_s1 + $0x1e70] sm:$0xff] }
 0x1b7   :  { %5298 = vmatpush1.bf16.msra.mxu1 %v5297_v15  ;;  %4516 = vmatprep.subr.bf16.mxu0 %v4515_v20  ;;  %v964_v15 = vld [vmem:[%s10991_s1 + $0x1c98] sm:$0xff]  ;;  %v4533_v20 = vpack.c.bf16 %v957_v10, %v953_v9  ;;  %v4535_v25 = vpack.c.bf16 %v966_v14, %v962_v13  ;;  %v5333_v9 = vpack.c.bf16 %v991_v0, %v987_v63  ;;  %v993_v10 = vld [vmem:[%s10991_s1 + $0x1d80] sm:$0xff]  ;;  %v999_v13 = vld [vmem:[%s10991_s1 + $0x1db0] sm:$0xff] }
 0x1b8   :  { %5300 = vmatprep.subr.bf16.mxu1 %v5299_v21  ;;  %v5317_v21 = vpack.c.bf16 %v959_v30, %v955_v29  ;;  %v5319_v61 = vpack.c.bf16 %v968_v18, %v964_v15  ;;  %v995_v30 = vld [vmem:[%s10991_s1 + $0x1d90] sm:$0xff]  ;;  %v1002_v14 = vld [vmem:[%s10991_s1 + $0x1dc8] sm:$0xff]  ;;  %v1004_v18 = vld [vmem:[%s10991_s1 + $0x1dd8] sm:$0xff] }
 0x1b9   :  { %v1006_v15 = vld [vmem:[%s10991_s1 + $0x1de8] sm:$0xff]  ;;  %v1027_v63 = vld [vmem:[%s10991_s1 + $0x1e90] sm:$0xff] }
 0x1ba   :  { %4518 = vmatpush1.bf16.msra.mxu0 %v4517_v27  ;;  %v970_v27 = vld [vmem:[%s10991_s1 + $0x1cc8] sm:$0xff]  ;;  %v1031_v0 = vld [vmem:[%s10991_s1 + $0x1eb0] sm:$0xff] }
 0x1bb   :  { %5302 = vmatpush1.bf16.msra.mxu1 %v5301_v28  ;;  %4520 = vmatprep.subr.bf16.mxu0 %v4519_v33  ;;  %v974_v28 = vld [vmem:[%s10991_s1 + $0x1ce8] sm:$0xff]  ;;  %v4537_v33 = vpack.c.bf16 %v965_v24, %v961_v22  ;;  %v1001_v22 = vld [vmem:[%s10991_s1 + $0x1dc0] sm:$0xff] }
 0x1bc   :  { %5304 = vmatprep.subr.bf16.mxu1 %v5303_v34  ;;  %v5321_v34 = vpack.c.bf16 %v967_v26, %v963_v62  ;;  %v4539_v39 = vpack.c.bf16 %v974_v28, %v970_v27  ;;  %v1005_v24 = vld [vmem:[%s10991_s1 + $0x1de0] sm:$0xff]  ;;  %v1003_v62 = vld [vmem:[%s10991_s1 + $0x1dd0] sm:$0xff]  ;;  %v1010_v27 = vld [vmem:[%s10991_s1 + $0x1e08] sm:$0xff] }
 0x1bd   :  { %v1007_v26 = vld [vmem:[%s10991_s1 + $0x1df0] sm:$0xff]  ;;  %v1014_v28 = vld [vmem:[%s10991_s1 + $0x1e28] sm:$0xff] }
 0x1be   :  { %4522 = vmatpush1.bf16.msra.mxu0 %v4521_v16  ;;  %v982_v16 = vld [vmem:[%s10991_s1 + $0x1d28] sm:$0xff] }
 0x1bf   :  { %5306 = vmatpush1.bf16.msra.mxu1 %v5305_v17  ;;  %4524 = vmatprep.subr.bf16.mxu0 %v4523_v47  ;;  %v980_v17 = vld [vmem:[%s10991_s1 + $0x1d18] sm:$0xff]  ;;  %v977_v47 = vld [vmem:[%s10991_s1 + $0x1d00] sm:$0xff]  ;;  %v4543_v49 = vpack.c.bf16 %v982_v16, %v978_v43  ;;  %v1018_v43 = vld [vmem:[%s10991_s1 + $0x1e48] sm:$0xff] }
 0x1c0   :  { %5308 = vmatprep.subr.bf16.mxu1 %v5307_v48  ;;  %v981_v48 = vld [vmem:[%s10991_s1 + $0x1d20] sm:$0xff]  ;;  %v5327_v50 = vpack.c.bf16 %v984_v44, %v980_v17  ;;  %v1022_v16 = vld [vmem:[%s10991_s1 + $0x1e68] sm:$0xff]  ;;  %v1020_v17 = vld [vmem:[%s10991_s1 + $0x1e58] sm:$0xff] }
 0x1c1   :  { %v4545_v57 = vpack.c.bf16 %v981_v48, %v977_v47  ;;  %v1024_v44 = vld [vmem:[%s10991_s1 + $0x1e78] sm:$0xff]  ;;  %v1017_v47 = vld [vmem:[%s10991_s1 + $0x1e40] sm:$0xff] }
 0x1c2   :  { %4526 = vmatpush1.bf16.msra.mxu0 %v4525_v55  ;;  %v988_v55 = vld [vmem:[%s10991_s1 + $0x1d58] sm:$0xff]  ;;  %v1021_v48 = vld [vmem:[%s10991_s1 + $0x1e60] sm:$0xff] }
 0x1c3   :  { %5310 = vmatpush1.bf16.msra.mxu1 %v5309_v56  ;;  %4528 = vmatprep.subr.bf16.mxu0 %v4527_v37  ;;  %v992_v56 = vld [vmem:[%s10991_s1 + $0x1d78] sm:$0xff]  ;;  %v985_v37 = vld [vmem:[%s10991_s1 + $0x1d40] sm:$0xff] }
 0x1c4   :  { %5312 = vmatprep.subr.bf16.mxu1 %v5311_v58  ;;  %v989_v58 = vld [vmem:[%s10991_s1 + $0x1d60] sm:$0xff]  ;;  %v5331_v60 = vpack.c.bf16 %v992_v56, %v988_v55  ;;  %v1028_v55 = vld [vmem:[%s10991_s1 + $0x1e98] sm:$0xff] }
 0x1c5   :  { %2418 = vmatmul.mubr.f32.vlgmr.msra.gmra.mrb[0].mxu0 %v1807_v8  ;;  %v1032_v56 = vld [vmem:[%s10991_s1 + $0x1eb8] sm:$0xff] }
 0x1c6   :  { %3341 = vmatmul.mubr.f32.vlgmr.msra.gmra.mrb[0].mxu1 %v1807_v8  ;;  %4530 = vmatpush1.bf16.msra.mxu0 %v4529_v3  ;;  %v996_v8 = vld [vmem:[%s10991_s1 + $0x1d98] sm:$0xff] }
 0x1c7   :  { %5314 = vmatpush1.bf16.msra.mxu1 %v5313_v4  ;;  %4532 = vmatprep.subr.bf16.mxu0 %v4531_v11  ;;  %v1000_v3 = vld [vmem:[%s10991_s1 + $0x1db8] sm:$0xff]  ;;  %v4549_v4 = vpack.c.bf16 %v989_v58, %v985_v37  ;;  %v997_v11 = vld [vmem:[%s10991_s1 + $0x1da0] sm:$0xff] }
 0x1c8   :  { %5316 = vmatprep.subr.bf16.mxu1 %v5315_v12  ;;  %2488 = vmatprep.mubr.f32.mxu0 %v1810_v19  ;;  %v4551_v12 = vpack.c.bf16 %v998_v2, %v994_v1  ;;  %v5335_v29 = vpack.c.bf16 %v1000_v3, %v996_v8  ;;  %v1025_v37 = vld [vmem:[%s10991_s1 + $0x1e80] sm:$0xff]  ;;  %v1034_v1 = vld [vmem:[%s10991_s1 + $0x1ec8] sm:$0xff]  ;;  %v1036_v8 = vld [vmem:[%s10991_s1 + $0x1ed8] sm:$0xff] }
 0x1c9   :  { %3411 = vmatprep.mubr.f32.mxu1 %v1810_v19  ;;  %v1008_v19 = vld [vmem:[%s10991_s1 + $0x1df8] sm:$0xff]  ;;  %v1029_v58 = vld [vmem:[%s10991_s1 + $0x1ea0] sm:$0xff]  ;;  %v1038_v2 = vld [vmem:[%s10991_s1 + $0x1ee8] sm:$0xff] }
 0x1ca   :  { %4534 = vmatpush1.bf16.msra.mxu0 %v4533_v20  ;;  %v4553_v20 = vpack.c.bf16 %v997_v11, %v993_v10  ;;  %v1040_v3 = vld [vmem:[%s10991_s1 + $0x1ef8] sm:$0xff]  ;;  %v1033_v10 = vld [vmem:[%s10991_s1 + $0x1ec0] sm:$0xff] }
 0x1cb   :  { %5318 = vmatpush1.bf16.msra.mxu1 %v5317_v21  ;;  %4536 = vmatprep.subr.bf16.mxu0 %v4535_v25  ;;  %v5337_v21 = vpack.c.bf16 %v999_v13, %v995_v30  ;;  %v4555_v25 = vpack.c.bf16 %v1006_v15, %v1002_v14  ;;  %v1037_v11 = vld [vmem:[%s10991_s1 + $0x1ee0] sm:$0xff]  ;;  %v1035_v30 = vld [vmem:[%s10991_s1 + $0x1ed0] sm:$0xff]  ;;  %v1042_v14 = vld [vmem:[%s10991_s1 + $0x1f08] sm:$0xff] }
 0x1cc   :  { %5320 = vmatprep.subr.bf16.mxu1 %v5319_v61  ;;  %v5339_v61 = vpack.c.bf16 %v1008_v19, %v1004_v18  ;;  %v1039_v13 = vld [vmem:[%s10991_s1 + $0x1ef0] sm:$0xff]  ;;  %v1046_v15 = vld [vmem:[%s10991_s1 + $0x1f28] sm:$0xff]  ;;  %v1044_v18 = vld [vmem:[%s10991_s1 + $0x1f18] sm:$0xff] }
 0x1cd   :  { %v1048_v19 = vld [vmem:[%s10991_s1 + $0x1f38] sm:$0xff] }
 0x1ce   :  { %4538 = vmatpush1.bf16.msra.mxu0 %v4537_v33  ;;  %v4557_v33 = vpack.c.bf16 %v1005_v24, %v1001_v22  ;;  %v1041_v22 = vld [vmem:[%s10991_s1 + $0x1f00] sm:$0xff] }
 0x1cf   :  { %5322 = vmatpush1.bf16.msra.mxu1 %v5321_v34  ;;  %4540 = vmatprep.subr.bf16.mxu0 %v4539_v39  ;;  %v5341_v34 = vpack.c.bf16 %v1007_v26, %v1003_v62  ;;  %v4559_v39 = vpack.c.bf16 %v1014_v28, %v1010_v27  ;;  %v1045_v24 = vld [vmem:[%s10991_s1 + $0x1f20] sm:$0xff]  ;;  %v1043_v62 = vld [vmem:[%s10991_s1 + $0x1f10] sm:$0xff]  ;;  %v1050_v27 = vld [vmem:[%s10991_s1 + $0x1f48] sm:$0xff] }
 0x1d0   :  { %5324 = vmatprep.subr.bf16.mxu1 %v5323_v40  ;;  %v5343_v40 = vpack.c.bf16 %v1016_v32, %v1012_v31  ;;  %v1047_v26 = vld [vmem:[%s10991_s1 + $0x1f30] sm:$0xff]  ;;  %v1054_v28 = vld [vmem:[%s10991_s1 + $0x1f68] sm:$0xff]  ;;  %v1052_v31 = vld [vmem:[%s10991_s1 + $0x1f58] sm:$0xff] }
 0x1d1   :  { %v1056_v32 = vld [vmem:[%s10991_s1 + $0x1f78] sm:$0xff] }
 0x1d2   :  { %4542 = vmatpush1.bf16.msra.mxu0 %v4541_v45  ;;  %v4561_v45 = vpack.c.bf16 %v1013_v35, %v1009_v38  ;;  %v1049_v38 = vld [vmem:[%s10991_s1 + $0x1f40] sm:$0xff] }
 0x1d3   :  { %5326 = vmatpush1.bf16.msra.mxu1 %v5325_v46  ;;  %4544 = vmatprep.subr.bf16.mxu0 %v4543_v49  ;;  %v5345_v46 = vpack.c.bf16 %v1015_v42, %v1011_v41  ;;  %v4563_v49 = vpack.c.bf16 %v1022_v16, %v1018_v43  ;;  %v1053_v35 = vld [vmem:[%s10991_s1 + $0x1f60] sm:$0xff]  ;;  %v1051_v41 = vld [vmem:[%s10991_s1 + $0x1f50] sm:$0xff]  ;;  %v1058_v43 = vld [vmem:[%s10991_s1 + $0x1f88] sm:$0xff] }
 0x1d4   :  { %5328 = vmatprep.subr.bf16.mxu1 %v5327_v50  ;;  %v5347_v50 = vpack.c.bf16 %v1024_v44, %v1020_v17  ;;  %v1055_v42 = vld [vmem:[%s10991_s1 + $0x1f70] sm:$0xff]  ;;  %v1062_v16 = vld [vmem:[%s10991_s1 + $0x1fa8] sm:$0xff]  ;;  %v1060_v17 = vld [vmem:[%s10991_s1 + $0x1f98] sm:$0xff] }
 0x1d5   :  { %v1064_v44 = vld [vmem:[%s10991_s1 + $0x1fb8] sm:$0xff] }
 0x1d6   :  { %4546 = vmatpush1.bf16.msra.mxu0 %v4545_v57  ;;  %v4565_v57 = vpack.c.bf16 %v1021_v48, %v1017_v47  ;;  %v1057_v47 = vld [vmem:[%s10991_s1 + $0x1f80] sm:$0xff] }
 0x1d7   :  { %5330 = vmatpush1.bf16.msra.mxu1 %v5329_v36  ;;  %4548 = vmatprep.subr.bf16.mxu0 %v4547_v59  ;;  %v5349_v36 = vpack.c.bf16 %v1023_v52, %v1019_v51  ;;  %v4567_v59 = vpack.c.bf16 %v1030_v54, %v1026_v53  ;;  %v1061_v48 = vld [vmem:[%s10991_s1 + $0x1fa0] sm:$0xff]  ;;  %v1059_v51 = vld [vmem:[%s10991_s1 + $0x1f90] sm:$0xff]  ;;  %v1066_v53 = vld [vmem:[%s10991_s1 + $0x1fc8] sm:$0xff] }
 0x1d8   :  { %5332 = vmatprep.subr.bf16.mxu1 %v5331_v60  ;;  %v5351_v60 = vpack.c.bf16 %v1032_v56, %v1028_v55  ;;  %v1063_v52 = vld [vmem:[%s10991_s1 + $0x1fb0] sm:$0xff]  ;;  %v1070_v54 = vld [vmem:[%s10991_s1 + $0x1fe8] sm:$0xff]  ;;  %v1068_v55 = vld [vmem:[%s10991_s1 + $0x1fd8] sm:$0xff] }
 0x1d9   :  { %v1072_v56 = vld [vmem:[%s10991_s1 + $0x1ff8] sm:$0xff] }
 0x1da   :  { %4550 = vmatpush1.bf16.msra.mxu0 %v4549_v4  ;;  %v4569_v4 = vpack.c.bf16 %v1029_v58, %v1025_v37  ;;  %v5369_v37 = vpack.c.bf16 %v1063_v52, %v1059_v51  ;;  %v1069_v58 = vld [vmem:[%s10991_s1 + $0x1fe0] sm:$0xff] }
 0x1db   :  { %5334 = vmatpush1.bf16.msra.mxu1 %v5333_v9  ;;  %4552 = vmatprep.subr.bf16.mxu0 %v4551_v12  ;;  %v5353_v9 = vpack.c.bf16 %v1031_v0, %v1027_v63  ;;  %v4571_v12 = vpack.c.bf16 %v1038_v2, %v1034_v1  ;;  %v4587_v63 = vpack.c.bf16 %v1070_v54, %v1066_v53  ;;  %v1074_v1 = vld [vmem:[%s10991_s1 + $0x2008] sm:$0xff]  ;;  %v1097_v51 = vld [vmem:[%s10991_s1 + $0x20c0] sm:$0xff] }
 0x1dc   :  { %5336 = vmatprep.subr.bf16.mxu1 %v5335_v29  ;;  %v5355_v29 = vpack.c.bf16 %v1040_v3, %v1036_v8  ;;  %v5371_v0 = vpack.c.bf16 %v1072_v56, %v1068_v55  ;;  %v1078_v2 = vld [vmem:[%s10991_s1 + $0x2028] sm:$0xff]  ;;  %v1076_v8 = vld [vmem:[%s10991_s1 + $0x2018] sm:$0xff]  ;;  %v1101_v52 = vld [vmem:[%s10991_s1 + $0x20e0] sm:$0xff] }
 0x1dd   :  { %v1080_v3 = vld [vmem:[%s10991_s1 + $0x2038] sm:$0xff]  ;;  %v1099_v55 = vld [vmem:[%s10991_s1 + $0x20d0] sm:$0xff] }
 0x1de   :  { %4554 = vmatpush1.bf16.msra.mxu0 %v4553_v20  ;;  %v4573_v20 = vpack.c.bf16 %v1037_v11, %v1033_v10  ;;  %v1103_v56 = vld [vmem:[%s10991_s1 + $0x20f0] sm:$0xff] }
 0x1df   :  { %5338 = vmatpush1.bf16.msra.mxu1 %v5337_v21  ;;  %4556 = vmatprep.subr.bf16.mxu0 %v4555_v25  ;;  %v5357_v21 = vpack.c.bf16 %v1039_v13, %v1035_v30  ;;  %v4575_v25 = vpack.c.bf16 %v1046_v15, %v1042_v14  ;;  %v4591_v30 = vpack.c.bf16 %v1078_v2, %v1074_v1  ;;  %v1075_v14 = vld [vmem:[%s10991_s1 + $0x2010] sm:$0xff] }
 0x1e0   :  { %5340 = vmatprep.subr.bf16.mxu1 %v5339_v61  ;;  %v5359_v61 = vpack.c.bf16 %v1048_v19, %v1044_v18  ;;  %v5375_v13 = vpack.c.bf16 %v1080_v3, %v1076_v8  ;;  %v1079_v15 = vld [vmem:[%s10991_s1 + $0x2030] sm:$0xff]  ;;  %v1082_v18 = vld [vmem:[%s10991_s1 + $0x2048] sm:$0xff] }
 0x1e1   :  { %v1086_v19 = vld [vmem:[%s10991_s1 + $0x2068] sm:$0xff]  ;;  %v1107_v8 = vld [vmem:[%s10991_s1 + $0x2110] sm:$0xff] }
 0x1e2   :  { %4558 = vmatpush1.bf16.msra.mxu0 %v4557_v33  ;;  %v4577_v33 = vpack.c.bf16 %v1045_v24, %v1041_v22  ;;  %v1111_v3 = vld [vmem:[%s10991_s1 + $0x2130] sm:$0xff] }
 0x1e3   :  { %5342 = vmatpush1.bf16.msra.mxu1 %v5341_v34  ;;  %4560 = vmatprep.subr.bf16.mxu0 %v4559_v39  ;;  %v5361_v34 = vpack.c.bf16 %v1047_v26, %v1043_v62  ;;  %v4579_v39 = vpack.c.bf16 %v1054_v28, %v1050_v27  ;;  %v5377_v62 = vpack.c.bf16 %v1079_v15, %v1075_v14  ;;  %v1081_v26 = vld [vmem:[%s10991_s1 + $0x2040] sm:$0xff] }
 0x1e4   :  { %5344 = vmatprep.subr.bf16.mxu1 %v5343_v40  ;;  %v5363_v40 = vpack.c.bf16 %v1056_v32, %v1052_v31  ;;  %v1085_v27 = vld [vmem:[%s10991_s1 + $0x2060] sm:$0xff]  ;;  %v4595_v28 = vpack.c.bf16 %v1086_v19, %v1082_v18  ;;  %v1090_v32 = vld [vmem:[%s10991_s1 + $0x2088] sm:$0xff]  ;;  %v1115_v18 = vld [vmem:[%s10991_s1 + $0x2150] sm:$0xff] }
 0x1e5   :  { %v1119_v19 = vld [vmem:[%s10991_s1 + $0x2170] sm:$0xff] }
 0x1e6   :  { %4562 = vmatpush1.bf16.msra.mxu0 %v4561_v45  ;;  %v4581_v45 = vpack.c.bf16 %v1053_v35, %v1049_v38  ;;  %v1096_v38 = vld [vmem:[%s10991_s1 + $0x20b8] sm:$0xff] }
 0x1e7   :  { %5346 = vmatpush1.bf16.msra.mxu1 %v5345_v46  ;;  %4564 = vmatprep.subr.bf16.mxu0 %v4563_v49  ;;  %v5365_v46 = vpack.c.bf16 %v1055_v42, %v1051_v41  ;;  %v4583_v49 = vpack.c.bf16 %v1062_v16, %v1058_v43  ;;  %v1089_v41 = vld [vmem:[%s10991_s1 + $0x2080] sm:$0xff] }
 0x1e8   :  { %5348 = vmatprep.subr.bf16.mxu1 %v5347_v50  ;;  %v5367_v50 = vpack.c.bf16 %v1064_v44, %v1060_v17  ;;  %v1093_v42 = vld [vmem:[%s10991_s1 + $0x20a0] sm:$0xff]  ;;  %v1091_v17 = vld [vmem:[%s10991_s1 + $0x2090] sm:$0xff] }
 0x1e9   :  { %v1095_v44 = vld [vmem:[%s10991_s1 + $0x20b0] sm:$0xff] }
 0x1ea   :  { %4566 = vmatpush1.bf16.msra.mxu0 %v4565_v57  ;;  %v1065_v57 = vld [vmem:[%s10991_s1 + $0x1fc0] sm:$0xff] }
 0x1eb   :  { %5350 = vmatpush1.bf16.msra.mxu1 %v5349_v36  ;;  %4568 = vmatprep.subr.bf16.mxu0 %v4567_v59  ;;  %v4585_v36 = vpack.c.bf16 %v1061_v48, %v1057_v47  ;;  %v1067_v59 = vld [vmem:[%s10991_s1 + $0x1fd0] sm:$0xff]  ;;  %v4589_v10 = vpack.c.bf16 %v1069_v58, %v1065_v57  ;;  %v1100_v47 = vld [vmem:[%s10991_s1 + $0x20d8] sm:$0xff]  ;;  %v1106_v57 = vld [vmem:[%s10991_s1 + $0x2108] sm:$0xff] }
 0x1ec   :  { %5352 = vmatprep.subr.bf16.mxu1 %v5351_v60  ;;  %v1071_v60 = vld [vmem:[%s10991_s1 + $0x1ff0] sm:$0xff]  ;;  %v1104_v48 = vld [vmem:[%s10991_s1 + $0x20f8] sm:$0xff] }
 0x1ed   :  { %v5373_v11 = vpack.c.bf16 %v1071_v60, %v1067_v59  ;;  %v5387_v54 = vpack.c.bf16 %v1104_v48, %v1100_v47  ;;  %v1112_v58 = vld [vmem:[%s10991_s1 + $0x2138] sm:$0xff]  ;;  %v4605_v59 = vpack.c.bf16 %v1101_v52, %v1097_v51  ;;  %v5389_v60 = vpack.c.bf16 %v1103_v56, %v1099_v55  ;;  %v1137_v51 = vld [vmem:[%s10991_s1 + $0x2200] sm:$0xff]  ;;  %v1139_v55 = vld [vmem:[%s10991_s1 + $0x2210] sm:$0xff] }
 0x1ee   :  { %4570 = vmatpush1.bf16.msra.mxu0 %v4569_v4  ;;  %v5792_v4 = vld [vmem:[%s10990_s0 + $0x20] ss:$50 sps:$4 sm:$0xff]   ;;  %v1140_v47 = vld [vmem:[%s10991_s1 + $0x2218] sm:$0xff] }
 0x1ef   :  { %5354 = vmatpush1.bf16.msra.mxu1 %v5353_v9  ;;  %4572 = vmatprep.subr.bf16.mxu0 %v4571_v12  ;;  %v5794_v9 = vld [vmem:[%s10990_s0 + $0x84] ss:$50 sps:$4 sm:$0xff]   ;;  %v9111_v22 = vrot.slane %v5792_v4, %v6168_v23  ;;  %v1114_v4 = vld [vmem:[%s10991_s1 + $0x2148] sm:$0xff] }
 0x1f0   :  { %5356 = vmatprep.subr.bf16.mxu1 %v5355_v29  ;;  %v1073_v12 = vld [vmem:[%s10991_s1 + $0x2000] sm:$0xff]  ;;  %v9114_v24 = vrot.slane %v5794_v9, %v6168_v23  ;;  %v1118_v9 = vld [vmem:[%s10991_s1 + $0x2168] sm:$0xff]  ;;  %v1144_v48 = vld [vmem:[%s10991_s1 + $0x2238] sm:$0xff] }
 0x1f1   :  { %v1077_v29 = vld [vmem:[%s10991_s1 + $0x2020] sm:$0xff]  ;;  %v4611_v14 = vpack.c.bf16 %v1118_v9, %v1114_v4  ;;  %v1143_v56 = vld [vmem:[%s10991_s1 + $0x2230] sm:$0xff]  ;;  %v1154_v4 = vld [vmem:[%s10991_s1 + $0x2288] sm:$0xff] }
 0x1f2   :  { %4574 = vmatpush1.bf16.msra.mxu0 %v4573_v20  ;;  %v1084_v20 = vld [vmem:[%s10991_s1 + $0x2058] sm:$0xff]  ;;  %v1844_v35 = vcombine.high %v9111_v22, %v9114_v24  ;;  %v1141_v52 = vld [vmem:[%s10991_s1 + $0x2220] sm:$0xff]  ;;  %v1158_v9 = vld [vmem:[%s10991_s1 + $0x22a8] sm:$0xff] }
 0x1f3   :  { %5358 = vmatpush1.bf16.msra.mxu1 %v5357_v21  ;;  %4576 = vmatprep.subr.bf16.mxu0 %v4575_v25  ;;  %v1088_v21 = vld [vmem:[%s10991_s1 + $0x2078] sm:$0xff]  ;;  %v1809_v25 = vcombine.low %v8711_v5, %v8714_v7  ;;  %v1083_v5 = vld [vmem:[%s10991_s1 + $0x2050] sm:$0xff] }
 0x1f4   :  { %5360 = vmatprep.subr.bf16.mxu1 %v5359_v61  ;;  %v4593_v61 = vpack.c.bf16 %v1077_v29, %v1073_v12  ;;  %v5379_v31 = vpack.c.bf16 %v1088_v21, %v1084_v20  ;;  %v1087_v7 = vld [vmem:[%s10991_s1 + $0x2070] sm:$0xff]  ;;  %v5393_v29 = vpack.c.bf16 %v1111_v3, %v1107_v8  ;;  %v1122_v20 = vld [vmem:[%s10991_s1 + $0x2188] sm:$0xff] }
 0x1f5   :  { %v1126_v21 = vld [vmem:[%s10991_s1 + $0x21a8] sm:$0xff]  ;;  %v1147_v8 = vld [vmem:[%s10991_s1 + $0x2250] sm:$0xff] }
 0x1f6   :  { %4578 = vmatpush1.bf16.msra.mxu0 %v4577_v33  ;;  %v1094_v33 = vld [vmem:[%s10991_s1 + $0x20a8] sm:$0xff]  ;;  %v1151_v3 = vld [vmem:[%s10991_s1 + $0x2270] sm:$0xff] }
 0x1f7   :  { %5362 = vmatpush1.bf16.msra.mxu1 %v5361_v34  ;;  %4580 = vmatprep.subr.bf16.mxu0 %v4579_v39  ;;  %v1092_v34 = vld [vmem:[%s10991_s1 + $0x2098] sm:$0xff]  ;;  %v4597_v39 = vpack.c.bf16 %v1085_v27, %v1081_v26  ;;  %v4599_v43 = vpack.c.bf16 %v1094_v33, %v1090_v32  ;;  %v5397_v26 = vpack.c.bf16 %v1119_v19, %v1115_v18  ;;  %v1121_v27 = vld [vmem:[%s10991_s1 + $0x2180] sm:$0xff]  ;;  %v1127_v32 = vld [vmem:[%s10991_s1 + $0x21b0] sm:$0xff] }
 0x1f8   :  { %5364 = vmatprep.subr.bf16.mxu1 %v5363_v40  ;;  %v5381_v40 = vpack.c.bf16 %v1087_v7, %v1083_v5  ;;  %v5383_v16 = vpack.c.bf16 %v1096_v38, %v1092_v34  ;;  %v1123_v7 = vld [vmem:[%s10991_s1 + $0x2190] sm:$0xff]  ;;  %v1130_v33 = vld [vmem:[%s10991_s1 + $0x21c8] sm:$0xff]  ;;  %v1132_v38 = vld [vmem:[%s10991_s1 + $0x21d8] sm:$0xff] }
 0x1f9   :  { %v1134_v34 = vld [vmem:[%s10991_s1 + $0x21e8] sm:$0xff]  ;;  %v1155_v18 = vld [vmem:[%s10991_s1 + $0x2290] sm:$0xff] }
 0x1fa   :  { %4582 = vmatpush1.bf16.msra.mxu0 %v4581_v45  ;;  %v1098_v45 = vld [vmem:[%s10991_s1 + $0x20c8] sm:$0xff]  ;;  %v1159_v19 = vld [vmem:[%s10991_s1 + $0x22b0] sm:$0xff] }
 0x1fb   :  { %5366 = vmatpush1.bf16.msra.mxu1 %v5365_v46  ;;  %4584 = vmatprep.subr.bf16.mxu0 %v4583_v49  ;;  %v1102_v46 = vld [vmem:[%s10991_s1 + $0x20e8] sm:$0xff]  ;;  %v4601_v49 = vpack.c.bf16 %v1093_v42, %v1089_v41  ;;  %v1129_v41 = vld [vmem:[%s10991_s1 + $0x21c0] sm:$0xff] }
 0x1fc   :  { %5368 = vmatprep.subr.bf16.mxu1 %v5367_v50  ;;  %v5385_v50 = vpack.c.bf16 %v1095_v44, %v1091_v17  ;;  %v4603_v53 = vpack.c.bf16 %v1102_v46, %v1098_v45  ;;  %v1133_v42 = vld [vmem:[%s10991_s1 + $0x21e0] sm:$0xff]  ;;  %v1131_v17 = vld [vmem:[%s10991_s1 + $0x21d0] sm:$0xff]  ;;  %v1138_v45 = vld [vmem:[%s10991_s1 + $0x2208] sm:$0xff] }
 0x1fd   :  { %v1135_v44 = vld [vmem:[%s10991_s1 + $0x21f0] sm:$0xff]  ;;  %v1142_v46 = vld [vmem:[%s10991_s1 + $0x2228] sm:$0xff] }
 0x1fe   :  { %4586 = vmatpush1.bf16.msra.mxu0 %v4585_v36  ;;  %v1110_v36 = vld [vmem:[%s10991_s1 + $0x2128] sm:$0xff] }
 0x1ff   :  { %5370 = vmatpush1.bf16.msra.mxu1 %v5369_v37  ;;  %4588 = vmatprep.subr.bf16.mxu0 %v4587_v63  ;;  %v1108_v37 = vld [vmem:[%s10991_s1 + $0x2118] sm:$0xff]  ;;  %v1105_v63 = vld [vmem:[%s10991_s1 + $0x2100] sm:$0xff]  ;;  %v4607_v1 = vpack.c.bf16 %v1110_v36, %v1106_v57  ;;  %v1146_v57 = vld [vmem:[%s10991_s1 + $0x2248] sm:$0xff] }
 0x200   :  { %5372 = vmatprep.subr.bf16.mxu1 %v5371_v0  ;;  %v1109_v0 = vld [vmem:[%s10991_s1 + $0x2120] sm:$0xff]  ;;  %v5391_v2 = vpack.c.bf16 %v1112_v58, %v1108_v37  ;;  %v1150_v36 = vld [vmem:[%s10991_s1 + $0x2268] sm:$0xff]  ;;  %v1148_v37 = vld [vmem:[%s10991_s1 + $0x2258] sm:$0xff] }
 0x201   :  { %v4609_v12 = vpack.c.bf16 %v1109_v0, %v1105_v63  ;;  %v1152_v58 = vld [vmem:[%s10991_s1 + $0x2278] sm:$0xff]  ;;  %v1145_v63 = vld [vmem:[%s10991_s1 + $0x2240] sm:$0xff] }
 0x202   :  { %4590 = vmatpush1.bf16.msra.mxu0 %v4589_v10  ;;  %v1116_v10 = vld [vmem:[%s10991_s1 + $0x2158] sm:$0xff]  ;;  %v1149_v0 = vld [vmem:[%s10991_s1 + $0x2260] sm:$0xff] }
 0x203   :  { %5374 = vmatpush1.bf16.msra.mxu1 %v5373_v11  ;;  %4592 = vmatprep.subr.bf16.mxu0 %v4591_v30  ;;  %v1120_v11 = vld [vmem:[%s10991_s1 + $0x2178] sm:$0xff]  ;;  %v1113_v30 = vld [vmem:[%s10991_s1 + $0x2140] sm:$0xff] }
 0x204   :  { %5376 = vmatprep.subr.bf16.mxu1 %v5375_v13  ;;  %v1117_v13 = vld [vmem:[%s10991_s1 + $0x2160] sm:$0xff]  ;;  %v5395_v15 = vpack.c.bf16 %v1120_v11, %v1116_v10  ;;  %v1156_v10 = vld [vmem:[%s10991_s1 + $0x2298] sm:$0xff] }
 0x205   :  { %2489 = vmatmul.mubr.f32.vlgmr.msra.gmra.mrb[0].mxu0 %v1809_v25  ;;  %v1160_v11 = vld [vmem:[%s10991_s1 + $0x22b8] sm:$0xff] }
 0x206   :  { %3412 = vmatmul.mubr.f32.vlgmr.msra.gmra.mrb[0].mxu1 %v1809_v25  ;;  %4594 = vmatpush1.bf16.msra.mxu0 %v4593_v61  ;;  %v1124_v25 = vld [vmem:[%s10991_s1 + $0x2198] sm:$0xff] }
 0x207   :  { %5378 = vmatpush1.bf16.msra.mxu1 %v5377_v62  ;;  %4596 = vmatprep.subr.bf16.mxu0 %v4595_v28  ;;  %v1128_v61 = vld [vmem:[%s10991_s1 + $0x21b8] sm:$0xff]  ;;  %v4613_v62 = vpack.c.bf16 %v1117_v13, %v1113_v30  ;;  %v1125_v28 = vld [vmem:[%s10991_s1 + $0x21a0] sm:$0xff] }
 0x208   :  { %5380 = vmatprep.subr.bf16.mxu1 %v5379_v31  ;;  %2559 = vmatprep.mubr.f32.mxu0 %v1844_v35  ;;  %v4615_v31 = vpack.c.bf16 %v1126_v21, %v1122_v20  ;;  %v5399_v5 = vpack.c.bf16 %v1128_v61, %v1124_v25  ;;  %v1153_v30 = vld [vmem:[%s10991_s1 + $0x2280] sm:$0xff]  ;;  %v1162_v20 = vld [vmem:[%s10991_s1 + $0x22c8] sm:$0xff]  ;;  %v1164_v25 = vld [vmem:[%s10991_s1 + $0x22d8] sm:$0xff] }
 0x209   :  { %3482 = vmatprep.mubr.f32.mxu1 %v1844_v35  ;;  %v1136_v35 = vld [vmem:[%s10991_s1 + $0x21f8] sm:$0xff]  ;;  %v1157_v13 = vld [vmem:[%s10991_s1 + $0x22a0] sm:$0xff]  ;;  %v1166_v21 = vld [vmem:[%s10991_s1 + $0x22e8] sm:$0xff] }
 0x20a   :  { %4598 = vmatpush1.bf16.msra.mxu0 %v4597_v39  ;;  %v4617_v39 = vpack.c.bf16 %v1125_v28, %v1121_v27  ;;  %v1168_v61 = vld [vmem:[%s10991_s1 + $0x22f8] sm:$0xff]  ;;  %v1161_v27 = vld [vmem:[%s10991_s1 + $0x22c0] sm:$0xff] }
 0x20b   :  { %5382 = vmatpush1.bf16.msra.mxu1 %v5381_v40  ;;  %4600 = vmatprep.subr.bf16.mxu0 %v4599_v43  ;;  %v5401_v40 = vpack.c.bf16 %v1127_v32, %v1123_v7  ;;  %v4619_v43 = vpack.c.bf16 %v1134_v34, %v1130_v33  ;;  %v1165_v28 = vld [vmem:[%s10991_s1 + $0x22e0] sm:$0xff]  ;;  %v1163_v7 = vld [vmem:[%s10991_s1 + $0x22d0] sm:$0xff]  ;;  %v1170_v33 = vld [vmem:[%s10991_s1 + $0x2308] sm:$0xff] }
 0x20c   :  { %5384 = vmatprep.subr.bf16.mxu1 %v5383_v16  ;;  %v5403_v16 = vpack.c.bf16 %v1136_v35, %v1132_v38  ;;  %v1167_v32 = vld [vmem:[%s10991_s1 + $0x22f0] sm:$0xff]  ;;  %v1174_v34 = vld [vmem:[%s10991_s1 + $0x2328] sm:$0xff]  ;;  %v1172_v38 = vld [vmem:[%s10991_s1 + $0x2318] sm:$0xff] }
 0x20d   :  { %v1176_v35 = vld [vmem:[%s10991_s1 + $0x2338] sm:$0xff] }
 0x20e   :  { %4602 = vmatpush1.bf16.msra.mxu0 %v4601_v49  ;;  %v4621_v49 = vpack.c.bf16 %v1133_v42, %v1129_v41  ;;  %v1169_v41 = vld [vmem:[%s10991_s1 + $0x2300] sm:$0xff] }
 0x20f   :  { %5386 = vmatpush1.bf16.msra.mxu1 %v5385_v50  ;;  %4604 = vmatprep.subr.bf16.mxu0 %v4603_v53  ;;  %v5405_v50 = vpack.c.bf16 %v1135_v44, %v1131_v17  ;;  %v4623_v53 = vpack.c.bf16 %v1142_v46, %v1138_v45  ;;  %v1173_v42 = vld [vmem:[%s10991_s1 + $0x2320] sm:$0xff]  ;;  %v1171_v17 = vld [vmem:[%s10991_s1 + $0x2310] sm:$0xff]  ;;  %v1178_v45 = vld [vmem:[%s10991_s1 + $0x2348] sm:$0xff] }
 0x210   :  { %5388 = vmatprep.subr.bf16.mxu1 %v5387_v54  ;;  %v5407_v54 = vpack.c.bf16 %v1144_v48, %v1140_v47  ;;  %v1175_v44 = vld [vmem:[%s10991_s1 + $0x2330] sm:$0xff]  ;;  %v1182_v46 = vld [vmem:[%s10991_s1 + $0x2368] sm:$0xff]  ;;  %v1180_v47 = vld [vmem:[%s10991_s1 + $0x2358] sm:$0xff] }
 0x211   :  { %v1184_v48 = vld [vmem:[%s10991_s1 + $0x2378] sm:$0xff] }
 0x212   :  { %4606 = vmatpush1.bf16.msra.mxu0 %v4605_v59  ;;  %v4625_v59 = vpack.c.bf16 %v1141_v52, %v1137_v51  ;;  %v1177_v51 = vld [vmem:[%s10991_s1 + $0x2340] sm:$0xff] }
 0x213   :  { %5390 = vmatpush1.bf16.msra.mxu1 %v5389_v60  ;;  %4608 = vmatprep.subr.bf16.mxu0 %v4607_v1  ;;  %v5409_v60 = vpack.c.bf16 %v1143_v56, %v1139_v55  ;;  %v4627_v1 = vpack.c.bf16 %v1150_v36, %v1146_v57  ;;  %v1181_v52 = vld [vmem:[%s10991_s1 + $0x2360] sm:$0xff]  ;;  %v1179_v55 = vld [vmem:[%s10991_s1 + $0x2350] sm:$0xff]  ;;  %v1186_v57 = vld [vmem:[%s10991_s1 + $0x2388] sm:$0xff] }
 0x214   :  { %5392 = vmatprep.subr.bf16.mxu1 %v5391_v2  ;;  %v5411_v2 = vpack.c.bf16 %v1152_v58, %v1148_v37  ;;  %v1183_v56 = vld [vmem:[%s10991_s1 + $0x2370] sm:$0xff]  ;;  %v1190_v36 = vld [vmem:[%s10991_s1 + $0x23a8] sm:$0xff]  ;;  %v1188_v37 = vld [vmem:[%s10991_s1 + $0x2398] sm:$0xff] }
 0x215   :  { %v1192_v58 = vld [vmem:[%s10991_s1 + $0x23b8] sm:$0xff] }
 0x216   :  { %4610 = vmatpush1.bf16.msra.mxu0 %v4609_v12  ;;  %v4629_v12 = vpack.c.bf16 %v1149_v0, %v1145_v63  ;;  %v1185_v63 = vld [vmem:[%s10991_s1 + $0x2380] sm:$0xff] }
 0x217   :  { %5394 = vmatpush1.bf16.msra.mxu1 %v5393_v29  ;;  %4612 = vmatprep.subr.bf16.mxu0 %v4611_v14  ;;  %v5413_v29 = vpack.c.bf16 %v1151_v3, %v1147_v8  ;;  %v4631_v14 = vpack.c.bf16 %v1158_v9, %v1154_v4  ;;  %v1189_v0 = vld [vmem:[%s10991_s1 + $0x23a0] sm:$0xff]  ;;  %v1187_v8 = vld [vmem:[%s10991_s1 + $0x2390] sm:$0xff]  ;;  %v1194_v4 = vld [vmem:[%s10991_s1 + $0x23c8] sm:$0xff] }
 0x218   :  { %5396 = vmatprep.subr.bf16.mxu1 %v5395_v15  ;;  %v5415_v15 = vpack.c.bf16 %v1160_v11, %v1156_v10  ;;  %v1191_v3 = vld [vmem:[%s10991_s1 + $0x23b0] sm:$0xff]  ;;  %v1198_v9 = vld [vmem:[%s10991_s1 + $0x23e8] sm:$0xff]  ;;  %v1196_v10 = vld [vmem:[%s10991_s1 + $0x23d8] sm:$0xff] }
 0x219   :  { %v1200_v11 = vld [vmem:[%s10991_s1 + $0x23f8] sm:$0xff] }
 0x21a   :  { %4614 = vmatpush1.bf16.msra.mxu0 %v4613_v62  ;;  %v4633_v62 = vpack.c.bf16 %v1157_v13, %v1153_v30  ;;  %v5433_v30 = vpack.c.bf16 %v1191_v3, %v1187_v8  ;;  %v1197_v13 = vld [vmem:[%s10991_s1 + $0x23e0] sm:$0xff] }
 0x21b   :  { %5398 = vmatpush1.bf16.msra.mxu1 %v5397_v26  ;;  %4616 = vmatprep.subr.bf16.mxu0 %v4615_v31  ;;  %v5417_v26 = vpack.c.bf16 %v1159_v19, %v1155_v18  ;;  %v4635_v31 = vpack.c.bf16 %v1166_v21, %v1162_v20  ;;  %v4651_v18 = vpack.c.bf16 %v1198_v9, %v1194_v4  ;;  %v1202_v20 = vld [vmem:[%s10991_s1 + $0x2408] sm:$0xff]  ;;  %v1225_v8 = vld [vmem:[%s10991_s1 + $0x24c0] sm:$0xff] }
 0x21c   :  { %5400 = vmatprep.subr.bf16.mxu1 %v5399_v5  ;;  %v5419_v5 = vpack.c.bf16 %v1168_v61, %v1164_v25  ;;  %v5435_v19 = vpack.c.bf16 %v1200_v11, %v1196_v10  ;;  %v1206_v21 = vld [vmem:[%s10991_s1 + $0x2428] sm:$0xff]  ;;  %v1204_v25 = vld [vmem:[%s10991_s1 + $0x2418] sm:$0xff]  ;;  %v1229_v3 = vld [vmem:[%s10991_s1 + $0x24e0] sm:$0xff] }
 0x21d   :  { %v1208_v61 = vld [vmem:[%s10991_s1 + $0x2438] sm:$0xff]  ;;  %v1227_v10 = vld [vmem:[%s10991_s1 + $0x24d0] sm:$0xff] }
 0x21e   :  { %4618 = vmatpush1.bf16.msra.mxu0 %v4617_v39  ;;  %v4637_v39 = vpack.c.bf16 %v1165_v28, %v1161_v27  ;;  %v1231_v11 = vld [vmem:[%s10991_s1 + $0x24f0] sm:$0xff] }
 0x21f   :  { %5402 = vmatpush1.bf16.msra.mxu1 %v5401_v40  ;;  %4620 = vmatprep.subr.bf16.mxu0 %v4619_v43  ;;  %v5421_v40 = vpack.c.bf16 %v1167_v32, %v1163_v7  ;;  %v4639_v43 = vpack.c.bf16 %v1174_v34, %v1170_v33  ;;  %v4655_v7 = vpack.c.bf16 %v1206_v21, %v1202_v20  ;;  %v1203_v33 = vld [vmem:[%s10991_s1 + $0x2410] sm:$0xff] }
 0x220   :  { %5404 = vmatprep.subr.bf16.mxu1 %v5403_v16  ;;  %v5423_v16 = vpack.c.bf16 %v1176_v35, %v1172_v38  ;;  %v5439_v32 = vpack.c.bf16 %v1208_v61, %v1204_v25  ;;  %v1207_v34 = vld [vmem:[%s10991_s1 + $0x2430] sm:$0xff]  ;;  %v1210_v38 = vld [vmem:[%s10991_s1 + $0x2448] sm:$0xff] }
 0x221   :  { %v1214_v35 = vld [vmem:[%s10991_s1 + $0x2468] sm:$0xff]  ;;  %v1235_v25 = vld [vmem:[%s10991_s1 + $0x2510] sm:$0xff] }
 0x222   :  { %4622 = vmatpush1.bf16.msra.mxu0 %v4621_v49  ;;  %v4641_v49 = vpack.c.bf16 %v1173_v42, %v1169_v41  ;;  %v1239_v61 = vld [vmem:[%s10991_s1 + $0x2530] sm:$0xff] }
 0x223   :  { %5406 = vmatpush1.bf16.msra.mxu1 %v5405_v50  ;;  %4624 = vmatprep.subr.bf16.mxu0 %v4623_v53  ;;  %v5425_v50 = vpack.c.bf16 %v1175_v44, %v1171_v17  ;;  %v4643_v53 = vpack.c.bf16 %v1182_v46, %v1178_v45  ;;  %v5441_v17 = vpack.c.bf16 %v1207_v34, %v1203_v33  ;;  %v1209_v44 = vld [vmem:[%s10991_s1 + $0x2440] sm:$0xff] }
 0x224   :  { %5408 = vmatprep.subr.bf16.mxu1 %v5407_v54  ;;  %v5427_v54 = vpack.c.bf16 %v1184_v48, %v1180_v47  ;;  %v1213_v45 = vld [vmem:[%s10991_s1 + $0x2460] sm:$0xff]  ;;  %v4659_v46 = vpack.c.bf16 %v1214_v35, %v1210_v38  ;;  %v1218_v48 = vld [vmem:[%s10991_s1 + $0x2488] sm:$0xff]  ;;  %v1243_v38 = vld [vmem:[%s10991_s1 + $0x2550] sm:$0xff] }
 0x225   :  { %v1247_v35 = vld [vmem:[%s10991_s1 + $0x2570] sm:$0xff] }
 0x226   :  { %4626 = vmatpush1.bf16.msra.mxu0 %v4625_v59  ;;  %v4645_v59 = vpack.c.bf16 %v1181_v52, %v1177_v51  ;;  %v1224_v51 = vld [vmem:[%s10991_s1 + $0x24b8] sm:$0xff] }
 0x227   :  { %5410 = vmatpush1.bf16.msra.mxu1 %v5409_v60  ;;  %4628 = vmatprep.subr.bf16.mxu0 %v4627_v1  ;;  %v5429_v60 = vpack.c.bf16 %v1183_v56, %v1179_v55  ;;  %v4647_v1 = vpack.c.bf16 %v1190_v36, %v1186_v57  ;;  %v1217_v55 = vld [vmem:[%s10991_s1 + $0x2480] sm:$0xff] }
 0x228   :  { %5412 = vmatprep.subr.bf16.mxu1 %v5411_v2  ;;  %v5431_v2 = vpack.c.bf16 %v1192_v58, %v1188_v37  ;;  %v1221_v56 = vld [vmem:[%s10991_s1 + $0x24a0] sm:$0xff]  ;;  %v1219_v37 = vld [vmem:[%s10991_s1 + $0x2490] sm:$0xff] }
 0x229   :  { %v1223_v58 = vld [vmem:[%s10991_s1 + $0x24b0] sm:$0xff] }
 0x22a   :  { %4630 = vmatpush1.bf16.msra.mxu0 %v4629_v12  ;;  %v1193_v12 = vld [vmem:[%s10991_s1 + $0x23c0] sm:$0xff] }
 0x22b   :  { %5414 = vmatpush1.bf16.msra.mxu1 %v5413_v29  ;;  %4632 = vmatprep.subr.bf16.mxu0 %v4631_v14  ;;  %v4649_v29 = vpack.c.bf16 %v1189_v0, %v1185_v63  ;;  %v1195_v14 = vld [vmem:[%s10991_s1 + $0x23d0] sm:$0xff]  ;;  %v4653_v27 = vpack.c.bf16 %v1197_v13, %v1193_v12  ;;  %v1228_v63 = vld [vmem:[%s10991_s1 + $0x24d8] sm:$0xff]  ;;  %v1234_v12 = vld [vmem:[%s10991_s1 + $0x2508] sm:$0xff] }
 0x22c   :  { %5416 = vmatprep.subr.bf16.mxu1 %v5415_v15  ;;  %v1199_v15 = vld [vmem:[%s10991_s1 + $0x23f0] sm:$0xff]  ;;  %v1232_v0 = vld [vmem:[%s10991_s1 + $0x24f8] sm:$0xff] }
 0x22d   :  { %v5437_v28 = vpack.c.bf16 %v1199_v15, %v1195_v14  ;;  %v5451_v9 = vpack.c.bf16 %v1232_v0, %v1228_v63  ;;  %v1240_v13 = vld [vmem:[%s10991_s1 + $0x2538] sm:$0xff]  ;;  %v4669_v14 = vpack.c.bf16 %v1229_v3, %v1225_v8  ;;  %v5453_v15 = vpack.c.bf16 %v1231_v11, %v1227_v10  ;;  %v1265_v8 = vld [vmem:[%s10991_s1 + $0x2600] sm:$0xff]  ;;  %v1267_v10 = vld [vmem:[%s10991_s1 + $0x2610] sm:$0xff] }
 0x22e   :  { %4634 = vmatpush1.bf16.msra.mxu0 %v4633_v62  ;;  %v5796_v62 = vld [vmem:[%s10990_s0 + $0x24] ss:$50 sps:$4 sm:$0xff]  }
 0x22f   :  { %5418 = vmatpush1.bf16.msra.mxu1 %v5417_v26  ;;  %4636 = vmatprep.subr.bf16.mxu0 %v4635_v31  ;;  %v5797_v26 = vld [vmem:[%s10990_s0 + $0x88] ss:$50 sps:$4 sm:$0xff]   ;;  %v1201_v31 = vld [vmem:[%s10991_s1 + $0x2400] sm:$0xff]  ;;  %v9511_v41 = vrot.slane %v5796_v62, %v6168_v23  ;;  %v1271_v11 = vld [vmem:[%s10991_s1 + $0x2630] sm:$0xff] }
 0x230   :  { %5420 = vmatprep.subr.bf16.mxu1 %v5419_v5  ;;  %v1205_v5 = vld [vmem:[%s10991_s1 + $0x2420] sm:$0xff]  ;;  %v9514_v42 = vrot.slane %v5797_v26, %v6168_v23  ;;  %v1242_v62 = vld [vmem:[%s10991_s1 + $0x2548] sm:$0xff]  ;;  %v1268_v63 = vld [vmem:[%s10991_s1 + $0x2618] sm:$0xff] }
 0x231   :  { %v1246_v26 = vld [vmem:[%s10991_s1 + $0x2568] sm:$0xff]  ;;  %v1272_v0 = vld [vmem:[%s10991_s1 + $0x2638] sm:$0xff]  ;;  %v1269_v3 = vld [vmem:[%s10991_s1 + $0x2620] sm:$0xff] }
 0x232   :  { %4638 = vmatpush1.bf16.msra.mxu0 %v4637_v39  ;;  %v1212_v39 = vld [vmem:[%s10991_s1 + $0x2458] sm:$0xff]  ;;  %v1846_v52 = vcombine.high %v9511_v41, %v9514_v42  ;;  %v4675_v33 = vpack.c.bf16 %v1246_v26, %v1242_v62  ;;  %v1282_v62 = vld [vmem:[%s10991_s1 + $0x2688] sm:$0xff] }
 0x233   :  { %5422 = vmatpush1.bf16.msra.mxu1 %v5421_v40  ;;  %4640 = vmatprep.subr.bf16.mxu0 %v4639_v43  ;;  %v1216_v40 = vld [vmem:[%s10991_s1 + $0x2478] sm:$0xff]  ;;  %v1843_v43 = vcombine.low %v9111_v22, %v9114_v24  ;;  %v1211_v22 = vld [vmem:[%s10991_s1 + $0x2450] sm:$0xff]  ;;  %v1286_v26 = vld [vmem:[%s10991_s1 + $0x26a8] sm:$0xff] }
 0x234   :  { %5424 = vmatprep.subr.bf16.mxu1 %v5423_v16  ;;  %v4657_v16 = vpack.c.bf16 %v1205_v5, %v1201_v31  ;;  %v5443_v47 = vpack.c.bf16 %v1216_v40, %v1212_v39  ;;  %v1215_v24 = vld [vmem:[%s10991_s1 + $0x2470] sm:$0xff]  ;;  %v5457_v5 = vpack.c.bf16 %v1239_v61, %v1235_v25  ;;  %v1250_v39 = vld [vmem:[%s10991_s1 + $0x2588] sm:$0xff] }
 0x235   :  { %v1254_v40 = vld [vmem:[%s10991_s1 + $0x25a8] sm:$0xff]  ;;  %v1275_v25 = vld [vmem:[%s10991_s1 + $0x2650] sm:$0xff] }
 0x236   :  { %4642 = vmatpush1.bf16.msra.mxu0 %v4641_v49  ;;  %v1222_v49 = vld [vmem:[%s10991_s1 + $0x24a8] sm:$0xff]  ;;  %v1279_v61 = vld [vmem:[%s10991_s1 + $0x2670] sm:$0xff] }
 0x237   :  { %5426 = vmatpush1.bf16.msra.mxu1 %v5425_v50  ;;  %4644 = vmatprep.subr.bf16.mxu0 %v4643_v53  ;;  %v1220_v50 = vld [vmem:[%s10991_s1 + $0x2498] sm:$0xff]  ;;  %v4661_v53 = vpack.c.bf16 %v1213_v45, %v1209_v44  ;;  %v4663_v57 = vpack.c.bf16 %v1222_v49, %v1218_v48  ;;  %v5461_v44 = vpack.c.bf16 %v1247_v35, %v1243_v38  ;;  %v1249_v45 = vld [vmem:[%s10991_s1 + $0x2580] sm:$0xff]  ;;  %v1255_v48 = vld [vmem:[%s10991_s1 + $0x25b0] sm:$0xff] }
 0x238   :  { %5428 = vmatprep.subr.bf16.mxu1 %v5427_v54  ;;  %v5445_v54 = vpack.c.bf16 %v1215_v24, %v1211_v22  ;;  %v5447_v36 = vpack.c.bf16 %v1224_v51, %v1220_v50  ;;  %v1251_v24 = vld [vmem:[%s10991_s1 + $0x2590] sm:$0xff]  ;;  %v1258_v49 = vld [vmem:[%s10991_s1 + $0x25c8] sm:$0xff]  ;;  %v1260_v51 = vld [vmem:[%s10991_s1 + $0x25d8] sm:$0xff] }
 0x239   :  { %v1262_v50 = vld [vmem:[%s10991_s1 + $0x25e8] sm:$0xff]  ;;  %v1283_v38 = vld [vmem:[%s10991_s1 + $0x2690] sm:$0xff] }
 0x23a   :  { %4646 = vmatpush1.bf16.msra.mxu0 %v4645_v59  ;;  %v1226_v59 = vld [vmem:[%s10991_s1 + $0x24c8] sm:$0xff]  ;;  %v1287_v35 = vld [vmem:[%s10991_s1 + $0x26b0] sm:$0xff] }
 0x23b   :  { %5430 = vmatpush1.bf16.msra.mxu1 %v5429_v60  ;;  %4648 = vmatprep.subr.bf16.mxu0 %v4647_v1  ;;  %v1230_v60 = vld [vmem:[%s10991_s1 + $0x24e8] sm:$0xff]  ;;  %v4665_v1 = vpack.c.bf16 %v1221_v56, %v1217_v55  ;;  %v1257_v55 = vld [vmem:[%s10991_s1 + $0x25c0] sm:$0xff] }
 0x23c   :  { %5432 = vmatprep.subr.bf16.mxu1 %v5431_v2  ;;  %v5449_v2 = vpack.c.bf16 %v1223_v58, %v1219_v37  ;;  %v4667_v4 = vpack.c.bf16 %v1230_v60, %v1226_v59  ;;  %v1261_v56 = vld [vmem:[%s10991_s1 + $0x25e0] sm:$0xff]  ;;  %v1259_v37 = vld [vmem:[%s10991_s1 + $0x25d0] sm:$0xff]  ;;  %v1266_v59 = vld [vmem:[%s10991_s1 + $0x2608] sm:$0xff] }
 0x23d   :  { %v1263_v58 = vld [vmem:[%s10991_s1 + $0x25f0] sm:$0xff]  ;;  %v1270_v60 = vld [vmem:[%s10991_s1 + $0x2628] sm:$0xff] }
 0x23e   :  { %4650 = vmatpush1.bf16.msra.mxu0 %v4649_v29  ;;  %v1238_v29 = vld [vmem:[%s10991_s1 + $0x2528] sm:$0xff] }
 0x23f   :  { %5434 = vmatpush1.bf16.msra.mxu1 %v5433_v30  ;;  %4652 = vmatprep.subr.bf16.mxu0 %v4651_v18  ;;  %v1236_v30 = vld [vmem:[%s10991_s1 + $0x2518] sm:$0xff]  ;;  %v1233_v18 = vld [vmem:[%s10991_s1 + $0x2500] sm:$0xff]  ;;  %v4671_v20 = vpack.c.bf16 %v1238_v29, %v1234_v12  ;;  %v1274_v12 = vld [vmem:[%s10991_s1 + $0x2648] sm:$0xff] }
 0x240   :  { %5436 = vmatprep.subr.bf16.mxu1 %v5435_v19  ;;  %v1237_v19 = vld [vmem:[%s10991_s1 + $0x2520] sm:$0xff]  ;;  %v5455_v21 = vpack.c.bf16 %v1240_v13, %v1236_v30  ;;  %v1278_v29 = vld [vmem:[%s10991_s1 + $0x2668] sm:$0xff]  ;;  %v1276_v30 = vld [vmem:[%s10991_s1 + $0x2658] sm:$0xff] }
 0x241   :  { %v4673_v31 = vpack.c.bf16 %v1237_v19, %v1233_v18  ;;  %v1280_v13 = vld [vmem:[%s10991_s1 + $0x2678] sm:$0xff]  ;;  %v1273_v18 = vld [vmem:[%s10991_s1 + $0x2640] sm:$0xff] }
 0x242   :  { %4654 = vmatpush1.bf16.msra.mxu0 %v4653_v27  ;;  %v1244_v27 = vld [vmem:[%s10991_s1 + $0x2558] sm:$0xff]  ;;  %v1277_v19 = vld [vmem:[%s10991_s1 + $0x2660] sm:$0xff] }
 0x243   :  { %5438 = vmatpush1.bf16.msra.mxu1 %v5437_v28  ;;  %4656 = vmatprep.subr.bf16.mxu0 %v4655_v7  ;;  %v1248_v28 = vld [vmem:[%s10991_s1 + $0x2578] sm:$0xff]  ;;  %v1241_v7 = vld [vmem:[%s10991_s1 + $0x2540] sm:$0xff] }
 0x244   :  { %5440 = vmatprep.subr.bf16.mxu1 %v5439_v32  ;;  %v1245_v32 = vld [vmem:[%s10991_s1 + $0x2560] sm:$0xff]  ;;  %v5459_v34 = vpack.c.bf16 %v1248_v28, %v1244_v27  ;;  %v1284_v27 = vld [vmem:[%s10991_s1 + $0x2698] sm:$0xff] }
 0x245   :  { %2560 = vmatmul.mubr.f32.vlgmr.msra.gmra.mrb[0].mxu0 %v1843_v43  ;;  %v1288_v28 = vld [vmem:[%s10991_s1 + $0x26b8] sm:$0xff] }
 0x246   :  { %3483 = vmatmul.mubr.f32.vlgmr.msra.gmra.mrb[0].mxu1 %v1843_v43  ;;  %4658 = vmatpush1.bf16.msra.mxu0 %v4657_v16  ;;  %v1252_v43 = vld [vmem:[%s10991_s1 + $0x2598] sm:$0xff] }
 0x247   :  { %5442 = vmatpush1.bf16.msra.mxu1 %v5441_v17  ;;  %4660 = vmatprep.subr.bf16.mxu0 %v4659_v46  ;;  %v1256_v16 = vld [vmem:[%s10991_s1 + $0x25b8] sm:$0xff]  ;;  %v4677_v17 = vpack.c.bf16 %v1245_v32, %v1241_v7  ;;  %v1253_v46 = vld [vmem:[%s10991_s1 + $0x25a0] sm:$0xff] }
 0x248   :  { %5444 = vmatprep.subr.bf16.mxu1 %v5443_v47  ;;  %2630 = vmatprep.mubr.f32.mxu0 %v1846_v52  ;;  %v4679_v47 = vpack.c.bf16 %v1254_v40, %v1250_v39  ;;  %v5463_v22 = vpack.c.bf16 %v1256_v16, %v1252_v43  ;;  %v1281_v7 = vld [vmem:[%s10991_s1 + $0x2680] sm:$0xff]  ;;  %v1290_v39 = vld [vmem:[%s10991_s1 + $0x26c8] sm:$0xff]  ;;  %v1292_v43 = vld [vmem:[%s10991_s1 + $0x26d8] sm:$0xff] }
 0x249   :  { %3553 = vmatprep.mubr.f32.mxu1 %v1846_v52  ;;  %v1264_v52 = vld [vmem:[%s10991_s1 + $0x25f8] sm:$0xff]  ;;  %v1285_v32 = vld [vmem:[%s10991_s1 + $0x26a0] sm:$0xff]  ;;  %v1294_v40 = vld [vmem:[%s10991_s1 + $0x26e8] sm:$0xff] }
 0x24a   :  { %4662 = vmatpush1.bf16.msra.mxu0 %v4661_v53  ;;  %v4681_v53 = vpack.c.bf16 %v1253_v46, %v1249_v45  ;;  %v1296_v16 = vld [vmem:[%s10991_s1 + $0x26f8] sm:$0xff]  ;;  %v1289_v45 = vld [vmem:[%s10991_s1 + $0x26c0] sm:$0xff] }
 0x24b   :  { %5446 = vmatpush1.bf16.msra.mxu1 %v5445_v54  ;;  %4664 = vmatprep.subr.bf16.mxu0 %v4663_v57  ;;  %v5465_v54 = vpack.c.bf16 %v1255_v48, %v1251_v24  ;;  %v4683_v57 = vpack.c.bf16 %v1262_v50, %v1258_v49  ;;  %v1293_v46 = vld [vmem:[%s10991_s1 + $0x26e0] sm:$0xff]  ;;  %v1291_v24 = vld [vmem:[%s10991_s1 + $0x26d0] sm:$0xff]  ;;  %v1298_v49 = vld [vmem:[%s10991_s1 + $0x2708] sm:$0xff] }
 0x24c   :  { %5448 = vmatprep.subr.bf16.mxu1 %v5447_v36  ;;  %v5467_v36 = vpack.c.bf16 %v1264_v52, %v1260_v51  ;;  %v1295_v48 = vld [vmem:[%s10991_s1 + $0x26f0] sm:$0xff]  ;;  %v1302_v50 = vld [vmem:[%s10991_s1 + $0x2728] sm:$0xff]  ;;  %v1300_v51 = vld [vmem:[%s10991_s1 + $0x2718] sm:$0xff] }
 0x24d   :  { %v1304_v52 = vld [vmem:[%s10991_s1 + $0x2738] sm:$0xff] }
 0x24e   :  { %4666 = vmatpush1.bf16.msra.mxu0 %v4665_v1  ;;  %v4685_v1 = vpack.c.bf16 %v1261_v56, %v1257_v55  ;;  %v1297_v55 = vld [vmem:[%s10991_s1 + $0x2700] sm:$0xff] }
 0x24f   :  { %5450 = vmatpush1.bf16.msra.mxu1 %v5449_v2  ;;  %4668 = vmatprep.subr.bf16.mxu0 %v4667_v4  ;;  %v5469_v2 = vpack.c.bf16 %v1263_v58, %v1259_v37  ;;  %v4687_v4 = vpack.c.bf16 %v1270_v60, %v1266_v59  ;;  %v1301_v56 = vld [vmem:[%s10991_s1 + $0x2720] sm:$0xff]  ;;  %v1299_v37 = vld [vmem:[%s10991_s1 + $0x2710] sm:$0xff]  ;;  %v1306_v59 = vld [vmem:[%s10991_s1 + $0x2748] sm:$0xff] }
 0x250   :  { %5452 = vmatprep.subr.bf16.mxu1 %v5451_v9  ;;  %v5471_v9 = vpack.c.bf16 %v1272_v0, %v1268_v63  ;;  %v1303_v58 = vld [vmem:[%s10991_s1 + $0x2730] sm:$0xff]  ;;  %v1310_v60 = vld [vmem:[%s10991_s1 + $0x2768] sm:$0xff]  ;;  %v1308_v63 = vld [vmem:[%s10991_s1 + $0x2758] sm:$0xff] }
 0x251   :  { %v1312_v0 = vld [vmem:[%s10991_s1 + $0x2778] sm:$0xff] }
 0x252   :  { %4670 = vmatpush1.bf16.msra.mxu0 %v4669_v14  ;;  %v4689_v14 = vpack.c.bf16 %v1269_v3, %v1265_v8  ;;  %v1305_v8 = vld [vmem:[%s10991_s1 + $0x2740] sm:$0xff] }
 0x253   :  { %5454 = vmatpush1.bf16.msra.mxu1 %v5453_v15  ;;  %4672 = vmatprep.subr.bf16.mxu0 %v4671_v20  ;;  %v5473_v15 = vpack.c.bf16 %v1271_v11, %v1267_v10  ;;  %v4691_v20 = vpack.c.bf16 %v1278_v29, %v1274_v12  ;;  %v1309_v3 = vld [vmem:[%s10991_s1 + $0x2760] sm:$0xff]  ;;  %v1307_v10 = vld [vmem:[%s10991_s1 + $0x2750] sm:$0xff]  ;;  %v1314_v12 = vld [vmem:[%s10991_s1 + $0x2788] sm:$0xff] }
 0x254   :  { %5456 = vmatprep.subr.bf16.mxu1 %v5455_v21  ;;  %v5475_v21 = vpack.c.bf16 %v1280_v13, %v1276_v30  ;;  %v1311_v11 = vld [vmem:[%s10991_s1 + $0x2770] sm:$0xff]  ;;  %v1318_v29 = vld [vmem:[%s10991_s1 + $0x27a8] sm:$0xff]  ;;  %v1316_v30 = vld [vmem:[%s10991_s1 + $0x2798] sm:$0xff] }
 0x255   :  { %v1320_v13 = vld [vmem:[%s10991_s1 + $0x27b8] sm:$0xff] }
 0x256   :  { %4674 = vmatpush1.bf16.msra.mxu0 %v4673_v31  ;;  %v4693_v31 = vpack.c.bf16 %v1277_v19, %v1273_v18  ;;  %v1313_v18 = vld [vmem:[%s10991_s1 + $0x2780] sm:$0xff] }
 0x257   :  { %5458 = vmatpush1.bf16.msra.mxu1 %v5457_v5  ;;  %4676 = vmatprep.subr.bf16.mxu0 %v4675_v33  ;;  %v5477_v5 = vpack.c.bf16 %v1279_v61, %v1275_v25  ;;  %v4695_v33 = vpack.c.bf16 %v1286_v26, %v1282_v62  ;;  %v1317_v19 = vld [vmem:[%s10991_s1 + $0x27a0] sm:$0xff]  ;;  %v1315_v25 = vld [vmem:[%s10991_s1 + $0x2790] sm:$0xff]  ;;  %v1322_v62 = vld [vmem:[%s10991_s1 + $0x27c8] sm:$0xff] }
 0x258   :  { %5460 = vmatprep.subr.bf16.mxu1 %v5459_v34  ;;  %v5479_v34 = vpack.c.bf16 %v1288_v28, %v1284_v27  ;;  %v1319_v61 = vld [vmem:[%s10991_s1 + $0x27b0] sm:$0xff]  ;;  %v1326_v26 = vld [vmem:[%s10991_s1 + $0x27e8] sm:$0xff]  ;;  %v1324_v27 = vld [vmem:[%s10991_s1 + $0x27d8] sm:$0xff] }
 0x259   :  { %v1328_v28 = vld [vmem:[%s10991_s1 + $0x27f8] sm:$0xff] }
 0x25a   :  { %4678 = vmatpush1.bf16.msra.mxu0 %v4677_v17  ;;  %v4697_v17 = vpack.c.bf16 %v1285_v32, %v1281_v7  ;;  %v5497_v7 = vpack.c.bf16 %v1319_v61, %v1315_v25  ;;  %v1325_v32 = vld [vmem:[%s10991_s1 + $0x27e0] sm:$0xff] }
 0x25b   :  { %5462 = vmatpush1.bf16.msra.mxu1 %v5461_v44  ;;  %4680 = vmatprep.subr.bf16.mxu0 %v4679_v47  ;;  %v5481_v44 = vpack.c.bf16 %v1287_v35, %v1283_v38  ;;  %v4699_v47 = vpack.c.bf16 %v1294_v40, %v1290_v39  ;;  %v4715_v38 = vpack.c.bf16 %v1326_v26, %v1322_v62  ;;  %v1330_v39 = vld [vmem:[%s10991_s1 + $0x2808] sm:$0xff]  ;;  %v1353_v25 = vld [vmem:[%s10991_s1 + $0x28c0] sm:$0xff] }
 0x25c   :  { %5464 = vmatprep.subr.bf16.mxu1 %v5463_v22  ;;  %v5483_v22 = vpack.c.bf16 %v1296_v16, %v1292_v43  ;;  %v5499_v35 = vpack.c.bf16 %v1328_v28, %v1324_v27  ;;  %v1334_v40 = vld [vmem:[%s10991_s1 + $0x2828] sm:$0xff]  ;;  %v1332_v43 = vld [vmem:[%s10991_s1 + $0x2818] sm:$0xff]  ;;  %v1357_v61 = vld [vmem:[%s10991_s1 + $0x28e0] sm:$0xff] }
 0x25d   :  { %v1336_v16 = vld [vmem:[%s10991_s1 + $0x2838] sm:$0xff]  ;;  %v1355_v27 = vld [vmem:[%s10991_s1 + $0x28d0] sm:$0xff] }
 0x25e   :  { %4682 = vmatpush1.bf16.msra.mxu0 %v4681_v53  ;;  %v4701_v53 = vpack.c.bf16 %v1293_v46, %v1289_v45  ;;  %v1359_v28 = vld [vmem:[%s10991_s1 + $0x28f0] sm:$0xff] }
 0x25f   :  { %5466 = vmatpush1.bf16.msra.mxu1 %v5465_v54  ;;  %4684 = vmatprep.subr.bf16.mxu0 %v4683_v57  ;;  %v5485_v54 = vpack.c.bf16 %v1295_v48, %v1291_v24  ;;  %v4703_v57 = vpack.c.bf16 %v1302_v50, %v1298_v49  ;;  %v4719_v24 = vpack.c.bf16 %v1334_v40, %v1330_v39  ;;  %v1331_v49 = vld [vmem:[%s10991_s1 + $0x2810] sm:$0xff] }
 0x260   :  { %5468 = vmatprep.subr.bf16.mxu1 %v5467_v36  ;;  %v5487_v36 = vpack.c.bf16 %v1304_v52, %v1300_v51  ;;  %v5503_v48 = vpack.c.bf16 %v1336_v16, %v1332_v43  ;;  %v1335_v50 = vld [vmem:[%s10991_s1 + $0x2830] sm:$0xff]  ;;  %v1338_v51 = vld [vmem:[%s10991_s1 + $0x2848] sm:$0xff] }
 0x261   :  { %v1342_v52 = vld [vmem:[%s10991_s1 + $0x2868] sm:$0xff]  ;;  %v1363_v43 = vld [vmem:[%s10991_s1 + $0x2910] sm:$0xff] }
 0x262   :  { %4686 = vmatpush1.bf16.msra.mxu0 %v4685_v1  ;;  %v4705_v1 = vpack.c.bf16 %v1301_v56, %v1297_v55  ;;  %v1367_v16 = vld [vmem:[%s10991_s1 + $0x2930] sm:$0xff] }
 0x263   :  { %5470 = vmatpush1.bf16.msra.mxu1 %v5469_v2  ;;  %4688 = vmatprep.subr.bf16.mxu0 %v4687_v4  ;;  %v5489_v2 = vpack.c.bf16 %v1303_v58, %v1299_v37  ;;  %v4707_v4 = vpack.c.bf16 %v1310_v60, %v1306_v59  ;;  %v5505_v37 = vpack.c.bf16 %v1335_v50, %v1331_v49  ;;  %v1337_v58 = vld [vmem:[%s10991_s1 + $0x2840] sm:$0xff] }
 0x264   :  { %5472 = vmatprep.subr.bf16.mxu1 %v5471_v9  ;;  %v5491_v9 = vpack.c.bf16 %v1312_v0, %v1308_v63  ;;  %v1341_v59 = vld [vmem:[%s10991_s1 + $0x2860] sm:$0xff]  ;;  %v4723_v60 = vpack.c.bf16 %v1342_v52, %v1338_v51  ;;  %v1346_v0 = vld [vmem:[%s10991_s1 + $0x2888] sm:$0xff]  ;;  %v1371_v51 = vld [vmem:[%s10991_s1 + $0x2950] sm:$0xff] }
 0x265   :  { %v1375_v52 = vld [vmem:[%s10991_s1 + $0x2970] sm:$0xff] }
 0x266   :  { %4690 = vmatpush1.bf16.msra.mxu0 %v4689_v14  ;;  %v4709_v14 = vpack.c.bf16 %v1309_v3, %v1305_v8  ;;  %v1352_v8 = vld [vmem:[%s10991_s1 + $0x28b8] sm:$0xff] }
 0x267   :  { %5474 = vmatpush1.bf16.msra.mxu1 %v5473_v15  ;;  %4692 = vmatprep.subr.bf16.mxu0 %v4691_v20  ;;  %v5493_v15 = vpack.c.bf16 %v1311_v11, %v1307_v10  ;;  %v4711_v20 = vpack.c.bf16 %v1318_v29, %v1314_v12  ;;  %v1345_v10 = vld [vmem:[%s10991_s1 + $0x2880] sm:$0xff] }
 0x268   :  { %5476 = vmatprep.subr.bf16.mxu1 %v5475_v21  ;;  %v5495_v21 = vpack.c.bf16 %v1320_v13, %v1316_v30  ;;  %v1349_v11 = vld [vmem:[%s10991_s1 + $0x28a0] sm:$0xff]  ;;  %v1347_v30 = vld [vmem:[%s10991_s1 + $0x2890] sm:$0xff] }
 0x269   :  { %v1351_v13 = vld [vmem:[%s10991_s1 + $0x28b0] sm:$0xff] }
 0x26a   :  { %4694 = vmatpush1.bf16.msra.mxu0 %v4693_v31  ;;  %v1321_v31 = vld [vmem:[%s10991_s1 + $0x27c0] sm:$0xff] }
 0x26b   :  { %5478 = vmatpush1.bf16.msra.mxu1 %v5477_v5  ;;  %4696 = vmatprep.subr.bf16.mxu0 %v4695_v33  ;;  %v4713_v5 = vpack.c.bf16 %v1317_v19, %v1313_v18  ;;  %v1323_v33 = vld [vmem:[%s10991_s1 + $0x27d0] sm:$0xff]  ;;  %v4717_v45 = vpack.c.bf16 %v1325_v32, %v1321_v31  ;;  %v1356_v18 = vld [vmem:[%s10991_s1 + $0x28d8] sm:$0xff]  ;;  %v1362_v31 = vld [vmem:[%s10991_s1 + $0x2908] sm:$0xff] }
 0x26c   :  { %5480 = vmatprep.subr.bf16.mxu1 %v5479_v34  ;;  %v1327_v34 = vld [vmem:[%s10991_s1 + $0x27f0] sm:$0xff]  ;;  %v1360_v19 = vld [vmem:[%s10991_s1 + $0x28f8] sm:$0xff] }
 0x26d   :  { %v5501_v46 = vpack.c.bf16 %v1327_v34, %v1323_v33  ;;  %v5515_v26 = vpack.c.bf16 %v1360_v19, %v1356_v18  ;;  %v1368_v32 = vld [vmem:[%s10991_s1 + $0x2938] sm:$0xff]  ;;  %v4733_v33 = vpack.c.bf16 %v1357_v61, %v1353_v25  ;;  %v5517_v34 = vpack.c.bf16 %v1359_v28, %v1355_v27  ;;  %v1393_v25 = vld [vmem:[%s10991_s1 + $0x2a00] sm:$0xff]  ;;  %v1395_v27 = vld [vmem:[%s10991_s1 + $0x2a10] sm:$0xff] }
 0x26e   :  { %4698 = vmatpush1.bf16.msra.mxu0 %v4697_v17  ;;  %v5798_v17 = vld [vmem:[%s10990_s0 + $0x28] ss:$50 sps:$4 sm:$0xff]   ;;  %v1397_v61 = vld [vmem:[%s10991_s1 + $0x2a20] sm:$0xff]  ;;  %v1399_v28 = vld [vmem:[%s10991_s1 + $0x2a30] sm:$0xff] }
 0x26f   :  { %5482 = vmatpush1.bf16.msra.mxu1 %v5481_v44  ;;  %4700 = vmatprep.subr.bf16.mxu0 %v4699_v47  ;;  %v5800_v44 = vld [vmem:[%s10990_s0 + $0x8c] ss:$50 sps:$4 sm:$0xff]   ;;  %v9911_v55 = vrot.slane %v5798_v17, %v6168_v23 }
 0x270   :  { %5484 = vmatprep.subr.bf16.mxu1 %v5483_v22  ;;  %v1329_v47 = vld [vmem:[%s10991_s1 + $0x2800] sm:$0xff]  ;;  %v9914_v56 = vrot.slane %v5800_v44, %v6168_v23  ;;  %v1370_v17 = vld [vmem:[%s10991_s1 + $0x2948] sm:$0xff]  ;;  %v1396_v18 = vld [vmem:[%s10991_s1 + $0x2a18] sm:$0xff] }
 0x271   :  { %v1333_v22 = vld [vmem:[%s10991_s1 + $0x2820] sm:$0xff]  ;;  %v1374_v44 = vld [vmem:[%s10991_s1 + $0x2968] sm:$0xff]  ;;  %v1400_v19 = vld [vmem:[%s10991_s1 + $0x2a38] sm:$0xff] }
 0x272   :  { %4702 = vmatpush1.bf16.msra.mxu0 %v4701_v53  ;;  %v1340_v53 = vld [vmem:[%s10991_s1 + $0x2858] sm:$0xff]  ;;  %v1880_v3 = vcombine.high %v9911_v55, %v9914_v56  ;;  %v4739_v49 = vpack.c.bf16 %v1374_v44, %v1370_v17  ;;  %v1410_v17 = vld [vmem:[%s10991_s1 + $0x2a88] sm:$0xff] }
 0x273   :  { %5486 = vmatpush1.bf16.msra.mxu1 %v5485_v54  ;;  %4704 = vmatprep.subr.bf16.mxu0 %v4703_v57  ;;  %v1344_v54 = vld [vmem:[%s10991_s1 + $0x2878] sm:$0xff]  ;;  %v1845_v57 = vcombine.low %v9511_v41, %v9514_v42  ;;  %v1339_v41 = vld [vmem:[%s10991_s1 + $0x2850] sm:$0xff]  ;;  %v1414_v44 = vld [vmem:[%s10991_s1 + $0x2aa8] sm:$0xff] }
 0x274   :  { %5488 = vmatprep.subr.bf16.mxu1 %v5487_v36  ;;  %v4721_v36 = vpack.c.bf16 %v1333_v22, %v1329_v47  ;;  %v5507_v63 = vpack.c.bf16 %v1344_v54, %v1340_v53  ;;  %v1343_v42 = vld [vmem:[%s10991_s1 + $0x2870] sm:$0xff]  ;;  %v5521_v22 = vpack.c.bf16 %v1367_v16, %v1363_v43  ;;  %v1378_v53 = vld [vmem:[%s10991_s1 + $0x2988] sm:$0xff] }
 0x275   :  { %v1382_v54 = vld [vmem:[%s10991_s1 + $0x29a8] sm:$0xff]  ;;  %v1403_v43 = vld [vmem:[%s10991_s1 + $0x2a50] sm:$0xff] }
 0x276   :  { %4706 = vmatpush1.bf16.msra.mxu0 %v4705_v1  ;;  %v1350_v1 = vld [vmem:[%s10991_s1 + $0x28a8] sm:$0xff]  ;;  %v1407_v16 = vld [vmem:[%s10991_s1 + $0x2a70] sm:$0xff] }
 0x277   :  { %5490 = vmatpush1.bf16.msra.mxu1 %v5489_v2  ;;  %4708 = vmatprep.subr.bf16.mxu0 %v4707_v4  ;;  %v1348_v2 = vld [vmem:[%s10991_s1 + $0x2898] sm:$0xff]  ;;  %v4725_v4 = vpack.c.bf16 %v1341_v59, %v1337_v58  ;;  %v4727_v12 = vpack.c.bf16 %v1350_v1, %v1346_v0  ;;  %v5525_v58 = vpack.c.bf16 %v1375_v52, %v1371_v51  ;;  %v1377_v59 = vld [vmem:[%s10991_s1 + $0x2980] sm:$0xff]  ;;  %v1383_v0 = vld [vmem:[%s10991_s1 + $0x29b0] sm:$0xff] }
 0x278   :  { %5492 = vmatprep.subr.bf16.mxu1 %v5491_v9  ;;  %v5509_v9 = vpack.c.bf16 %v1343_v42, %v1339_v41  ;;  %v5511_v29 = vpack.c.bf16 %v1352_v8, %v1348_v2  ;;  %v1379_v42 = vld [vmem:[%s10991_s1 + $0x2990] sm:$0xff]  ;;  %v1386_v1 = vld [vmem:[%s10991_s1 + $0x29c8] sm:$0xff]  ;;  %v1388_v8 = vld [vmem:[%s10991_s1 + $0x29d8] sm:$0xff] }
 0x279   :  { %v1390_v2 = vld [vmem:[%s10991_s1 + $0x29e8] sm:$0xff]  ;;  %v1411_v51 = vld [vmem:[%s10991_s1 + $0x2a90] sm:$0xff] }
 0x27a   :  { %4710 = vmatpush1.bf16.msra.mxu0 %v4709_v14  ;;  %v1354_v14 = vld [vmem:[%s10991_s1 + $0x28c8] sm:$0xff]  ;;  %v1415_v52 = vld [vmem:[%s10991_s1 + $0x2ab0] sm:$0xff] }
 0x27b   :  { %5494 = vmatpush1.bf16.msra.mxu1 %v5493_v15  ;;  %4712 = vmatprep.subr.bf16.mxu0 %v4711_v20  ;;  %v1358_v15 = vld [vmem:[%s10991_s1 + $0x28e8] sm:$0xff]  ;;  %v4729_v20 = vpack.c.bf16 %v1349_v11, %v1345_v10  ;;  %v1385_v10 = vld [vmem:[%s10991_s1 + $0x29c0] sm:$0xff] }
 0x27c   :  { %5496 = vmatprep.subr.bf16.mxu1 %v5495_v21  ;;  %v5513_v21 = vpack.c.bf16 %v1351_v13, %v1347_v30  ;;  %v4731_v62 = vpack.c.bf16 %v1358_v15, %v1354_v14  ;;  %v1389_v11 = vld [vmem:[%s10991_s1 + $0x29e0] sm:$0xff]  ;;  %v1387_v30 = vld [vmem:[%s10991_s1 + $0x29d0] sm:$0xff]  ;;  %v1394_v14 = vld [vmem:[%s10991_s1 + $0x2a08] sm:$0xff] }
 0x27d   :  { %v1391_v13 = vld [vmem:[%s10991_s1 + $0x29f0] sm:$0xff]  ;;  %v1398_v15 = vld [vmem:[%s10991_s1 + $0x2a28] sm:$0xff] }
 0x27e   :  { %4714 = vmatpush1.bf16.msra.mxu0 %v4713_v5  ;;  %v1366_v5 = vld [vmem:[%s10991_s1 + $0x2928] sm:$0xff] }
 0x27f   :  { %5498 = vmatpush1.bf16.msra.mxu1 %v5497_v7  ;;  %4716 = vmatprep.subr.bf16.mxu0 %v4715_v38  ;;  %v1364_v7 = vld [vmem:[%s10991_s1 + $0x2918] sm:$0xff]  ;;  %v1361_v38 = vld [vmem:[%s10991_s1 + $0x2900] sm:$0xff]  ;;  %v4735_v39 = vpack.c.bf16 %v1366_v5, %v1362_v31  ;;  %v1402_v31 = vld [vmem:[%s10991_s1 + $0x2a48] sm:$0xff] }
 0x280   :  { %5500 = vmatprep.subr.bf16.mxu1 %v5499_v35  ;;  %v1365_v35 = vld [vmem:[%s10991_s1 + $0x2920] sm:$0xff]  ;;  %v5519_v40 = vpack.c.bf16 %v1368_v32, %v1364_v7  ;;  %v1406_v5 = vld [vmem:[%s10991_s1 + $0x2a68] sm:$0xff]  ;;  %v1404_v7 = vld [vmem:[%s10991_s1 + $0x2a58] sm:$0xff] }
 0x281   :  { %v4737_v47 = vpack.c.bf16 %v1365_v35, %v1361_v38  ;;  %v1408_v32 = vld [vmem:[%s10991_s1 + $0x2a78] sm:$0xff]  ;;  %v1401_v38 = vld [vmem:[%s10991_s1 + $0x2a40] sm:$0xff] }
 0x282   :  { %4718 = vmatpush1.bf16.msra.mxu0 %v4717_v45  ;;  %v1372_v45 = vld [vmem:[%s10991_s1 + $0x2958] sm:$0xff]  ;;  %v1405_v35 = vld [vmem:[%s10991_s1 + $0x2a60] sm:$0xff] }
 0x283   :  { %5502 = vmatpush1.bf16.msra.mxu1 %v5501_v46  ;;  %4720 = vmatprep.subr.bf16.mxu0 %v4719_v24  ;;  %v1376_v46 = vld [vmem:[%s10991_s1 + $0x2978] sm:$0xff]  ;;  %v1369_v24 = vld [vmem:[%s10991_s1 + $0x2940] sm:$0xff] }
 0x284   :  { %5504 = vmatprep.subr.bf16.mxu1 %v5503_v48  ;;  %v1373_v48 = vld [vmem:[%s10991_s1 + $0x2960] sm:$0xff]  ;;  %v5523_v50 = vpack.c.bf16 %v1376_v46, %v1372_v45  ;;  %v1412_v45 = vld [vmem:[%s10991_s1 + $0x2a98] sm:$0xff] }
 0x285   :  { %2631 = vmatmul.mubr.f32.vlgmr.msra.gmra.mrb[0].mxu0 %v1845_v57  ;;  %v1416_v46 = vld [vmem:[%s10991_s1 + $0x2ab8] sm:$0xff] }
 0x286   :  { %3554 = vmatmul.mubr.f32.vlgmr.msra.gmra.mrb[0].mxu1 %v1845_v57  ;;  %4722 = vmatpush1.bf16.msra.mxu0 %v4721_v36  ;;  %v1380_v57 = vld [vmem:[%s10991_s1 + $0x2998] sm:$0xff] }
 0x287   :  { %5506 = vmatpush1.bf16.msra.mxu1 %v5505_v37  ;;  %4724 = vmatprep.subr.bf16.mxu0 %v4723_v60  ;;  %v1384_v36 = vld [vmem:[%s10991_s1 + $0x29b8] sm:$0xff]  ;;  %v4741_v37 = vpack.c.bf16 %v1373_v48, %v1369_v24  ;;  %v1381_v60 = vld [vmem:[%s10991_s1 + $0x29a0] sm:$0xff] }
 0x288   :  { %5508 = vmatprep.subr.bf16.mxu1 %v5507_v63  ;;  %2701 = vmatprep.mubr.f32.mxu0 %v1880_v3  ;;  %v4743_v63 = vpack.c.bf16 %v1382_v54, %v1378_v53  ;;  %v5527_v41 = vpack.c.bf16 %v1384_v36, %v1380_v57  ;;  %v1409_v24 = vld [vmem:[%s10991_s1 + $0x2a80] sm:$0xff]  ;;  %v1418_v53 = vld [vmem:[%s10991_s1 + $0x2ac8] sm:$0xff]  ;;  %v1420_v57 = vld [vmem:[%s10991_s1 + $0x2ad8] sm:$0xff] }
 0x289   :  { %3624 = vmatprep.mubr.f32.mxu1 %v1880_v3  ;;  %v1392_v3 = vld [vmem:[%s10991_s1 + $0x29f8] sm:$0xff]  ;;  %v1413_v48 = vld [vmem:[%s10991_s1 + $0x2aa0] sm:$0xff]  ;;  %v1422_v54 = vld [vmem:[%s10991_s1 + $0x2ae8] sm:$0xff] }
 0x28a   :  { %4726 = vmatpush1.bf16.msra.mxu0 %v4725_v4  ;;  %v4745_v4 = vpack.c.bf16 %v1381_v60, %v1377_v59  ;;  %v1424_v36 = vld [vmem:[%s10991_s1 + $0x2af8] sm:$0xff]  ;;  %v1417_v59 = vld [vmem:[%s10991_s1 + $0x2ac0] sm:$0xff] }
 0x28b   :  { %5510 = vmatpush1.bf16.msra.mxu1 %v5509_v9  ;;  %4728 = vmatprep.subr.bf16.mxu0 %v4727_v12  ;;  %v5529_v9 = vpack.c.bf16 %v1383_v0, %v1379_v42  ;;  %v4747_v12 = vpack.c.bf16 %v1390_v2, %v1386_v1  ;;  %v1421_v60 = vld [vmem:[%s10991_s1 + $0x2ae0] sm:$0xff]  ;;  %v1419_v42 = vld [vmem:[%s10991_s1 + $0x2ad0] sm:$0xff]  ;;  %v1426_v1 = vld [vmem:[%s10991_s1 + $0x2b08] sm:$0xff] }
 0x28c   :  { %5512 = vmatprep.subr.bf16.mxu1 %v5511_v29  ;;  %v5531_v29 = vpack.c.bf16 %v1392_v3, %v1388_v8  ;;  %v1423_v0 = vld [vmem:[%s10991_s1 + $0x2af0] sm:$0xff]  ;;  %v1430_v2 = vld [vmem:[%s10991_s1 + $0x2b28] sm:$0xff]  ;;  %v1428_v8 = vld [vmem:[%s10991_s1 + $0x2b18] sm:$0xff] }
 0x28d   :  { %v1432_v3 = vld [vmem:[%s10991_s1 + $0x2b38] sm:$0xff] }
 0x28e   :  { %4730 = vmatpush1.bf16.msra.mxu0 %v4729_v20  ;;  %v4749_v20 = vpack.c.bf16 %v1389_v11, %v1385_v10  ;;  %v1425_v10 = vld [vmem:[%s10991_s1 + $0x2b00] sm:$0xff] }
 0x28f   :  { %5514 = vmatpush1.bf16.msra.mxu1 %v5513_v21  ;;  %4732 = vmatprep.subr.bf16.mxu0 %v4731_v62  ;;  %v5533_v21 = vpack.c.bf16 %v1391_v13, %v1387_v30  ;;  %v4751_v62 = vpack.c.bf16 %v1398_v15, %v1394_v14  ;;  %v1429_v11 = vld [vmem:[%s10991_s1 + $0x2b20] sm:$0xff]  ;;  %v1427_v30 = vld [vmem:[%s10991_s1 + $0x2b10] sm:$0xff]  ;;  %v1434_v14 = vld [vmem:[%s10991_s1 + $0x2b48] sm:$0xff] }
 0x290   :  { %5516 = vmatprep.subr.bf16.mxu1 %v5515_v26  ;;  %v5535_v26 = vpack.c.bf16 %v1400_v19, %v1396_v18  ;;  %v1431_v13 = vld [vmem:[%s10991_s1 + $0x2b30] sm:$0xff]  ;;  %v1438_v15 = vld [vmem:[%s10991_s1 + $0x2b68] sm:$0xff]  ;;  %v1436_v18 = vld [vmem:[%s10991_s1 + $0x2b58] sm:$0xff] }
 0x291   :  { %v1440_v19 = vld [vmem:[%s10991_s1 + $0x2b78] sm:$0xff] }
 0x292   :  { %4734 = vmatpush1.bf16.msra.mxu0 %v4733_v33  ;;  %v4753_v33 = vpack.c.bf16 %v1397_v61, %v1393_v25  ;;  %v1433_v25 = vld [vmem:[%s10991_s1 + $0x2b40] sm:$0xff] }
 0x293   :  { %5518 = vmatpush1.bf16.msra.mxu1 %v5517_v34  ;;  %4736 = vmatprep.subr.bf16.mxu0 %v4735_v39  ;;  %v5537_v34 = vpack.c.bf16 %v1399_v28, %v1395_v27  ;;  %v4755_v39 = vpack.c.bf16 %v1406_v5, %v1402_v31  ;;  %v1437_v61 = vld [vmem:[%s10991_s1 + $0x2b60] sm:$0xff]  ;;  %v1435_v27 = vld [vmem:[%s10991_s1 + $0x2b50] sm:$0xff]  ;;  %v1442_v31 = vld [vmem:[%s10991_s1 + $0x2b88] sm:$0xff] }
 0x294   :  { %5520 = vmatprep.subr.bf16.mxu1 %v5519_v40  ;;  %v5539_v40 = vpack.c.bf16 %v1408_v32, %v1404_v7  ;;  %v1439_v28 = vld [vmem:[%s10991_s1 + $0x2b70] sm:$0xff]  ;;  %v1446_v5 = vld [vmem:[%s10991_s1 + $0x2ba8] sm:$0xff]  ;;  %v1444_v7 = vld [vmem:[%s10991_s1 + $0x2b98] sm:$0xff] }
 0x295   :  { %v1448_v32 = vld [vmem:[%s10991_s1 + $0x2bb8] sm:$0xff] }
 0x296   :  { %4738 = vmatpush1.bf16.msra.mxu0 %v4737_v47  ;;  %v4757_v47 = vpack.c.bf16 %v1405_v35, %v1401_v38  ;;  %v1441_v38 = vld [vmem:[%s10991_s1 + $0x2b80] sm:$0xff] }
 0x297   :  { %5522 = vmatpush1.bf16.msra.mxu1 %v5521_v22  ;;  %4740 = vmatprep.subr.bf16.mxu0 %v4739_v49  ;;  %v5541_v22 = vpack.c.bf16 %v1407_v16, %v1403_v43  ;;  %v4759_v49 = vpack.c.bf16 %v1414_v44, %v1410_v17  ;;  %v1445_v35 = vld [vmem:[%s10991_s1 + $0x2ba0] sm:$0xff]  ;;  %v1443_v43 = vld [vmem:[%s10991_s1 + $0x2b90] sm:$0xff]  ;;  %v1450_v17 = vld [vmem:[%s10991_s1 + $0x2bc8] sm:$0xff] }
 0x298   :  { %5524 = vmatprep.subr.bf16.mxu1 %v5523_v50  ;;  %v5543_v50 = vpack.c.bf16 %v1416_v46, %v1412_v45  ;;  %v1447_v16 = vld [vmem:[%s10991_s1 + $0x2bb0] sm:$0xff]  ;;  %v1454_v44 = vld [vmem:[%s10991_s1 + $0x2be8] sm:$0xff]  ;;  %v1452_v45 = vld [vmem:[%s10991_s1 + $0x2bd8] sm:$0xff] }
 0x299   :  { %v1456_v46 = vld [vmem:[%s10991_s1 + $0x2bf8] sm:$0xff] }
 0x29a   :  { %4742 = vmatpush1.bf16.msra.mxu0 %v4741_v37  ;;  %v4761_v37 = vpack.c.bf16 %v1413_v48, %v1409_v24  ;;  %v5561_v24 = vpack.c.bf16 %v1447_v16, %v1443_v43  ;;  %v1453_v48 = vld [vmem:[%s10991_s1 + $0x2be0] sm:$0xff] }
 0x29b   :  { %5526 = vmatpush1.bf16.msra.mxu1 %v5525_v58  ;;  %4744 = vmatprep.subr.bf16.mxu0 %v4743_v63  ;;  %v5545_v58 = vpack.c.bf16 %v1415_v52, %v1411_v51  ;;  %v4763_v63 = vpack.c.bf16 %v1422_v54, %v1418_v53  ;;  %v4779_v51 = vpack.c.bf16 %v1454_v44, %v1450_v17  ;;  %v1458_v53 = vld [vmem:[%s10991_s1 + $0x2c08] sm:$0xff]  ;;  %v1481_v43 = vld [vmem:[%s10991_s1 + $0x2cc0] sm:$0xff] }
 0x29c   :  { %5528 = vmatprep.subr.bf16.mxu1 %v5527_v41  ;;  %v5547_v41 = vpack.c.bf16 %v1424_v36, %v1420_v57  ;;  %v5563_v52 = vpack.c.bf16 %v1456_v46, %v1452_v45  ;;  %v1462_v54 = vld [vmem:[%s10991_s1 + $0x2c28] sm:$0xff]  ;;  %v1460_v57 = vld [vmem:[%s10991_s1 + $0x2c18] sm:$0xff]  ;;  %v1485_v16 = vld [vmem:[%s10991_s1 + $0x2ce0] sm:$0xff] }
 0x29d   :  { %v1464_v36 = vld [vmem:[%s10991_s1 + $0x2c38] sm:$0xff]  ;;  %v1483_v45 = vld [vmem:[%s10991_s1 + $0x2cd0] sm:$0xff] }
 0x29e   :  { %4746 = vmatpush1.bf16.msra.mxu0 %v4745_v4  ;;  %v4765_v4 = vpack.c.bf16 %v1421_v60, %v1417_v59  ;;  %v1487_v46 = vld [vmem:[%s10991_s1 + $0x2cf0] sm:$0xff] }
 0x29f   :  { %5530 = vmatpush1.bf16.msra.mxu1 %v5529_v9  ;;  %4748 = vmatprep.subr.bf16.mxu0 %v4747_v12  ;;  %v5549_v9 = vpack.c.bf16 %v1423_v0, %v1419_v42  ;;  %v4767_v12 = vpack.c.bf16 %v1430_v2, %v1426_v1  ;;  %v4783_v42 = vpack.c.bf16 %v1462_v54, %v1458_v53  ;;  %v1459_v1 = vld [vmem:[%s10991_s1 + $0x2c10] sm:$0xff] }
 0x2a0   :  { %5532 = vmatprep.subr.bf16.mxu1 %v5531_v29  ;;  %v5551_v29 = vpack.c.bf16 %v1432_v3, %v1428_v8  ;;  %v5567_v0 = vpack.c.bf16 %v1464_v36, %v1460_v57  ;;  %v1463_v2 = vld [vmem:[%s10991_s1 + $0x2c30] sm:$0xff]  ;;  %v1466_v8 = vld [vmem:[%s10991_s1 + $0x2c48] sm:$0xff] }
 0x2a1   :  { %v1470_v3 = vld [vmem:[%s10991_s1 + $0x2c68] sm:$0xff]  ;;  %v1491_v57 = vld [vmem:[%s10991_s1 + $0x2d10] sm:$0xff] }
 0x2a2   :  { %4750 = vmatpush1.bf16.msra.mxu0 %v4749_v20  ;;  %v4769_v20 = vpack.c.bf16 %v1429_v11, %v1425_v10  ;;  %v1495_v36 = vld [vmem:[%s10991_s1 + $0x2d30] sm:$0xff] }
 0x2a3   :  { %5534 = vmatpush1.bf16.msra.mxu1 %v5533_v21  ;;  %4752 = vmatprep.subr.bf16.mxu0 %v4751_v62  ;;  %v5553_v21 = vpack.c.bf16 %v1431_v13, %v1427_v30  ;;  %v4771_v62 = vpack.c.bf16 %v1438_v15, %v1434_v14  ;;  %v5569_v30 = vpack.c.bf16 %v1463_v2, %v1459_v1  ;;  %v1465_v13 = vld [vmem:[%s10991_s1 + $0x2c40] sm:$0xff] }
 0x2a4   :  { %5536 = vmatprep.subr.bf16.mxu1 %v5535_v26  ;;  %v5555_v26 = vpack.c.bf16 %v1440_v19, %v1436_v18  ;;  %v1469_v14 = vld [vmem:[%s10991_s1 + $0x2c60] sm:$0xff]  ;;  %v4787_v15 = vpack.c.bf16 %v1470_v3, %v1466_v8  ;;  %v1474_v19 = vld [vmem:[%s10991_s1 + $0x2c88] sm:$0xff]  ;;  %v1499_v8 = vld [vmem:[%s10991_s1 + $0x2d50] sm:$0xff] }
 0x2a5   :  { %v1503_v3 = vld [vmem:[%s10991_s1 + $0x2d70] sm:$0xff] }
 0x2a6   :  { %4754 = vmatpush1.bf16.msra.mxu0 %v4753_v33  ;;  %v4773_v33 = vpack.c.bf16 %v1437_v61, %v1433_v25  ;;  %v1480_v25 = vld [vmem:[%s10991_s1 + $0x2cb8] sm:$0xff] }
 0x2a7   :  { %5538 = vmatpush1.bf16.msra.mxu1 %v5537_v34  ;;  %4756 = vmatprep.subr.bf16.mxu0 %v4755_v39  ;;  %v5557_v34 = vpack.c.bf16 %v1439_v28, %v1435_v27  ;;  %v4775_v39 = vpack.c.bf16 %v1446_v5, %v1442_v31  ;;  %v1473_v27 = vld [vmem:[%s10991_s1 + $0x2c80] sm:$0xff] }
 0x2a8   :  { %5540 = vmatprep.subr.bf16.mxu1 %v5539_v40  ;;  %v5559_v40 = vpack.c.bf16 %v1448_v32, %v1444_v7  ;;  %v1477_v28 = vld [vmem:[%s10991_s1 + $0x2ca0] sm:$0xff]  ;;  %v1475_v7 = vld [vmem:[%s10991_s1 + $0x2c90] sm:$0xff] }
 0x2a9   :  { %v1479_v32 = vld [vmem:[%s10991_s1 + $0x2cb0] sm:$0xff] }
 0x2aa   :  { %4758 = vmatpush1.bf16.msra.mxu0 %v4757_v47  ;;  %v1449_v47 = vld [vmem:[%s10991_s1 + $0x2bc0] sm:$0xff] }
 0x2ab   :  { %5542 = vmatpush1.bf16.msra.mxu1 %v5541_v22  ;;  %4760 = vmatprep.subr.bf16.mxu0 %v4759_v49  ;;  %v4777_v22 = vpack.c.bf16 %v1445_v35, %v1441_v38  ;;  %v1451_v49 = vld [vmem:[%s10991_s1 + $0x2bd0] sm:$0xff]  ;;  %v4781_v59 = vpack.c.bf16 %v1453_v48, %v1449_v47  ;;  %v1484_v38 = vld [vmem:[%s10991_s1 + $0x2cd8] sm:$0xff]  ;;  %v1490_v47 = vld [vmem:[%s10991_s1 + $0x2d08] sm:$0xff] }
 0x2ac   :  { %5544 = vmatprep.subr.bf16.mxu1 %v5543_v50  ;;  %v1455_v50 = vld [vmem:[%s10991_s1 + $0x2bf0] sm:$0xff]  ;;  %v1488_v35 = vld [vmem:[%s10991_s1 + $0x2cf8] sm:$0xff] }
 0x2ad   :  { %v5565_v60 = vpack.c.bf16 %v1455_v50, %v1451_v49  ;;  %v5579_v44 = vpack.c.bf16 %v1488_v35, %v1484_v38  ;;  %v1496_v48 = vld [vmem:[%s10991_s1 + $0x2d38] sm:$0xff]  ;;  %v4797_v49 = vpack.c.bf16 %v1485_v16, %v1481_v43  ;;  %v5581_v50 = vpack.c.bf16 %v1487_v46, %v1483_v45  ;;  %v1521_v43 = vld [vmem:[%s10991_s1 + $0x2e00] sm:$0xff]  ;;  %v1523_v45 = vld [vmem:[%s10991_s1 + $0x2e10] sm:$0xff] }
 0x2ae   :  { %4762 = vmatpush1.bf16.msra.mxu0 %v4761_v37  ;;  %v5802_v37 = vld [vmem:[%s10990_s0 + $0x2c] ss:$50 sps:$4 sm:$0xff]   ;;  %v1527_v46 = vld [vmem:[%s10991_s1 + $0x2e30] sm:$0xff] }
 0x2af   :  { %5546 = vmatpush1.bf16.msra.mxu1 %v5545_v58  ;;  %4764 = vmatprep.subr.bf16.mxu0 %v4763_v63  ;;  %v5803_v58 = vld [vmem:[%s10990_s0 + $0x90] ss:$50 sps:$4 sm:$0xff]   ;;  %v10311_v10 = vrot.slane %v5802_v37, %v6168_v23  ;;  %v1498_v37 = vld [vmem:[%s10991_s1 + $0x2d48] sm:$0xff]  ;;  %v1524_v38 = vld [vmem:[%s10991_s1 + $0x2e18] sm:$0xff] }
 0x2b0   :  { %5548 = vmatprep.subr.bf16.mxu1 %v5547_v41  ;;  %v1457_v63 = vld [vmem:[%s10991_s1 + $0x2c00] sm:$0xff]  ;;  %v10314_v11 = vrot.slane %v5803_v58, %v6168_v23  ;;  %v1502_v58 = vld [vmem:[%s10991_s1 + $0x2d68] sm:$0xff]  ;;  %v1528_v35 = vld [vmem:[%s10991_s1 + $0x2e38] sm:$0xff] }
 0x2b1   :  { %v1461_v41 = vld [vmem:[%s10991_s1 + $0x2c20] sm:$0xff]  ;;  %v4803_v1 = vpack.c.bf16 %v1502_v58, %v1498_v37  ;;  %v1538_v37 = vld [vmem:[%s10991_s1 + $0x2e88] sm:$0xff] }
 0x2b2   :  { %4766 = vmatpush1.bf16.msra.mxu0 %v4765_v4  ;;  %v1468_v4 = vld [vmem:[%s10991_s1 + $0x2c58] sm:$0xff]  ;;  %v1882_v61 = vcombine.high %v10311_v10, %v10314_v11  ;;  %v1525_v16 = vld [vmem:[%s10991_s1 + $0x2e20] sm:$0xff]  ;;  %v1542_v58 = vld [vmem:[%s10991_s1 + $0x2ea8] sm:$0xff] }
 0x2b3   :  { %5550 = vmatpush1.bf16.msra.mxu1 %v5549_v9  ;;  %4768 = vmatprep.subr.bf16.mxu0 %v4767_v12  ;;  %v1472_v9 = vld [vmem:[%s10991_s1 + $0x2c78] sm:$0xff]  ;;  %v1879_v12 = vcombine.low %v9911_v55, %v9914_v56  ;;  %v1467_v55 = vld [vmem:[%s10991_s1 + $0x2c50] sm:$0xff] }
 0x2b4   :  { %5552 = vmatprep.subr.bf16.mxu1 %v5551_v29  ;;  %v4785_v29 = vpack.c.bf16 %v1461_v41, %v1457_v63  ;;  %v5571_v18 = vpack.c.bf16 %v1472_v9, %v1468_v4  ;;  %v1471_v56 = vld [vmem:[%s10991_s1 + $0x2c70] sm:$0xff]  ;;  %v5585_v41 = vpack.c.bf16 %v1495_v36, %v1491_v57  ;;  %v1506_v4 = vld [vmem:[%s10991_s1 + $0x2d88] sm:$0xff] }
 0x2b5   :  { %v1510_v9 = vld [vmem:[%s10991_s1 + $0x2da8] sm:$0xff]  ;;  %v1531_v57 = vld [vmem:[%s10991_s1 + $0x2e50] sm:$0xff] }
 0x2b6   :  { %4770 = vmatpush1.bf16.msra.mxu0 %v4769_v20  ;;  %v1478_v20 = vld [vmem:[%s10991_s1 + $0x2ca8] sm:$0xff]  ;;  %v1535_v36 = vld [vmem:[%s10991_s1 + $0x2e70] sm:$0xff] }
 0x2b7   :  { %5554 = vmatpush1.bf16.msra.mxu1 %v5553_v21  ;;  %4772 = vmatprep.subr.bf16.mxu0 %v4771_v62  ;;  %v1476_v21 = vld [vmem:[%s10991_s1 + $0x2c98] sm:$0xff]  ;;  %v4789_v62 = vpack.c.bf16 %v1469_v14, %v1465_v13  ;;  %v4791_v31 = vpack.c.bf16 %v1478_v20, %v1474_v19  ;;  %v5589_v13 = vpack.c.bf16 %v1503_v3, %v1499_v8  ;;  %v1505_v14 = vld [vmem:[%s10991_s1 + $0x2d80] sm:$0xff]  ;;  %v1511_v19 = vld [vmem:[%s10991_s1 + $0x2db0] sm:$0xff] }
 0x2b8   :  { %5556 = vmatprep.subr.bf16.mxu1 %v5555_v26  ;;  %v5573_v26 = vpack.c.bf16 %v1471_v56, %v1467_v55  ;;  %v5575_v5 = vpack.c.bf16 %v1480_v25, %v1476_v21  ;;  %v1507_v56 = vld [vmem:[%s10991_s1 + $0x2d90] sm:$0xff]  ;;  %v1514_v20 = vld [vmem:[%s10991_s1 + $0x2dc8] sm:$0xff]  ;;  %v1516_v25 = vld [vmem:[%s10991_s1 + $0x2dd8] sm:$0xff] }
 0x2b9   :  { %v1518_v21 = vld [vmem:[%s10991_s1 + $0x2de8] sm:$0xff]  ;;  %v1539_v8 = vld [vmem:[%s10991_s1 + $0x2e90] sm:$0xff] }
 0x2ba   :  { %4774 = vmatpush1.bf16.msra.mxu0 %v4773_v33  ;;  %v1482_v33 = vld [vmem:[%s10991_s1 + $0x2cc8] sm:$0xff]  ;;  %v1543_v3 = vld [vmem:[%s10991_s1 + $0x2eb0] sm:$0xff] }
 0x2bb   :  { %5558 = vmatpush1.bf16.msra.mxu1 %v5557_v34  ;;  %4776 = vmatprep.subr.bf16.mxu0 %v4775_v39  ;;  %v1486_v34 = vld [vmem:[%s10991_s1 + $0x2ce8] sm:$0xff]  ;;  %v4793_v39 = vpack.c.bf16 %v1477_v28, %v1473_v27  ;;  %v1513_v27 = vld [vmem:[%s10991_s1 + $0x2dc0] sm:$0xff] }
 0x2bc   :  { %5560 = vmatprep.subr.bf16.mxu1 %v5559_v40  ;;  %v5577_v40 = vpack.c.bf16 %v1479_v32, %v1475_v7  ;;  %v4795_v17 = vpack.c.bf16 %v1486_v34, %v1482_v33  ;;  %v1517_v28 = vld [vmem:[%s10991_s1 + $0x2de0] sm:$0xff]  ;;  %v1515_v7 = vld [vmem:[%s10991_s1 + $0x2dd0] sm:$0xff]  ;;  %v1522_v33 = vld [vmem:[%s10991_s1 + $0x2e08] sm:$0xff] }
 0x2bd   :  { %v1519_v32 = vld [vmem:[%s10991_s1 + $0x2df0] sm:$0xff]  ;;  %v1526_v34 = vld [vmem:[%s10991_s1 + $0x2e28] sm:$0xff] }
 0x2be   :  { %4778 = vmatpush1.bf16.msra.mxu0 %v4777_v22  ;;  %v1494_v22 = vld [vmem:[%s10991_s1 + $0x2d28] sm:$0xff] }
 0x2bf   :  { %5562 = vmatpush1.bf16.msra.mxu1 %v5561_v24  ;;  %4780 = vmatprep.subr.bf16.mxu0 %v4779_v51  ;;  %v1492_v24 = vld [vmem:[%s10991_s1 + $0x2d18] sm:$0xff]  ;;  %v1489_v51 = vld [vmem:[%s10991_s1 + $0x2d00] sm:$0xff]  ;;  %v4799_v53 = vpack.c.bf16 %v1494_v22, %v1490_v47  ;;  %v1530_v47 = vld [vmem:[%s10991_s1 + $0x2e48] sm:$0xff] }
 0x2c0   :  { %5564 = vmatprep.subr.bf16.mxu1 %v5563_v52  ;;  %v1493_v52 = vld [vmem:[%s10991_s1 + $0x2d20] sm:$0xff]  ;;  %v5583_v54 = vpack.c.bf16 %v1496_v48, %v1492_v24  ;;  %v1534_v22 = vld [vmem:[%s10991_s1 + $0x2e68] sm:$0xff]  ;;  %v1532_v24 = vld [vmem:[%s10991_s1 + $0x2e58] sm:$0xff] }
 0x2c1   :  { %v4801_v63 = vpack.c.bf16 %v1493_v52, %v1489_v51  ;;  %v1536_v48 = vld [vmem:[%s10991_s1 + $0x2e78] sm:$0xff]  ;;  %v1529_v51 = vld [vmem:[%s10991_s1 + $0x2e40] sm:$0xff] }
 0x2c2   :  { %4782 = vmatpush1.bf16.msra.mxu0 %v4781_v59  ;;  %v1500_v59 = vld [vmem:[%s10991_s1 + $0x2d58] sm:$0xff]  ;;  %v1533_v52 = vld [vmem:[%s10991_s1 + $0x2e60] sm:$0xff] }
 0x2c3   :  { %5566 = vmatpush1.bf16.msra.mxu1 %v5565_v60  ;;  %4784 = vmatprep.subr.bf16.mxu0 %v4783_v42  ;;  %v1504_v60 = vld [vmem:[%s10991_s1 + $0x2d78] sm:$0xff]  ;;  %v1497_v42 = vld [vmem:[%s10991_s1 + $0x2d40] sm:$0xff] }
 0x2c4   :  { %5568 = vmatprep.subr.bf16.mxu1 %v5567_v0  ;;  %v1501_v0 = vld [vmem:[%s10991_s1 + $0x2d60] sm:$0xff]  ;;  %v5587_v2 = vpack.c.bf16 %v1504_v60, %v1500_v59  ;;  %v1540_v59 = vld [vmem:[%s10991_s1 + $0x2e98] sm:$0xff] }
 0x2c5   :  { %2702 = vmatmul.mubr.f32.vlgmr.msra.gmra.mrb[0].mxu0 %v1879_v12  ;;  %v1544_v60 = vld [vmem:[%s10991_s1 + $0x2eb8] sm:$0xff] }
 0x2c6   :  { %3625 = vmatmul.mubr.f32.vlgmr.msra.gmra.mrb[0].mxu1 %v1879_v12  ;;  %4786 = vmatpush1.bf16.msra.mxu0 %v4785_v29  ;;  %v1508_v12 = vld [vmem:[%s10991_s1 + $0x2d98] sm:$0xff] }
 0x2c7   :  { %5570 = vmatpush1.bf16.msra.mxu1 %v5569_v30  ;;  %4788 = vmatprep.subr.bf16.mxu0 %v4787_v15  ;;  %v1512_v29 = vld [vmem:[%s10991_s1 + $0x2db8] sm:$0xff]  ;;  %v4805_v30 = vpack.c.bf16 %v1501_v0, %v1497_v42  ;;  %v1509_v15 = vld [vmem:[%s10991_s1 + $0x2da0] sm:$0xff] }
 0x2c8   :  { %5572 = vmatprep.subr.bf16.mxu1 %v5571_v18  ;;  %2772 = vmatprep.mubr.f32.mxu0 %v1882_v61  ;;  %v4807_v18 = vpack.c.bf16 %v1510_v9, %v1506_v4  ;;  %v5591_v55 = vpack.c.bf16 %v1512_v29, %v1508_v12  ;;  %v1537_v42 = vld [vmem:[%s10991_s1 + $0x2e80] sm:$0xff]  ;;  %v1546_v4 = vld [vmem:[%s10991_s1 + $0x2ec8] sm:$0xff]  ;;  %v1548_v12 = vld [vmem:[%s10991_s1 + $0x2ed8] sm:$0xff] }
 0x2c9   :  { %3695 = vmatprep.mubr.f32.mxu1 %v1882_v61  ;;  %v1520_v61 = vld [vmem:[%s10991_s1 + $0x2df8] sm:$0xff]  ;;  %v1541_v0 = vld [vmem:[%s10991_s1 + $0x2ea0] sm:$0xff]  ;;  %v1550_v9 = vld [vmem:[%s10991_s1 + $0x2ee8] sm:$0xff] }
 0x2ca   :  { %4790 = vmatpush1.bf16.msra.mxu0 %v4789_v62  ;;  %v4809_v62 = vpack.c.bf16 %v1509_v15, %v1505_v14  ;;  %v1552_v29 = vld [vmem:[%s10991_s1 + $0x2ef8] sm:$0xff]  ;;  %v1545_v14 = vld [vmem:[%s10991_s1 + $0x2ec0] sm:$0xff] }
 0x2cb   :  { %5574 = vmatpush1.bf16.msra.mxu1 %v5573_v26  ;;  %4792 = vmatprep.subr.bf16.mxu0 %v4791_v31  ;;  %v5593_v26 = vpack.c.bf16 %v1511_v19, %v1507_v56  ;;  %v4811_v31 = vpack.c.bf16 %v1518_v21, %v1514_v20  ;;  %v1549_v15 = vld [vmem:[%s10991_s1 + $0x2ee0] sm:$0xff]  ;;  %v1547_v56 = vld [vmem:[%s10991_s1 + $0x2ed0] sm:$0xff]  ;;  %v1554_v20 = vld [vmem:[%s10991_s1 + $0x2f08] sm:$0xff] }
 0x2cc   :  { %5576 = vmatprep.subr.bf16.mxu1 %v5575_v5  ;;  %v5595_v5 = vpack.c.bf16 %v1520_v61, %v1516_v25  ;;  %v1551_v19 = vld [vmem:[%s10991_s1 + $0x2ef0] sm:$0xff]  ;;  %v1558_v21 = vld [vmem:[%s10991_s1 + $0x2f28] sm:$0xff]  ;;  %v1556_v25 = vld [vmem:[%s10991_s1 + $0x2f18] sm:$0xff] }
 0x2cd   :  { %v1560_v61 = vld [vmem:[%s10991_s1 + $0x2f38] sm:$0xff] }
 0x2ce   :  { %4794 = vmatpush1.bf16.msra.mxu0 %v4793_v39  ;;  %v4813_v39 = vpack.c.bf16 %v1517_v28, %v1513_v27  ;;  %v1553_v27 = vld [vmem:[%s10991_s1 + $0x2f00] sm:$0xff] }
 0x2cf   :  { %5578 = vmatpush1.bf16.msra.mxu1 %v5577_v40  ;;  %4796 = vmatprep.subr.bf16.mxu0 %v4795_v17  ;;  %v5597_v40 = vpack.c.bf16 %v1519_v32, %v1515_v7  ;;  %v4815_v17 = vpack.c.bf16 %v1526_v34, %v1522_v33  ;;  %v1557_v28 = vld [vmem:[%s10991_s1 + $0x2f20] sm:$0xff]  ;;  %v1555_v7 = vld [vmem:[%s10991_s1 + $0x2f10] sm:$0xff]  ;;  %v1562_v33 = vld [vmem:[%s10991_s1 + $0x2f48] sm:$0xff] }
 0x2d0   :  { %5580 = vmatprep.subr.bf16.mxu1 %v5579_v44  ;;  %v5599_v44 = vpack.c.bf16 %v1528_v35, %v1524_v38  ;;  %v1559_v32 = vld [vmem:[%s10991_s1 + $0x2f30] sm:$0xff]  ;;  %v1566_v34 = vld [vmem:[%s10991_s1 + $0x2f68] sm:$0xff]  ;;  %v1564_v38 = vld [vmem:[%s10991_s1 + $0x2f58] sm:$0xff] }
 0x2d1   :  { %v1568_v35 = vld [vmem:[%s10991_s1 + $0x2f78] sm:$0xff] }
 0x2d2   :  { %4798 = vmatpush1.bf16.msra.mxu0 %v4797_v49  ;;  %v4817_v49 = vpack.c.bf16 %v1525_v16, %v1521_v43  ;;  %v1561_v43 = vld [vmem:[%s10991_s1 + $0x2f40] sm:$0xff] }
 0x2d3   :  { %5582 = vmatpush1.bf16.msra.mxu1 %v5581_v50  ;;  %4800 = vmatprep.subr.bf16.mxu0 %v4799_v53  ;;  %v5601_v50 = vpack.c.bf16 %v1527_v46, %v1523_v45  ;;  %v4819_v53 = vpack.c.bf16 %v1534_v22, %v1530_v47  ;;  %v1565_v16 = vld [vmem:[%s10991_s1 + $0x2f60] sm:$0xff]  ;;  %v1563_v45 = vld [vmem:[%s10991_s1 + $0x2f50] sm:$0xff]  ;;  %v1570_v47 = vld [vmem:[%s10991_s1 + $0x2f88] sm:$0xff] }
 0x2d4   :  { %5584 = vmatprep.subr.bf16.mxu1 %v5583_v54  ;;  %v5603_v54 = vpack.c.bf16 %v1536_v48, %v1532_v24  ;;  %v1567_v46 = vld [vmem:[%s10991_s1 + $0x2f70] sm:$0xff]  ;;  %v1574_v22 = vld [vmem:[%s10991_s1 + $0x2fa8] sm:$0xff]  ;;  %v1572_v24 = vld [vmem:[%s10991_s1 + $0x2f98] sm:$0xff] }
 0x2d5   :  { %v1576_v48 = vld [vmem:[%s10991_s1 + $0x2fb8] sm:$0xff] }
 0x2d6   :  { %4802 = vmatpush1.bf16.msra.mxu0 %v4801_v63  ;;  %v4821_v63 = vpack.c.bf16 %v1533_v52, %v1529_v51  ;;  %v1569_v51 = vld [vmem:[%s10991_s1 + $0x2f80] sm:$0xff] }
 0x2d7   :  { %5586 = vmatpush1.bf16.msra.mxu1 %v5585_v41  ;;  %4804 = vmatprep.subr.bf16.mxu0 %v4803_v1  ;;  %v5605_v41 = vpack.c.bf16 %v1535_v36, %v1531_v57  ;;  %v4823_v1 = vpack.c.bf16 %v1542_v58, %v1538_v37  ;;  %v1573_v52 = vld [vmem:[%s10991_s1 + $0x2fa0] sm:$0xff]  ;;  %v1571_v57 = vld [vmem:[%s10991_s1 + $0x2f90] sm:$0xff]  ;;  %v1578_v37 = vld [vmem:[%s10991_s1 + $0x2fc8] sm:$0xff] }
 0x2d8   :  { %5588 = vmatprep.subr.bf16.mxu1 %v5587_v2  ;;  %v5607_v2 = vpack.c.bf16 %v1544_v60, %v1540_v59  ;;  %v1575_v36 = vld [vmem:[%s10991_s1 + $0x2fb0] sm:$0xff]  ;;  %v1582_v58 = vld [vmem:[%s10991_s1 + $0x2fe8] sm:$0xff]  ;;  %v1580_v59 = vld [vmem:[%s10991_s1 + $0x2fd8] sm:$0xff] }
 0x2d9   :  { %v1584_v60 = vld [vmem:[%s10991_s1 + $0x2ff8] sm:$0xff] }
 0x2da   :  { %4806 = vmatpush1.bf16.msra.mxu0 %v4805_v30  ;;  %v4825_v30 = vpack.c.bf16 %v1541_v0, %v1537_v42  ;;  %v1577_v42 = vld [vmem:[%s10991_s1 + $0x2fc0] sm:$0xff] }
 0x2db   :  { %5590 = vmatpush1.bf16.msra.mxu1 %v5589_v13  ;;  %4808 = vmatprep.subr.bf16.mxu0 %v4807_v18  ;;  %v5609_v13 = vpack.c.bf16 %v1543_v3, %v1539_v8  ;;  %v4827_v18 = vpack.c.bf16 %v1550_v9, %v1546_v4  ;;  %v1581_v0 = vld [vmem:[%s10991_s1 + $0x2fe0] sm:$0xff]  ;;  %v1579_v8 = vld [vmem:[%s10991_s1 + $0x2fd0] sm:$0xff]  ;;  %v1586_v4 = vld [vmem:[%s10991_s1 + $0x3008] sm:$0xff] }
 0x2dc   :  { %5592 = vmatprep.subr.bf16.mxu1 %v5591_v55  ;;  %v5611_v55 = vpack.c.bf16 %v1552_v29, %v1548_v12  ;;  %v1583_v3 = vld [vmem:[%s10991_s1 + $0x2ff0] sm:$0xff]  ;;  %v1590_v9 = vld [vmem:[%s10991_s1 + $0x3028] sm:$0xff]  ;;  %v1588_v12 = vld [vmem:[%s10991_s1 + $0x3018] sm:$0xff] }
 0x2dd   :  { %v1592_v29 = vld [vmem:[%s10991_s1 + $0x3038] sm:$0xff] }
 0x2de   :  { %4810 = vmatpush1.bf16.msra.mxu0 %v4809_v62  ;;  %v4829_v62 = vpack.c.bf16 %v1549_v15, %v1545_v14  ;;  %v1585_v14 = vld [vmem:[%s10991_s1 + $0x3000] sm:$0xff] }
 0x2df   :  { %5594 = vmatpush1.bf16.msra.mxu1 %v5593_v26  ;;  %4812 = vmatprep.subr.bf16.mxu0 %v4811_v31  ;;  %v5613_v26 = vpack.c.bf16 %v1551_v19, %v1547_v56  ;;  %v4831_v31 = vpack.c.bf16 %v1558_v21, %v1554_v20  ;;  %v1589_v15 = vld [vmem:[%s10991_s1 + $0x3020] sm:$0xff]  ;;  %v1587_v56 = vld [vmem:[%s10991_s1 + $0x3010] sm:$0xff]  ;;  %v1594_v20 = vld [vmem:[%s10991_s1 + $0x3048] sm:$0xff] }
 0x2e0   :  { %5596 = vmatprep.subr.bf16.mxu1 %v5595_v5  ;;  %v5615_v5 = vpack.c.bf16 %v1560_v61, %v1556_v25  ;;  %v1591_v19 = vld [vmem:[%s10991_s1 + $0x3030] sm:$0xff]  ;;  %v1598_v21 = vld [vmem:[%s10991_s1 + $0x3068] sm:$0xff]  ;;  %v1596_v25 = vld [vmem:[%s10991_s1 + $0x3058] sm:$0xff] }
 0x2e1   :  { %v1600_v61 = vld [vmem:[%s10991_s1 + $0x3078] sm:$0xff] }
 0x2e2   :  { %4814 = vmatpush1.bf16.msra.mxu0 %v4813_v39  ;;  %v4833_v39 = vpack.c.bf16 %v1557_v28, %v1553_v27  ;;  %v5633_v27 = vpack.c.bf16 %v1591_v19, %v1587_v56  ;;  %v1593_v28 = vld [vmem:[%s10991_s1 + $0x3040] sm:$0xff]  ;;  %v3779_v56 = vld [vmem:[%s10993_s3 + $0x10] sm:$0xff]  ;;  %v3780_v19 = vld [vmem:[%s10993_s3 + $0x18] sm:$0xff] }
 0x2e3   :  { %5598 = vmatpush1.bf16.msra.mxu1 %v5597_v40  ;;  %4816 = vmatprep.subr.bf16.mxu0 %v4815_v17  ;;  %v5617_v40 = vpack.c.bf16 %v1559_v32, %v1555_v7  ;;  %v4835_v17 = vpack.c.bf16 %v1566_v34, %v1562_v33  ;;  %v5635_v7 = vpack.c.bf16 %v1600_v61, %v1596_v25  ;;  %v1602_v32 = vld [vmem:[%s10991_s1 + $0x3088] sm:$0xff]  ;;  %v1604_v34 = vld [vmem:[%s10991_s1 + $0x3098] sm:$0xff]  ;;  %v3811_v25 = vld [vmem:[%s10993_s3 + $0x110] sm:$0xff] }
 0x2e4   :  { %5600 = vmatprep.subr.bf16.mxu1 %v5599_v44  ;;  %v5619_v44 = vpack.c.bf16 %v1568_v35, %v1564_v38  ;;  %v1606_v33 = vld [vmem:[%s10991_s1 + $0x30a8] sm:$0xff]  ;;  %v1608_v38 = vld [vmem:[%s10991_s1 + $0x30b8] sm:$0xff] }
 0x2e5   :  { %v3812_v61 = vld [vmem:[%s10993_s3 + $0x118] sm:$0xff] }
 0x2e6   :  { %4818 = vmatpush1.bf16.msra.mxu0 %v4817_v49  ;;  %v4837_v49 = vpack.c.bf16 %v1565_v16, %v1561_v43  ;;  %v1605_v43 = vld [vmem:[%s10991_s1 + $0x30a0] sm:$0xff]  ;;  %v4855_v16 = vpack.c.bf16 %v1606_v33, %v1602_v32 }
 0x2e7   :  { %5602 = vmatpush1.bf16.msra.mxu1 %v5601_v50  ;;  %4820 = vmatprep.subr.bf16.mxu0 %v4819_v53  ;;  %v5621_v50 = vpack.c.bf16 %v1567_v46, %v1563_v45  ;;  %v4839_v53 = vpack.c.bf16 %v1574_v22, %v1570_v47  ;;  %v1607_v45 = vld [vmem:[%s10991_s1 + $0x30b0] sm:$0xff]  ;;  %v1610_v46 = vld [vmem:[%s10991_s1 + $0x30c8] sm:$0xff]  ;;  %v1612_v22 = vld [vmem:[%s10991_s1 + $0x30d8] sm:$0xff] }
 0x2e8   :  { %5604 = vmatprep.subr.bf16.mxu1 %v5603_v54  ;;  %v5623_v54 = vpack.c.bf16 %v1576_v48, %v1572_v24  ;;  %v1614_v47 = vld [vmem:[%s10991_s1 + $0x30e8] sm:$0xff]  ;;  %v1616_v24 = vld [vmem:[%s10991_s1 + $0x30f8] sm:$0xff]  ;;  %v5831_v48 = vmov 0.0   ;;  %v3813_v33 = vld [vmem:[%s10993_s3 + $0x120] sm:$0xff] }
 0x2ea   :  { %4822 = vmatpush1.bf16.msra.mxu0 %v4821_v63  ;;  %v4841_v63 = vpack.c.bf16 %v1573_v52, %v1569_v51 }
 0x2eb   :  { %5606 = vmatpush1.bf16.msra.mxu1 %v5605_v41  ;;  %4824 = vmatprep.subr.bf16.mxu0 %v4823_v1  ;;  %v5625_v41 = vpack.c.bf16 %v1575_v36, %v1571_v57  ;;  %v4843_v1 = vpack.c.bf16 %v1582_v58, %v1578_v37  ;;  %v4859_v57 = vpack.c.bf16 %v1614_v47, %v1610_v46  ;;  %v1611_v37 = vld [vmem:[%s10991_s1 + $0x30d0] sm:$0xff] }
 0x2ec   :  { %5608 = vmatprep.subr.bf16.mxu1 %v5607_v2  ;;  %v5627_v2 = vpack.c.bf16 %v1584_v60, %v1580_v59  ;;  %v5643_v36 = vpack.c.bf16 %v1616_v24, %v1612_v22  ;;  %v1615_v58 = vld [vmem:[%s10991_s1 + $0x30f0] sm:$0xff]  ;;  %v3793_v59 = vld [vmem:[%s10993_s3 + $0x80] sm:$0xff]  ;;  %v3794_v60 = vld [vmem:[%s10993_s3 + $0x88] sm:$0xff] }
 0x2ed   :  { %v3815_v47 = vld [vmem:[%s10993_s3 + $0x130] sm:$0xff]  ;;  %v3816_v22 = vld [vmem:[%s10993_s3 + $0x138] sm:$0xff]  ;;  %v3801_v24 = vld [vmem:[%s10993_s3 + $0xc0] sm:$0xff] }
 0x2ee   :  { %4826 = vmatpush1.bf16.msra.mxu0 %v4825_v30  ;;  %v4845_v30 = vpack.c.bf16 %v1581_v0, %v1577_v42 }
 0x2ef   :  { %5610 = vmatpush1.bf16.msra.mxu1 %v5609_v13  ;;  %4828 = vmatprep.subr.bf16.mxu0 %v4827_v18  ;;  %v5629_v13 = vpack.c.bf16 %v1583_v3, %v1579_v8  ;;  %v4847_v18 = vpack.c.bf16 %v1590_v9, %v1586_v4  ;;  %v3777_v8 = vld [vmem:[%s10993_s3] sm:$0xff]  ;;  %v3778_v3 = vld [vmem:[%s10993_s3 + $0x8] sm:$0xff]  ;;  %v5647_v4 = vpack.c.bf16 %v3794_v60, %v3793_v59  ;;  %v3803_v59 = vld [vmem:[%s10993_s3 + $0xd0] sm:$0xff] }
 0x2f0   :  { %5612 = vmatprep.subr.bf16.mxu1 %v5611_v55  ;;  %v5631_v55 = vpack.c.bf16 %v1592_v29, %v1588_v12  ;;  %v3810_v12 = vld [vmem:[%s10993_s3 + $0x108] sm:$0xff]  ;;  %v3795_v29 = vld [vmem:[%s10993_s3 + $0x90] sm:$0xff]  ;;  %v3804_v60 = vld [vmem:[%s10993_s3 + $0xd8] sm:$0xff] }
 0x2f2   :  { %4830 = vmatpush1.bf16.msra.mxu0 %v4829_v62  ;;  %v1881_v62 = vcombine.low %v10311_v10, %v10314_v11  ;;  %v1595_v10 = vld [vmem:[%s10991_s1 + $0x3050] sm:$0xff] }
 0x2f3   :  { %5614 = vmatpush1.bf16.msra.mxu1 %v5613_v26  ;;  %4832 = vmatprep.subr.bf16.mxu0 %v4831_v31  ;;  %v4849_v26 = vpack.c.bf16 %v1589_v15, %v1585_v14  ;;  %v1597_v31 = vld [vmem:[%s10991_s1 + $0x3060] sm:$0xff]  ;;  %v1599_v11 = vld [vmem:[%s10991_s1 + $0x3070] sm:$0xff]  ;;  %v3828_v14 = vld [vmem:[%s10993_s3 + $0x198] sm:$0xff] }
 0x2f4   :  { %5616 = vmatprep.subr.bf16.mxu1 %v5615_v5  ;;  %v4851_v5 = vpack.c.bf16 %v1598_v21, %v1594_v20  ;;  %v4853_v35 = vpack.c.bf16 %v1597_v31, %v1593_v28  ;;  %v3830_v28 = vld [vmem:[%s10993_s3 + $0x1a8] sm:$0xff]  ;;  %v5653_v31 = vpack.c.bf16 %v3780_v19, %v3779_v56  ;;  %v3821_v19 = vld [vmem:[%s10993_s3 + $0x160] sm:$0xff] }
 0x2f5   :  { %v3790_v56 = vld [vmem:[%s10993_s3 + $0x68] sm:$0xff] }
 0x2f6   :  { %4834 = vmatpush1.bf16.msra.mxu0 %v4833_v39  ;;  %v5637_v39 = vpack.c.bf16 %v1599_v11, %v1595_v10  ;;  %v3782_v10 = vld [vmem:[%s10993_s3 + $0x28] sm:$0xff] }
 0x2f7   :  { %5618 = vmatpush1.bf16.msra.mxu1 %v5617_v40  ;;  %4836 = vmatprep.subr.bf16.mxu0 %v4835_v17  ;;  %v1601_v40 = vld [vmem:[%s10991_s1 + $0x3080] sm:$0xff]  ;;  %v5639_v17 = vpack.c.bf16 %v1608_v38, %v1604_v34  ;;  %v3814_v34 = vld [vmem:[%s10993_s3 + $0x128] sm:$0xff]  ;;  %v3799_v38 = vld [vmem:[%s10993_s3 + $0xb0] sm:$0xff] }
 0x2f8   :  { %5620 = vmatprep.subr.bf16.mxu1 %v5619_v44  ;;  %v1603_v44 = vld [vmem:[%s10991_s1 + $0x3090] sm:$0xff]  ;;  %v4857_v51 = vpack.c.bf16 %v1605_v43, %v1601_v40  ;;  %v3832_v40 = vld [vmem:[%s10993_s3 + $0x1b8] sm:$0xff] }
 0x2f9   :  { %v5641_v52 = vpack.c.bf16 %v1607_v45, %v1603_v44  ;;  %v3784_v44 = vld [vmem:[%s10993_s3 + $0x38] sm:$0xff] }
 0x2fa   :  { %4838 = vmatpush1.bf16.msra.mxu0 %v4837_v49  ;;  %v5804_v49 = vld [vmem:[%s10990_s0 + $0x30] ss:$50 sps:$4 sm:$0x33]  }
 0x2fb   :  { %5622 = vmatpush1.bf16.msra.mxu1 %v5621_v50  ;;  %4840 = vmatprep.subr.bf16.mxu0 %v4839_v53  ;;  %v5805_v50 = vld [vmem:[%s10990_s0 + $0x94] ss:$50 sps:$4 sm:$0x33]   ;;  %v1891_v42 = vrot.slane %v5804_v49, %v6168_v23 }
 0x2fc   :  { %5624 = vmatprep.subr.bf16.mxu1 %v5623_v54  ;;  %v1609_v53 = vld [vmem:[%s10991_s1 + $0x30c0] sm:$0xff]  ;;  %v1898_v0 = vrot.slane %v5805_v50, %v6168_v23  ;;  %v3834_v50 = vld [vmem:[%s10993_s3 + $0x1c8] sm:$0xff] }
 0x2fd   :  { %v1613_v54 = vld [vmem:[%s10991_s1 + $0x30e0] sm:$0xff] }
 0x2fe   :  { %4842 = vmatpush1.bf16.msra.mxu0 %v4841_v63  ;;  %v3825_v63 = vld [vmem:[%s10993_s3 + $0x180] sm:$0xff]  ;;  %v1899_v15 = vcombine.low %v1891_v42, %v1898_v0 }
 0x2ff   :  { %5626 = vmatpush1.bf16.msra.mxu1 %v5625_v41  ;;  %4844 = vmatprep.subr.bf16.mxu0 %v4843_v1  ;;  %v3826_v41 = vld [vmem:[%s10993_s3 + $0x188] sm:$0xff]  ;;  %v4861_v1 = vpack.c.bf16 %v1613_v54, %v1609_v53  ;;  %v3809_v23 = vld [vmem:[%s10993_s3 + $0x100] sm:$0xff] }
 0x300   :  { %5628 = vmatprep.subr.bf16.mxu1 %v5627_v2  ;;  %v5645_v2 = vpack.c.bf16 %v1615_v58, %v1611_v37  ;;  %v5679_v9 = vpack.c.bf16 %v3826_v41, %v3825_v63  ;;  %v3833_v49 = vld [vmem:[%s10993_s3 + $0x1c0] sm:$0xff]  ;;  %v3786_v54 = vld [vmem:[%s10993_s3 + $0x48] sm:$0xff]  ;;  %v3835_v63 = vld [vmem:[%s10993_s3 + $0x1d0] sm:$0xff] }
 0x301   :  { %v3785_v53 = vld [vmem:[%s10993_s3 + $0x40] sm:$0xff]  ;;  %v3818_v58 = vld [vmem:[%s10993_s3 + $0x148] sm:$0xff]  ;;  %v3836_v41 = vld [vmem:[%s10993_s3 + $0x1d8] sm:$0xff] }
 0x302   :  { %4846 = vmatpush1.bf16.msra.mxu0 %v4845_v30  ;;  %v3796_v30 = vld [vmem:[%s10993_s3 + $0x98] sm:$0xff]  ;;  %v3817_v37 = vld [vmem:[%s10993_s3 + $0x140] sm:$0xff]  ;;  %v5665_v42 = vpack.c.bf16 %v3786_v54, %v3785_v53 }
 0x303   :  { %5630 = vmatpush1.bf16.msra.mxu1 %v5629_v13  ;;  %4848 = vmatprep.subr.bf16.mxu0 %v4847_v18  ;;  %v3827_v13 = vld [vmem:[%s10993_s3 + $0x190] sm:$0xff]  ;;  %v5649_v18 = vpack.c.bf16 %v3778_v3, %v3777_v8  ;;  %v5651_v20 = vpack.c.bf16 %v3796_v30, %v3795_v29  ;;  %v5697_v0 = vpack.c.bf16 %v3818_v58, %v3817_v37  ;;  %v3837_v29 = vld [vmem:[%s10993_s3 + $0x1e0] sm:$0xff]  ;;  %v3838_v30 = vld [vmem:[%s10993_s3 + $0x1e8] sm:$0xff] }
 0x304   :  { %5632 = vmatprep.subr.bf16.mxu1 %v5631_v55  ;;  %v5681_v55 = vpack.c.bf16 %v3810_v12, %v3809_v23  ;;  %v5683_v21 = vpack.c.bf16 %v3828_v14, %v3827_v13  ;;  %v5667_v8 = vpack.c.bf16 %v3804_v60, %v3803_v59  ;;  %v5699_v3 = vpack.c.bf16 %v3836_v41, %v3835_v63  ;;  %v3805_v23 = vld [vmem:[%s10993_s3 + $0xe0] sm:$0xff]  ;;  %v3806_v12 = vld [vmem:[%s10993_s3 + $0xe8] sm:$0xff] }
 0x305   :  { %2773 = vmatmul.mubr.f32.vlgmr.msra.gmra.mrb[0].mxu0 %v1881_v62 }
 0x306   :  { %3696 = vmatmul.mubr.f32.vlgmr.msra.gmra.mrb[0].mxu1 %v1881_v62  ;;  %4850 = vmatpush1.bf16.msra.mxu0 %v4849_v26  ;;  %v3797_v62 = vld [vmem:[%s10993_s3 + $0xa0] sm:$0xff]  ;;  %v3798_v26 = vld [vmem:[%s10993_s3 + $0xa8] sm:$0xff] }
 0x307   :  { %5634 = vmatpush1.bf16.msra.mxu1 %v5633_v27  ;;  %4852 = vmatprep.subr.bf16.mxu0 %v4851_v5  ;;  %v3829_v27 = vld [vmem:[%s10993_s3 + $0x1a0] sm:$0xff]  ;;  %v5685_v5 = vpack.c.bf16 %v3812_v61, %v3811_v25  ;;  %v5655_v11 = vpack.c.bf16 %v3798_v26, %v3797_v62  ;;  %v3807_v61 = vld [vmem:[%s10993_s3 + $0xf0] sm:$0xff]  ;;  %v3808_v62 = vld [vmem:[%s10993_s3 + $0xf8] sm:$0xff] }
 0x308   :  { %5636 = vmatprep.subr.bf16.mxu1 %v5635_v7  ;;  %2843 = vmatprep.mubr.f32.mxu0 %v5831_v48  ;;  %v3781_v7 = vld [vmem:[%s10993_s3 + $0x20] sm:$0xff]  ;;  %v5687_v32 = vpack.c.bf16 %v3830_v28, %v3829_v27  ;;  %v3839_v26 = vld [vmem:[%s10993_s3 + $0x1f0] sm:$0xff]  ;;  %v5675_v27 = vpack.c.bf16 %v3808_v62, %v3807_v61  ;;  %v3840_v28 = vld [vmem:[%s10993_s3 + $0x1f8] sm:$0xff] }
 0x309   :  { %3766 = vmatprep.mubr.f32.mxu1 %v5831_v48  ;;  %v5657_v43 = vpack.c.bf16 %v3782_v10, %v3781_v7  ;;  %v3802_v48 = vld [vmem:[%s10993_s3 + $0xc8] sm:$0xff]  ;;  %v5707_v7 = vpack.c.bf16 %v3840_v28, %v3839_v26 }
 0x30a   :  { %4854 = vmatpush1.bf16.msra.mxu0 %v4853_v35  ;;  %v3800_v35 = vld [vmem:[%s10993_s3 + $0xb8] sm:$0xff] }
 0x30b   :  { %5638 = vmatpush1.bf16.msra.mxu1 %v5637_v39  ;;  %4856 = vmatprep.subr.bf16.mxu0 %v4855_v16  ;;  %v3831_v39 = vld [vmem:[%s10993_s3 + $0x1b0] sm:$0xff]  ;;  %v5689_v16 = vpack.c.bf16 %v3814_v34, %v3813_v33  ;;  %v5659_v45 = vpack.c.bf16 %v3800_v35, %v3799_v38  ;;  %v1621_v34 = vsub.s32 0, %v6132_v6  ;;  %v1629_v38 = vsub.s32 2, %v6132_v6  ;;  %v1617_v35 = vld [vmem:[%s10992_s2] sm:$0xf] }
 0x30c   :  { %5640 = vmatprep.subr.bf16.mxu1 %v5639_v17  ;;  %v3783_v17 = vld [vmem:[%s10993_s3 + $0x30] sm:$0xff]  ;;  %v5691_v46 = vpack.c.bf16 %v3832_v40, %v3831_v39  ;;  %v1625_v39 = vsub.s32 1, %v6132_v6  ;;  %v1633_v40 = vsub.s32 3, %v6132_v6 }
 0x30e   :  { %4858 = vmatpush1.bf16.msra.mxu0 %v4857_v51  ;;  %v5661_v51 = vpack.c.bf16 %v3784_v44, %v3783_v17  ;;  %v1626_v17 = vrot.slane %v1617_v35, %v1625_v39  ;;  %v1634_v44 = vrot.slane %v1617_v35, %v1633_v40 }
 0x30f   :  { %5642 = vmatpush1.bf16.msra.mxu1 %v5641_v52  ;;  %4860 = vmatprep.subr.bf16.mxu0 %v4859_v57  ;;  %v5693_v52 = vpack.c.bf16 %v3816_v22, %v3815_v47  ;;  %v5663_v57 = vpack.c.bf16 %v3802_v48, %v3801_v24 }
 0x310   :  { %5644 = vmatprep.subr.bf16.mxu1 %v5643_v36  ;;  %v5695_v36 = vpack.c.bf16 %v3834_v50, %v3833_v49 }
 0x312   :  { %4862 = vmatpush1.bf16.msra.mxu0 %v4861_v1  ;;  %v3787_v1 = vld [vmem:[%s10993_s3 + $0x50] sm:$0xff] }
 0x313   :  { %5646 = vmatpush1.bf16.msra.mxu1 %v5645_v2  ;;  %5648 = vmatprep.subr.bf16.mxu0 %v5647_v4  ;;  %v3788_v2 = vld [vmem:[%s10993_s3 + $0x58] sm:$0xff]  ;;  %v3819_v4 = vld [vmem:[%s10993_s3 + $0x150] sm:$0xff] }
 0x314   :  { %5680 = vmatprep.subr.bf16.mxu1 %v5679_v9  ;;  %v3820_v9 = vld [vmem:[%s10993_s3 + $0x158] sm:$0xff]  ;;  %v5669_v13 = vpack.c.bf16 %v3788_v2, %v3787_v1 }
 0x315   :  { %4006 = vmatmul.mubr.msk.f32.vlgmr.msra.gmra.mrb[0].mxu0 %vm1924_vm0, %v1899_v15  ;;  %v5701_v14 = vpack.c.bf16 %v3820_v9, %v3819_v4 }
 0x316   :  { %4007 = vmatmul.mubr.msk.f32.vlgmr.msra.gmra.mrb[0].mxu1 %vm1924_vm0, %v1899_v15  ;;  %5650 = vmatpush3.bf16.msra.mxu0 %v5649_v18  ;;  %v5671_v15 = vpack.c.bf16 %v3806_v12, %v3805_v23  ;;  %v5703_v18 = vpack.c.bf16 %v3838_v30, %v3837_v29 }
 0x317   :  { %5682 = vmatpush3.bf16.msra.mxu1 %v5681_v55  ;;  %5652 = vmatprep.subr.bf16.mxu0 %v5651_v20  ;;  %v3789_v55 = vld [vmem:[%s10993_s3 + $0x60] sm:$0xff] }
 0x318   :  { %5684 = vmatprep.subr.bf16.mxu1 %v5683_v21  ;;  %v5673_v20 = vpack.c.bf16 %v3790_v56, %v3789_v55  ;;  %v3822_v21 = vld [vmem:[%s10993_s3 + $0x168] sm:$0xff] }
 0x319   :  { %v5705_v25 = vpack.c.bf16 %v3822_v21, %v3821_v19 }
 0x31a   :  { %5654 = vmatpush3.bf16.msra.mxu0 %v5653_v31  ;;  %v3791_v31 = vld [vmem:[%s10993_s3 + $0x70] sm:$0xff] }
 0x31b   :  { %5686 = vmatpush3.bf16.msra.mxu1 %v5685_v5  ;;  %5656 = vmatprep.subr.bf16.mxu0 %v5655_v11  ;;  %v3792_v5 = vld [vmem:[%s10993_s3 + $0x78] sm:$0xff]  ;;  %v3823_v11 = vld [vmem:[%s10993_s3 + $0x170] sm:$0xff] }
 0x31c   :  { %5688 = vmatprep.subr.bf16.mxu1 %v5687_v32  ;;  %v5677_v10 = vpack.c.bf16 %v3792_v5, %v3791_v31  ;;  %v3824_v32 = vld [vmem:[%s10993_s3 + $0x178] sm:$0xff] }
 0x31d   :  { %v5709_v33 = vpack.c.bf16 %v3824_v32, %v3823_v11 }
 0x31e   :  { %5658 = vmatpush3.bf16.msra.mxu0 %v5657_v43  ;;  %v1622_v43 = vrot.slane %v1617_v35, %v1621_v34 }
 0x31f   :  { %5690 = vmatpush3.bf16.msra.mxu1 %v5689_v16  ;;  %5660 = vmatprep.subr.bf16.mxu0 %v5659_v45  ;;  %v1630_v16 = vrot.slane %v1617_v35, %v1629_v38 }
 0x320   :  { %5692 = vmatprep.subr.bf16.mxu1 %v5691_v46 }
 0x322   :  { %5662 = vmatpush3.bf16.msra.mxu0 %v5661_v51 }
 0x323   :  { %5694 = vmatpush3.bf16.msra.mxu1 %v5693_v52  ;;  %5664 = vmatprep.subr.bf16.mxu0 %v5663_v57 }
 0x324   :  { %5696 = vmatprep.subr.bf16.mxu1 %v5695_v36  ;;  %v4008_v36 = vld [vmem:[%s10994_s4] ss:$0 sm:$0xff] }
 0x326   :  { %5666 = vmatpush3.bf16.msra.mxu0 %v5665_v42 }
 0x327   :  { %5698 = vmatpush3.bf16.msra.mxu1 %v5697_v0  ;;  %5668 = vmatprep.subr.bf16.mxu0 %v5667_v8 }
 0x328   :  { %5700 = vmatprep.subr.bf16.mxu1 %v5699_v3 }
 0x32a   :  { %5670 = vmatpush3.bf16.msra.mxu0 %v5669_v13 }
 0x32b   :  { %5702 = vmatpush3.bf16.msra.mxu1 %v5701_v14  ;;  %5672 = vmatprep.subr.bf16.mxu0 %v5671_v15 }
 0x32c   :  { %5704 = vmatprep.subr.bf16.mxu1 %v5703_v18 }
 0x32e   :  { %5674 = vmatpush3.bf16.msra.mxu0 %v5673_v20 }
 0x32f   :  { %5706 = vmatpush3.bf16.msra.mxu1 %v5705_v25  ;;  %5676 = vmatprep.subr.bf16.mxu0 %v5675_v27 }
 0x330   :  { %5708 = vmatprep.subr.bf16.mxu1 %v5707_v7 }
 0x332   :  { %5678 = vmatpush3.bf16.msra.mxu0 %v5677_v10 }
 0x333   :  { %5710 = vmatpush3.bf16.msra.mxu1 %v5709_v33 }
 0x3e8   :  { %v2845_v45 = vpop.f32.mrb[0].mxu0 }
 0x3e9   :  { %v3768_v46 = vpop.f32.mrb[0].mxu1  ;;  %v5711_v47 = vadd.f32 %v2845_v45, %v1622_v43  ;;  %v2847_v24 = vpop.f32.mrb[1].mxu0 }
 0x3ea   :  { %v5713_v22 = vadd.f32 %v3768_v46, %v1630_v16  ;;  %v3770_v48 = vpop.f32.mrb[1].mxu1  ;;  %v5712_v49 = vadd.f32 %v2847_v24, %v1626_v17 }
 0x3eb   :  { %v5714_v50 = vadd.f32 %v3770_v48, %v1634_v44  ;;  %v3773_v53 = vmax.f32 %v5711_v47, 0.0 }
 0x3ec   :  { %v3774_v51 = vmax.f32 %v5712_v49, 0.0  ;;  %v3775_v54 = vmax.f32 %v5713_v22, 0.0 }
 0x3ed   :  { %v3776_v52 = vmax.f32 %v5714_v50, 0.0 }
 0x3ee   :  { %3912 = vmatprep.mubr.f32.mxu0 %v3774_v51 }
 0x3ef   :  { %3982 = vmatprep.mubr.f32.mxu1 %v3776_v52  ;;  %3913 = vmatmul.mubr.f32.vlgmr.msra.gmra.mrb[2].mxu0 %v3773_v53 }
 0x3f0   :  { %3983 = vmatmul.mubr.f32.vlgmr.msra.gmra.mrb[2].mxu1 %v3775_v54 }
 0x4c2   :  { %v4041_v6 = vpop.f32.mrb[2].mxu0 }
 0x4c3   :  { %v4076_v57 = vpop.f32.mrb[2].mxu1  ;;  %v4042_v37 = vpop.f32.mrb[3].mxu0 }
 0x4c4   :  { %v4077_v58 = vpop.f32.mrb[3].mxu1  ;;  %v4043_v59 = vadd.f32 %v4042_v37, %v4041_v6 }
 0x4c5   :  { %v4078_v60 = vadd.f32 %v4077_v58, %v4076_v57 }
 0x4c6   :  { %v3915_v63 = vadd.f32 %v4043_v59, %v4008_v36 }
 0x4c8   :  { %v3985_v41 = vadd.f32 %v4078_v60, %v3915_v63 }
 0x4ca   :  { %3989 = vst.msk [vmem:[#allocation2] sm:$0xff] %vm3988_vm1, %v3985_v41 }
 0x4cb   :  { %3994 = vsyncadd [#allocation3], 96  ;;  %s5832_s26 = smov [#allocation2]  }
 0x4cc   :  { %s3995_s27 = sshll.u32 %s5832_s26, 4  ;;  %s3996_s27 = int_to_ptr.vmem [resolvable:$true] %s3995_s27 }
 0x4cd   :  { %s5806_s28 = scalar_lea.vmem %s3996_s27, 32  ;;  %s5810_s0 = scalar_lea.vmem %s3996_s27, 128 }
 0x4ce   :  { %p5807_p0 = scmp.ne.s32.totalorder %s3996_s27, %s5806_s28  ;;  %p5811_p1 = scmp.lt.s32.totalorder %s3996_s27, %s3996_s27 }
 0x4cf   :  { %p5812_p2 = scmp.lt.s32.totalorder %s5810_s0, %s5806_s28 }
 0x4d1   :  { %p5813_p3 = por %p5812_p2, %p5811_p1 }
 0x4d3   :  { %p5814_p4 = pnand %p5813_p3, %p5807_p0 }
 0x4d5   :  { %5817 = shalt.err (!%p5814_p4)
}
 0x4d6   :  { %s5818_s30 = scalar_lea.hbm %s10995_s5, 32 }
 0x4d7   :  { %p5819_p5 = scmp.ne.s32.totalorder %s10995_s5, %s5818_s30  ;;  %p5822_p6 = scmp.lt.u32.totalorder %s5818_s30, %s10995_s5 }
 0x4d9   :  { %p5824_p7 = pnand %p5822_p6, %p5819_p5 }
 0x4db   :  { %5827 = shalt.err (!%p5824_p7)
}
 0x4dc   :  { %s5833_s10 = smov 32   ;;  %s5834_s11 = smov 2  }
 0x4dd   :  { %4001 = dma.vmem_to_hbm [thread:$0]  %s3996_s27, 32, %s10995_s5, [#allocation3], %s5833_s10, %s5833_s10, %s5834_s11  }
 0x4de   :  { %5828 = dma.done.wait [#allocation3], 128  }
 0x4df   :  { %5829 = vsyncadd [#allocation3], 4294967168 }
 0x4e0   :  { %4005 = vsyncpa [#allocation3], 1 }

</bundles_post_ra>
